<compile_context>
chip_gen: v5e
topology: v5e:2x2
jax: 0.10.0
libtpu: 0.0.40
codegen_flags: <defaults>
</compile_context>

<pallas_src>
import functools
import math

import jax
import jax.numpy as jnp
from jax.experimental import pallas as pl
from jax.experimental.pallas import tpu as pltpu

# ----------------------------- model hyper-params (small) -----------------------------
NODE_EMB = 64     # node_embedding_size
EDGE_EMB = 32     # edge_embedding_size (power of two -> in-kernel mod via bitwise and)
HID = 64          # hidden_channels (reduced from 256 for a small synthetic run)
HID2 = HID // 2   # 32

G = 2             # graphs in the batch
NPG = 12          # nodes per graph
EPG = 24          # edges per graph
N0 = G * NPG      # 24  (multiple of 8)
E0 = G * EPG      # 48  (multiple of 8)

_VMEM = pl.BlockSpec(memory_space=pltpu.MemorySpace.VMEM)


# --------------------- fused NNConv + BatchNorm + ReLU + pool-score kernel ---------------------
def _nnconv_layer_kernel(xin_ref, keep_ref, ea_ref, src_ref, dst_ref, emask_ref,
                         wkr_ref, bmat_ref, wroot_ref, scale_ref, shift_ref,
                         poolw_ref, o_ref, *, f_in, edge_dim, fused_input):
    assert edge_dim & (edge_dim - 1) == 0          # power of two (bitwise-and mod below)
    n_pad = xin_ref.shape[0]
    e_pad = ea_ref.shape[0]
    fk = f_in * edge_dim

    keep = keep_ref[...]                           # [N, 1] f32, 1 = node still alive
    xin = xin_ref[...]
    if fused_input:
        # TopKPooling of the previous layer fused here: x = keep * y_prev * tanh(score_prev).
        x_f32 = xin[:, :f_in] * xin[:, f_in:2 * f_in] * keep
    else:
        x_f32 = xin * keep
    x_bf = x_f32.astype(jnp.bfloat16)

    ea_bf = ea_ref[...]                            # [E, edge_dim] bf16
    emask = emask_ref[...]                         # [E, 1] f32

    # ---- gather x[src] as ONE dense one-hot MXU matmul --------------------------------
    node_ids = jax.lax.broadcasted_iota(jnp.int32, (e_pad, n_pad), 1)
    gsrc = (jnp.where(node_ids == src_ref[...], 1.0, 0.0) * emask).astype(jnp.bfloat16)
    x_src = jnp.dot(gsrc, x_bf, preferred_element_type=jnp.float32)        # [E, f_in]
    x_src_bf = x_src.astype(jnp.bfloat16)

    # ---- NNConv messages via ONE Khatri-Rao matmul ------------------------------------
    # z[e, i*ED + d] = x_src[e, i] * ea[e, d];   m = z @ W_kr + x_src @ B
    # Expansion one-hots built in-kernel from iota (exact in bf16, no HBM traffic).
    lane_x = jax.lax.broadcasted_iota(jnp.int32, (f_in, fk), 1)
    row_x = jax.lax.broadcasted_iota(jnp.int32, (f_in, fk), 0)
    r_x = jnp.where((lane_x >= row_x * edge_dim) & (lane_x < (row_x + 1) * edge_dim),
                    1.0, 0.0).astype(jnp.bfloat16)                         # [f_in, fk]
    lane_e = jax.lax.broadcasted_iota(jnp.int32, (edge_dim, fk), 1)
    row_e = jax.lax.broadcasted_iota(jnp.int32, (edge_dim, fk), 0)
    r_e = jnp.where((lane_e & (edge_dim - 1)) == row_e, 1.0, 0.0).astype(jnp.bfloat16)

    x_rep = jnp.dot(x_src_bf, r_x, preferred_element_type=jnp.float32)     # [E, fk]
    ea_tile = jnp.dot(ea_bf, r_e, preferred_element_type=jnp.float32)      # [E, fk]
    z_bf = (x_rep * ea_tile).astype(jnp.bfloat16)                          # Khatri-Rao product
    m = jnp.dot(z_bf, wkr_ref[...], preferred_element_type=jnp.float32)    # [E, f_out]
    m = m + jnp.dot(x_src_bf, bmat_ref[...], preferred_element_type=jnp.float32)

    # ---- scatter-add to target nodes (aggr='add') as a one-hot matmul -----------------
    # NOTE: sdst is intentionally NOT masked: masked / dropped-source edges already produce
    # exactly-zero messages because x_src is zeroed through the masked gsrc gather.
    node_ids_t = jax.lax.broadcasted_iota(jnp.int32, (n_pad, e_pad), 0)
    sdst = jnp.where(node_ids_t == dst_ref[...], 1.0, 0.0).astype(jnp.bfloat16)
    agg = jnp.dot(sdst, m.astype(jnp.bfloat16), preferred_element_type=jnp.float32)

    # ---- root weight, conv-bias + eval-BatchNorm folded affine, ReLU ------------------
    root = jnp.dot(x_bf, wroot_ref[...], preferred_element_type=jnp.float32)
    y = jnp.maximum((agg + root) * scale_ref[...] + shift_ref[...], 0.0)

    # ---- TopKPooling score tanh(y . w/||w||); dead nodes forced below tanh range ------
    score = jnp.tanh(jnp.dot(y.astype(jnp.bfloat16), poolw_ref[...],
                             preferred_element_type=jnp.float32))
    score = jnp.where(keep > 0.0, score, -10.0)

    o_ref[...] = jnp.concatenate([y, score], axis=-1)                      # [N, 128] lane-dense


def nnconv_layer(xin, keep_col, ea_bf, src, dst, emask, p, *, f_in, fused_input):
    n = xin.shape[0]
    return pl.pallas_call(
        functools.partial(_nnconv_layer_kernel, f_in=f_in, edge_dim=EDGE_EMB,
                          fused_input=fused_input),
        out_shape=jax.ShapeDtypeStruct((n, 2 * HID), jnp.float32),
        in_specs=[_VMEM] * 12,
        out_specs=_VMEM,
    )(xin, keep_col, ea_bf, src, dst, emask,
      p["w_kr"], p["b_mat"], p["w_root"], p["scale"], p["shift"], p["pool_w"])


# ---------------- fused TopKPooling-3 + global_mean_pool + MLP head kernel ----------------
def _head_kernel(slab_ref, keep_ref, batch_ref, w1_ref, b1_ref, w2_ref, b2_ref, o_ref, *, f):
    slab = slab_ref[...]
    x = slab[:, :f] * slab[:, f:2 * f]                   # y3 * tanh(score3)
    g_pad, n_pad = o_ref.shape[0], slab.shape[0]
    g_ids = jax.lax.broadcasted_iota(jnp.int32, (g_pad, n_pad), 0)
    pmat = jnp.where(g_ids == batch_ref[...], 1.0, 0.0) * keep_ref[...]    # kept nodes only
    sums = jnp.dot(pmat, x, preferred_element_type=jnp.float32)
    counts = jnp.sum(pmat, axis=1, keepdims=True)
    gmean = sums / jnp.maximum(counts, 1.0)              # global_mean_pool over kept nodes
    # TODO(synk): F.dropout(p=0.5) is identity in eval mode; training-mode RNG dropout not emitted.
    h = jnp.maximum(jnp.dot(gmean, w1_ref[...], preferred_element_type=jnp.float32)
                    + b1_ref[...], 0.0)
    w2 = jnp.broadcast_to(w2_ref[...], (w2_ref.shape[0], o_ref.shape[1]))  # lane-dense final store
    o_ref[...] = jax.nn.sigmoid(jnp.dot(h, w2, preferred_element_type=jnp.float32) + b2_ref[...])


def mlp_head(slab, keep_row, params):
    n = slab.shape[0]
    batch_row = jnp.repeat(jnp.arange(G, dtype=jnp.int32), NPG).reshape(1, n)
    out = pl.pallas_call(
        functools.partial(_head_kernel, f=HID),
        out_shape=jax.ShapeDtypeStruct((8, 128), jnp.float32),
        in_specs=[_VMEM] * 7,
        out_specs=_VMEM,
    )(slab, keep_row, batch_row, params["lin1_w"], params["lin1_b"],
      params["lin2_w"], params["lin2_b"])
    return out[:G, :1]


# -------------------------------------- parameters --------------------------------------
def init_params():
    key = jax.random.PRNGKey(42)
    keys = iter(jax.random.split(key, 64))

    def nrm(shape, fan_in, fan_out):
        return math.sqrt(2.0 / (fan_in + fan_out)) * jax.random.normal(next(keys), shape, jnp.float32)

    def conv_layer_params(f_in, f_out, edge_dim):
        # NNConv edge-nn: Linear(edge_dim, f_in*f_out), pre-reshaped for the Khatri-Rao matmul:
        # W_kr[i*edge_dim + d, o] = nn_w[d, i, o];  B[i, o] = nn_b[i*f_out + o].
        nn_w = nrm((edge_dim, f_in * f_out), edge_dim, f_in * f_out)
        w_kr = nn_w.reshape(edge_dim, f_in, f_out).transpose(1, 0, 2).reshape(f_in * edge_dim, f_out)
        b_mat = 0.01 * jax.random.normal(next(keys), (f_in, f_out), jnp.float32)
        w_root = nrm((f_in, f_out), f_in, f_out)
        bias = 0.01 * jax.random.normal(next(keys), (f_out,), jnp.float32)
        # eval-mode BatchNorm (gamma, beta, running mean/var) folded with the conv bias
        gamma = jnp.ones((f_out,), jnp.float32)
        beta = 0.01 * jax.random.normal(next(keys), (f_out,), jnp.float32)
        mean = jnp.zeros((f_out,), jnp.float32)
        var = jnp.ones((f_out,), jnp.float32)
        scale = gamma * jax.lax.rsqrt(var + 1e-5)
        shift = (bias - mean) * scale + beta
        # TopKPooling weight, pre-normalised and lane-broadcast for a 64-wide score matmul
        pool = nrm((f_out,), f_out, 1)
        pool_n = pool * jax.lax.rsqrt(jnp.sum(pool * pool) + 1e-16)
        pool_w = jnp.broadcast_to(pool_n[:, None], (f_out, f_out))
        return dict(w_kr=w_kr.astype(jnp.bfloat16),
                    b_mat=b_mat.astype(jnp.bfloat16),
                    w_root=w_root.astype(jnp.bfloat16),
                    scale=scale.reshape(1, f_out),
                    shift=shift.reshape(1, f_out),
                    pool_w=pool_w.astype(jnp.bfloat16))

    return dict(
        conv1=conv_layer_params(NODE_EMB, HID, EDGE_EMB),
        conv2=conv_layer_params(HID, HID, EDGE_EMB),
        conv3=conv_layer_params(HID, HID, EDGE_EMB),
        lin1_w=nrm((HID, HID2), HID, HID2), lin1_b=jnp.zeros((1, HID2), jnp.float32),
        lin2_w=nrm((HID2, 1), HID2, 1), lin2_b=jnp.zeros((1, 1), jnp.float32),
    )


# --------------------------------------- forward ---------------------------------------
def forward(params, x, edge_index, edge_attr):
    n, e = x.shape[0], edge_attr.shape[0]
    assert n % 8 == 0 and e % 8 == 0
    src = edge_index[0].astype(jnp.int32).reshape(e, 1)
    dst = edge_index[1].astype(jnp.int32).reshape(1, e)
    emask = jnp.ones((e, 1), jnp.float32)
    ea_bf = edge_attr.astype(jnp.bfloat16)

    keep = jnp.ones((n,), jnp.float32)     # node "still alive" mask (pooling == masking)
    slab = x                               # layer-1 input: raw [n, NODE_EMB] features
    npg, f_in, fused = NPG, NODE_EMB, False
    for lp in (params["conv1"], params["conv2"], params["conv3"]):
        slab = nnconv_layer(slab, keep.reshape(n, 1), ea_bf, src, dst, emask,
                            lp, f_in=f_in, fused_input=fused)
        # TopKPooling selection: ONLY lax.top_k (+ one-hot scatter for the keep mask) stays in XLA.
        k = int(math.ceil(0.5 * npg))
        idx = jax.lax.top_k(slab[:, HID].reshape(G, NPG), k)[1]            # scores pre-masked in-kernel
        flat = (idx + (jnp.arange(G, dtype=jnp.int32) * NPG)[:, None]).reshape(-1)
        keep = jnp.zeros((n,), jnp.float32).at[flat].set(1.0)
        npg, f_in, fused = k, HID, True

    return mlp_head(slab, keep.reshape(1, n), params)


# ----------------------------------------- main -----------------------------------------
if __name__ == "__main__":
    key = jax.random.PRNGKey(0)
    kx, ks, kd, ke = jax.random.split(key, 4)

    x = jax.random.normal(kx, (N0, NODE_EMB), jnp.float32)

    # random intra-graph edges, no self-loops; batch is implicit (G equal contiguous graphs)
    src_l = jax.random.randint(ks, (G, EPG), 0, NPG)
    dst_l = jax.random.randint(kd, (G, EPG), 0, NPG)
    dst_l = jnp.where(dst_l == src_l, (dst_l + 1) % NPG, dst_l)
    offs = (jnp.arange(G) * NPG)[:, None]
    edge_index = jnp.stack([(src_l + offs).reshape(-1),
                            (dst_l + offs).reshape(-1)]).astype(jnp.int32)
    edge_attr = jax.random.normal(ke, (E0, EDGE_EMB), jnp.float32)

    params = init_params()
    fwd = jax.jit(forward)
    out = jax.block_until_ready(fwd(params, x, edge_index, edge_attr))
    assert out.shape == (G, 1)
    print("KERNEL_OK")
</pallas_src>

<mosaic_0001>
module attributes {stable_mosaic.version = 11 : i64} {
  func.func @_nnconv_layer_kernel(%arg0: memref<24x64xf32, #tpu.memory_space<vmem>>, %arg1: memref<24x1xf32, #tpu.memory_space<vmem>>, %arg2: memref<48x32xbf16, #tpu.memory_space<vmem>>, %arg3: memref<48x1xi32, #tpu.memory_space<vmem>>, %arg4: memref<1x48xi32, #tpu.memory_space<vmem>>, %arg5: memref<48x1xf32, #tpu.memory_space<vmem>>, %arg6: memref<2048x64xbf16, #tpu.memory_space<vmem>>, %arg7: memref<64x64xbf16, #tpu.memory_space<vmem>>, %arg8: memref<64x64xbf16, #tpu.memory_space<vmem>>, %arg9: memref<1x64xf32, #tpu.memory_space<vmem>>, %arg10: memref<1x64xf32, #tpu.memory_space<vmem>>, %arg11: memref<64x64xbf16, #tpu.memory_space<vmem>>, %arg12: memref<24x128xf32, #tpu.memory_space<vmem>>) attributes {dimension_semantics = [], scalar_prefetch = 0 : i64, scratch_operands = 0 : i64, tpu.core_type = #tpu.core_type<tc>} {
    %c0 = arith.constant 0 : index
    %c0_0 = arith.constant 0 : index
    %0 = vector.load %arg1[%c0, %c0_0] : memref<24x1xf32, #tpu.memory_space<vmem>>, vector<24x1xf32>
    %c0_1 = arith.constant 0 : index
    %c0_2 = arith.constant 0 : index
    %1 = vector.load %arg0[%c0_1, %c0_2] : memref<24x64xf32, #tpu.memory_space<vmem>>, vector<24x64xf32>
    %2 = vector.broadcast %0 : vector<24x1xf32> to vector<24x64xf32>
    %3 = arith.mulf %1, %2 : vector<24x64xf32>
    %4 = arith.truncf %3 : vector<24x64xf32> to vector<24x64xbf16>
    %c0_3 = arith.constant 0 : index
    %c0_4 = arith.constant 0 : index
    %5 = vector.load %arg2[%c0_3, %c0_4] : memref<48x32xbf16, #tpu.memory_space<vmem>>, vector<48x32xbf16>
    %c0_5 = arith.constant 0 : index
    %c0_6 = arith.constant 0 : index
    %6 = vector.load %arg5[%c0_5, %c0_6] : memref<48x1xf32, #tpu.memory_space<vmem>>, vector<48x1xf32>
    %7 = tpu.iota {dimensions = array<i32: 1>} : vector<48x24xi32>
    %c0_7 = arith.constant 0 : index
    %c0_8 = arith.constant 0 : index
    %8 = vector.load %arg3[%c0_7, %c0_8] : memref<48x1xi32, #tpu.memory_space<vmem>>, vector<48x1xi32>
    %9 = vector.broadcast %8 : vector<48x1xi32> to vector<48x24xi32>
    %10 = arith.cmpi eq, %7, %9 : vector<48x24xi32>
    %cst = arith.constant 1.000000e+00 : f32
    %cst_9 = arith.constant 0.000000e+00 : f32
    %11 = vector.broadcast %cst : f32 to vector<48x24xf32>
    %12 = vector.broadcast %cst_9 : f32 to vector<48x24xf32>
    %13 = arith.select %10, %11, %12 : vector<48x24xi1>, vector<48x24xf32>
    %14 = vector.broadcast %6 : vector<48x1xf32> to vector<48x24xf32>
    %15 = arith.mulf %13, %14 : vector<48x24xf32>
    %16 = arith.truncf %15 : vector<48x24xf32> to vector<48x24xbf16>
    %cst_10 = arith.constant dense<0.000000e+00> : vector<48x64xf32>
    %17 = tpu.matmul %16, %4, %cst_10 {dimension_numbers = #tpu.dot_dimension_numbers<[1], [0], [0], [1], [0, 0, 1, 1], [], []>} : vector<48x24xbf16>, vector<24x64xbf16>, vector<48x64xf32> -> vector<48x64xf32>
    %18 = arith.truncf %17 : vector<48x64xf32> to vector<48x64xbf16>
    %19 = tpu.iota {dimensions = array<i32: 1>} : vector<64x2048xi32>
    %20 = tpu.iota {dimensions = array<i32: 0>} : vector<64x2048xi32>
    %c32_i32 = arith.constant 32 : i32
    %21 = vector.broadcast %c32_i32 : i32 to vector<64x2048xi32>
    %22 = arith.muli %20, %21 : vector<64x2048xi32>
    %23 = arith.cmpi sge, %19, %22 : vector<64x2048xi32>
    %c1_i32 = arith.constant 1 : i32
    %24 = vector.broadcast %c1_i32 : i32 to vector<64x2048xi32>
    %25 = arith.addi %20, %24 : vector<64x2048xi32>
    %c32_i32_11 = arith.constant 32 : i32
    %26 = vector.broadcast %c32_i32_11 : i32 to vector<64x2048xi32>
    %27 = arith.muli %25, %26 : vector<64x2048xi32>
    %28 = arith.cmpi slt, %19, %27 : vector<64x2048xi32>
    %29 = arith.andi %23, %28 : vector<64x2048xi1>
    %cst_12 = arith.constant 1.000000e+00 : f32
    %cst_13 = arith.constant 0.000000e+00 : f32
    %30 = vector.broadcast %cst_12 : f32 to vector<64x2048xf32>
    %31 = vector.broadcast %cst_13 : f32 to vector<64x2048xf32>
    %32 = arith.select %29, %30, %31 : vector<64x2048xi1>, vector<64x2048xf32>
    %33 = arith.truncf %32 : vector<64x2048xf32> to vector<64x2048xbf16>
    %34 = tpu.iota {dimensions = array<i32: 1>} : vector<32x2048xi32>
    %35 = tpu.iota {dimensions = array<i32: 0>} : vector<32x2048xi32>
    %c31_i32 = arith.constant 31 : i32
    %36 = vector.broadcast %c31_i32 : i32 to vector<32x2048xi32>
    %37 = arith.andi %34, %36 : vector<32x2048xi32>
    %38 = arith.cmpi eq, %37, %35 : vector<32x2048xi32>
    %cst_14 = arith.constant 1.000000e+00 : f32
    %cst_15 = arith.constant 0.000000e+00 : f32
    %39 = vector.broadcast %cst_14 : f32 to vector<32x2048xf32>
    %40 = vector.broadcast %cst_15 : f32 to vector<32x2048xf32>
    %41 = arith.select %38, %39, %40 : vector<32x2048xi1>, vector<32x2048xf32>
    %42 = arith.truncf %41 : vector<32x2048xf32> to vector<32x2048xbf16>
    %cst_16 = arith.constant dense<0.000000e+00> : vector<48x2048xf32>
    %43 = tpu.matmul %18, %33, %cst_16 {dimension_numbers = #tpu.dot_dimension_numbers<[1], [0], [0], [1], [0, 0, 1, 1], [], []>} : vector<48x64xbf16>, vector<64x2048xbf16>, vector<48x2048xf32> -> vector<48x2048xf32>
    %cst_17 = arith.constant dense<0.000000e+00> : vector<48x2048xf32>
    %44 = tpu.matmul %5, %42, %cst_17 {dimension_numbers = #tpu.dot_dimension_numbers<[1], [0], [0], [1], [0, 0, 1, 1], [], []>} : vector<48x32xbf16>, vector<32x2048xbf16>, vector<48x2048xf32> -> vector<48x2048xf32>
    %45 = arith.mulf %43, %44 : vector<48x2048xf32>
    %46 = arith.truncf %45 : vector<48x2048xf32> to vector<48x2048xbf16>
    %c0_18 = arith.constant 0 : index
    %c0_19 = arith.constant 0 : index
    %47 = vector.load %arg6[%c0_18, %c0_19] : memref<2048x64xbf16, #tpu.memory_space<vmem>>, vector<2048x64xbf16>
    %cst_20 = arith.constant dense<0.000000e+00> : vector<48x64xf32>
    %48 = tpu.matmul %46, %47, %cst_20 {dimension_numbers = #tpu.dot_dimension_numbers<[1], [0], [0], [1], [0, 0, 1, 1], [], []>} : vector<48x2048xbf16>, vector<2048x64xbf16>, vector<48x64xf32> -> vector<48x64xf32>
    %c0_21 = arith.constant 0 : index
    %c0_22 = arith.constant 0 : index
    %49 = vector.load %arg7[%c0_21, %c0_22] : memref<64x64xbf16, #tpu.memory_space<vmem>>, vector<64x64xbf16>
    %cst_23 = arith.constant dense<0.000000e+00> : vector<48x64xf32>
    %50 = tpu.matmul %18, %49, %cst_23 {dimension_numbers = #tpu.dot_dimension_numbers<[1], [0], [0], [1], [0, 0, 1, 1], [], []>} : vector<48x64xbf16>, vector<64x64xbf16>, vector<48x64xf32> -> vector<48x64xf32>
    %51 = arith.addf %48, %50 : vector<48x64xf32>
    %52 = tpu.iota {dimensions = array<i32: 0>} : vector<24x48xi32>
    %c0_24 = arith.constant 0 : index
    %c0_25 = arith.constant 0 : index
    %53 = vector.load %arg4[%c0_24, %c0_25] : memref<1x48xi32, #tpu.memory_space<vmem>>, vector<1x48xi32>
    %54 = vector.broadcast %53 : vector<1x48xi32> to vector<24x48xi32>
    %55 = arith.cmpi eq, %52, %54 : vector<24x48xi32>
    %cst_26 = arith.constant 1.000000e+00 : f32
    %cst_27 = arith.constant 0.000000e+00 : f32
    %56 = vector.broadcast %cst_26 : f32 to vector<24x48xf32>
    %57 = vector.broadcast %cst_27 : f32 to vector<24x48xf32>
    %58 = arith.select %55, %56, %57 : vector<24x48xi1>, vector<24x48xf32>
    %59 = arith.truncf %58 : vector<24x48xf32> to vector<24x48xbf16>
    %60 = arith.truncf %51 : vector<48x64xf32> to vector<48x64xbf16>
    %cst_28 = arith.constant dense<0.000000e+00> : vector<24x64xf32>
    %61 = tpu.matmul %59, %60, %cst_28 {dimension_numbers = #tpu.dot_dimension_numbers<[1], [0], [0], [1], [0, 0, 1, 1], [], []>} : vector<24x48xbf16>, vector<48x64xbf16>, vector<24x64xf32> -> vector<24x64xf32>
    %c0_29 = arith.constant 0 : index
    %c0_30 = arith.constant 0 : index
    %62 = vector.load %arg8[%c0_29, %c0_30] : memref<64x64xbf16, #tpu.memory_space<vmem>>, vector<64x64xbf16>
    %cst_31 = arith.constant dense<0.000000e+00> : vector<24x64xf32>
    %63 = tpu.matmul %4, %62, %cst_31 {dimension_numbers = #tpu.dot_dimension_numbers<[1], [0], [0], [1], [0, 0, 1, 1], [], []>} : vector<24x64xbf16>, vector<64x64xbf16>, vector<24x64xf32> -> vector<24x64xf32>
    %64 = arith.addf %61, %63 : vector<24x64xf32>
    %c0_32 = arith.constant 0 : index
    %c0_33 = arith.constant 0 : index
    %65 = vector.load %arg9[%c0_32, %c0_33] : memref<1x64xf32, #tpu.memory_space<vmem>>, vector<1x64xf32>
    %66 = vector.broadcast %65 : vector<1x64xf32> to vector<24x64xf32>
    %67 = arith.mulf %64, %66 : vector<24x64xf32>
    %c0_34 = arith.constant 0 : index
    %c0_35 = arith.constant 0 : index
    %68 = vector.load %arg10[%c0_34, %c0_35] : memref<1x64xf32, #tpu.memory_space<vmem>>, vector<1x64xf32>
    %69 = vector.broadcast %68 : vector<1x64xf32> to vector<24x64xf32>
    %70 = arith.addf %67, %69 : vector<24x64xf32>
    %cst_36 = arith.constant 0.000000e+00 : f32
    %71 = vector.broadcast %cst_36 : f32 to vector<24x64xf32>
    %72 = arith.maximumf %70, %71 : vector<24x64xf32>
    %73 = arith.truncf %72 : vector<24x64xf32> to vector<24x64xbf16>
    %c0_37 = arith.constant 0 : index
    %c0_38 = arith.constant 0 : index
    %74 = vector.load %arg11[%c0_37, %c0_38] : memref<64x64xbf16, #tpu.memory_space<vmem>>, vector<64x64xbf16>
    %cst_39 = arith.constant dense<0.000000e+00> : vector<24x64xf32>
    %75 = tpu.matmul %73, %74, %cst_39 {dimension_numbers = #tpu.dot_dimension_numbers<[1], [0], [0], [1], [0, 0, 1, 1], [], []>} : vector<24x64xbf16>, vector<64x64xbf16>, vector<24x64xf32> -> vector<24x64xf32>
    %76 = math.tanh %75 : vector<24x64xf32>
    %cst_40 = arith.constant 0.000000e+00 : f32
    %77 = vector.broadcast %cst_40 : f32 to vector<24x1xf32>
    %78 = arith.cmpf ogt, %0, %77 : vector<24x1xf32>
    %cst_41 = arith.constant -1.000000e+01 : f32
    %79 = vector.shape_cast %78 : vector<24x1xi1> to vector<24x1xi1>
    %80 = vector.broadcast %79 : vector<24x1xi1> to vector<24x64xi1>
    %81 = vector.broadcast %cst_41 : f32 to vector<24x64xf32>
    %82 = arith.select %80, %76, %81 : vector<24x64xi1>, vector<24x64xf32>
    %83 = tpu.concatenate %72, %82 in 1 : vector<24x64xf32>, vector<24x64xf32> -> vector<24x128xf32>
    %c0_42 = arith.constant 0 : index
    %c0_43 = arith.constant 0 : index
    %84 = vector.load %arg12[%c0_42, %c0_43] : memref<24x128xf32, #tpu.memory_space<vmem>>, vector<24x128xf32>
    tpu.vector_store %arg12[%c0_42, %c0_43], %83 {strides = array<i32>} : memref<24x128xf32, #tpu.memory_space<vmem>>, vector<24x128xf32>,
    return
  }
}

module attributes {stable_mosaic.version = 11 : i64} {
  func.func @_nnconv_layer_kernel(%arg0: memref<24x128xf32, #tpu.memory_space<vmem>>, %arg1: memref<24x1xf32, #tpu.memory_space<vmem>>, %arg2: memref<48x32xbf16, #tpu.memory_space<vmem>>, %arg3: memref<48x1xi32, #tpu.memory_space<vmem>>, %arg4: memref<1x48xi32, #tpu.memory_space<vmem>>, %arg5: memref<48x1xf32, #tpu.memory_space<vmem>>, %arg6: memref<2048x64xbf16, #tpu.memory_space<vmem>>, %arg7: memref<64x64xbf16, #tpu.memory_space<vmem>>, %arg8: memref<64x64xbf16, #tpu.memory_space<vmem>>, %arg9: memref<1x64xf32, #tpu.memory_space<vmem>>, %arg10: memref<1x64xf32, #tpu.memory_space<vmem>>, %arg11: memref<64x64xbf16, #tpu.memory_space<vmem>>, %arg12: memref<24x128xf32, #tpu.memory_space<vmem>>) attributes {dimension_semantics = [], scalar_prefetch = 0 : i64, scratch_operands = 0 : i64, tpu.core_type = #tpu.core_type<tc>} {
    %c0 = arith.constant 0 : index
    %c0_0 = arith.constant 0 : index
    %0 = vector.load %arg1[%c0, %c0_0] : memref<24x1xf32, #tpu.memory_space<vmem>>, vector<24x1xf32>
    %c0_1 = arith.constant 0 : index
    %c0_2 = arith.constant 0 : index
    %1 = vector.load %arg0[%c0_1, %c0_2] : memref<24x128xf32, #tpu.memory_space<vmem>>, vector<24x128xf32>
    %2 = vector.extract_strided_slice %1 {offsets = [0, 0], sizes = [24, 64], strides = [1, 1]} : vector<24x128xf32> to vector<24x64xf32>
    %3 = vector.extract_strided_slice %1 {offsets = [0, 64], sizes = [24, 64], strides = [1, 1]} : vector<24x128xf32> to vector<24x64xf32>
    %4 = arith.mulf %2, %3 : vector<24x64xf32>
    %5 = vector.broadcast %0 : vector<24x1xf32> to vector<24x64xf32>
    %6 = arith.mulf %4, %5 : vector<24x64xf32>
    %7 = arith.truncf %6 : vector<24x64xf32> to vector<24x64xbf16>
    %c0_3 = arith.constant 0 : index
    %c0_4 = arith.constant 0 : index
    %8 = vector.load %arg2[%c0_3, %c0_4] : memref<48x32xbf16, #tpu.memory_space<vmem>>, vector<48x32xbf16>
    %c0_5 = arith.constant 0 : index
    %c0_6 = arith.constant 0 : index
    %9 = vector.load %arg5[%c0_5, %c0_6] : memref<48x1xf32, #tpu.memory_space<vmem>>, vector<48x1xf32>
    %10 = tpu.iota {dimensions = array<i32: 1>} : vector<48x24xi32>
    %c0_7 = arith.constant 0 : index
    %c0_8 = arith.constant 0 : index
    %11 = vector.load %arg3[%c0_7, %c0_8] : memref<48x1xi32, #tpu.memory_space<vmem>>, vector<48x1xi32>
    %12 = vector.broadcast %11 : vector<48x1xi32> to vector<48x24xi32>
    %13 = arith.cmpi eq, %10, %12 : vector<48x24xi32>
    %cst = arith.constant 1.000000e+00 : f32
    %cst_9 = arith.constant 0.000000e+00 : f32
    %14 = vector.broadcast %cst : f32 to vector<48x24xf32>
    %15 = vector.broadcast %cst_9 : f32 to vector<48x24xf32>
    %16 = arith.select %13, %14, %15 : vector<48x24xi1>, vector<48x24xf32>
    %17 = vector.broadcast %9 : vector<48x1xf32> to vector<48x24xf32>
    %18 = arith.mulf %16, %17 : vector<48x24xf32>
    %19 = arith.truncf %18 : vector<48x24xf32> to vector<48x24xbf16>
    %cst_10 = arith.constant dense<0.000000e+00> : vector<48x64xf32>
    %20 = tpu.matmul %19, %7, %cst_10 {dimension_numbers = #tpu.dot_dimension_numbers<[1], [0], [0], [1], [0, 0, 1, 1], [], []>} : vector<48x24xbf16>, vector<24x64xbf16>, vector<48x64xf32> -> vector<48x64xf32>
    %21 = arith.truncf %20 : vector<48x64xf32> to vector<48x64xbf16>
    %22 = tpu.iota {dimensions = array<i32: 1>} : vector<64x2048xi32>
    %23 = tpu.iota {dimensions = array<i32: 0>} : vector<64x2048xi32>
    %c32_i32 = arith.constant 32 : i32
    %24 = vector.broadcast %c32_i32 : i32 to vector<64x2048xi32>
    %25 = arith.muli %23, %24 : vector<64x2048xi32>
    %26 = arith.cmpi sge, %22, %25 : vector<64x2048xi32>
    %c1_i32 = arith.constant 1 : i32
    %27 = vector.broadcast %c1_i32 : i32 to vector<64x2048xi32>
    %28 = arith.addi %23, %27 : vector<64x2048xi32>
    %c32_i32_11 = arith.constant 32 : i32
    %29 = vector.broadcast %c32_i32_11 : i32 to vector<64x2048xi32>
    %30 = arith.muli %28, %29 : vector<64x2048xi32>
    %31 = arith.cmpi slt, %22, %30 : vector<64x2048xi32>
    %32 = arith.andi %26, %31 : vector<64x2048xi1>
    %cst_12 = arith.constant 1.000000e+00 : f32
    %cst_13 = arith.constant 0.000000e+00 : f32
    %33 = vector.broadcast %cst_12 : f32 to vector<64x2048xf32>
    %34 = vector.broadcast %cst_13 : f32 to vector<64x2048xf32>
    %35 = arith.select %32, %33, %34 : vector<64x2048xi1>, vector<64x2048xf32>
    %36 = arith.truncf %35 : vector<64x2048xf32> to vector<64x2048xbf16>
    %37 = tpu.iota {dimensions = array<i32: 1>} : vector<32x2048xi32>
    %38 = tpu.iota {dimensions = array<i32: 0>} : vector<32x2048xi32>
    %c31_i32 = arith.constant 31 : i32
    %39 = vector.broadcast %c31_i32 : i32 to vector<32x2048xi32>
    %40 = arith.andi %37, %39 : vector<32x2048xi32>
    %41 = arith.cmpi eq, %40, %38 : vector<32x2048xi32>
    %cst_14 = arith.constant 1.000000e+00 : f32
    %cst_15 = arith.constant 0.000000e+00 : f32
    %42 = vector.broadcast %cst_14 : f32 to vector<32x2048xf32>
    %43 = vector.broadcast %cst_15 : f32 to vector<32x2048xf32>
    %44 = arith.select %41, %42, %43 : vector<32x2048xi1>, vector<32x2048xf32>
    %45 = arith.truncf %44 : vector<32x2048xf32> to vector<32x2048xbf16>
    %cst_16 = arith.constant dense<0.000000e+00> : vector<48x2048xf32>
    %46 = tpu.matmul %21, %36, %cst_16 {dimension_numbers = #tpu.dot_dimension_numbers<[1], [0], [0], [1], [0, 0, 1, 1], [], []>} : vector<48x64xbf16>, vector<64x2048xbf16>, vector<48x2048xf32> -> vector<48x2048xf32>
    %cst_17 = arith.constant dense<0.000000e+00> : vector<48x2048xf32>
    %47 = tpu.matmul %8, %45, %cst_17 {dimension_numbers = #tpu.dot_dimension_numbers<[1], [0], [0], [1], [0, 0, 1, 1], [], []>} : vector<48x32xbf16>, vector<32x2048xbf16>, vector<48x2048xf32> -> vector<48x2048xf32>
    %48 = arith.mulf %46, %47 : vector<48x2048xf32>
    %49 = arith.truncf %48 : vector<48x2048xf32> to vector<48x2048xbf16>
    %c0_18 = arith.constant 0 : index
    %c0_19 = arith.constant 0 : index
    %50 = vector.load %arg6[%c0_18, %c0_19] : memref<2048x64xbf16, #tpu.memory_space<vmem>>, vector<2048x64xbf16>
    %cst_20 = arith.constant dense<0.000000e+00> : vector<48x64xf32>
    %51 = tpu.matmul %49, %50, %cst_20 {dimension_numbers = #tpu.dot_dimension_numbers<[1], [0], [0], [1], [0, 0, 1, 1], [], []>} : vector<48x2048xbf16>, vector<2048x64xbf16>, vector<48x64xf32> -> vector<48x64xf32>
    %c0_21 = arith.constant 0 : index
    %c0_22 = arith.constant 0 : index
    %52 = vector.load %arg7[%c0_21, %c0_22] : memref<64x64xbf16, #tpu.memory_space<vmem>>, vector<64x64xbf16>
    %cst_23 = arith.constant dense<0.000000e+00> : vector<48x64xf32>
    %53 = tpu.matmul %21, %52, %cst_23 {dimension_numbers = #tpu.dot_dimension_numbers<[1], [0], [0], [1], [0, 0, 1, 1], [], []>} : vector<48x64xbf16>, vector<64x64xbf16>, vector<48x64xf32> -> vector<48x64xf32>
    %54 = arith.addf %51, %53 : vector<48x64xf32>
    %55 = tpu.iota {dimensions = array<i32: 0>} : vector<24x48xi32>
    %c0_24 = arith.constant 0 : index
    %c0_25 = arith.constant 0 : index
    %56 = vector.load %arg4[%c0_24, %c0_25] : memref<1x48xi32, #tpu.memory_space<vmem>>, vector<1x48xi32>
    %57 = vector.broadcast %56 : vector<1x48xi32> to vector<24x48xi32>
    %58 = arith.cmpi eq, %55, %57 : vector<24x48xi32>
    %cst_26 = arith.constant 1.000000e+00 : f32
    %cst_27 = arith.constant 0.000000e+00 : f32
    %59 = vector.broadcast %cst_26 : f32 to vector<24x48xf32>
    %60 = vector.broadcast %cst_27 : f32 to vector<24x48xf32>
    %61 = arith.select %58, %59, %60 : vector<24x48xi1>, vector<24x48xf32>
    %62 = arith.truncf %61 : vector<24x48xf32> to vector<24x48xbf16>
    %63 = arith.truncf %54 : vector<48x64xf32> to vector<48x64xbf16>
    %cst_28 = arith.constant dense<0.000000e+00> : vector<24x64xf32>
    %64 = tpu.matmul %62, %63, %cst_28 {dimension_numbers = #tpu.dot_dimension_numbers<[1], [0], [0], [1], [0, 0, 1, 1], [], []>} : vector<24x48xbf16>, vector<48x64xbf16>, vector<24x64xf32> -> vector<24x64xf32>
    %c0_29 = arith.constant 0 : index
    %c0_30 = arith.constant 0 : index
    %65 = vector.load %arg8[%c0_29, %c0_30] : memref<64x64xbf16, #tpu.memory_space<vmem>>, vector<64x64xbf16>
    %cst_31 = arith.constant dense<0.000000e+00> : vector<24x64xf32>
    %66 = tpu.matmul %7, %65, %cst_31 {dimension_numbers = #tpu.dot_dimension_numbers<[1], [0], [0], [1], [0, 0, 1, 1], [], []>} : vector<24x64xbf16>, vector<64x64xbf16>, vector<24x64xf32> -> vector<24x64xf32>
    %67 = arith.addf %64, %66 : vector<24x64xf32>
    %c0_32 = arith.constant 0 : index
    %c0_33 = arith.constant 0 : index
    %68 = vector.load %arg9[%c0_32, %c0_33] : memref<1x64xf32, #tpu.memory_space<vmem>>, vector<1x64xf32>
    %69 = vector.broadcast %68 : vector<1x64xf32> to vector<24x64xf32>
    %70 = arith.mulf %67, %69 : vector<24x64xf32>
    %c0_34 = arith.constant 0 : index
    %c0_35 = arith.constant 0 : index
    %71 = vector.load %arg10[%c0_34, %c0_35] : memref<1x64xf32, #tpu.memory_space<vmem>>, vector<1x64xf32>
    %72 = vector.broadcast %71 : vector<1x64xf32> to vector<24x64xf32>
    %73 = arith.addf %70, %72 : vector<24x64xf32>
    %cst_36 = arith.constant 0.000000e+00 : f32
    %74 = vector.broadcast %cst_36 : f32 to vector<24x64xf32>
    %75 = arith.maximumf %73, %74 : vector<24x64xf32>
    %76 = arith.truncf %75 : vector<24x64xf32> to vector<24x64xbf16>
    %c0_37 = arith.constant 0 : index
    %c0_38 = arith.constant 0 : index
    %77 = vector.load %arg11[%c0_37, %c0_38] : memref<64x64xbf16, #tpu.memory_space<vmem>>, vector<64x64xbf16>
    %cst_39 = arith.constant dense<0.000000e+00> : vector<24x64xf32>
    %78 = tpu.matmul %76, %77, %cst_39 {dimension_numbers = #tpu.dot_dimension_numbers<[1], [0], [0], [1], [0, 0, 1, 1], [], []>} : vector<24x64xbf16>, vector<64x64xbf16>, vector<24x64xf32> -> vector<24x64xf32>
    %79 = math.tanh %78 : vector<24x64xf32>
    %cst_40 = arith.constant 0.000000e+00 : f32
    %80 = vector.broadcast %cst_40 : f32 to vector<24x1xf32>
    %81 = arith.cmpf ogt, %0, %80 : vector<24x1xf32>
    %cst_41 = arith.constant -1.000000e+01 : f32
    %82 = vector.shape_cast %81 : vector<24x1xi1> to vector<24x1xi1>
    %83 = vector.broadcast %82 : vector<24x1xi1> to vector<24x64xi1>
    %84 = vector.broadcast %cst_41 : f32 to vector<24x64xf32>
    %85 = arith.select %83, %79, %84 : vector<24x64xi1>, vector<24x64xf32>
    %86 = tpu.concatenate %75, %85 in 1 : vector<24x64xf32>, vector<24x64xf32> -> vector<24x128xf32>
    %c0_42 = arith.constant 0 : index
    %c0_43 = arith.constant 0 : index
    %87 = vector.load %arg12[%c0_42, %c0_43] : memref<24x128xf32, #tpu.memory_space<vmem>>, vector<24x128xf32>
    tpu.vector_store %arg12[%c0_42, %c0_43], %86 {strides = array<i32>} : memref<24x128xf32, #tpu.memory_space<vmem>>, vector<24x128xf32>,
    return
  }
}

module attributes {stable_mosaic.version = 11 : i64} {
  func.func @_head_kernel(%arg0: memref<24x128xf32, #tpu.memory_space<vmem>>, %arg1: memref<1x24xf32, #tpu.memory_space<vmem>>, %arg2: memref<1x24xi32, #tpu.memory_space<vmem>>, %arg3: memref<64x32xf32, #tpu.memory_space<vmem>>, %arg4: memref<1x32xf32, #tpu.memory_space<vmem>>, %arg5: memref<32x1xf32, #tpu.memory_space<vmem>>, %arg6: memref<1x1xf32, #tpu.memory_space<vmem>>, %arg7: memref<8x128xf32, #tpu.memory_space<vmem>>) attributes {dimension_semantics = [], scalar_prefetch = 0 : i64, scratch_operands = 0 : i64, tpu.core_type = #tpu.core_type<tc>} {
    %c0 = arith.constant 0 : index
    %c0_0 = arith.constant 0 : index
    %0 = vector.load %arg0[%c0, %c0_0] : memref<24x128xf32, #tpu.memory_space<vmem>>, vector<24x128xf32>
    %1 = vector.extract_strided_slice %0 {offsets = [0, 0], sizes = [24, 64], strides = [1, 1]} : vector<24x128xf32> to vector<24x64xf32>
    %2 = vector.extract_strided_slice %0 {offsets = [0, 64], sizes = [24, 64], strides = [1, 1]} : vector<24x128xf32> to vector<24x64xf32>
    %3 = arith.mulf %1, %2 : vector<24x64xf32>
    %4 = tpu.iota {dimensions = array<i32: 0>} : vector<8x24xi32>
    %c0_1 = arith.constant 0 : index
    %c0_2 = arith.constant 0 : index
    %5 = vector.load %arg2[%c0_1, %c0_2] : memref<1x24xi32, #tpu.memory_space<vmem>>, vector<1x24xi32>
    %6 = vector.broadcast %5 : vector<1x24xi32> to vector<8x24xi32>
    %7 = arith.cmpi eq, %4, %6 : vector<8x24xi32>
    %cst = arith.constant 1.000000e+00 : f32
    %cst_3 = arith.constant 0.000000e+00 : f32
    %8 = vector.broadcast %cst : f32 to vector<8x24xf32>
    %9 = vector.broadcast %cst_3 : f32 to vector<8x24xf32>
    %10 = arith.select %7, %8, %9 : vector<8x24xi1>, vector<8x24xf32>
    %c0_4 = arith.constant 0 : index
    %c0_5 = arith.constant 0 : index
    %11 = vector.load %arg1[%c0_4, %c0_5] : memref<1x24xf32, #tpu.memory_space<vmem>>, vector<1x24xf32>
    %12 = vector.broadcast %11 : vector<1x24xf32> to vector<8x24xf32>
    %13 = arith.mulf %10, %12 : vector<8x24xf32>
    %cst_6 = arith.constant dense<0.000000e+00> : vector<8x64xf32>
    %14 = tpu.matmul %13, %3, %cst_6 {dimension_numbers = #tpu.dot_dimension_numbers<[1], [0], [0], [1], [0, 0, 1, 1], [], []>} : vector<8x24xf32>, vector<24x64xf32>, vector<8x64xf32> -> vector<8x64xf32>
    %cst_7 = arith.constant dense<0.000000e+00> : vector<8xf32>
    %15 = vector.multi_reduction <add>, %13, %cst_7 [1] : vector<8x24xf32> to vector<8xf32>
    %16 = vector.shape_cast %15 : vector<8xf32> to vector<8x1xf32>
    %cst_8 = arith.constant 1.000000e+00 : f32
    %17 = vector.broadcast %cst_8 : f32 to vector<8x1xf32>
    %18 = arith.maximumf %16, %17 : vector<8x1xf32>
    %19 = vector.broadcast %18 : vector<8x1xf32> to vector<8x64xf32>
    %20 = arith.divf %14, %19 : vector<8x64xf32>
    %c0_9 = arith.constant 0 : index
    %c0_10 = arith.constant 0 : index
    %21 = vector.load %arg3[%c0_9, %c0_10] : memref<64x32xf32, #tpu.memory_space<vmem>>, vector<64x32xf32>
    %cst_11 = arith.constant dense<0.000000e+00> : vector<8x32xf32>
    %22 = tpu.matmul %20, %21, %cst_11 {dimension_numbers = #tpu.dot_dimension_numbers<[1], [0], [0], [1], [0, 0, 1, 1], [], []>} : vector<8x64xf32>, vector<64x32xf32>, vector<8x32xf32> -> vector<8x32xf32>
    %c0_12 = arith.constant 0 : index
    %c0_13 = arith.constant 0 : index
    %23 = vector.load %arg4[%c0_12, %c0_13] : memref<1x32xf32, #tpu.memory_space<vmem>>, vector<1x32xf32>
    %24 = vector.broadcast %23 : vector<1x32xf32> to vector<8x32xf32>
    %25 = arith.addf %22, %24 : vector<8x32xf32>
    %cst_14 = arith.constant 0.000000e+00 : f32
    %26 = vector.broadcast %cst_14 : f32 to vector<8x32xf32>
    %27 = arith.maximumf %25, %26 : vector<8x32xf32>
    %c0_15 = arith.constant 0 : index
    %c0_16 = arith.constant 0 : index
    %28 = vector.load %arg5[%c0_15, %c0_16] : memref<32x1xf32, #tpu.memory_space<vmem>>, vector<32x1xf32>
    %29 = vector.shape_cast %28 : vector<32x1xf32> to vector<32x1xf32>
    %30 = vector.broadcast %29 : vector<32x1xf32> to vector<32x128xf32>
    %cst_17 = arith.constant dense<0.000000e+00> : vector<8x128xf32>
    %31 = tpu.matmul %27, %30, %cst_17 {dimension_numbers = #tpu.dot_dimension_numbers<[1], [0], [0], [1], [0, 0, 1, 1], [], []>} : vector<8x32xf32>, vector<32x128xf32>, vector<8x128xf32> -> vector<8x128xf32>
    %c0_18 = arith.constant 0 : index
    %c0_19 = arith.constant 0 : index
    %32 = vector.load %arg6[%c0_18, %c0_19] : memref<1x1xf32, #tpu.memory_space<vmem>>, vector<1x1xf32>
    %33 = vector.broadcast %32 : vector<1x1xf32> to vector<8x128xf32>
    %34 = arith.addf %31, %33 : vector<8x128xf32>
    %35 = arith.negf %34 : vector<8x128xf32>
    %36 = math.exp %35 : vector<8x128xf32>
    %cst_20 = arith.constant 1.000000e+00 : f32
    %37 = vector.broadcast %cst_20 : f32 to vector<8x128xf32>
    %38 = arith.addf %37, %36 : vector<8x128xf32>
    %39 = arith.divf %37, %38 : vector<8x128xf32>
    %c0_21 = arith.constant 0 : index
    %c0_22 = arith.constant 0 : index
    %40 = vector.load %arg7[%c0_21, %c0_22] : memref<8x128xf32, #tpu.memory_space<vmem>>, vector<8x128xf32>
    tpu.vector_store %arg7[%c0_21, %c0_22], %39 {strides = array<i32>} : memref<8x128xf32, #tpu.memory_space<vmem>>, vector<8x128xf32>,
    return
  }
}

</mosaic_0001>

<bundles_post_ra>
// kernel: squeeze.5
= control target key start
LH: loop header
LB: loop body
LE: loop exit
PB: predicated region body
PF: predicated region fallthrough
CT: control target
= control target key end

     0   :  { %vm7_vm0 = vcmask 97280   ;;  %s39_s0 = inlined_call_operand.vmem [shape: f32[24], index: 0, kind: input, shape index: {}]   ;;  %s40_s1 = inlined_call_operand.vmem [shape: f32[2,12], index: 1, kind: output, shape index: {}]  }
   0x1   :  { %v4_v0 = vld [vmem:[%s39_s0] sm:$0x1]  ;;  %s22_s0 = smov 116  }
   0x2   :  { %5 = vst [vmem:[#allocation1] sm:$0x1] %v4_v0 }
   0x9   :  { %v9_v1 = vld [vmem:[#allocation1] sm:$0x1]  }
   0xa   :  { %v6_v2 = vld [vmem:[#allocation1] sm:$0x1]   ;;  %10 = vrot.lane.b32.xlu0 %v9_v1, %s22_s0 }
   0xb   :  { %8 = vst.msk [vmem:[#allocation0] sm:$0x1] %vm7_vm0, %v6_v2  }
  0x7c   :  { %v11_v3 = vpop.permute.xlu0 %10  }
  0x7d   :  { %14 = vst.msk [vmem:[#allocation0 + $0x1] sm:$0x1] %vm7_vm0, %v11_v3  }
  0x84   :  { %v17_v4 = vld [vmem:[#allocation0] sm:$0x3] }
  0x85   :  { %20 = vst [vmem:[%s40_s1] sm:$0x3] %v17_v4 }

// kernel: forward.7
= control target key start
LH: loop header
LB: loop body
LE: loop exit
PB: predicated region body
PF: predicated region fallthrough
CT: control target
= control target key end

     0   :  { %s245_s28 = smov 64   ;;  %v46_v3 = vlaneseq  ;;  %v246_v7 = vmov 0.0   ;;  %vm57_vm1 = vcmask 195584   ;;  %v247_v29 = vmov 0   ;;  %s348_s0 = inlined_call_operand.vmem [shape: f32[24,128], index: 0, kind: input, shape index: {}]   ;;  %s349_s2 = inlined_call_operand.vmem [shape: s32[1,24], index: 2, kind: input, shape index: {}]   ;;  %s350_s1 = inlined_call_operand.vmem [shape: f32[1,24], index: 1, kind: input, shape index: {}]   ;;  %s351_s3 = inlined_call_operand.vmem [shape: f32[64,32], index: 3, kind: input, shape index: {}]   ;;  %s352_s4 = inlined_call_operand.vmem [shape: f32[1,32], index: 4, kind: input, shape index: {}]   ;;  %s353_s5 = inlined_call_operand.vmem [shape: f32[32,1], index: 5, kind: input, shape index: {}]   ;;  %s354_s6 = inlined_call_operand.<no memory space> [shape: f32[1,1], index: 6, kind: input, shape index: {}]   ;;  %s355_s7 = inlined_call_operand.vmem [shape: f32[8,128], index: 7, kind: output, shape index: {}]  }
   0x1   :  { %v30_v0 = vld [vmem:[%s348_s0 + $0x10] sm:$0xff]  ;;  %v28_v1 = vld [vmem:[%s348_s0] sm:$0xff]  ;;  %v29_v2 = vld [vmem:[%s348_s0 + $0x8] sm:$0xff]  ;;  %223 = vset.pattern.permute.xlu2 %v247_v29  ;;  %234 = vset.pattern.permute.xlu0 %v247_v29  ;;  %vm112_vm6 = vcmask 523264   ;;  %v12_v52 = vstv %s354_s6  ;;  %vm168_vm7 = vcmask 261120  }
   0x2   :  { %38 = vrot.lane.b32.xlu0 %v30_v0, %s245_s28  ;;  %34 = vrot.lane.b32.xlu1 %v28_v1, %s245_s28  ;;  %v47_v4 = vshrl.u32 %v46_v3, 7  ;;  %v235_v5 = vld [vmem:[%s349_s2] ss:$0 sm:$0xff]  ;;  %v107_v17 = vld [vmem:[%s351_s3 + $0x38] sm:$0xff]  ;;  %13 = vst [vmem:[#allocation2] sm:$0x1] %v12_v52 }
   0x3   :  { %v236_v6 = vld [vmem:[%s350_s1] ss:$0 sm:$0xff]  ;;  %v106_v18 = vld [vmem:[%s351_s3 + $0x30] sm:$0xff]  ;;  %124 = vmatpush.msra.mxu1 %v107_v17  ;;  %v105_v19 = vld [vmem:[%s351_s3 + $0x28] sm:$0xff] }
   0x4   :  { %vm50_vm0 = vcmp.eq.s32.totalorder %v47_v4, %v235_v5  ;;  %v104_v20 = vld [vmem:[%s351_s3 + $0x20] sm:$0xff]  ;;  %v103_v21 = vld [vmem:[%s351_s3 + $0x18] sm:$0xff]  ;;  %v102_v22 = vld [vmem:[%s351_s3 + $0x10] sm:$0xff] }
   0x5   :  { %v51_v8 = vsel %vm50_vm0, 1.0, %v246_v7  ;;  %125 = vmatpush.msra.mxu1 %v106_v18  ;;  %v101_v24 = vld [vmem:[%s351_s3 + $0x8] sm:$0xff]  ;;  %v100_v26 = vld [vmem:[%s351_s3] sm:$0xff]  ;;  %v139_v27 = vld [vmem:[%s353_s5 + $0x10] sm:$0xff] }
   0x6   :  { %v56_v9 = vmul.f32 %v236_v6, %v51_v8  ;;  %v140_v28 = vld [vmem:[%s353_s5 + $0x18] sm:$0xff]  ;;  %v137_v31 = vld [vmem:[%s353_s5] sm:$0xff]  ;;  %v138_v32 = vld [vmem:[%s353_s5 + $0x8] sm:$0xff] }
   0x7   :  { %126 = vmatpush.msra.mxu1 %v105_v19  ;;  %v224_v30 = vpack.i.bf16 %v139_v27, %v140_v28  ;;  %v229_v34 = vpack.i.bf16 %v137_v31, %v138_v32  ;;  %v237_v54 = vld [vmem:[%s352_s4] ss:$0 sm:$0xff] }
   0x8   :  { %v81_v10 = vsel %vm57_vm1, %v56_v9, 0.0 }
   0x9   :  { %127 = vmatpush.msra.mxu1 %v104_v20  ;;  %225 = vperm.xlu2 %223, %v224_v30   ;;  %v238_v53 = vld [vmem:[#allocation2] ss:$0 sm:$0xff] }
   0xa   :  { %36 = vrot.lane.b32.xlu0 %v29_v2, %s245_s28 }
   0xb   :  { %128 = vmatpush.msra.mxu1 %v103_v21 }
   0xd   :  { %129 = vmatpush.msra.mxu1 %v102_v22 }
   0xf   :  { %130 = vmatpush.msra.mxu1 %v101_v24 }
  0x11   :  { %131 = vmatpush.msra.mxu1 %v100_v26  ;;  %230 = vperm.xlu2 %223, %v229_v34  }
  0x12   :  { %165 = vperm.xlu0 %234, %v238_v53  }
  0x2c   :  { %82 = vadd.xlane.f32.xlu1 %v81_v10 }
  0x63   :  { %v226_v46 = vpop.permute.xlu2 %225 }
  0x64   :  { %v227_v47 = vunpack.i.l.bf16 %v226_v46  ;;  %v228_v48 = vunpack.i.h.bf16 %v226_v46 }
  0x66   :  { %184 = vmatpush.msra.mxu2 %v227_v47 }
  0x68   :  { %185 = vmatpush.msra.mxu2 %v228_v48 }
  0x6b   :  { %v231_v49 = vpop.permute.xlu2 %230 }
  0x6c   :  { %v233_v50 = vunpack.i.h.bf16 %v231_v49  ;;  %v232_v51 = vunpack.i.l.bf16 %v231_v49 }
  0x6e   :  { %186 = vmatpush.msra.mxu2 %v232_v51 }
  0x70   :  { %187 = vmatpush.msra.mxu2 %v233_v50 }
  0x74   :  { %v39_v11 = vpop.permute.xlu0 %38  ;;  %v35_v13 = vpop.permute.xlu1 %34 }
  0x75   :  { %v45_v12 = vmul.f32 %v39_v11, %v30_v0  ;;  %v43_v16 = vmul.f32 %v35_v13, %v28_v1 }
  0x77   :  { %74 = vmatpush.msra.mxu0 %v45_v12 }
  0x7c   :  { %v37_v14 = vpop.permute.xlu0 %36 }
  0x7d   :  { %v44_v15 = vmul.f32 %v37_v14, %v29_v2 }
  0x7f   :  { %75 = vmatpush.msra.mxu0 %v44_v15 }
  0x81   :  { %76 = vmatpush.msra.mxu0 %v43_v16 }
  0x82   :  { %216 = vmatmul.msk.f32.vlgmr.msra.gmra.mxu0 %vm57_vm1, %v56_v9 }
  0x84   :  { %v166_v58 = vpop.permute.xlu0 %165 }
  0x9f   :  { %v83_v23 = vpop.xlane.xlu1 %82 }
  0xa0   :  { %v84_v25 = vmax.f32 %v83_v23, 1.0 }
  0xa2   :  { %239 = vrcp.f32 %v84_v25  ;;  %vm90_vm2 = vweird.f32 %v84_v25  ;;  %v96_v38 = vand.u32 2147483648, %v84_v25  ;;  %v94_v40 = vand.u32 2147483647, %v84_v25 }
  0xa4   :  { %v97_v41 = vor.u32 1.1754944e-38, %v96_v38  ;;  %vm95_vm5 = vcmp.eq.f32.partialorder %v94_v40, 8.507059e+37 }
  0xa8   :  { %v240_v33 = vpop.eup %239 }
  0xa9   :  { %v86_v35 = vmul.f32 %v240_v33, %v84_v25  ;;  %vm91_vm3 = vweird.f32 %v240_v33 }
  0xaa   :  { %vm92_vm4 = vmor %vm90_vm2, %vm91_vm3 }
  0xab   :  { %v87_v36 = vsub.f32 1.0, %v86_v35 }
  0xad   :  { %v88_v37 = vmul.f32 %v240_v33, %v87_v36 }
  0xaf   :  { %v89_v39 = vadd.f32 %v240_v33, %v88_v37 }
  0xb1   :  { %v93_v42 = vsel %vm92_vm4, %v240_v33, %v89_v39 }
  0xb2   :  { %v98_v44 = vsel %vm95_vm5, %v97_v41, %v93_v42 }
  0xff   :  { %v78_v43 = vpop.f32.mrf.mxu0 }
 0x100   :  { %v99_v45 = vmul.f32 %v98_v44, %v78_v43 }
 0x102   :  { %217 = vmatmul.msk.f32.vlgmr.msra.gmra.mxu1 %vm112_vm6, %v99_v45 }
 0x17f   :  { %v133_v55 = vpop.f32.mrf.mxu1 }
 0x180   :  { %v134_v56 = vadd.f32 %v237_v54, %v133_v55 }
 0x182   :  { %v136_v57 = vmax.f32 %v134_v56, 0.0 }
 0x184   :  { %218 = vmatmul.msk.f32.vlgmr.msra.gmra.mxu2 %vm168_vm7, %v136_v57 }
 0x207   :  { %v189_v59 = vpop.f32.mrf.mxu2 }
 0x208   :  { %v190_v60 = vadd.f32 %v189_v59, %v166_v58 }
 0x20a   :  { %v219_v61 = vmul.f32 -1.442695, %v190_v60 }
 0x20c   :  { %241 = vpow2.f32 %v219_v61 }
 0x212   :  { %v242_v62 = vpop.eup %241 }
 0x213   :  { %v195_v63 = vadd.f32 1.0, %v242_v62 }
 0x215   :  { %243 = vrcp.f32 %v195_v63  ;;  %v207_v3 = vand.u32 2147483648, %v195_v63  ;;  %v205_v5 = vand.u32 2147483647, %v195_v63  ;;  %vm201_vm9 = vweird.f32 %v195_v63 }
 0x217   :  { %v208_v7 = vor.u32 1.1754944e-38, %v207_v3  ;;  %vm206_vm11 = vcmp.eq.f32.partialorder %v205_v5, 8.507059e+37 }
 0x21b   :  { %v244_v0 = vpop.eup %243 }
 0x21c   :  { %v197_v1 = vmul.f32 %v244_v0, %v195_v63  ;;  %vm202_vm8 = vweird.f32 %v244_v0 }
 0x21d   :  { %vm203_vm10 = vmor %vm201_vm9, %vm202_vm8 }
 0x21e   :  { %v198_v2 = vsub.f32 1.0, %v197_v1 }
 0x220   :  { %v199_v4 = vmul.f32 %v244_v0, %v198_v2 }
 0x222   :  { %v200_v6 = vadd.f32 %v244_v0, %v199_v4 }
 0x224   :  { %v204_v8 = vsel %vm203_vm10, %v244_v0, %v200_v6 }
 0x225   :  { %v209_v9 = vsel %vm206_vm11, %v208_v7, %v204_v8 }
 0x226   :  { %211 = vst [vmem:[%s355_s7] sm:$0xff] %v209_v9 }

// kernel: forward.4
= control target key start
LH: loop header
LB: loop body
LE: loop exit
PB: predicated region body
PF: predicated region fallthrough
CT: control target
= control target key end

     0   :  { %v4658_v0 = vmov 0   ;;  %vm167_vm3 = vcmask 1043456   ;;  %v80_v23 = vlaneseq  ;;  %v6906_v35 = vmov 0.0   ;;  %s6893_s3 = inlined_call_operand.vmem [shape: s32[48,1], index: 3, kind: input, shape index: {}]   ;;  %s6894_s1 = inlined_call_operand.vmem [shape: f32[24,1], index: 1, kind: input, shape index: {}]   ;;  %s6895_s5 = inlined_call_operand.vmem [shape: f32[48,1], index: 5, kind: input, shape index: {}]   ;;  %s6896_s0 = inlined_call_operand.vmem [shape: f32[24,64], index: 0, kind: input, shape index: {}]   ;;  %s6897_s2 = inlined_call_operand.vmem [shape: bf16[48,32], index: 2, kind: input, shape index: {}]   ;;  %s6898_s6 = inlined_call_operand.vmem [shape: bf16[2048,64], index: 6, kind: input, shape index: {}]   ;;  %s6899_s7 = inlined_call_operand.vmem [shape: bf16[64,64], index: 7, kind: input, shape index: {}]   ;;  %s6900_s8 = inlined_call_operand.vmem [shape: bf16[64,64], index: 8, kind: input, shape index: {}]   ;;  %s6901_s4 = inlined_call_operand.vmem [shape: s32[1,48], index: 4, kind: input, shape index: {}]   ;;  %s6902_s9 = inlined_call_operand.vmem [shape: f32[1,64], index: 9, kind: input, shape index: {}]   ;;  %s6903_s10 = inlined_call_operand.vmem [shape: f32[1,64], index: 10, kind: input, shape index: {}]   ;;  %s6904_s11 = inlined_call_operand.vmem [shape: bf16[64,64], index: 11, kind: input, shape index: {}]   ;;  %s6905_s12 = inlined_call_operand.vmem [shape: f32[24,128], index: 12, kind: output, shape index: {}]  }
   0x1   :  { %4648 = vset.pattern.permute.xlu2 %v4658_v0  ;;  %4647 = vset.pattern.permute.xlu1 %v4658_v0  ;;  %v83_v1 = vld [vmem:[%s6893_s3 + $0x8] sm:$0xff]  ;;  %v44_v2 = vld [vmem:[%s6894_s1 + $0x10] sm:$0xff]  ;;  %v74_v4 = vld [vmem:[%s6895_s5] sm:$0xff]  ;;  %vm157_vm6 = vcmask 195584   ;;  %v6910_v62 = vmov 1.0|1.0  }
   0x2   :  { %v43_v3 = vld [vmem:[%s6894_s1 + $0x8] sm:$0xff]  ;;  %4646 = vset.pattern.permute.xlu0 %v4658_v0  ;;  %92 = vperm.xlu2 %4648, %v83_v1   ;;  %v82_v5 = vld [vmem:[%s6893_s3] sm:$0xff]  ;;  %v85_v7 = vld [vmem:[%s6893_s3 + $0x18] sm:$0xff]  ;;  %vm3582_vm0 = vcmp.gt.f32.partialorder %v44_v2, 0.0  ;;  %v4784_v29 = vand.u32 127, %v80_v23  ;;  %v4794_v44 = vshrl.u32 %v80_v23, 7 }
   0x3   :  { %60 = vperm.xlu0 %4646, %v44_v2   ;;  %55 = vperm.xlu1 %4647, %v43_v3   ;;  %v42_v6 = vld [vmem:[%s6894_s1] sm:$0xff]  ;;  %v84_v8 = vld [vmem:[%s6893_s3 + $0x10] sm:$0xff]  ;;  %v75_v9 = vld [vmem:[%s6895_s5 + $0x8] sm:$0xff]  ;;  %vm3581_vm1 = vcmp.gt.f32.partialorder %v43_v3, 0.0  ;;  %v3585_v16 = vsel %vm3582_vm0, 1, %v4658_v0 }
   0x4   :  { %v86_v10 = vld [vmem:[%s6893_s3 + $0x20] sm:$0xff]  ;;  %v77_v11 = vld [vmem:[%s6895_s5 + $0x18] sm:$0xff]  ;;  %v76_v12 = vld [vmem:[%s6895_s5 + $0x10] sm:$0xff]  ;;  %vm3580_vm2 = vcmp.gt.f32.partialorder %v42_v6, 0.0  ;;  %v3584_v17 = vsel %vm3581_vm1, 1, %v4658_v0  ;;  %6921 = vst [vmem:[#allocation4_spill] sm:$0xff] %v4794_v44 }
   0x5   :  { %v79_v13 = vld [vmem:[%s6895_s5 + $0x28] sm:$0xff]  ;;  %v78_v14 = vld [vmem:[%s6895_s5 + $0x20] sm:$0xff]  ;;  %v3583_v18 = vsel %vm3580_vm2, 1, %v4658_v0  ;;  %v47_v19 = vld [vmem:[%s6896_s0 + $0x10] sm:$0xff]  ;;  %v220_v45 = vadd.s32 48, %v4794_v44  ;;  %v221_v46 = vadd.s32 56, %v4794_v44 }
   0x6   :  { %v87_v15 = vld [vmem:[%s6893_s3 + $0x28] sm:$0xff]  ;;  %v45_v28 = vld [vmem:[%s6896_s0] sm:$0xff]  ;;  %v4805_v52 = vadd.s32 128, %v4784_v29  ;;  %v4822_v59 = vadd.s32 384, %v4784_v29 }
   0x7   :  { %v46_v27 = vld [vmem:[%s6896_s0 + $0x8] sm:$0xff]  ;;  %v4798_v48 = vmul.u32 32, %v220_v45  ;;  %v4800_v49 = vmul.u32 32, %v221_v46  ;;  %v364_v50 = vadd.s32 1, %v220_v45  ;;  %v365_v51 = vadd.s32 1, %v221_v46 }
   0x9   :  { %vm326_vm9 = vcmp.ge.s32.totalorder %v4784_v29, %v4798_v48  ;;  %v4809_v55 = vmul.u32 32, %v364_v50  ;;  %v4811_v56 = vmul.u32 32, %v365_v51  ;;  %vm342_vm10 = vcmp.ge.s32.totalorder %v4784_v29, %v4800_v49 }
   0xa   :  { %120 = vperm.xlu2 %4648, %v74_v4   ;;  %vm327_vm14 = vcmp.ge.s32.totalorder %v4805_v52, %v4798_v48  ;;  %vm343_vm1 = vcmp.ge.s32.totalorder %v4805_v52, %v4800_v49 }
   0xb   :  { %89 = vperm.xlu1 %4647, %v82_v5   ;;  %50 = vperm.xlu0 %4646, %v42_v6   ;;  %vm470_vm11 = vcmp.lt.s32.totalorder %v4784_v29, %v4809_v55  ;;  %vm486_vm12 = vcmp.lt.s32.totalorder %v4784_v29, %v4811_v56  ;;  %vm471_vm15 = vcmp.lt.s32.totalorder %v4805_v52, %v4809_v55 }
   0xc   :  { %vm598_vm13 = vmand %vm326_vm9, %vm470_vm11  ;;  %vm487_vm2 = vcmp.lt.s32.totalorder %v4805_v52, %v4811_v56  ;;  %vm345_vm9 = vcmp.ge.s32.totalorder %v4822_v59, %v4800_v49 }
   0xd   :  { %vm614_vm0 = vmand %vm342_vm10, %vm486_vm12  ;;  %vm489_vm10 = vcmp.lt.s32.totalorder %v4822_v59, %v4811_v56 }
  0x12   :  { %98 = vperm.xlu2 %4648, %v85_v7  }
  0x13   :  { %95 = vperm.xlu1 %4647, %v84_v8   ;;  %125 = vperm.xlu0 %4646, %v75_v9   ;;  %v218_v9 = vadd.s32 32, %v4794_v44 }
  0x1a   :  { %101 = vperm.xlu2 %4648, %v86_v10   ;;  %v219_v10 = vadd.s32 40, %v4794_v44 }
  0x1b   :  { %135 = vperm.xlu1 %4647, %v77_v11   ;;  %130 = vperm.xlu0 %4646, %v76_v12   ;;  %v362_v11 = vadd.s32 1, %v218_v9 }
  0x1c   :  { %v363_v12 = vadd.s32 1, %v219_v10 }
  0x22   :  { %145 = vperm.xlu2 %4648, %v79_v13   ;;  %v4852_v13 = vmul.u32 32, %v218_v9 }
  0x23   :  { %140 = vperm.xlu1 %4647, %v78_v14   ;;  %104 = vperm.xlu0 %4646, %v87_v15   ;;  %v4854_v14 = vmul.u32 32, %v219_v10  ;;  %v4856_v15 = vmul.u32 32, %v362_v11  ;;  %v823_v11 = vand.u32 31, %v4805_v52 }
  0x2a   :  { %3593 = vperm.xlu2 %4648, %v3585_v16   ;;  %v4858_v16 = vmul.u32 32, %v363_v12 }
  0x2b   :  { %3590 = vperm.xlu1 %4647, %v3584_v17   ;;  %3587 = vperm.xlu0 %4646, %v3583_v18   ;;  %v4861_v17 = vadd.s32 16, %v4794_v44  ;;  %v4864_v18 = vadd.s32 24, %v4794_v44 }
  0x2d   :  { %6922 = vst [vmem:[#allocation5_spill] sm:$0xff] %v4861_v17  ;;  %v4899_v23 = vmul.u32 32, %v4864_v18 }
  0x5c   :  { %v93_v25 = vpop.permute.xlu2 %92 }
  0x5d   :  { %vm107_vm5 = vcmp.eq.s32.totalorder %v4784_v29, %v93_v25 }
  0x5e   :  { %v113_v38 = vsel %vm107_vm5, 1.0, %v6906_v35  ;;  %vm329_vm5 = vcmp.ge.s32.totalorder %v4822_v59, %v4798_v48 }
  0x64   :  { %v121_v37 = vpop.permute.xlu2 %120 }
  0x6c   :  { %v99_v47 = vpop.permute.xlu2 %98 }
  0x6d   :  { %vm109_vm7 = vcmp.eq.s32.totalorder %v4784_v29, %v99_v47 }
  0x6e   :  { %v115_v57 = vsel %vm109_vm7, 1.0, %v6906_v35  ;;  %vm473_vm7 = vcmp.lt.s32.totalorder %v4822_v59, %v4809_v55 }
  0x6f   :  { %vm601_vm12 = vmand %vm329_vm5, %vm473_vm7  ;;  %vm295_vm5 = vcmp.ge.s32.totalorder %v4805_v52, %v4852_v13  ;;  %vm439_vm7 = vcmp.lt.s32.totalorder %v4805_v52, %v4856_v15 }
  0x74   :  { %v102_v0 = vpop.permute.xlu2 %101 }
  0x75   :  { %v61_v20 = vpop.permute.xlu0 %60  ;;  %v56_v21 = vpop.permute.xlu1 %55 }
  0x76   :  { %v65_v22 = vmul.f32 %v61_v20, %v47_v19  ;;  %v64_v32 = vmul.f32 %v56_v21, %v46_v27  ;;  %v4883_v19 = vmul.u32 32, %v4861_v17  ;;  %v360_v20 = vadd.s32 1, %v4861_v17 }
  0x77   :  { %v361_v21 = vadd.s32 1, %v4864_v18  ;;  %v4908_v27 = vadd.s32 8, %v4794_v44 }
  0x78   :  { %v4775_v24 = vpack.c.bf16 %v65_v22, %v65_v22  ;;  %v4903_v25 = vmul.u32 32, %v360_v20 }
  0x79   :  { %6925 = vst [vmem:[#allocation6_spill] sm:$0xff] %v4908_v27 }
  0x7a   :  { %6919 = vst [vmem:[#allocation2_spill] sm:$0xff] %v4775_v24  ;;  %v169_v26 = vsel %vm167_vm3, %v4775_v24, 0  ;;  %vm3626_vm3 = vmpackc.low %vm614_vm0, %vm598_vm13  ;;  %vm110_vm0 = vcmp.eq.s32.totalorder %v4784_v29, %v102_v0  ;;  %v5344_v0 = vadd.s32 1664, %v4784_v29 }
  0x7b   :  { %177 = vmatpush.bf16.msra.mxu0 %v169_v26  ;;  %3627 = vmatpush.bf16.msk.msra.mxu1 %vm3626_vm3, %v6910_v62  ;;  %vm617_vm13 = vmand %vm345_vm9, %vm489_vm10  ;;  %v116_v6 = vsel %vm110_vm0, 1.0, %v6906_v35  ;;  %vm454_vm3 = vcmp.lt.s32.totalorder %v4784_v29, %v4858_v16  ;;  %vm311_vm9 = vcmp.ge.s32.totalorder %v4805_v52, %v4854_v14  ;;  %vm455_vm10 = vcmp.lt.s32.totalorder %v4805_v52, %v4858_v16 }
  0x7c   :  { %v146_v3 = vpop.permute.xlu2 %145  ;;  %vm583_vm0 = vmand %vm311_vm9, %vm455_vm10  ;;  %v4905_v26 = vmul.u32 32, %v361_v21  ;;  %v5580_v21 = vadd.s32 1792, %v4784_v29 }
  0x7d   :  { %v90_v30 = vpop.permute.xlu1 %89  ;;  %v51_v31 = vpop.permute.xlu0 %50 }
  0x7e   :  { %v63_v33 = vmul.f32 %v51_v31, %v45_v28  ;;  %vm106_vm4 = vcmp.eq.s32.totalorder %v4784_v29, %v90_v30  ;;  %v358_v28 = vadd.s32 1, %v4794_v44  ;;  %v359_v30 = vadd.s32 1, %v4908_v27 }
  0x7f   :  { %v112_v36 = vsel %vm106_vm4, 1.0, %v6906_v35  ;;  %vm599_vm4 = vmand %vm327_vm14, %vm471_vm15  ;;  %v4934_v31 = vmul.u32 32, %v4794_v44 }
  0x80   :  { %v4787_v34 = vpack.c.bf16 %v64_v32, %v63_v33  ;;  %v148_v40 = vmul.f32 %v121_v37, %v112_v36  ;;  %vm3659_vm14 = vmpackc.low %vm617_vm13, %vm601_vm12  ;;  %vm297_vm13 = vcmp.ge.s32.totalorder %v4822_v59, %v4852_v13  ;;  %v4936_v32 = vmul.u32 32, %v358_v28  ;;  %v5680_v28 = vld [vmem:[%s6897_s2] sm:$0xff] }
  0x81   :  { %vm4888_vm12 = vmand %vm295_vm5, %vm439_vm7  ;;  %vm278_vm7 = vcmp.ge.s32.totalorder %v4784_v29, %v4899_v23  ;;  %v4944_v33 = vmul.u32 32, %v4908_v27  ;;  %v4946_v36 = vmul.u32 32, %v359_v30  ;;  %v4983_v37 = vadd.s32 640, %v4784_v29 }
  0x82   :  { %6920 = vst [vmem:[#allocation3_spill] sm:$0xff] %v4787_v34  ;;  %178 = vmatpush.bf16.msra.mxu0 %v4787_v34 }
  0x85   :  { %v126_v39 = vpop.permute.xlu0 %125  ;;  %v96_v42 = vpop.permute.xlu1 %95 }
  0x86   :  { %v149_v41 = vmul.f32 %v126_v39, %v113_v38  ;;  %vm108_vm8 = vcmp.eq.s32.totalorder %v4784_v29, %v96_v42  ;;  %3660 = vmatpush.bf16.msk.msrb.mxu0 %vm3659_vm14, %v6910_v62  ;;  %vm313_vm14 = vcmp.ge.s32.totalorder %v4822_v59, %v4854_v14 }
  0x87   :  { %v114_v58 = vsel %vm108_vm8, 1.0, %v6906_v35  ;;  %vm615_vm8 = vmand %vm343_vm1, %vm487_vm2  ;;  %vm310_vm1 = vcmp.ge.s32.totalorder %v4784_v29, %v4854_v14  ;;  %vm438_vm2 = vcmp.lt.s32.totalorder %v4784_v29, %v4856_v15 }
  0x88   :  { %v154_v43 = vpack.c.bf16 %v149_v41, %v148_v40  ;;  %vm3637_vm11 = vmpackc.low %vm615_vm8, %vm599_vm4  ;;  %v5022_v40 = vadd.s32 256, %v4784_v29  ;;  %v5025_v41 = vadd.s32 512, %v4784_v29 }
  0x89   :  { %3638 = vmatpush.bf16.msk.msra.mxu2 %vm3637_vm11, %v6910_v62  ;;  %4638 = vmatpush.bf16.msk.msra.mxu3 %vm3637_vm11, %v6910_v62  ;;  %vm582_vm8 = vmand %vm310_vm1, %vm454_vm3  ;;  %vm262_vm3 = vcmp.ge.s32.totalorder %v4784_v29, %v4883_v19 }
  0x8a   :  { %3623 = vmatmul.msk.bf16.vlgmr.msra.gmra.mxu0 %vm157_vm6, %v154_v43  ;;  %vm3639_vm1 = vmpackc.low %vm583_vm0, %vm4888_vm12  ;;  %vm407_vm12 = vcmp.lt.s32.totalorder %v4805_v52, %v4903_v25  ;;  %v5030_v43 = vadd.s32 896, %v4784_v29 }
  0x8d   :  { %v136_v53 = vpop.permute.xlu1 %135  ;;  %v131_v54 = vpop.permute.xlu0 %130  ;;  %3640 = vmatpush.bf16.msk.msra.mxu2 %vm3639_vm1, %v6910_v62  ;;  %4639 = vmatpush.bf16.msk.msra.mxu3 %vm3639_vm1, %v6910_v62  ;;  %vm265_vm1 = vcmp.ge.s32.totalorder %v4822_v59, %v4883_v19 }
  0x8e   :  { %v151_v60 = vmul.f32 %v136_v53, %v115_v57  ;;  %v150_v61 = vmul.f32 %v131_v54, %v114_v58  ;;  %v5145_v53 = vadd.s32 1152, %v4784_v29  ;;  %v5207_v58 = vadd.s32 768, %v4784_v29 }
  0x90   :  { %v155_v63 = vpack.c.bf16 %v151_v60, %v150_v61  ;;  %v5210_v60 = vadd.s32 1024, %v4784_v29 }
  0x95   :  { %v105_v1 = vpop.permute.xlu0 %104  ;;  %v141_v4 = vpop.permute.xlu1 %140 }
  0x96   :  { %vm111_vm15 = vcmp.eq.s32.totalorder %v4784_v29, %v105_v1  ;;  %v152_v7 = vmul.f32 %v141_v4, %v116_v6  ;;  %v824_v4 = vand.u32 31, %v5022_v40 }
  0x97   :  { %v117_v2 = vsel %vm111_vm15, 1.0, %v6906_v35  ;;  %vm441_vm15 = vcmp.lt.s32.totalorder %v4822_v59, %v4856_v15 }
  0x98   :  { %v153_v5 = vmul.f32 %v146_v3, %v117_v2  ;;  %v5404_v2 = vadd.s32 1280, %v4784_v29  ;;  %v5407_v3 = vadd.s32 1536, %v4784_v29 }
  0x9a   :  { %3624 = vmatmul.msk.bf16.gmra.mxu0 %vm157_vm6, %v155_v63  ;;  %v156_v8 = vpack.c.bf16 %v153_v5, %v152_v7  ;;  %v5217_v63 = vadd.s32 1408, %v4784_v29  ;;  %v5414_v5 = vadd.s32 1920, %v4784_v29 }
  0xaa   :  { %3625 = vmatmul.msk.bf16.gmra.mxu0 %vm157_vm6, %v156_v8  ;;  %vm294_vm6 = vcmp.ge.s32.totalorder %v4784_v29, %v4852_v13 }
  0xab   :  { %vm566_vm4 = vmand %vm294_vm6, %vm438_vm2  ;;  %vm457_vm6 = vcmp.lt.s32.totalorder %v4822_v59, %v4858_v16 }
  0xac   :  { %vm3628_vm11 = vmpackc.low %vm582_vm8, %vm566_vm4  ;;  %vm406_vm4 = vcmp.lt.s32.totalorder %v4784_v29, %v4903_v25  ;;  %vm422_vm8 = vcmp.lt.s32.totalorder %v4784_v29, %v4905_v26 }
  0xad   :  { %3629 = vmatpush.bf16.msk.msra.mxu1 %vm3628_vm11, %v6910_v62  ;;  %vm569_vm2 = vmand %vm297_vm13, %vm441_vm15  ;;  %vm263_vm11 = vcmp.ge.s32.totalorder %v4805_v52, %v4883_v19  ;;  %vm423_vm15 = vcmp.lt.s32.totalorder %v4805_v52, %v4905_v26 }
  0xae   :  { %vm585_vm5 = vmand %vm313_vm14, %vm457_vm6  ;;  %vm279_vm14 = vcmp.ge.s32.totalorder %v4805_v52, %v4899_v23 }
  0xaf   :  { %vm3661_vm9 = vmpackc.low %vm585_vm5, %vm569_vm2  ;;  %vm409_vm2 = vcmp.lt.s32.totalorder %v4822_v59, %v4903_v25  ;;  %vm425_vm5 = vcmp.lt.s32.totalorder %v4822_v59, %v4905_v26 }
  0xb0   :  { %3662 = vmatpush.bf16.msk.msrb.mxu0 %vm3661_vm9, %v6910_v62  ;;  %vm534_vm10 = vmand %vm262_vm3, %vm406_vm4  ;;  %vm281_vm4 = vcmp.ge.s32.totalorder %v4822_v59, %v4899_v23  ;;  %vm230_vm9 = vcmp.ge.s32.totalorder %v4784_v29, %v4934_v31 }
  0xb1   :  { %vm550_vm13 = vmand %vm278_vm7, %vm422_vm8 }
  0xb2   :  { %vm3630_vm0 = vmpackc.low %vm550_vm13, %vm534_vm10  ;;  %vm374_vm10 = vcmp.lt.s32.totalorder %v4784_v29, %v4936_v32  ;;  %vm390_vm13 = vcmp.lt.s32.totalorder %v4784_v29, %v4946_v36 }
  0xb3   :  { %3631 = vmatpush.bf16.msk.msra.mxu1 %vm3630_vm0, %v6910_v62  ;;  %vm535_vm6 = vmand %vm263_vm11, %vm407_vm12  ;;  %vm246_vm12 = vcmp.ge.s32.totalorder %v4784_v29, %v4944_v33  ;;  %vm231_vm0 = vcmp.ge.s32.totalorder %v4805_v52, %v4934_v31 }
  0xb4   :  { %vm551_vm3 = vmand %vm279_vm14, %vm423_vm15 }
  0xb5   :  { %vm3641_vm7 = vmpackc.low %vm551_vm3, %vm535_vm6  ;;  %vm375_vm6 = vcmp.lt.s32.totalorder %v4805_v52, %v4936_v32  ;;  %vm391_vm3 = vcmp.lt.s32.totalorder %v4805_v52, %v4946_v36 }
  0xb6   :  { %3642 = vmatpush.bf16.msk.msra.mxu2 %vm3641_vm7, %v6910_v62  ;;  %vm537_vm8 = vmand %vm265_vm1, %vm409_vm2  ;;  %4640 = vmatpush.bf16.msk.msra.mxu3 %vm3641_vm7, %v6910_v62  ;;  %vm247_vm2 = vcmp.ge.s32.totalorder %v4805_v52, %v4944_v33  ;;  %vm233_vm7 = vcmp.ge.s32.totalorder %v4822_v59, %v4934_v31 }
  0xb7   :  { %vm553_vm11 = vmand %vm281_vm4, %vm425_vm5 }
  0xb8   :  { %vm3663_vm14 = vmpackc.low %vm553_vm11, %vm537_vm8  ;;  %vm377_vm8 = vcmp.lt.s32.totalorder %v4822_v59, %v4936_v32  ;;  %vm393_vm11 = vcmp.lt.s32.totalorder %v4822_v59, %v4946_v36 }
  0xb9   :  { %3664 = vmatpush.bf16.msk.msrb.mxu0 %vm3663_vm14, %v6910_v62  ;;  %vm502_vm15 = vmand %vm230_vm9, %vm374_vm10  ;;  %vm249_vm10 = vcmp.ge.s32.totalorder %v4822_v59, %v4944_v33 }
  0xba   :  { %vm518_vm1 = vmand %vm246_vm12, %vm390_vm13 }
  0xbb   :  { %vm3632_vm4 = vmpackc.low %vm518_vm1, %vm502_vm15  ;;  %vm475_vm1 = vcmp.lt.s32.totalorder %v4983_v37, %v4809_v55 }
  0xbc   :  { %3633 = vmatpush.bf16.msk.msra.mxu1 %vm3632_vm4, %v6910_v62  ;;  %vm503_vm5 = vmand %vm231_vm0, %vm375_vm6  ;;  %vm331_vm0 = vcmp.ge.s32.totalorder %v4983_v37, %v4798_v48  ;;  %vm347_vm6 = vcmp.ge.s32.totalorder %v4983_v37, %v4800_v49 }
  0xbd   :  { %vm519_vm9 = vmand %vm247_vm2, %vm391_vm3  ;;  %vm491_vm2 = vcmp.lt.s32.totalorder %v4983_v37, %v4811_v56 }
  0xbe   :  { %vm3643_vm12 = vmpackc.low %vm519_vm9, %vm503_vm5  ;;  %vm443_vm9 = vcmp.lt.s32.totalorder %v4983_v37, %v4856_v15 }
  0xbf   :  { %3644 = vmatpush.bf16.msk.msra.mxu2 %vm3643_vm12, %v6910_v62  ;;  %vm505_vm13 = vmand %vm233_vm7, %vm377_vm8  ;;  %4641 = vmatpush.bf16.msk.msra.mxu3 %vm3643_vm12, %v6910_v62  ;;  %vm299_vm7 = vcmp.ge.s32.totalorder %v4983_v37, %v4852_v13  ;;  %vm315_vm8 = vcmp.ge.s32.totalorder %v4983_v37, %v4854_v14 }
  0xc0   :  { %vm521_vm14 = vmand %vm249_vm10, %vm393_vm11  ;;  %vm459_vm10 = vcmp.lt.s32.totalorder %v4983_v37, %v4858_v16 }
  0xc1   :  { %vm3665_vm15 = vmpackc.low %vm521_vm14, %vm505_vm13  ;;  %vm267_vm13 = vcmp.ge.s32.totalorder %v4983_v37, %v4883_v19  ;;  %vm283_vm14 = vcmp.ge.s32.totalorder %v4983_v37, %v4899_v23 }
  0xc2   :  { %3666 = vmatpush.bf16.msk.msrb.mxu0 %vm3665_vm15, %v6910_v62  ;;  %vm603_vm3 = vmand %vm331_vm0, %vm475_vm1  ;;  %vm411_vm15 = vcmp.lt.s32.totalorder %v4983_v37, %v4903_v25  ;;  %vm427_vm0 = vcmp.lt.s32.totalorder %v4983_v37, %v4905_v26 }
  0xc3   :  { %vm619_vm4 = vmand %vm347_vm6, %vm491_vm2 }
  0xc4   :  { %vm3681_vm5 = vmpackc.low %vm619_vm4, %vm603_vm3  ;;  %vm235_vm4 = vcmp.ge.s32.totalorder %v4983_v37, %v4934_v31 }
  0xc5   :  { %3682 = vmatpush.bf16.msk.msrb.mxu2 %vm3681_vm5, %v6910_v62  ;;  %vm571_vm11 = vmand %vm299_vm7, %vm443_vm9  ;;  %vm251_vm5 = vcmp.ge.s32.totalorder %v4983_v37, %v4944_v33  ;;  %vm379_vm7 = vcmp.lt.s32.totalorder %v4983_v37, %v4936_v32 }
  0xc6   :  { %vm587_vm12 = vmand %vm315_vm8, %vm459_vm10  ;;  %vm395_vm8 = vcmp.lt.s32.totalorder %v4983_v37, %v4946_v36  ;;  %vm998_vm10 = vcmask 523264  }
  0xc7   :  { %vm3683_vm6 = vmpackc.low %vm587_vm12, %vm571_vm11 }
  0xc8   :  { %vm539_vm1 = vmand %vm267_vm13, %vm411_vm15  ;;  %vm328_vm13 = vcmp.ge.s32.totalorder %v5022_v40, %v4798_v48  ;;  %vm472_vm15 = vcmp.lt.s32.totalorder %v5022_v40, %v4809_v55 }
  0xc9   :  { %3684 = vmatpush.bf16.msk.msrb.mxu2 %vm3683_vm6, %v6910_v62  ;;  %vm555_vm2 = vmand %vm283_vm14, %vm427_vm0  ;;  %vm344_vm14 = vcmp.ge.s32.totalorder %v5022_v40, %v4800_v49  ;;  %vm488_vm0 = vcmp.lt.s32.totalorder %v5022_v40, %v4811_v56 }
  0xca   :  { %vm3685_vm3 = vmpackc.low %vm555_vm2, %vm539_vm1  ;;  %vm330_vm1 = vcmp.ge.s32.totalorder %v5025_v41, %v4798_v48  ;;  %vm474_vm2 = vcmp.lt.s32.totalorder %v5025_v41, %v4809_v55 }
  0xcb   :  { %vm507_vm9 = vmand %vm235_vm4, %vm379_vm7  ;;  %vm346_vm4 = vcmp.ge.s32.totalorder %v5025_v41, %v4800_v49 }
  0xcc   :  { %vm523_vm11 = vmand %vm251_vm5, %vm395_vm8  ;;  %vm490_vm5 = vcmp.lt.s32.totalorder %v5025_v41, %v4811_v56 }
  0xcd   :  { %3686 = vmatpush.bf16.msk.msrb.mxu2 %vm3685_vm3, %v6910_v62  ;;  %vm3687_vm12 = vmpackc.low %vm523_vm11, %vm507_vm9  ;;  %vm333_vm9 = vcmp.ge.s32.totalorder %v5030_v43, %v4798_v48  ;;  %vm477_vm11 = vcmp.lt.s32.totalorder %v5030_v43, %v4809_v55 }
  0xce   :  { %vm600_vm6 = vmand %vm328_vm13, %vm472_vm15  ;;  %vm349_vm13 = vcmp.ge.s32.totalorder %v5030_v43, %v4800_v49 }
  0xcf   :  { %vm616_vm3 = vmand %vm344_vm14, %vm488_vm0  ;;  %vm493_vm14 = vcmp.lt.s32.totalorder %v5030_v43, %v4811_v56 }
  0xd0   :  { %vm3648_vm7 = vmpackc.low %vm616_vm3, %vm600_vm6  ;;  %vm296_vm6 = vcmp.ge.s32.totalorder %v5022_v40, %v4852_v13  ;;  %vm312_vm3 = vcmp.ge.s32.totalorder %v5022_v40, %v4854_v14 }
  0xd1   :  { %3688 = vmatpush.bf16.msk.msrb.mxu2 %vm3687_vm12, %v6910_v62  ;;  %3649 = vmatpush.bf16.msk.msrb.mxu3 %vm3648_vm7, %v6910_v62  ;;  %vm602_vm8 = vmand %vm330_vm1, %vm474_vm2  ;;  %vm440_vm1 = vcmp.lt.s32.totalorder %v5022_v40, %v4856_v15 }
  0xd2   :  { %vm618_vm12 = vmand %vm346_vm4, %vm490_vm5  ;;  %vm456_vm4 = vcmp.lt.s32.totalorder %v5022_v40, %v4858_v16 }
  0xd3   :  { %vm3670_vm15 = vmpackc.low %vm618_vm12, %vm602_vm8  ;;  %vm298_vm8 = vcmp.ge.s32.totalorder %v5025_v41, %v4852_v13  ;;  %vm314_vm12 = vcmp.ge.s32.totalorder %v5025_v41, %v4854_v14 }
  0xd4   :  { %3671 = vmatpush.bf16.msk.msrb.mxu1 %vm3670_vm15, %v6910_v62  ;;  %vm605_vm0 = vmand %vm333_vm9, %vm477_vm11  ;;  %vm442_vm9 = vcmp.lt.s32.totalorder %v5025_v41, %v4856_v15 }
  0xd5   :  { %vm621_vm2 = vmand %vm349_vm13, %vm493_vm14  ;;  %vm458_vm13 = vcmp.lt.s32.totalorder %v5025_v41, %v4858_v16 }
  0xd6   :  { %vm3703_vm5 = vmpackc.low %vm621_vm2, %vm605_vm0  ;;  %vm301_vm0 = vcmp.ge.s32.totalorder %v5030_v43, %v4852_v13  ;;  %vm317_vm2 = vcmp.ge.s32.totalorder %v5030_v43, %v4854_v14 }
  0xd7   :  { %3704 = vmatpush.bf16.msk.msra.mxu0 %vm3703_vm5, %v6910_v62  ;;  %vm568_vm7 = vmand %vm296_vm6, %vm440_vm1  ;;  %vm445_vm6 = vcmp.lt.s32.totalorder %v5030_v43, %v4856_v15 }
  0xd8   :  { %vm584_vm11 = vmand %vm312_vm3, %vm456_vm4  ;;  %vm461_vm3 = vcmp.lt.s32.totalorder %v5030_v43, %v4858_v16 }
  0xd9   :  { %vm3650_vm14 = vmpackc.low %vm584_vm11, %vm568_vm7  ;;  %vm264_vm7 = vcmp.ge.s32.totalorder %v5022_v40, %v4883_v19  ;;  %vm280_vm11 = vcmp.ge.s32.totalorder %v5022_v40, %v4899_v23 }
  0xda   :  { %3651 = vmatpush.bf16.msk.msrb.mxu3 %vm3650_vm14, %v6910_v62  ;;  %vm570_vm15 = vmand %vm298_vm8, %vm442_vm9  ;;  %vm408_vm8 = vcmp.lt.s32.totalorder %v5022_v40, %v4903_v25 }
  0xdb   :  { %vm586_vm1 = vmand %vm314_vm12, %vm458_vm13  ;;  %vm424_vm12 = vcmp.lt.s32.totalorder %v5022_v40, %v4905_v26 }
  0xdc   :  { %vm3672_vm4 = vmpackc.low %vm586_vm1, %vm570_vm15  ;;  %vm266_vm15 = vcmp.ge.s32.totalorder %v5025_v41, %v4883_v19  ;;  %vm282_vm1 = vcmp.ge.s32.totalorder %v5025_v41, %v4899_v23 }
  0xdd   :  { %3673 = vmatpush.bf16.msk.msrb.mxu1 %vm3672_vm4, %v6910_v62  ;;  %vm573_vm5 = vmand %vm301_vm0, %vm445_vm6  ;;  %vm410_vm0 = vcmp.lt.s32.totalorder %v5025_v41, %v4903_v25 }
  0xde   :  { %vm589_vm9 = vmand %vm317_vm2, %vm461_vm3  ;;  %vm426_vm2 = vcmp.lt.s32.totalorder %v5025_v41, %v4905_v26 }
  0xdf   :  { %vm3705_vm13 = vmpackc.low %vm589_vm9, %vm573_vm5  ;;  %vm269_vm5 = vcmp.ge.s32.totalorder %v5030_v43, %v4883_v19  ;;  %vm285_vm9 = vcmp.ge.s32.totalorder %v5030_v43, %v4899_v23 }
  0xe0   :  { %3706 = vmatpush.bf16.msk.msra.mxu0 %vm3705_vm13, %v6910_v62  ;;  %vm536_vm14 = vmand %vm264_vm7, %vm408_vm8  ;;  %vm413_vm7 = vcmp.lt.s32.totalorder %v5030_v43, %v4903_v25 }
  0xe1   :  { %vm552_vm6 = vmand %vm280_vm11, %vm424_vm12  ;;  %vm429_vm11 = vcmp.lt.s32.totalorder %v5030_v43, %v4905_v26 }
  0xe2   :  { %vm3652_vm3 = vmpackc.low %vm552_vm6, %vm536_vm14  ;;  %vm232_vm14 = vcmp.ge.s32.totalorder %v5022_v40, %v4934_v31  ;;  %vm248_vm6 = vcmp.ge.s32.totalorder %v5022_v40, %v4944_v33 }
  0xe3   :  { %3653 = vmatpush.bf16.msk.msrb.mxu3 %vm3652_vm3, %v6910_v62  ;;  %vm538_vm4 = vmand %vm266_vm15, %vm410_vm0  ;;  %vm376_vm15 = vcmp.lt.s32.totalorder %v5022_v40, %v4936_v32 }
  0xe4   :  { %vm554_vm8 = vmand %vm282_vm1, %vm426_vm2  ;;  %vm392_vm1 = vcmp.lt.s32.totalorder %v5022_v40, %v4946_v36 }
  0xe5   :  { %vm3674_vm12 = vmpackc.low %vm554_vm8, %vm538_vm4  ;;  %vm234_vm4 = vcmp.ge.s32.totalorder %v5025_v41, %v4934_v31  ;;  %vm250_vm8 = vcmp.ge.s32.totalorder %v5025_v41, %v4944_v33 }
  0xe6   :  { %3675 = vmatpush.bf16.msk.msrb.mxu1 %vm3674_vm12, %v6910_v62  ;;  %vm541_vm13 = vmand %vm269_vm5, %vm413_vm7  ;;  %vm378_vm5 = vcmp.lt.s32.totalorder %v5025_v41, %v4936_v32 }
  0xe7   :  { %vm557_vm0 = vmand %vm285_vm9, %vm429_vm11  ;;  %vm394_vm9 = vcmp.lt.s32.totalorder %v5025_v41, %v4946_v36 }
  0xe8   :  { %vm3707_vm2 = vmpackc.low %vm557_vm0, %vm541_vm13  ;;  %vm237_vm13 = vcmp.ge.s32.totalorder %v5030_v43, %v4934_v31  ;;  %vm253_vm0 = vcmp.ge.s32.totalorder %v5030_v43, %v4944_v33 }
  0xe9   :  { %3708 = vmatpush.bf16.msk.msra.mxu0 %vm3707_vm2, %v6910_v62  ;;  %vm504_vm3 = vmand %vm232_vm14, %vm376_vm15  ;;  %vm381_vm14 = vcmp.lt.s32.totalorder %v5030_v43, %v4936_v32 }
  0xea   :  { %vm520_vm7 = vmand %vm248_vm6, %vm392_vm1  ;;  %vm397_vm6 = vcmp.lt.s32.totalorder %v5030_v43, %v4946_v36 }
  0xeb   :  { %vm3654_vm11 = vmpackc.low %vm520_vm7, %vm504_vm3  ;;  %vm335_vm3 = vcmp.ge.s32.totalorder %v5145_v53, %v4798_v48  ;;  %vm351_vm7 = vcmp.ge.s32.totalorder %v5145_v53, %v4800_v49 }
  0xec   :  { %3655 = vmatpush.bf16.msk.msrb.mxu3 %vm3654_vm11, %v6910_v62  ;;  %vm506_vm12 = vmand %vm234_vm4, %vm378_vm5  ;;  %vm479_vm4 = vcmp.lt.s32.totalorder %v5145_v53, %v4809_v55 }
  0xed   :  { %vm522_vm15 = vmand %vm250_vm8, %vm394_vm9  ;;  %vm495_vm8 = vcmp.lt.s32.totalorder %v5145_v53, %v4811_v56 }
  0xee   :  { %vm3676_vm1 = vmpackc.low %vm522_vm15, %vm506_vm12  ;;  %vm303_vm12 = vcmp.ge.s32.totalorder %v5145_v53, %v4852_v13  ;;  %vm319_vm15 = vcmp.ge.s32.totalorder %v5145_v53, %v4854_v14 }
  0xef   :  { %vm509_vm2 = vmand %vm237_vm13, %vm381_vm14  ;;  %3677 = vmatpush.bf16.msk.msrb.mxu1 %vm3676_vm1, %v6910_v62  ;;  %vm447_vm13 = vcmp.lt.s32.totalorder %v5145_v53, %v4856_v15 }
  0xf0   :  { %vm525_vm5 = vmand %vm253_vm0, %vm397_vm6  ;;  %vm463_vm0 = vcmp.lt.s32.totalorder %v5145_v53, %v4858_v16 }
  0xf1   :  { %vm3709_vm9 = vmpackc.low %vm525_vm5, %vm509_vm2  ;;  %vm271_vm2 = vcmp.ge.s32.totalorder %v5145_v53, %v4883_v19  ;;  %vm287_vm5 = vcmp.ge.s32.totalorder %v5145_v53, %v4899_v23 }
  0xf2   :  { %3710 = vmatpush.bf16.msk.msra.mxu0 %vm3709_vm9, %v6910_v62  ;;  %vm607_vm11 = vmand %vm335_vm3, %vm479_vm4  ;;  %vm415_vm3 = vcmp.lt.s32.totalorder %v5145_v53, %v4903_v25 }
  0xf3   :  { %vm623_vm14 = vmand %vm351_vm7, %vm495_vm8  ;;  %vm431_vm7 = vcmp.lt.s32.totalorder %v5145_v53, %v4905_v26 }
  0xf4   :  { %vm3725_vm6 = vmpackc.low %vm623_vm14, %vm607_vm11  ;;  %vm239_vm11 = vcmp.ge.s32.totalorder %v5145_v53, %v4934_v31  ;;  %vm255_vm14 = vcmp.ge.s32.totalorder %v5145_v53, %v4944_v33 }
  0xf5   :  { %vm575_vm1 = vmand %vm303_vm12, %vm447_vm13  ;;  %vm383_vm12 = vcmp.lt.s32.totalorder %v5145_v53, %v4936_v32 }
  0xf6   :  { %vm591_vm4 = vmand %vm319_vm15, %vm463_vm0  ;;  %vm399_vm15 = vcmp.lt.s32.totalorder %v5145_v53, %v4946_v36 }
  0xf7   :  { %vm3727_vm8 = vmpackc.low %vm591_vm4, %vm575_vm1  ;;  %vm348_vm4 = vcmp.ge.s32.totalorder %v5207_v58, %v4800_v49 }
  0xf8   :  { %vm543_vm9 = vmand %vm271_vm2, %vm415_vm3  ;;  %vm332_vm3 = vcmp.ge.s32.totalorder %v5207_v58, %v4798_v48 }
  0xf9   :  { %vm559_vm13 = vmand %vm287_vm5, %vm431_vm7  ;;  %vm476_vm5 = vcmp.lt.s32.totalorder %v5207_v58, %v4809_v55  ;;  %vm492_vm7 = vcmp.lt.s32.totalorder %v5207_v58, %v4811_v56 }
  0xfa   :  { %vm3729_vm0 = vmpackc.low %vm559_vm13, %vm543_vm9  ;;  %vm334_vm9 = vcmp.ge.s32.totalorder %v5210_v60, %v4798_v48  ;;  %vm350_vm13 = vcmp.ge.s32.totalorder %v5210_v60, %v4800_v49 }
  0xfb   :  { %vm5212_vm1 = vmand %vm255_vm14, %vm399_vm15  ;;  %vm494_vm14 = vcmp.lt.s32.totalorder %v5210_v60, %v4811_v56 }
 0x107   :  { %v180_v38 = vpop.f32.mrf.mxu0 }
 0x10f   :  { %v182_v39 = vpop.f32.mrf.mxu0 }
 0x110   :  { %v5027_v42 = vpack.c.bf16 %v182_v39, %v180_v38  ;;  %v827_v38 = vand.u32 31, %v4983_v37  ;;  %v5715_v37 = vld [vmem:[%s6897_s2 + $0x8] sm:$0xff] }
 0x112   :  { %3634 = vmatmul.msk.bf16.vlgmr.msra.gmra.mxu1 %vm998_vm10, %v5027_v42  ;;  %3645 = vmatmul.msk.bf16.vlgmr.msra.gmra.mxu2 %vm998_vm10, %v5027_v42 }
 0x113   :  { %3667 = vmatmul.msk.bf16.vlgmr.msrb.gmra.mxu0 %vm998_vm10, %v5027_v42  ;;  %3726 = vmatpush.bf16.msk.msra.mxu2 %vm3725_vm6, %v6910_v62  ;;  %vm5202_vm6 = vmand %vm239_vm11, %vm383_vm12  ;;  %vm478_vm11 = vcmp.lt.s32.totalorder %v5210_v60, %v4809_v55 }
 0x114   :  { %vm3731_vm2 = vmpackc.low %vm5212_vm1, %vm5202_vm6  ;;  %vm300_vm1 = vcmp.ge.s32.totalorder %v5207_v58, %v4852_v13 }
 0x115   :  { %vm620_vm12 = vmand %vm348_vm4, %vm492_vm7  ;;  %vm481_vm4 = vcmp.lt.s32.totalorder %v5217_v63, %v4809_v55  ;;  %vm353_vm7 = vcmp.ge.s32.totalorder %v5217_v63, %v4800_v49 }
 0x117   :  { %v185_v45 = vpop.f32.mrf.mxu0  ;;  %3728 = vmatpush.bf16.msk.msra.mxu2 %vm3727_vm8, %v6910_v62  ;;  %vm604_vm8 = vmand %vm332_vm3, %vm476_vm5  ;;  %vm337_vm3 = vcmp.ge.s32.totalorder %v5217_v63, %v4798_v48 }
 0x118   :  { %vm3692_vm15 = vmpackc.low %vm620_vm12, %vm604_vm8  ;;  %vm497_vm8 = vcmp.lt.s32.totalorder %v5217_v63, %v4811_v56 }
 0x119   :  { %vm622_vm5 = vmand %vm350_vm13, %vm494_vm14  ;;  %vm460_vm13 = vcmp.lt.s32.totalorder %v5207_v58, %v4858_v16 }
 0x11a   :  { %vm609_vm6 = vmand %vm337_vm3, %vm481_vm4  ;;  %vm446_vm3 = vcmp.lt.s32.totalorder %v5210_v60, %v4856_v15 }
 0x11b   :  { %3730 = vmatpush.bf16.msk.msra.mxu2 %vm3729_vm0, %v6910_v62  ;;  %vm606_vm0 = vmand %vm334_vm9, %vm478_vm11  ;;  %vm316_vm11 = vcmp.ge.s32.totalorder %v5207_v58, %v4854_v14 }
 0x11c   :  { %vm3714_vm12 = vmpackc.low %vm622_vm5, %vm606_vm0  ;;  %vm302_vm0 = vcmp.ge.s32.totalorder %v5210_v60, %v4852_v13  ;;  %vm318_vm5 = vcmp.ge.s32.totalorder %v5210_v60, %v4854_v14 }
 0x11d   :  { %3715 = vmatpush.bf16.msk.msra.mxu1 %vm3714_vm12, %v6910_v62  ;;  %vm625_vm9 = vmand %vm353_vm7, %vm497_vm8  ;;  %vm462_vm7 = vcmp.lt.s32.totalorder %v5210_v60, %v4858_v16 }
 0x11e   :  { %vm3747_vm14 = vmpackc.low %vm625_vm9, %vm609_vm6  ;;  %vm305_vm6 = vcmp.ge.s32.totalorder %v5217_v63, %v4852_v13  ;;  %vm321_vm9 = vcmp.ge.s32.totalorder %v5217_v63, %v4854_v14 }
 0x11f   :  { %v187_v46 = vpop.f32.mrf.mxu0  ;;  %3732 = vmatpush.bf16.msk.msra.mxu2 %vm3731_vm2, %v6910_v62  ;;  %vm444_vm2 = vcmp.lt.s32.totalorder %v5207_v58, %v4856_v15  ;;  %3748 = vmatpush.bf16.msk.msrb.mxu0 %vm3747_vm14, %v6910_v62  ;;  %vm588_vm4 = vmand %vm316_vm11, %vm460_vm13  ;;  %vm465_vm11 = vcmp.lt.s32.totalorder %v5217_v63, %v4858_v16 }
 0x120   :  { %v5091_v47 = vpack.c.bf16 %v187_v46, %v185_v45  ;;  %vm574_vm12 = vmand %vm302_vm0, %vm446_vm3  ;;  %vm412_vm0 = vcmp.lt.s32.totalorder %v5207_v58, %v4903_v25 }
 0x121   :  { %vm593_vm3 = vmand %vm321_vm9, %vm465_vm11  ;;  %vm430_vm9 = vcmp.lt.s32.totalorder %v5210_v60, %v4905_v26 }
 0x122   :  { %3635 = vmatmul.msk.bf16.gmra.mxu1 %vm998_vm10, %v5091_v47  ;;  %3646 = vmatmul.msk.bf16.gmra.mxu2 %vm998_vm10, %v5091_v47 }
 0x123   :  { %3668 = vmatmul.msk.bf16.gmra.mxu0 %vm998_vm10, %v5091_v47 }
 0x127   :  { %v190_v50 = vpop.f32.mrf.mxu0 }
 0x12f   :  { %v192_v51 = vpop.f32.mrf.mxu0 }
 0x130   :  { %v5147_v54 = vpack.c.bf16 %v192_v51, %v190_v50 }
 0x132   :  { %3636 = vmatmul.msk.bf16.gmra.mxu1 %vm998_vm10, %v5147_v54  ;;  %3647 = vmatmul.msk.bf16.vlgmr.msra.gmra.mxu3 %vm998_vm10, %v5147_v54 }
 0x133   :  { %3669 = vmatmul.msk.bf16.gmra.mxu0 %vm998_vm10, %v5147_v54  ;;  %3689 = vmatmul.msk.bf16.vlgmr.msrb.gmra.mxu2 %vm998_vm10, %v5027_v42 }
 0x134   :  { %3693 = vmatpush.bf16.msk.msra.mxu3 %vm3692_vm15, %v6910_v62  ;;  %vm572_vm15 = vmand %vm300_vm1, %vm444_vm2  ;;  %vm449_vm1 = vcmp.lt.s32.totalorder %v5217_v63, %v4856_v15 }
 0x135   :  { %vm3694_vm8 = vmpackc.low %vm588_vm4, %vm572_vm15  ;;  %vm268_vm15 = vcmp.ge.s32.totalorder %v5207_v58, %v4883_v19  ;;  %vm284_vm4 = vcmp.ge.s32.totalorder %v5207_v58, %v4899_v23 }
 0x136   :  { %vm590_vm2 = vmand %vm318_vm5, %vm462_vm7  ;;  %vm428_vm5 = vcmp.lt.s32.totalorder %v5207_v58, %v4905_v26 }
 0x137   :  { %vm3716_vm13 = vmpackc.low %vm590_vm2, %vm574_vm12  ;;  %vm270_vm12 = vcmp.ge.s32.totalorder %v5210_v60, %v4883_v19  ;;  %vm286_vm2 = vcmp.ge.s32.totalorder %v5210_v60, %v4899_v23 }
 0x138   :  { %3695 = vmatpush.bf16.msk.msra.mxu3 %vm3694_vm8, %v6910_v62  ;;  %3717 = vmatpush.bf16.msk.msra.mxu1 %vm3716_vm13, %v6910_v62  ;;  %vm577_vm14 = vmand %vm305_vm6, %vm449_vm1  ;;  %vm414_vm6 = vcmp.lt.s32.totalorder %v5210_v60, %v4903_v25 }
 0x139   :  { %vm3749_vm7 = vmpackc.low %vm593_vm3, %vm577_vm14  ;;  %vm273_vm14 = vcmp.ge.s32.totalorder %v5217_v63, %v4883_v19  ;;  %vm289_vm3 = vcmp.ge.s32.totalorder %v5217_v63, %v4899_v23 }
 0x13a   :  { %3750 = vmatpush.bf16.msk.msrb.mxu0 %vm3749_vm7, %v6910_v62  ;;  %vm540_vm8 = vmand %vm268_vm15, %vm412_vm0  ;;  %vm417_vm15 = vcmp.lt.s32.totalorder %v5217_v63, %v4903_v25 }
 0x13b   :  { %vm556_vm1 = vmand %vm284_vm4, %vm428_vm5  ;;  %vm433_vm4 = vcmp.lt.s32.totalorder %v5217_v63, %v4905_v26 }
 0x13c   :  { %vm3696_vm11 = vmpackc.low %vm556_vm1, %vm540_vm8  ;;  %vm236_vm8 = vcmp.ge.s32.totalorder %v5207_v58, %v4934_v31  ;;  %vm252_vm1 = vcmp.ge.s32.totalorder %v5207_v58, %v4944_v33 }
 0x13d   :  { %3697 = vmatpush.bf16.msk.msra.mxu3 %vm3696_vm11, %v6910_v62  ;;  %vm542_vm13 = vmand %vm270_vm12, %vm414_vm6  ;;  %vm380_vm12 = vcmp.lt.s32.totalorder %v5207_v58, %v4936_v32 }
 0x13e   :  { %vm558_vm0 = vmand %vm286_vm2, %vm430_vm9  ;;  %vm396_vm2 = vcmp.lt.s32.totalorder %v5207_v58, %v4946_v36 }
 0x13f   :  { %vm3718_vm5 = vmpackc.low %vm558_vm0, %vm542_vm13  ;;  %vm238_vm13 = vcmp.ge.s32.totalorder %v5210_v60, %v4934_v31  ;;  %vm254_vm0 = vcmp.ge.s32.totalorder %v5210_v60, %v4944_v33 }
 0x140   :  { %3719 = vmatpush.bf16.msk.msra.mxu1 %vm3718_vm5, %v6910_v62  ;;  %vm545_vm7 = vmand %vm273_vm14, %vm417_vm15  ;;  %vm382_vm14 = vcmp.lt.s32.totalorder %v5210_v60, %v4936_v32 }
 0x141   :  { %vm561_vm6 = vmand %vm289_vm3, %vm433_vm4  ;;  %vm398_vm3 = vcmp.lt.s32.totalorder %v5210_v60, %v4946_v36 }
 0x142   :  { %3656 = vmatmul.msk.bf16.vlgmr.msrb.gmra.mxu3 %vm998_vm10, %v5027_v42  ;;  %3678 = vmatmul.msk.bf16.vlgmr.msrb.gmra.mxu1 %vm998_vm10, %v5027_v42  ;;  %vm3751_vm9 = vmpackc.low %vm561_vm6, %vm545_vm7  ;;  %vm241_vm7 = vcmp.ge.s32.totalorder %v5217_v63, %v4934_v31  ;;  %vm257_vm6 = vcmp.ge.s32.totalorder %v5217_v63, %v4944_v33 }
 0x143   :  { %3690 = vmatmul.msk.bf16.gmra.mxu2 %vm998_vm10, %v5091_v47  ;;  %3711 = vmatmul.msk.bf16.vlgmr.msra.gmra.mxu0 %vm998_vm10, %v5027_v42  ;;  %vm508_vm11 = vmand %vm236_vm8, %vm380_vm12  ;;  %vm385_vm8 = vcmp.lt.s32.totalorder %v5217_v63, %v4936_v32 }
 0x144   :  { %3752 = vmatpush.bf16.msk.msrb.mxu0 %vm3751_vm9, %v6910_v62  ;;  %vm524_vm15 = vmand %vm252_vm1, %vm396_vm2  ;;  %vm401_vm1 = vcmp.lt.s32.totalorder %v5217_v63, %v4946_v36 }
 0x145   :  { %vm3698_vm4 = vmpackc.low %vm524_vm15, %vm508_vm11  ;;  %vm339_vm11 = vcmp.ge.s32.totalorder %v5344_v0, %v4798_v48  ;;  %vm355_vm15 = vcmp.ge.s32.totalorder %v5344_v0, %v4800_v49 }
 0x146   :  { %3699 = vmatpush.bf16.msk.msra.mxu3 %vm3698_vm4, %v6910_v62  ;;  %vm510_vm5 = vmand %vm238_vm13, %vm382_vm14  ;;  %vm483_vm13 = vcmp.lt.s32.totalorder %v5344_v0, %v4809_v55 }
 0x147   :  { %vm526_vm12 = vmand %vm254_vm0, %vm398_vm3  ;;  %vm499_vm0 = vcmp.lt.s32.totalorder %v5344_v0, %v4811_v56 }
 0x148   :  { %vm3720_vm2 = vmpackc.low %vm526_vm12, %vm510_vm5  ;;  %vm307_vm5 = vcmp.ge.s32.totalorder %v5344_v0, %v4852_v13  ;;  %vm323_vm12 = vcmp.ge.s32.totalorder %v5344_v0, %v4854_v14 }
 0x149   :  { %vm513_vm9 = vmand %vm241_vm7, %vm385_vm8  ;;  %3721 = vmatpush.bf16.msk.msra.mxu1 %vm3720_vm2, %v6910_v62  ;;  %vm451_vm7 = vcmp.lt.s32.totalorder %v5344_v0, %v4856_v15 }
 0x14a   :  { %vm529_vm14 = vmand %vm257_vm6, %vm401_vm1  ;;  %vm467_vm6 = vcmp.lt.s32.totalorder %v5344_v0, %v4858_v16 }
 0x14b   :  { %vm3753_vm3 = vmpackc.low %vm529_vm14, %vm513_vm9  ;;  %vm275_vm9 = vcmp.ge.s32.totalorder %v5344_v0, %v4883_v19  ;;  %vm291_vm14 = vcmp.ge.s32.totalorder %v5344_v0, %v4899_v23 }
 0x14c   :  { %3754 = vmatpush.bf16.msk.msrb.mxu0 %vm3753_vm3, %v6910_v62  ;;  %vm611_vm4 = vmand %vm339_vm11, %vm483_vm13  ;;  %vm419_vm11 = vcmp.lt.s32.totalorder %v5344_v0, %v4903_v25 }
 0x14d   :  { %vm627_vm8 = vmand %vm355_vm15, %vm499_vm0  ;;  %vm435_vm15 = vcmp.lt.s32.totalorder %v5344_v0, %v4905_v26 }
 0x14e   :  { %vm3769_vm1 = vmpackc.low %vm627_vm8, %vm611_vm4  ;;  %vm387_vm8 = vcmp.lt.s32.totalorder %v5344_v0, %v4936_v32 }
 0x14f   :  { %3770 = vmatpush.bf16.msk.msrb.mxu2 %vm3769_vm1, %v6910_v62  ;;  %vm579_vm2 = vmand %vm307_vm5, %vm451_vm7  ;;  %vm243_vm5 = vcmp.ge.s32.totalorder %v5344_v0, %v4934_v31  ;;  %vm259_vm7 = vcmp.ge.s32.totalorder %v5344_v0, %v4944_v33 }
 0x150   :  { %vm595_vm13 = vmand %vm323_vm12, %vm467_vm6  ;;  %vm403_vm12 = vcmp.lt.s32.totalorder %v5344_v0, %v4946_v36 }
 0x151   :  { %vm3771_vm0 = vmpackc.low %vm595_vm13, %vm579_vm2  ;;  %vm352_vm13 = vcmp.ge.s32.totalorder %v5404_v2, %v4800_v49 }
 0x152   :  { %3657 = vmatmul.msk.bf16.gmra.mxu3 %vm998_vm10, %v5091_v47  ;;  %3679 = vmatmul.msk.bf16.gmra.mxu1 %vm998_vm10, %v5091_v47  ;;  %vm547_vm3 = vmand %vm275_vm9, %vm419_vm11  ;;  %vm336_vm11 = vcmp.ge.s32.totalorder %v5404_v2, %v4798_v48 }
 0x153   :  { %3691 = vmatmul.msk.bf16.gmra.mxu2 %vm998_vm10, %v5147_v54  ;;  %3712 = vmatmul.msk.bf16.gmra.mxu0 %vm998_vm10, %v5091_v47  ;;  %vm563_vm4 = vmand %vm291_vm14, %vm435_vm15  ;;  %vm480_vm14 = vcmp.lt.s32.totalorder %v5404_v2, %v4809_v55  ;;  %vm496_vm15 = vcmp.lt.s32.totalorder %v5404_v2, %v4811_v56 }
 0x154   :  { %3772 = vmatpush.bf16.msk.msrb.mxu2 %vm3771_vm0, %v6910_v62  ;;  %vm3773_vm6 = vmpackc.low %vm563_vm4, %vm547_vm3  ;;  %vm338_vm3 = vcmp.ge.s32.totalorder %v5407_v3, %v4798_v48  ;;  %vm482_vm4 = vcmp.lt.s32.totalorder %v5407_v3, %v4809_v55 }
 0x155   :  { %vm5399_vm1 = vmand %vm243_vm5, %vm387_vm8  ;;  %vm498_vm8 = vcmp.lt.s32.totalorder %v5407_v3, %v4811_v56 }
 0x156   :  { %vm5409_vm2 = vmand %vm259_vm7, %vm403_vm12  ;;  %vm354_vm7 = vcmp.ge.s32.totalorder %v5407_v3, %v4800_v49 }
 0x157   :  { %vm3775_vm9 = vmpackc.low %vm5409_vm2, %vm5399_vm1  ;;  %vm304_vm2 = vcmp.ge.s32.totalorder %v5404_v2, %v4852_v13 }
 0x158   :  { %3774 = vmatpush.bf16.msk.msrb.mxu2 %vm3773_vm6, %v6910_v62  ;;  %vm608_vm0 = vmand %vm336_vm11, %vm480_vm14  ;;  %vm341_vm11 = vcmp.ge.s32.totalorder %v5414_v5, %v4798_v48 }
 0x159   :  { %vm624_vm5 = vmand %vm352_vm13, %vm496_vm15  ;;  %vm485_vm13 = vcmp.lt.s32.totalorder %v5414_v5, %v4809_v55  ;;  %vm357_vm15 = vcmp.ge.s32.totalorder %v5414_v5, %v4800_v49 }
 0x15a   :  { %vm3736_vm12 = vmpackc.low %vm624_vm5, %vm608_vm0  ;;  %vm501_vm0 = vcmp.lt.s32.totalorder %v5414_v5, %v4811_v56 }
 0x15b   :  { %3737 = vmatpush.bf16.msk.msrb.mxu3 %vm3736_vm12, %v6910_v62  ;;  %vm610_vm6 = vmand %vm338_vm3, %vm482_vm4  ;;  %vm320_vm4 = vcmp.ge.s32.totalorder %v5404_v2, %v4854_v14 }
 0x15c   :  { %3776 = vmatpush.bf16.msk.msrb.mxu2 %vm3775_vm9, %v6910_v62  ;;  %vm626_vm14 = vmand %vm354_vm7, %vm498_vm8  ;;  %vm448_vm9 = vcmp.lt.s32.totalorder %v5404_v2, %v4856_v15  ;;  %vm464_vm7 = vcmp.lt.s32.totalorder %v5404_v2, %v4858_v16 }
 0x15d   :  { %vm3758_vm5 = vmpackc.low %vm626_vm14, %vm610_vm6  ;;  %vm306_vm6 = vcmp.ge.s32.totalorder %v5407_v3, %v4852_v13  ;;  %vm322_vm14 = vcmp.ge.s32.totalorder %v5407_v3, %v4854_v14 }
 0x15e   :  { %3759 = vmatpush.bf16.msk.msrb.mxu1 %vm3758_vm5, %v6910_v62  ;;  %vm613_vm1 = vmand %vm341_vm11, %vm485_vm13  ;;  %vm450_vm11 = vcmp.lt.s32.totalorder %v5407_v3, %v4856_v15 }
 0x15f   :  { %vm629_vm3 = vmand %vm357_vm15, %vm501_vm0  ;;  %vm466_vm15 = vcmp.lt.s32.totalorder %v5407_v3, %v4858_v16 }
 0x160   :  { %vm3791_vm8 = vmpackc.low %vm629_vm3, %vm613_vm1  ;;  %vm309_vm1 = vcmp.ge.s32.totalorder %v5414_v5, %v4852_v13  ;;  %vm325_vm3 = vcmp.ge.s32.totalorder %v5414_v5, %v4854_v14 }
 0x161   :  { %3792 = vmatpush.bf16.msk.msra.mxu0 %vm3791_vm8, %v6910_v62  ;;  %vm576_vm12 = vmand %vm304_vm2, %vm448_vm9  ;;  %vm453_vm2 = vcmp.lt.s32.totalorder %v5414_v5, %v4856_v15 }
 0x162   :  { %3658 = vmatmul.msk.bf16.gmra.mxu3 %vm998_vm10, %v5147_v54  ;;  %3680 = vmatmul.msk.bf16.gmra.mxu1 %vm998_vm10, %v5147_v54  ;;  %vm592_vm13 = vmand %vm320_vm4, %vm464_vm7  ;;  %vm469_vm4 = vcmp.lt.s32.totalorder %v5414_v5, %v4858_v16 }
 0x163   :  { %3713 = vmatmul.msk.bf16.gmra.mxu0 %vm998_vm10, %v5147_v54  ;;  %3733 = vmatmul.msk.bf16.vlgmr.msra.gmra.mxu2 %vm998_vm10, %v5027_v42  ;;  %vm3738_vm0 = vmpackc.low %vm592_vm13, %vm576_vm12  ;;  %vm272_vm12 = vcmp.ge.s32.totalorder %v5404_v2, %v4883_v19  ;;  %vm288_vm13 = vcmp.ge.s32.totalorder %v5404_v2, %v4899_v23 }
 0x164   :  { %3739 = vmatpush.bf16.msk.msrb.mxu3 %vm3738_vm0, %v6910_v62  ;;  %vm578_vm5 = vmand %vm306_vm6, %vm450_vm11  ;;  %vm416_vm6 = vcmp.lt.s32.totalorder %v5404_v2, %v4903_v25 }
 0x165   :  { %vm594_vm9 = vmand %vm322_vm14, %vm466_vm15  ;;  %vm432_vm14 = vcmp.lt.s32.totalorder %v5404_v2, %v4905_v26 }
 0x166   :  { %vm3760_vm7 = vmpackc.low %vm594_vm9, %vm578_vm5  ;;  %vm274_vm5 = vcmp.ge.s32.totalorder %v5407_v3, %v4883_v19  ;;  %vm290_vm9 = vcmp.ge.s32.totalorder %v5407_v3, %v4899_v23 }
 0x167   :  { %3761 = vmatpush.bf16.msk.msrb.mxu1 %vm3760_vm7, %v6910_v62  ;;  %vm581_vm8 = vmand %vm309_vm1, %vm453_vm2  ;;  %vm418_vm1 = vcmp.lt.s32.totalorder %v5407_v3, %v4903_v25 }
 0x168   :  { %vm597_vm11 = vmand %vm325_vm3, %vm469_vm4  ;;  %vm434_vm3 = vcmp.lt.s32.totalorder %v5407_v3, %v4905_v26 }
 0x169   :  { %vm3793_vm15 = vmpackc.low %vm597_vm11, %vm581_vm8  ;;  %vm277_vm8 = vcmp.ge.s32.totalorder %v5414_v5, %v4883_v19  ;;  %vm293_vm11 = vcmp.ge.s32.totalorder %v5414_v5, %v4899_v23 }
 0x16a   :  { %3794 = vmatpush.bf16.msk.msra.mxu0 %vm3793_vm15, %v6910_v62  ;;  %vm544_vm0 = vmand %vm272_vm12, %vm416_vm6  ;;  %vm421_vm12 = vcmp.lt.s32.totalorder %v5414_v5, %v4903_v25 }
 0x16b   :  { %vm560_vm2 = vmand %vm288_vm13, %vm432_vm14  ;;  %vm437_vm13 = vcmp.lt.s32.totalorder %v5414_v5, %v4905_v26 }
 0x16c   :  { %vm3740_vm4 = vmpackc.low %vm560_vm2, %vm544_vm0  ;;  %vm240_vm0 = vcmp.ge.s32.totalorder %v5404_v2, %v4934_v31  ;;  %vm256_vm2 = vcmp.ge.s32.totalorder %v5404_v2, %v4944_v33 }
 0x16d   :  { %3741 = vmatpush.bf16.msk.msrb.mxu3 %vm3740_vm4, %v6910_v62  ;;  %vm546_vm7 = vmand %vm274_vm5, %vm418_vm1  ;;  %vm384_vm5 = vcmp.lt.s32.totalorder %v5404_v2, %v4936_v32 }
 0x16e   :  { %vm562_vm6 = vmand %vm290_vm9, %vm434_vm3  ;;  %vm400_vm9 = vcmp.lt.s32.totalorder %v5404_v2, %v4946_v36 }
 0x16f   :  { %vm3762_vm14 = vmpackc.low %vm562_vm6, %vm546_vm7  ;;  %vm242_vm7 = vcmp.ge.s32.totalorder %v5407_v3, %v4934_v31  ;;  %vm258_vm6 = vcmp.ge.s32.totalorder %v5407_v3, %v4944_v33 }
 0x170   :  { %3763 = vmatpush.bf16.msk.msrb.mxu1 %vm3762_vm14, %v6910_v62  ;;  %vm549_vm15 = vmand %vm277_vm8, %vm421_vm12  ;;  %vm386_vm8 = vcmp.lt.s32.totalorder %v5407_v3, %v4936_v32 }
 0x171   :  { %vm565_vm1 = vmand %vm293_vm11, %vm437_vm13  ;;  %vm402_vm11 = vcmp.lt.s32.totalorder %v5407_v3, %v4946_v36 }
 0x172   :  { %3700 = vmatmul.msk.bf16.vlgmr.msra.gmra.mxu3 %vm998_vm10, %v5027_v42  ;;  %3722 = vmatmul.msk.bf16.vlgmr.msra.gmra.mxu1 %vm998_vm10, %v5027_v42  ;;  %vm3795_vm3 = vmpackc.low %vm565_vm1, %vm549_vm15  ;;  %vm245_vm15 = vcmp.ge.s32.totalorder %v5414_v5, %v4934_v31  ;;  %vm261_vm1 = vcmp.ge.s32.totalorder %v5414_v5, %v4944_v33 }
 0x173   :  { %3734 = vmatmul.msk.bf16.gmra.mxu2 %vm998_vm10, %v5091_v47  ;;  %3755 = vmatmul.msk.bf16.vlgmr.msrb.gmra.mxu0 %vm998_vm10, %v5027_v42  ;;  %vm512_vm4 = vmand %vm240_vm0, %vm384_vm5  ;;  %vm389_vm0 = vcmp.lt.s32.totalorder %v5414_v5, %v4936_v32 }
 0x174   :  { %3796 = vmatpush.bf16.msk.msra.mxu0 %vm3795_vm3, %v6910_v62  ;;  %vm528_vm12 = vmand %vm256_vm2, %vm400_vm9  ;;  %vm405_vm2 = vcmp.lt.s32.totalorder %v5414_v5, %v4946_v36 }
 0x175   :  { %vm3742_vm13 = vmpackc.low %vm528_vm12, %vm512_vm4  ;;  %vm887_vm12 = vcmp.eq.s32.totalorder %v823_v11, %v4864_v18 }
 0x176   :  { %3743 = vmatpush.bf16.msk.msrb.mxu3 %vm3742_vm13, %v6910_v62  ;;  %vm514_vm14 = vmand %vm242_vm7, %vm386_vm8  ;;  %vm871_vm8 = vcmp.eq.s32.totalorder %v823_v11, %v4861_v17  ;;  %vm855_vm13 = vcmp.eq.s32.totalorder %v823_v11, %v4908_v27 }
 0x177   :  { %vm530_vm5 = vmand %vm258_vm6, %vm402_vm11  ;;  %vm839_vm11 = vcmp.eq.s32.totalorder %v823_v11, %v4794_v44  ;;  %v826_v11 = vand.u32 31, %v5025_v41 }
 0x178   :  { %vm3764_vm9 = vmpackc.low %vm530_vm5, %vm514_vm14  ;;  %vm484_vm5 = vcmp.lt.s32.totalorder %v5580_v21, %v4809_v55 }
 0x179   :  { %vm517_vm3 = vmand %vm245_vm15, %vm389_vm0  ;;  %3765 = vmatpush.bf16.msk.msrb.mxu1 %vm3764_vm9, %v6910_v62  ;;  %vm340_vm15 = vcmp.ge.s32.totalorder %v5580_v21, %v4798_v48  ;;  %vm356_vm0 = vcmp.ge.s32.totalorder %v5580_v21, %v4800_v49 }
 0x17a   :  { %vm533_vm4 = vmand %vm261_vm1, %vm405_vm2  ;;  %vm500_vm1 = vcmp.lt.s32.totalorder %v5580_v21, %v4811_v56  ;;  %v822_v56 = vand.u32 31, %v4784_v29 }
 0x17b   :  { %vm3797_vm7 = vmpackc.low %vm533_vm4, %vm517_vm3  ;;  %vm308_vm4 = vcmp.ge.s32.totalorder %v5580_v21, %v4852_v13  ;;  %v825_v13 = vand.u32 31, %v4822_v59 }
 0x17c   :  { %3798 = vmatpush.bf16.msk.msra.mxu0 %vm3797_vm7, %v6910_v62  ;;  %vm3821_vm6 = vmpackc.low %vm887_vm12, %vm871_vm8  ;;  %vm324_vm7 = vcmp.ge.s32.totalorder %v5580_v21, %v4854_v14  ;;  %vm452_vm8 = vcmp.lt.s32.totalorder %v5580_v21, %v4856_v15  ;;  %vm468_vm12 = vcmp.lt.s32.totalorder %v5580_v21, %v4858_v16 }
 0x17d   :  { %3822 = vmatpush.bf16.msk.msra.mxu2 %vm3821_vm6, %v6910_v62  ;;  %vm3823_vm14 = vmpackc.low %vm855_vm13, %vm839_vm11 }
 0x17e   :  { %vm612_vm2 = vmand %vm340_vm15, %vm484_vm5  ;;  %vm292_vm15 = vcmp.ge.s32.totalorder %v5580_v21, %v4899_v23  ;;  %vm436_vm5 = vcmp.lt.s32.totalorder %v5580_v21, %v4905_v26 }
 0x17f   :  { %vm628_vm9 = vmand %vm356_vm0, %vm500_vm1  ;;  %vm420_vm0 = vcmp.lt.s32.totalorder %v5580_v21, %v4903_v25 }
 0x180   :  { %vm3780_vm3 = vmpackc.low %vm628_vm9, %vm612_vm2 }
 0x181   :  { %3824 = vmatpush.bf16.msk.msra.mxu2 %vm3823_vm14, %v6910_v62  ;;  %3781 = vmatpush.bf16.msk.msra.mxu3 %vm3780_vm3, %v6910_v62  ;;  %vm580_vm6 = vmand %vm308_vm4, %vm452_vm8  ;;  %vm276_vm14 = vcmp.ge.s32.totalorder %v5580_v21, %v4883_v19  ;;  %vm870_vm3 = vcmp.eq.s32.totalorder %v822_v56, %v4861_v17  ;;  %vm886_vm4 = vcmp.eq.s32.totalorder %v822_v56, %v4864_v18 }
 0x182   :  { %3701 = vmatmul.msk.bf16.gmra.mxu3 %vm998_vm10, %v5091_v47  ;;  %3723 = vmatmul.msk.bf16.gmra.mxu1 %vm998_vm10, %v5091_v47  ;;  %vm596_vm11 = vmand %vm324_vm7, %vm468_vm12  ;;  %vm873_vm7 = vcmp.eq.s32.totalorder %v825_v13, %v4861_v17  ;;  %vm889_vm8 = vcmp.eq.s32.totalorder %v825_v13, %v4864_v18 }
 0x183   :  { %3735 = vmatmul.msk.bf16.gmra.mxu2 %vm998_vm10, %v5147_v54  ;;  %3756 = vmatmul.msk.bf16.gmra.mxu0 %vm998_vm10, %v5091_v47  ;;  %vm3782_vm13 = vmpackc.low %vm596_vm11, %vm580_vm6  ;;  %vm244_vm11 = vcmp.ge.s32.totalorder %v5580_v21, %v4934_v31 }
 0x184   :  { %vm548_vm1 = vmand %vm276_vm14, %vm420_vm0  ;;  %vm388_vm14 = vcmp.lt.s32.totalorder %v5580_v21, %v4936_v32 }
 0x185   :  { %3783 = vmatpush.bf16.msk.msra.mxu3 %vm3782_vm13, %v6910_v62  ;;  %vm564_vm2 = vmand %vm292_vm15, %vm436_vm5  ;;  %vm260_vm13 = vcmp.ge.s32.totalorder %v5580_v21, %v4944_v33  ;;  %vm404_vm15 = vcmp.lt.s32.totalorder %v5580_v21, %v4946_v36  ;;  %vm838_vm5 = vcmp.eq.s32.totalorder %v822_v56, %v4794_v44 }
 0x186   :  { %vm3784_vm9 = vmpackc.low %vm564_vm2, %vm548_vm1  ;;  %vm854_vm1 = vcmp.eq.s32.totalorder %v822_v56, %v4908_v27  ;;  %v829_v56 = vand.u32 31, %v5030_v43 }
 0x187   :  { %vm3814_vm12 = vmpackc.low %vm886_vm4, %vm870_vm3  ;;  %vm857_vm3 = vcmp.eq.s32.totalorder %v825_v13, %v4908_v27 }
 0x188   :  { %3815 = vmatpush.bf16.msk.msra.mxu1 %vm3814_vm12, %v6910_v62  ;;  %vm3835_vm6 = vmpackc.low %vm889_vm8, %vm873_vm7  ;;  %vm1407_vm12 = vcmask 261120  }
 0x189   :  { %3785 = vmatpush.bf16.msk.msra.mxu3 %vm3784_vm9, %v6910_v62  ;;  %3836 = vmatpush.bf16.msk.msrb.mxu0 %vm3835_vm6, %v6910_v62  ;;  %vm516_vm0 = vmand %vm244_vm11, %vm388_vm14  ;;  %vm841_vm9 = vcmp.eq.s32.totalorder %v825_v13, %v4794_v44  ;;  %vm875_vm6 = vcmp.eq.s32.totalorder %v827_v38, %v4861_v17  ;;  %vm891_vm11 = vcmp.eq.s32.totalorder %v827_v38, %v4864_v18  ;;  %v5761_v13 = vld [vmem:[%s6897_s2 + $0x10] sm:$0xff] }
 0x18a   :  { %vm532_vm2 = vmand %vm260_vm13, %vm404_vm15  ;;  %vm843_vm14 = vcmp.eq.s32.totalorder %v827_v38, %v4794_v44  ;;  %vm859_vm15 = vcmp.eq.s32.totalorder %v827_v38, %v4908_v27 }
 0x18b   :  { %vm3786_vm4 = vmpackc.low %vm532_vm2, %vm516_vm0  ;;  %vm874_vm2 = vcmp.eq.s32.totalorder %v826_v11, %v4861_v17 }
 0x18c   :  { %vm3816_vm7 = vmpackc.low %vm854_vm1, %vm838_vm5  ;;  %vm872_vm5 = vcmp.eq.s32.totalorder %v824_v4, %v4861_v17  ;;  %vm888_vm1 = vcmp.eq.s32.totalorder %v824_v4, %v4864_v18 }
 0x18d   :  { %3787 = vmatpush.bf16.msk.msra.mxu3 %vm3786_vm4, %v6910_v62  ;;  %vm3837_vm8 = vmpackc.low %vm857_vm3, %vm841_vm9  ;;  %3817 = vmatpush.bf16.msk.msra.mxu1 %vm3816_vm7, %v6910_v62  ;;  %vm890_vm9 = vcmp.eq.s32.totalorder %v826_v11, %v4864_v18  ;;  %vm877_vm4 = vcmp.eq.s32.totalorder %v829_v56, %v4861_v17  ;;  %vm893_vm7 = vcmp.eq.s32.totalorder %v829_v56, %v4864_v18 }
 0x18e   :  { %3838 = vmatpush.bf16.msk.msrb.mxu0 %vm3837_vm8, %v6910_v62  ;;  %vm3849_vm13 = vmpackc.low %vm891_vm11, %vm875_vm6  ;;  %vm840_vm11 = vcmp.eq.s32.totalorder %v824_v4, %v4794_v44 }
 0x18f   :  { %v5540_v6 = vpop.f32.mrf.mxu1  ;;  %vm3851_vm0 = vmpackc.low %vm859_vm15, %vm843_vm14  ;;  %vm842_vm14 = vcmp.eq.s32.totalorder %v826_v11, %v4794_v44  ;;  %vm858_vm15 = vcmp.eq.s32.totalorder %v826_v11, %v4908_v27 }
 0x190   :  { %v5542_v7 = vpop.f32.mrf.mxu0  ;;  %vm3828_vm3 = vmpackc.low %vm888_vm1, %vm872_vm5  ;;  %vm845_vm5 = vcmp.eq.s32.totalorder %v829_v56, %v4794_v44  ;;  %vm861_vm1 = vcmp.eq.s32.totalorder %v829_v56, %v4908_v27 }
 0x191   :  { %vm3842_vm8 = vmpackc.low %vm890_vm9, %vm874_vm2 }
 0x192   :  { %3702 = vmatmul.msk.bf16.gmra.mxu3 %vm998_vm10, %v5147_v54  ;;  %3724 = vmatmul.msk.bf16.gmra.mxu1 %vm998_vm10, %v5147_v54  ;;  %vm3863_vm6 = vmpackc.low %vm893_vm7, %vm877_vm4 }
 0x193   :  { %3757 = vmatmul.msk.bf16.gmra.mxu0 %vm998_vm10, %v5147_v54  ;;  %3777 = vmatmul.msk.bf16.vlgmr.msrb.gmra.mxu2 %vm998_vm10, %v5027_v42  ;;  %vm3844_vm2 = vmpackc.low %vm858_vm15, %vm842_vm14 }
 0x194   :  { %3850 = vmatpush.bf16.msk.msrb.mxu2 %vm3849_vm13, %v6910_v62  ;;  %vm856_vm13 = vcmp.eq.s32.totalorder %v824_v4, %v4908_v27  ;;  %vm3865_vm9 = vmpackc.low %vm861_vm1, %vm845_vm5 }
 0x195   :  { %v5562_v8 = vpop.f32.mrf.mxu2 }
 0x197   :  { %v5565_v9 = vpop.f32.mrf.mxu1 }
 0x198   :  { %v5567_v10 = vpop.f32.mrf.mxu0  ;;  %3852 = vmatpush.bf16.msk.msrb.mxu2 %vm3851_vm0, %v6910_v62  ;;  %vm3830_vm0 = vmpackc.low %vm856_vm13, %vm840_vm11 }
 0x19d   :  { %v5573_v12 = vpop.f32.mrf.mxu2 }
 0x19f   :  { %v5577_v20 = vpop.f32.mrf.mxu1 }
 0x1a0   :  { %v5582_v52 = vpop.f32.mrf.mxu0 }
 0x1a1   :  { %6934 = vst [vmem:[#allocation7_spill] sm:$0xff] %v5582_v52  ;;  %v833_v52 = vand.u32 31, %v5217_v63 }
 0x1a2   :  { %3744 = vmatmul.msk.bf16.vlgmr.msrb.gmra.mxu3 %vm998_vm10, %v5027_v42  ;;  %3766 = vmatmul.msk.bf16.vlgmr.msrb.gmra.mxu1 %vm998_vm10, %v5027_v42 }
 0x1a3   :  { %3778 = vmatmul.msk.bf16.gmra.mxu2 %vm998_vm10, %v5091_v47  ;;  %3799 = vmatmul.msk.bf16.vlgmr.msra.gmra.mxu0 %vm998_vm10, %v5027_v42  ;;  %vm881_vm1 = vcmp.eq.s32.totalorder %v833_v52, %v4861_v17 }
 0x1a4   :  { %3829 = vmatpush.bf16.msk.msrb.mxu3 %vm3828_vm3, %v6910_v62  ;;  %3843 = vmatpush.bf16.msk.msrb.mxu1 %vm3842_vm8, %v6910_v62 }
 0x1a5   :  { %v5601_v48 = vpop.f32.mrf.mxu2  ;;  %3864 = vmatpush.bf16.msk.msra.mxu0 %vm3863_vm6, %v6910_v62 }
 0x1a7   :  { %v5612_v49 = vpop.f32.mrf.mxu1 }
 0x1a8   :  { %v5614_v55 = vpop.f32.mrf.mxu0  ;;  %3831 = vmatpush.bf16.msk.msrb.mxu3 %vm3830_vm0, %v6910_v62  ;;  %3845 = vmatpush.bf16.msk.msrb.mxu1 %vm3844_vm2, %v6910_v62  ;;  %vm897_vm2 = vcmp.eq.s32.totalorder %v833_v52, %v4864_v18 }
 0x1a9   :  { %3866 = vmatpush.bf16.msk.msra.mxu0 %vm3865_vm9, %v6910_v62 }
 0x1ad   :  { %v5631_v14 = vpop.f32.mrf.mxu2 }
 0x1af   :  { %v5646_v29 = vpop.f32.mrf.mxu1 }
 0x1b0   :  { %v5650_v59 = vpop.f32.mrf.mxu0 }
 0x1b1   :  { %6935 = vst [vmem:[#allocation8_spill] sm:$0xff] %v5650_v59 }
 0x1b2   :  { %3745 = vmatmul.msk.bf16.gmra.mxu3 %vm998_vm10, %v5091_v47  ;;  %3767 = vmatmul.msk.bf16.gmra.mxu1 %vm998_vm10, %v5091_v47 }
 0x1b3   :  { %3779 = vmatmul.msk.bf16.gmra.mxu2 %vm998_vm10, %v5147_v54  ;;  %3800 = vmatmul.msk.bf16.gmra.mxu0 %vm998_vm10, %v5091_v47 }
 0x1b5   :  { %v5663_v15 = vpop.f32.mrf.mxu3 }
 0x1b6   :  { %v5665_v16 = vpop.f32.mrf.mxu2 }
 0x1b7   :  { %v5667_v19 = vpop.f32.mrf.mxu1 }
 0x1b8   :  { %v5669_v22 = vpop.f32.mrf.mxu0 }
 0x1b9   :  { %6936 = vst [vmem:[#allocation9_spill] sm:$0xff] %v5669_v22  ;;  %v828_v22 = vand.u32 31, %v5207_v58 }
 0x1bb   :  { %vm876_vm13 = vcmp.eq.s32.totalorder %v828_v22, %v4861_v17  ;;  %vm892_vm14 = vcmp.eq.s32.totalorder %v828_v22, %v4864_v18 }
 0x1bc   :  { %vm3856_vm5 = vmpackc.low %vm892_vm14, %vm876_vm13  ;;  %vm849_vm13 = vcmp.eq.s32.totalorder %v833_v52, %v4794_v44  ;;  %vm865_vm14 = vcmp.eq.s32.totalorder %v833_v52, %v4908_v27 }
 0x1bd   :  { %v5671_v23 = vpop.f32.mrf.mxu3 }
 0x1be   :  { %v5673_v25 = vpop.f32.mrf.mxu2 }
 0x1bf   :  { %v5675_v26 = vpop.f32.mrf.mxu1 }
 0x1c0   :  { %v5682_v30 = vpop.f32.mrf.mxu0 }
 0x1c1   :  { %6937 = vst [vmem:[#allocation10_spill] sm:$0xff] %v5682_v30 }
 0x1c2   :  { %3746 = vmatmul.msk.bf16.gmra.mxu3 %vm998_vm10, %v5147_v54  ;;  %3768 = vmatmul.msk.bf16.gmra.mxu1 %vm998_vm10, %v5147_v54 }
 0x1c3   :  { %3801 = vmatmul.msk.bf16.gmra.mxu0 %vm998_vm10, %v5147_v54  ;;  %3825 = vmatmul.msk.bf16.vlgmr.msra.gmra.mxu2 %vm1407_vm12, %v5680_v28 }
 0x1c5   :  { %v5692_v31 = vpop.f32.mrf.mxu3 }
 0x1c6   :  { %v5694_v32 = vpop.f32.mrf.mxu2 }
 0x1c7   :  { %v5696_v33 = vpop.f32.mrf.mxu1 }
 0x1c8   :  { %v5698_v36 = vpop.f32.mrf.mxu0 }
 0x1c9   :  { %6938 = vst [vmem:[#allocation11_spill] sm:$0xff] %v5698_v36  ;;  %v6948_v36 = vmov 1.0|1.0  }
 0x1cd   :  { %v5704_v39 = vpop.f32.mrf.mxu3 }
 0x1ce   :  { %v5706_v45 = vpop.f32.mrf.mxu2 }
 0x1cf   :  { %v5710_v46 = vpop.f32.mrf.mxu1 }
 0x1d0   :  { %v5717_v50 = vpop.f32.mrf.mxu0 }
 0x1d1   :  { %6939 = vst [vmem:[#allocation12_spill] sm:$0xff] %v5717_v50 }
 0x1d2   :  { %3788 = vmatmul.msk.bf16.vlgmr.msra.gmra.mxu3 %vm998_vm10, %v5027_v42  ;;  %3818 = vmatmul.msk.bf16.vlgmr.msra.gmra.mxu1 %vm1407_vm12, %v5680_v28 }
 0x1d3   :  { %3826 = vmatmul.msk.bf16.gmra.mxu2 %vm1407_vm12, %v5715_v37  ;;  %3839 = vmatmul.msk.bf16.vlgmr.msrb.gmra.mxu0 %vm1407_vm12, %v5680_v28 }
 0x1d4   :  { %3857 = vmatpush.bf16.msk.msra.mxu3 %vm3856_vm5, %v6948_v36 }
 0x1d5   :  { %v5728_v51 = vpop.f32.mrf.mxu3 }
 0x1d6   :  { %v5730_v57 = vpop.f32.mrf.mxu2 }
 0x1d7   :  { %v5732_v61 = vpop.f32.mrf.mxu1 }
 0x1d8   :  { %v5734_v1 = vpop.f32.mrf.mxu0 }
 0x1d9   :  { %6940 = vst [vmem:[#allocation13_spill] sm:$0xff] %v5734_v1 }
 0x1dd   :  { %v5746_v40 = vpop.f32.mrf.mxu3 }
 0x1de   :  { %v5749_v41 = vpop.f32.mrf.mxu2 }
 0x1df   :  { %v5756_v43 = vpop.f32.mrf.mxu1 }
 0x1e0   :  { %6941 = vst [vmem:[#allocation14_spill] sm:$0xff] %v5756_v43  ;;  %v5765_v38 = vpop.f32.mrf.mxu0  ;;  %v830_v43 = vand.u32 31, %v5210_v60 }
 0x1e1   :  { %6942 = vst [vmem:[#allocation15_spill] sm:$0xff] %v5765_v38 }
 0x1e2   :  { %3789 = vmatmul.msk.bf16.gmra.mxu3 %vm998_vm10, %v5091_v47  ;;  %3819 = vmatmul.msk.bf16.gmra.mxu1 %vm1407_vm12, %v5715_v37  ;;  %vm878_vm15 = vcmp.eq.s32.totalorder %v830_v43, %v4861_v17  ;;  %vm894_vm0 = vcmp.eq.s32.totalorder %v830_v43, %v4864_v18 }
 0x1e3   :  { %3827 = vmatmul.msk.bf16.gmra.mxu2 %vm1407_vm12, %v5761_v13  ;;  %3840 = vmatmul.msk.bf16.gmra.mxu0 %vm1407_vm12, %v5715_v37  ;;  %vm3870_vm9 = vmpackc.low %vm894_vm0, %vm878_vm15 }
 0x1e4   :  { %3871 = vmatpush.bf16.msk.msra.mxu1 %vm3870_vm9, %v6948_v36  ;;  %vm3893_vm0 = vmpackc.low %vm865_vm14, %vm849_vm13 }
 0x1e5   :  { %v5778_v4 = vpop.f32.mrf.mxu3 }
 0x1e6   :  { %v5780_v11 = vpop.f32.mrf.mxu2 }
 0x1e7   :  { %v5782_v56 = vpop.f32.mrf.mxu1 }
 0x1e8   :  { %v5784_v35 = vpop.f32.mrf.mxu0 }
 0x1e9   :  { %6943 = vst [vmem:[#allocation16_spill] sm:$0xff] %v5784_v35 }
 0x1ed   :  { %v5786_v24 = vpop.f32.mrf.mxu3 }
 0x1ee   :  { %v5788_v34 = vpop.f32.mrf.mxu2 }
 0x1ef   :  { %v5790_v38 = vpop.f32.mrf.mxu1 }
 0x1f0   :  { %6944 = vst [vmem:[#allocation17_spill] sm:$0xff] %v5790_v38  ;;  %v5792_v50 = vpop.f32.mrf.mxu0 }
 0x1f1   :  { %6945 = vst [vmem:[#allocation18_spill] sm:$0xff] %v5792_v50  ;;  %v831_v50 = vand.u32 31, %v5145_v53 }
 0x1f2   :  { %3790 = vmatmul.msk.bf16.gmra.mxu3 %vm998_vm10, %v5147_v54  ;;  %3820 = vmatmul.msk.bf16.gmra.mxu1 %vm1407_vm12, %v5761_v13 }
 0x1f3   :  { %3841 = vmatmul.msk.bf16.gmra.mxu0 %vm1407_vm12, %v5761_v13  ;;  %3853 = vmatmul.msk.bf16.vlgmr.msrb.gmra.mxu2 %vm1407_vm12, %v5680_v28  ;;  %vm879_vm3 = vcmp.eq.s32.totalorder %v831_v50, %v4861_v17  ;;  %vm895_vm4 = vcmp.eq.s32.totalorder %v831_v50, %v4864_v18  ;;  %vm847_vm8 = vcmp.eq.s32.totalorder %v831_v50, %v4794_v44 }
 0x1f4   :  { %vm3877_vm7 = vmpackc.low %vm895_vm4, %vm879_vm3  ;;  %vm863_vm6 = vcmp.eq.s32.totalorder %v831_v50, %v4908_v27  ;;  %vm844_vm4 = vcmp.eq.s32.totalorder %v828_v22, %v4794_v44 }
 0x1f5   :  { %v5802_v62 = vpop.f32.mrf.mxu3  ;;  %3878 = vmatpush.bf16.msk.msra.mxu2 %vm3877_vm7, %v6948_v36  ;;  %vm3879_vm11 = vmpackc.low %vm863_vm6, %vm847_vm8  ;;  %vm860_vm7 = vcmp.eq.s32.totalorder %v828_v22, %v4908_v27  ;;  %vm846_vm8 = vcmp.eq.s32.totalorder %v830_v43, %v4794_v44  ;;  %vm862_vm6 = vcmp.eq.s32.totalorder %v830_v43, %v4908_v27 }
 0x1f6   :  { %v5804_v35 = vpop.f32.mrf.mxu2  ;;  %vm3891_vm3 = vmpackc.low %vm897_vm2, %vm881_vm1 }
 0x1f7   :  { %v5806_v1 = vpop.f32.mrf.mxu1  ;;  %3892 = vmatpush.bf16.msk.msrb.mxu0 %vm3891_vm3, %v6948_v36  ;;  %vm3872_vm15 = vmpackc.low %vm862_vm6, %vm846_vm8 }
 0x1f8   :  { %6946 = vst [vmem:[#allocation19_spill] sm:$0xff] %v5806_v1  ;;  %v5808_v30 = vpop.f32.mrf.mxu0  ;;  %3873 = vmatpush.bf16.msk.msra.mxu1 %vm3872_vm15, %v6948_v36 }
 0x1f9   :  { %6947 = vst [vmem:[#allocation20_spill] sm:$0xff] %v5808_v30  ;;  %3880 = vmatpush.bf16.msk.msra.mxu2 %vm3879_vm11, %v6948_v36  ;;  %vm3858_vm11 = vmpackc.low %vm860_vm7, %vm844_vm4 }
 0x1fa   :  { %3859 = vmatpush.bf16.msk.msra.mxu3 %vm3858_vm11, %v6948_v36 }
 0x1fb   :  { %3894 = vmatpush.bf16.msk.msrb.mxu0 %vm3893_vm0, %v6948_v36 }
 0x1fd   :  { %v5814_v38 = vpop.f32.mrf.mxu3 }
 0x1fe   :  { %v5816_v59 = vpop.f32.mrf.mxu2 }
 0x1ff   :  { %v5820_v1 = vpop.f32.mrf.mxu1 }
 0x200   :  { %6949 = vst [vmem:[#allocation21_spill] sm:$0xff] %v5820_v1  ;;  %v5822_v30 = vpop.f32.mrf.mxu0 }
 0x201   :  { %6950 = vst [vmem:[#allocation22_spill] sm:$0xff] %v5822_v30 }
 0x202   :  { %3832 = vmatmul.msk.bf16.vlgmr.msrb.gmra.mxu3 %vm1407_vm12, %v5680_v28  ;;  %3846 = vmatmul.msk.bf16.vlgmr.msrb.gmra.mxu1 %vm1407_vm12, %v5680_v28 }
 0x203   :  { %3854 = vmatmul.msk.bf16.gmra.mxu2 %vm1407_vm12, %v5715_v37  ;;  %3867 = vmatmul.msk.bf16.vlgmr.msra.gmra.mxu0 %vm1407_vm12, %v5680_v28 }
 0x205   :  { %v5833_v53 = vpop.f32.mrf.mxu3 }
 0x206   :  { %6951 = vst [vmem:[#allocation23_spill] sm:$0xff] %v5833_v53  ;;  %v5835_v50 = vpop.f32.mrf.mxu2 }
 0x207   :  { %6952 = vst [vmem:[#allocation24_spill] sm:$0xff] %v5835_v50  ;;  %v5837_v1 = vpop.f32.mrf.mxu1 }
 0x208   :  { %6953 = vst [vmem:[#allocation25_spill] sm:$0xff] %v5837_v1  ;;  %v5839_v30 = vpop.f32.mrf.mxu0 }
 0x209   :  { %6954 = vst [vmem:[#allocation26_spill] sm:$0xff] %v5839_v30 }
 0x20d   :  { %v5851_v58 = vpop.f32.mrf.mxu3 }
 0x20e   :  { %6955 = vst [vmem:[#allocation27_spill] sm:$0xff] %v5851_v58  ;;  %v5854_v60 = vpop.f32.mrf.mxu2 }
 0x20f   :  { %6956 = vst [vmem:[#allocation28_spill] sm:$0xff] %v5854_v60  ;;  %v5861_v63 = vpop.f32.mrf.mxu1 }
 0x210   :  { %6957 = vst [vmem:[#allocation29_spill] sm:$0xff] %v5861_v63  ;;  %v5865_v30 = vpop.f32.mrf.mxu0 }
 0x211   :  { %6958 = vst [vmem:[#allocation30_spill] sm:$0xff] %v5865_v30 }
 0x212   :  { %3833 = vmatmul.msk.bf16.gmra.mxu3 %vm1407_vm12, %v5715_v37  ;;  %3847 = vmatmul.msk.bf16.gmra.mxu1 %vm1407_vm12, %v5715_v37 }
 0x213   :  { %3855 = vmatmul.msk.bf16.gmra.mxu2 %vm1407_vm12, %v5761_v13  ;;  %3868 = vmatmul.msk.bf16.gmra.mxu0 %vm1407_vm12, %v5715_v37 }
 0x215   :  { %v5878_v52 = vpop.f32.mrf.mxu3 }
 0x216   :  { %6959 = vst [vmem:[#allocation31_spill] sm:$0xff] %v5878_v52  ;;  %v5880_v22 = vpop.f32.mrf.mxu2  ;;  %v4498_v52 = vld [vmem:[%s6898_s6] sm:$0xff] }
 0x217   :  { %6960 = vst [vmem:[#allocation32_spill] sm:$0xff] %v5880_v22  ;;  %v5882_v43 = vpop.f32.mrf.mxu1 }
 0x218   :  { %6961 = vst [vmem:[#allocation33_spill] sm:$0xff] %v5882_v43  ;;  %v5884_v30 = vpop.f32.mrf.mxu0 }
 0x219   :  { %6962 = vst [vmem:[#allocation34_spill] sm:$0xff] %v5884_v30 }
 0x21d   :  { %v5886_v63 = vpop.f32.mrf.mxu3 }
 0x21e   :  { %6963 = vst [vmem:[#allocation35_spill] sm:$0xff] %v5886_v63  ;;  %v5888_v1 = vpop.f32.mrf.mxu2 }
 0x21f   :  { %6964 = vst [vmem:[#allocation36_spill] sm:$0xff] %v5888_v1  ;;  %v5890_v60 = vpop.f32.mrf.mxu1 }
 0x220   :  { %6965 = vst [vmem:[#allocation37_spill] sm:$0xff] %v5890_v60  ;;  %v5892_v50 = vpop.f32.mrf.mxu0 }
 0x221   :  { %6966 = vst [vmem:[#allocation38_spill] sm:$0xff] %v5892_v50  ;;  %v835_v50 = vand.u32 31, %v5344_v0 }
 0x222   :  { %3834 = vmatmul.msk.bf16.gmra.mxu3 %vm1407_vm12, %v5761_v13  ;;  %3848 = vmatmul.msk.bf16.gmra.mxu1 %vm1407_vm12, %v5761_v13 }
 0x223   :  { %3869 = vmatmul.msk.bf16.gmra.mxu0 %vm1407_vm12, %v5761_v13  ;;  %3881 = vmatmul.msk.bf16.vlgmr.msra.gmra.mxu2 %vm1407_vm12, %v5680_v28  ;;  %vm883_vm5 = vcmp.eq.s32.totalorder %v835_v50, %v4861_v17  ;;  %vm899_vm1 = vcmp.eq.s32.totalorder %v835_v50, %v4864_v18  ;;  %vm851_vm9 = vcmp.eq.s32.totalorder %v835_v50, %v4794_v44 }
 0x224   :  { %vm3905_vm2 = vmpackc.low %vm899_vm1, %vm883_vm5  ;;  %vm867_vm3 = vcmp.eq.s32.totalorder %v835_v50, %v4908_v27 }
 0x225   :  { %v5902_v30 = vpop.f32.mrf.mxu3  ;;  %3906 = vmatpush.bf16.msk.msrb.mxu2 %vm3905_vm2, %v6948_v36  ;;  %vm3907_vm4 = vmpackc.low %vm867_vm3, %vm851_vm9 }
 0x226   :  { %6967 = vst [vmem:[#allocation39_spill] sm:$0xff] %v5902_v30  ;;  %v5904_v43 = vpop.f32.mrf.mxu2 }
 0x227   :  { %6968 = vst [vmem:[#allocation40_spill] sm:$0xff] %v5904_v43  ;;  %v5906_v1 = vpop.f32.mrf.mxu1  ;;  %v834_v43 = vand.u32 31, %v5407_v3 }
 0x228   :  { %6969 = vst [vmem:[#allocation41_spill] sm:$0xff] %v5906_v1  ;;  %v5908_v60 = vpop.f32.mrf.mxu0 }
 0x229   :  { %6970 = vst [vmem:[#allocation42_spill] sm:$0xff] %v5908_v60  ;;  %3908 = vmatpush.bf16.msk.msrb.mxu2 %vm3907_vm4, %v6948_v36  ;;  %vm882_vm6 = vcmp.eq.s32.totalorder %v834_v43, %v4861_v17  ;;  %vm898_vm11 = vcmp.eq.s32.totalorder %v834_v43, %v4864_v18  ;;  %vm850_vm9 = vcmp.eq.s32.totalorder %v834_v43, %v4794_v44 }
 0x22a   :  { %vm3898_vm0 = vmpackc.low %vm898_vm11, %vm882_vm6  ;;  %vm866_vm3 = vcmp.eq.s32.totalorder %v834_v43, %v4908_v27 }
 0x22b   :  { %3899 = vmatpush.bf16.msk.msrb.mxu1 %vm3898_vm0, %v6948_v36  ;;  %vm3900_vm6 = vmpackc.low %vm866_vm3, %vm850_vm9  ;;  %vm3477_vm9 = vcmask 392192  }
 0x22d   :  { %v5914_v22 = vpop.f32.mrf.mxu3 }
 0x22e   :  { %6971 = vst [vmem:[#allocation43_spill] sm:$0xff] %v5914_v22  ;;  %v5916_v63 = vpop.f32.mrf.mxu2  ;;  %v837_v22 = vand.u32 31, %v5414_v5 }
 0x22f   :  { %6972 = vst [vmem:[#allocation44_spill] sm:$0xff] %v5916_v63  ;;  %v5920_v1 = vpop.f32.mrf.mxu1  ;;  %v832_v63 = vand.u32 31, %v5404_v2  ;;  %3901 = vmatpush.bf16.msk.msrb.mxu1 %vm3900_vm6, %v6948_v36 }
 0x230   :  { %6973 = vst [vmem:[#allocation45_spill] sm:$0xff] %v5920_v1  ;;  %v5922_v60 = vpop.f32.mrf.mxu0  ;;  %vm885_vm14 = vcmp.eq.s32.totalorder %v837_v22, %v4861_v17  ;;  %vm901_vm15 = vcmp.eq.s32.totalorder %v837_v22, %v4864_v18 }
 0x231   :  { %6974 = vst [vmem:[#allocation46_spill] sm:$0xff] %v5922_v60  ;;  %vm880_vm7 = vcmp.eq.s32.totalorder %v832_v63, %v4861_v17  ;;  %vm896_vm8 = vcmp.eq.s32.totalorder %v832_v63, %v4864_v18  ;;  %vm3919_vm5 = vmpackc.low %vm901_vm15, %vm885_vm14  ;;  %vm848_vm1 = vcmp.eq.s32.totalorder %v832_v63, %v4794_v44  ;;  %vm864_vm2 = vcmp.eq.s32.totalorder %v832_v63, %v4908_v27  ;;  %v4505_v63 = vld [vmem:[%s6898_s6 + $0x38] sm:$0xff] }
 0x232   :  { %3860 = vmatmul.msk.bf16.vlgmr.msra.gmra.mxu3 %vm1407_vm12, %v5680_v28  ;;  %3874 = vmatmul.msk.bf16.vlgmr.msra.gmra.mxu1 %vm1407_vm12, %v5680_v28  ;;  %vm3884_vm13 = vmpackc.low %vm896_vm8, %vm880_vm7  ;;  %vm853_vm7 = vcmp.eq.s32.totalorder %v837_v22, %v4794_v44  ;;  %vm869_vm8 = vcmp.eq.s32.totalorder %v837_v22, %v4908_v27 }
 0x233   :  { %3882 = vmatmul.msk.bf16.gmra.mxu2 %vm1407_vm12, %v5715_v37  ;;  %3895 = vmatmul.msk.bf16.vlgmr.msrb.gmra.mxu0 %vm1407_vm12, %v5680_v28  ;;  %vm3886_vm4 = vmpackc.low %vm864_vm2, %vm848_vm1 }
 0x234   :  { %3885 = vmatpush.bf16.msk.msrb.mxu3 %vm3884_vm13, %v6948_v36  ;;  %3920 = vmatpush.bf16.msk.msra.mxu0 %vm3919_vm5, %v6948_v36  ;;  %vm3921_vm11 = vmpackc.low %vm869_vm8, %vm853_vm7 }
 0x235   :  { %v5933_v0 = vpop.f32.mrf.mxu3  ;;  %3025 = vmatpush.bf16.msra.mxu2 %v4505_v63 }
 0x236   :  { %6975 = vst [vmem:[#allocation47_spill] sm:$0xff] %v5933_v0  ;;  %v5935_v50 = vpop.f32.mrf.mxu2 }
 0x237   :  { %6976 = vst [vmem:[#allocation48_spill] sm:$0xff] %v5935_v50  ;;  %v5937_v1 = vpop.f32.mrf.mxu1 }
 0x238   :  { %6977 = vst [vmem:[#allocation49_spill] sm:$0xff] %v5937_v1  ;;  %v5939_v60 = vpop.f32.mrf.mxu0  ;;  %3887 = vmatpush.bf16.msk.msrb.mxu3 %vm3886_vm4, %v6948_v36  ;;  %3922 = vmatpush.bf16.msk.msra.mxu0 %vm3921_vm11, %v6948_v36 }
 0x239   :  { %6978 = vst [vmem:[#allocation50_spill] sm:$0xff] %v5939_v60 }
 0x23d   :  { %v5951_v2 = vpop.f32.mrf.mxu3 }
 0x23e   :  { %6979 = vst [vmem:[#allocation51_spill] sm:$0xff] %v5951_v2  ;;  %v5954_v3 = vpop.f32.mrf.mxu2 }
 0x23f   :  { %6980 = vst [vmem:[#allocation52_spill] sm:$0xff] %v5954_v3  ;;  %v5961_v5 = vpop.f32.mrf.mxu1  ;;  %v4503_v3 = vld [vmem:[%s6898_s6 + $0x28] sm:$0xff] }
 0x240   :  { %6981 = vst [vmem:[#allocation53_spill] sm:$0xff] %v5961_v5  ;;  %v5965_v60 = vpop.f32.mrf.mxu0 }
 0x241   :  { %6982 = vst [vmem:[#allocation54_spill] sm:$0xff] %v5965_v60  ;;  %v4504_v60 = vld [vmem:[%s6898_s6 + $0x30] sm:$0xff] }
 0x242   :  { %3861 = vmatmul.msk.bf16.gmra.mxu3 %vm1407_vm12, %v5715_v37  ;;  %3875 = vmatmul.msk.bf16.gmra.mxu1 %vm1407_vm12, %v5715_v37 }
 0x243   :  { %3883 = vmatmul.msk.bf16.gmra.mxu2 %vm1407_vm12, %v5761_v13  ;;  %3896 = vmatmul.msk.bf16.gmra.mxu0 %vm1407_vm12, %v5715_v37 }
 0x244   :  { %3026 = vmatpush.bf16.msra.mxu2 %v4504_v60 }
 0x245   :  { %v5981_v22 = vpop.f32.mrf.mxu3 }
 0x246   :  { %6983 = vst [vmem:[#allocation55_spill] sm:$0xff] %v5981_v22  ;;  %v1450_v43 = vpop.f32.mrf.mxu2  ;;  %v4502_v22 = vld [vmem:[%s6898_s6 + $0x20] sm:$0xff] }
 0x247   :  { %v5986_v5 = vpop.f32.mrf.mxu1  ;;  %v5999_v2 = vmul.f32 %v1450_v43, %v5562_v8  ;;  %v4501_v8 = vld [vmem:[%s6898_s6 + $0x18] sm:$0xff] }
 0x248   :  { %6984 = vst [vmem:[#allocation56_spill] sm:$0xff] %v5986_v5  ;;  %v5988_v1 = vpop.f32.mrf.mxu0  ;;  %3027 = vmatpush.bf16.msra.mxu2 %v4503_v3  ;;  %v4520_v3 = vld [vmem:[%s6898_s6 + $0xb0] sm:$0xff] }
 0x249   :  { %6985 = vst [vmem:[#allocation57_spill] sm:$0xff] %v5988_v1 }
 0x24c   :  { %3028 = vmatpush.bf16.msra.mxu2 %v4502_v22 }
 0x24d   :  { %v5993_v50 = vpop.f32.mrf.mxu3 }
 0x24e   :  { %6986 = vst [vmem:[#allocation58_spill] sm:$0xff] %v5993_v50  ;;  %v1452_v63 = vpop.f32.mrf.mxu2 }
 0x24f   :  { %v6002_v5 = vmul.f32 %v1452_v63, %v5573_v12  ;;  %v6004_v1 = vpop.f32.mrf.mxu1  ;;  %v4521_v12 = vld [vmem:[%s6898_s6 + $0xb8] sm:$0xff]  ;;  %v4500_v63 = vld [vmem:[%s6898_s6 + $0x10] sm:$0xff] }
 0x250   :  { %v6006_v60 = vpop.f32.mrf.mxu0  ;;  %3029 = vmatpush.bf16.msra.mxu2 %v4501_v8  ;;  %3073 = vmatpush.bf16.msrb.mxu0 %v4521_v12  ;;  %v4499_v8 = vld [vmem:[%s6898_s6 + $0x8] sm:$0xff] }
 0x251   :  { %v4519_v12 = vld [vmem:[%s6898_s6 + $0xa8] sm:$0xff] }
 0x252   :  { %3862 = vmatmul.msk.bf16.gmra.mxu3 %vm1407_vm12, %v5761_v13  ;;  %3876 = vmatmul.msk.bf16.gmra.mxu1 %vm1407_vm12, %v5761_v13 }
 0x253   :  { %3897 = vmatmul.msk.bf16.gmra.mxu0 %vm1407_vm12, %v5761_v13  ;;  %3909 = vmatmul.msk.bf16.vlgmr.msrb.gmra.mxu2 %vm1407_vm12, %v5680_v28 }
 0x254   :  { %3030 = vmatpush.bf16.msra.mxu2 %v4500_v63  ;;  %3074 = vmatpush.bf16.msrb.mxu0 %v4520_v3  ;;  %v4518_v3 = vld [vmem:[%s6898_s6 + $0xa0] sm:$0xff] }
 0x255   :  { %v6024_v22 = vpop.f32.mrf.mxu3 }
 0x256   :  { %6987 = vst [vmem:[#allocation59_spill] sm:$0xff] %v6024_v22  ;;  %v1455_v43 = vpop.f32.mrf.mxu2 }
 0x257   :  { %v6032_v50 = vpop.f32.mrf.mxu1  ;;  %v6051_v63 = vmul.f32 %v1455_v43, %v5601_v48  ;;  %v4629_v48 = vld [vmem:[%s6899_s7 + $0x18] sm:$0xff]  ;;  %v4628_v43 = vld [vmem:[%s6899_s7 + $0x10] sm:$0xff] }
 0x258   :  { %v6034_v0 = vpop.f32.mrf.mxu0  ;;  %3031 = vmatpush.bf16.msra.mxu2 %v4499_v8  ;;  %3075 = vmatpush.bf16.msrb.mxu0 %v4519_v12 }
 0x259   :  { %6989 = vst [vmem:[#allocation61_spill] sm:$0xff] %v6051_v63  ;;  %2237 = vmatpush.bf16.msra.mxu1 %v4629_v48  ;;  %v836_v63 = vand.u32 31, %v5580_v21  ;;  %v4627_v48 = vld [vmem:[%s6899_s7 + $0x8] sm:$0xff] }
 0x25b   :  { %vm884_vm13 = vcmp.eq.s32.totalorder %v836_v63, %v4861_v17  ;;  %vm900_vm14 = vcmp.eq.s32.totalorder %v836_v63, %v4864_v18  ;;  %vm852_vm0 = vcmp.eq.s32.totalorder %v836_v63, %v4794_v44  ;;  %vm868_vm5 = vcmp.eq.s32.totalorder %v836_v63, %v4908_v27  ;;  %v4626_v18 = vld [vmem:[%s6899_s7] sm:$0xff] }
 0x25c   :  { %3032 = vmatpush.bf16.msra.mxu2 %v4498_v52  ;;  %3076 = vmatpush.bf16.msrb.mxu0 %v4518_v3  ;;  %v4516_v3 = vld [vmem:[%s6898_s6 + $0x90] sm:$0xff]  ;;  %vm3912_vm15 = vmpackc.low %vm900_vm14, %vm884_vm13  ;;  %v4534_v44 = vld [vmem:[%s6898_s6 + $0x120] sm:$0xff] }
 0x25d   :  { %v6042_v22 = vpop.f32.mrf.mxu3  ;;  %2238 = vmatpush.bf16.msra.mxu1 %v4628_v43  ;;  %3913 = vmatpush.bf16.msk.msra.mxu3 %vm3912_vm15, %v6948_v36  ;;  %v4514_v43 = vld [vmem:[%s6898_s6 + $0x80] sm:$0xff]  ;;  %vm3914_vm1 = vmpackc.low %vm868_vm5, %vm852_vm0 }
 0x25e   :  { %6988 = vst [vmem:[#allocation60_spill] sm:$0xff] %v6042_v22  ;;  %v1457_v30 = vpop.f32.mrf.mxu2 }
 0x25f   :  { %v6054_v58 = vmul.f32 %v1457_v30, %v5631_v14  ;;  %v6056_v53 = vpop.f32.mrf.mxu1  ;;  %v4517_v14 = vld [vmem:[%s6898_s6 + $0x98] sm:$0xff] }
 0x260   :  { %v6058_v8 = vpop.f32.mrf.mxu0  ;;  %3077 = vmatpush.bf16.msrb.mxu0 %v4517_v14  ;;  %v4515_v14 = vld [vmem:[%s6898_s6 + $0x88] sm:$0xff] }
 0x261   :  { %2239 = vmatpush.bf16.msra.mxu1 %v4627_v48  ;;  %3915 = vmatpush.bf16.msk.msra.mxu3 %vm3914_vm1, %v6948_v36 }
 0x262   :  { %3888 = vmatmul.msk.bf16.vlgmr.msrb.gmra.mxu3 %vm1407_vm12, %v5680_v28  ;;  %3902 = vmatmul.msk.bf16.vlgmr.msrb.gmra.mxu1 %vm1407_vm12, %v5680_v28 }
 0x263   :  { %3910 = vmatmul.msk.bf16.gmra.mxu2 %vm1407_vm12, %v5715_v37  ;;  %3923 = vmatmul.msk.bf16.vlgmr.msra.gmra.mxu0 %vm1407_vm12, %v5680_v28 }
 0x264   :  { %3078 = vmatpush.bf16.msrb.mxu0 %v4516_v3 }
 0x265   :  { %v6076_v30 = vpop.f32.mrf.mxu3  ;;  %2240 = vmatpush.bf16.msra.mxu1 %v4626_v18 }
 0x266   :  { %6990 = vst [vmem:[#allocation62_spill] sm:$0xff] %v6076_v30  ;;  %v1460_v52 = vpop.f32.mrf.mxu2 }
 0x267   :  { %v6084_v12 = vpop.f32.mrf.mxu1  ;;  %v6109_v3 = vmul.f32 %v1460_v52, %v5663_v15  ;;  %v4537_v15 = vld [vmem:[%s6898_s6 + $0x138] sm:$0xff]  ;;  %v4536_v52 = vld [vmem:[%s6898_s6 + $0x130] sm:$0xff] }
 0x268   :  { %v6086_v22 = vpop.f32.mrf.mxu0  ;;  %3079 = vmatpush.bf16.msrb.mxu0 %v4515_v14  ;;  %3121 = vmatpush.bf16.msrb.mxu2 %v4537_v15  ;;  %v1817_v15 = vmul.f32 %v6032_v50, %v5565_v9  ;;  %v4531_v50 = vld [vmem:[%s6898_s6 + $0x108] sm:$0xff] }
 0x269   :  { %6992 = vst [vmem:[#allocation64_spill] sm:$0xff] %v6109_v3 }
 0x26c   :  { %3080 = vmatpush.bf16.msrb.mxu0 %v4514_v43  ;;  %3122 = vmatpush.bf16.msrb.mxu2 %v4536_v52  ;;  %v4535_v43 = vld [vmem:[%s6898_s6 + $0x128] sm:$0xff] }
 0x26d   :  { %v6098_v30 = vpop.f32.mrf.mxu3 }
 0x26e   :  { %6991 = vst [vmem:[#allocation63_spill] sm:$0xff] %v6098_v30  ;;  %v1462_v21 = vpop.f32.mrf.mxu2 }
 0x26f   :  { %v6112_v48 = vmul.f32 %v1462_v21, %v5671_v23  ;;  %v6114_v14 = vpop.f32.mrf.mxu1 }
 0x270   :  { %v6116_v17 = vpop.f32.mrf.mxu0  ;;  %3123 = vmatpush.bf16.msrb.mxu2 %v4535_v43 }
 0x272   :  { %3889 = vmatmul.msk.bf16.gmra.mxu3 %vm1407_vm12, %v5715_v37  ;;  %3903 = vmatmul.msk.bf16.gmra.mxu1 %vm1407_vm12, %v5715_v37 }
 0x273   :  { %3911 = vmatmul.msk.bf16.gmra.mxu2 %vm1407_vm12, %v5761_v13  ;;  %3924 = vmatmul.msk.bf16.gmra.mxu0 %vm1407_vm12, %v5715_v37 }
 0x274   :  { %3124 = vmatpush.bf16.msrb.mxu2 %v4534_v44  ;;  %v4533_v44 = vld [vmem:[%s6898_s6 + $0x118] sm:$0xff] }
 0x275   :  { %v6132_v23 = vpop.f32.mrf.mxu3 }
 0x276   :  { %6993 = vst [vmem:[#allocation65_spill] sm:$0xff] %v6132_v23  ;;  %v1546_v36 = vpop.f32.mrf.mxu2  ;;  %v1801_v23 = vmul.f32 %v6004_v1, %v5540_v6  ;;  %v4529_v6 = vld [vmem:[%s6898_s6 + $0xf8] sm:$0xff] }
 0x277   :  { %v6137_v21 = vpop.f32.mrf.mxu1  ;;  %v6154_v52 = vmul.f32 %v1546_v36, %v5665_v16  ;;  %v4553_v16 = vld [vmem:[%s6898_s6 + $0x1b8] sm:$0xff]  ;;  %3097 = vmatpush.bf16.msrb.mxu1 %v4529_v6  ;;  %v4528_v36 = vld [vmem:[%s6898_s6 + $0xf0] sm:$0xff] }
 0x278   :  { %v6139_v18 = vpop.f32.mrf.mxu0  ;;  %v1897_v9 = vpack.c.bf16 %v1817_v15, %v1801_v23  ;;  %3125 = vmatpush.bf16.msrb.mxu2 %v4533_v44  ;;  %3169 = vmatpush.bf16.msra.mxu0 %v4553_v16  ;;  %v4512_v23 = vld [vmem:[%s6898_s6 + $0x70] sm:$0xff]  ;;  %v4511_v44 = vld [vmem:[%s6898_s6 + $0x68] sm:$0xff] }
 0x279   :  { %6995 = vst [vmem:[#allocation67_spill] sm:$0xff] %v6154_v52  ;;  %v4532_v15 = vld [vmem:[%s6898_s6 + $0x110] sm:$0xff]  ;;  %v4527_v16 = vld [vmem:[%s6898_s6 + $0xe8] sm:$0xff] }
 0x27b   :  { %3098 = vmatpush.bf16.msrb.mxu1 %v4528_v36 }
 0x27c   :  { %3126 = vmatpush.bf16.msrb.mxu2 %v4532_v15 }
 0x27d   :  { %v6146_v63 = vpop.f32.mrf.mxu3 }
 0x27e   :  { %6994 = vst [vmem:[#allocation66_spill] sm:$0xff] %v6146_v63  ;;  %v1548_v27 = vpop.f32.mrf.mxu2  ;;  %v4551_v63 = vld [vmem:[%s6898_s6 + $0x1a8] sm:$0xff] }
 0x27f   :  { %v6157_v30 = vmul.f32 %v1548_v27, %v5673_v25  ;;  %v6159_v43 = vpop.f32.mrf.mxu1  ;;  %v4513_v27 = vld [vmem:[%s6898_s6 + $0x78] sm:$0xff]  ;;  %3099 = vmatpush.bf16.msrb.mxu1 %v4527_v16 }
 0x280   :  { %v6161_v3 = vpop.f32.mrf.mxu0  ;;  %3049 = vmatpush.bf16.msrb.mxu3 %v4513_v27  ;;  %v4552_v27 = vld [vmem:[%s6898_s6 + $0x1b0] sm:$0xff]  ;;  %3127 = vmatpush.bf16.msrb.mxu2 %v4531_v50  ;;  %v4550_v50 = vld [vmem:[%s6898_s6 + $0x1a0] sm:$0xff] }
 0x281   :  { %6996 = vst [vmem:[#allocation68_spill] sm:$0xff] %v6157_v30  ;;  %3170 = vmatpush.bf16.msra.mxu0 %v4552_v27  ;;  %v4510_v30 = vld [vmem:[%s6898_s6 + $0x60] sm:$0xff] }
 0x282   :  { %3890 = vmatmul.msk.bf16.gmra.mxu3 %vm1407_vm12, %v5761_v13  ;;  %3904 = vmatmul.msk.bf16.gmra.mxu1 %vm1407_vm12, %v5761_v13 }
 0x283   :  { %3925 = vmatmul.msk.bf16.gmra.mxu0 %vm1407_vm12, %v5761_v13  ;;  %3033 = vmatmul.bf16.vlgmr.msra.gmra.mxu2 %v1897_v9 }
 0x284   :  { %3050 = vmatpush.bf16.msrb.mxu3 %v4512_v23  ;;  %v1849_v23 = vmul.f32 %v6084_v12, %v5612_v49  ;;  %v4530_v49 = vld [vmem:[%s6898_s6 + $0x100] sm:$0xff]  ;;  %v1833_v12 = vmul.f32 %v6056_v53, %v5577_v20  ;;  %v4549_v53 = vld [vmem:[%s6898_s6 + $0x198] sm:$0xff] }
 0x285   :  { %v1474_v25 = vpop.f32.mrf.mxu3  ;;  %3171 = vmatpush.bf16.msra.mxu0 %v4551_v63  ;;  %3128 = vmatpush.bf16.msrb.mxu2 %v4530_v49  ;;  %v4547_v49 = vld [vmem:[%s6898_s6 + $0x188] sm:$0xff] }
 0x286   :  { %v1551_v1 = vpop.f32.mrf.mxu2  ;;  %v1803_v15 = vmul.f32 %v1474_v25, %v5692_v31 }
 0x287   :  { %v6192_v9 = vpop.f32.mrf.mxu1  ;;  %v6227_v31 = vmul.f32 %v1551_v1, %v5694_v32  ;;  %v4509_v32 = vld [vmem:[%s6898_s6 + $0x58] sm:$0xff]  ;;  %v4548_v1 = vld [vmem:[%s6898_s6 + $0x190] sm:$0xff] }
 0x288   :  { %v6197_v6 = vpop.f32.mrf.mxu0  ;;  %3051 = vmatpush.bf16.msrb.mxu3 %v4511_v44  ;;  %v4526_v44 = vld [vmem:[%s6898_s6 + $0xe0] sm:$0xff] }
 0x289   :  { %3100 = vmatpush.bf16.msrb.mxu1 %v4526_v44  ;;  %3172 = vmatpush.bf16.msra.mxu0 %v4550_v50  ;;  %v4523_v44 = vld [vmem:[%s6898_s6 + $0xc8] sm:$0xff] }
 0x28c   :  { %3052 = vmatpush.bf16.msrb.mxu3 %v4510_v30 }
 0x28d   :  { %v1476_v36 = vpop.f32.mrf.mxu3  ;;  %3173 = vmatpush.bf16.msra.mxu0 %v4549_v53  ;;  %v4522_v53 = vld [vmem:[%s6898_s6 + $0xc0] sm:$0xff] }
 0x28e   :  { %v1819_v27 = vmul.f32 %v1476_v36, %v5704_v39  ;;  %v1553_v52 = vpop.f32.mrf.mxu2  ;;  %v1913_v36 = vpack.c.bf16 %v1849_v23, %v1833_v12  ;;  %v1881_v12 = vmul.f32 %v6137_v21, %v5667_v19  ;;  %v1865_v19 = vmul.f32 %v6114_v14, %v5646_v29  ;;  %v4569_v29 = vld [vmem:[%s6898_s6 + $0x238] sm:$0xff]  ;;  %v4568_v14 = vld [vmem:[%s6898_s6 + $0x230] sm:$0xff] }
 0x28f   :  { %v6230_v39 = vmul.f32 %v1553_v52, %v5706_v45  ;;  %v6232_v63 = vpop.f32.mrf.mxu1  ;;  %v4525_v45 = vld [vmem:[%s6898_s6 + $0xd8] sm:$0xff]  ;;  %v4524_v52 = vld [vmem:[%s6898_s6 + $0xd0] sm:$0xff]  ;;  %3217 = vmatpush.bf16.msra.mxu2 %v4569_v29 }
 0x290   :  { %v1899_v25 = vpack.c.bf16 %v1819_v27, %v1803_v15  ;;  %v6237_v16 = vpop.f32.mrf.mxu0  ;;  %3053 = vmatpush.bf16.msrb.mxu3 %v4509_v32  ;;  %3101 = vmatpush.bf16.msrb.mxu1 %v4525_v45  ;;  %v4507_v27 = vld [vmem:[%s6898_s6 + $0x48] sm:$0xff]  ;;  %v4506_v45 = vld [vmem:[%s6898_s6 + $0x40] sm:$0xff] }
 0x291   :  { %v1918_v20 = vpack.c.bf16 %v6230_v39, %v6227_v31  ;;  %3174 = vmatpush.bf16.msra.mxu0 %v4548_v1  ;;  %v1929_v1 = vpack.c.bf16 %v1881_v12, %v1865_v19  ;;  %v4544_v19 = vld [vmem:[%s6898_s6 + $0x170] sm:$0xff]  ;;  %v7038_v39 = vld [vmem:[#allocation55_spill] sm:$0xff] }
 0x292   :  { %3916 = vmatmul.msk.bf16.vlgmr.msra.gmra.mxu3 %vm1407_vm12, %v5680_v28  ;;  %3942 = vmatmul.msk.bf16.vlgmr.msra.gmra.mxu1 %vm998_vm10, %v5027_v42  ;;  %v4508_v42 = vld [vmem:[%s6898_s6 + $0x50] sm:$0xff] }
 0x293   :  { %3038 = vmatmul.bf16.gmra.mxu2 %v1913_v36  ;;  %3081 = vmatmul.bf16.vlgmr.msrb.gmra.mxu0 %v1899_v25 }
 0x294   :  { %3054 = vmatpush.bf16.msrb.mxu3 %v4508_v42  ;;  %3102 = vmatpush.bf16.msrb.mxu1 %v4524_v52  ;;  %v4546_v42 = vld [vmem:[%s6898_s6 + $0x180] sm:$0xff] }
 0x295   :  { %v1479_v28 = vpop.f32.mrf.mxu3  ;;  %3175 = vmatpush.bf16.msra.mxu0 %v4547_v49  ;;  %3218 = vmatpush.bf16.msra.mxu2 %v4568_v14  ;;  %v4543_v14 = vld [vmem:[%s6898_s6 + $0x168] sm:$0xff] }
 0x296   :  { %v1556_v30 = vpop.f32.mrf.mxu2  ;;  %v1835_v25 = vmul.f32 %v1479_v28, %v5728_v51 }
 0x297   :  { %v6263_v23 = vpop.f32.mrf.mxu1  ;;  %v6292_v51 = vmul.f32 %v1556_v30, %v5730_v57 }
 0x298   :  { %v6265_v15 = vpop.f32.mrf.mxu0  ;;  %3055 = vmatpush.bf16.msrb.mxu3 %v4507_v27  ;;  %3103 = vmatpush.bf16.msrb.mxu1 %v4523_v44 }
 0x299   :  { %3176 = vmatpush.bf16.msra.mxu0 %v4546_v42 }
 0x29c   :  { %3056 = vmatpush.bf16.msrb.mxu3 %v4506_v45  ;;  %3104 = vmatpush.bf16.msrb.mxu1 %v4522_v53 }
 0x29d   :  { %v1481_v50 = vpop.f32.mrf.mxu3 }
 0x29e   :  { %v1851_v36 = vmul.f32 %v1481_v50, %v5746_v40  ;;  %v1558_v32 = vpop.f32.mrf.mxu2 }
 0x29f   :  { %v6295_v40 = vmul.f32 %v1558_v32, %v5749_v41  ;;  %v6297_v21 = vpop.f32.mrf.mxu1  ;;  %v1805_v32 = vmul.f32 %v6159_v43, %v5675_v26  ;;  %v4561_v26 = vld [vmem:[%s6898_s6 + $0x1f8] sm:$0xff] }
 0x2a0   :  { %v1915_v28 = vpack.c.bf16 %v1851_v36, %v1835_v25  ;;  %v6299_v52 = vpop.f32.mrf.mxu0  ;;  %v4566_v36 = vld [vmem:[%s6898_s6 + $0x220] sm:$0xff]  ;;  %3193 = vmatpush.bf16.msra.mxu1 %v4561_v26 }
 0x2a1   :  { %v1934_v27 = vpack.c.bf16 %v6295_v40, %v6292_v51  ;;  %v4608_v40 = vld [vmem:[%s6898_s6 + $0x370] sm:$0xff] }
 0x2a2   :  { %3917 = vmatmul.msk.bf16.gmra.mxu3 %vm1407_vm12, %v5715_v37  ;;  %3943 = vmatmul.msk.bf16.gmra.mxu1 %vm998_vm10, %v5091_v47  ;;  %v4567_v47 = vld [vmem:[%s6898_s6 + $0x228] sm:$0xff]  ;;  %v1821_v37 = vmul.f32 %v6192_v9, %v5696_v33 }
 0x2a3   :  { %3043 = vmatmul.bf16.gmra.mxu2 %v1929_v1  ;;  %3086 = vmatmul.bf16.gmra.mxu0 %v1915_v28  ;;  %v4560_v28 = vld [vmem:[%s6898_s6 + $0x1f0] sm:$0xff] }
 0x2a4   :  { %3219 = vmatpush.bf16.msra.mxu2 %v4567_v47  ;;  %v4564_v1 = vld [vmem:[%s6898_s6 + $0x210] sm:$0xff]  ;;  %3194 = vmatpush.bf16.msra.mxu1 %v4560_v28  ;;  %v4559_v47 = vld [vmem:[%s6898_s6 + $0x1e8] sm:$0xff] }
 0x2a5   :  { %v1484_v57 = vpop.f32.mrf.mxu3  ;;  %v4580_v28 = vld [vmem:[%s6898_s6 + $0x290] sm:$0xff] }
 0x2a6   :  { %v1642_v41 = vpop.f32.mrf.mxu2  ;;  %v1867_v12 = vmul.f32 %v1484_v57, %v5778_v4  ;;  %v4584_v57 = vld [vmem:[%s6898_s6 + $0x2b0] sm:$0xff] }
 0x2a7   :  { %v6313_v30 = vpop.f32.mrf.mxu1  ;;  %v6330_v45 = vmul.f32 %v1642_v41, %v5780_v11  ;;  %v4565_v11 = vld [vmem:[%s6898_s6 + $0x218] sm:$0xff] }
 0x2a8   :  { %v6315_v44 = vpop.f32.mrf.mxu0  ;;  %3220 = vmatpush.bf16.msra.mxu2 %v4566_v36  ;;  %3195 = vmatpush.bf16.msra.mxu1 %v4559_v47  ;;  %v1804_v36 = vmul.f32 %v6006_v60, %v5542_v7  ;;  %v1837_v7 = vmul.f32 %v6232_v63, %v5710_v46  ;;  %v4541_v46 = vld [vmem:[%s6898_s6 + $0x158] sm:$0xff]  ;;  %v4555_v47 = vld [vmem:[%s6898_s6 + $0x1c8] sm:$0xff] }
 0x2a9   :  { %v4557_v63 = vld [vmem:[%s6898_s6 + $0x1d8] sm:$0xff] }
 0x2ac   :  { %3221 = vmatpush.bf16.msra.mxu2 %v4565_v11 }
 0x2ad   :  { %v1486_v49 = vpop.f32.mrf.mxu3 }
 0x2ae   :  { %v1883_v50 = vmul.f32 %v1486_v49, %v5786_v24  ;;  %v1644_v25 = vpop.f32.mrf.mxu2  ;;  %v1901_v24 = vpack.c.bf16 %v1821_v37, %v1805_v32  ;;  %v4563_v37 = vld [vmem:[%s6898_s6 + $0x208] sm:$0xff] }
 0x2af   :  { %v6333_v53 = vmul.f32 %v1644_v25, %v5788_v34  ;;  %v6335_v33 = vpop.f32.mrf.mxu1  ;;  %v4545_v34 = vld [vmem:[%s6898_s6 + $0x178] sm:$0xff]  ;;  %v4583_v49 = vld [vmem:[%s6898_s6 + $0x2a8] sm:$0xff] }
 0x2b0   :  { %v1931_v9 = vpack.c.bf16 %v1883_v50, %v1867_v12  ;;  %v6337_v4 = vpop.f32.mrf.mxu0  ;;  %3145 = vmatpush.bf16.msra.mxu3 %v4545_v34  ;;  %3222 = vmatpush.bf16.msra.mxu2 %v4564_v1  ;;  %v1820_v12 = vmul.f32 %v6034_v0, %v5567_v10  ;;  %v1853_v50 = vmul.f32 %v6263_v23, %v5732_v61  ;;  %v4542_v10 = vld [vmem:[%s6898_s6 + $0x160] sm:$0xff] }
 0x2b1   :  { %v1906_v42 = vpack.c.bf16 %v6333_v53, %v6330_v45  ;;  %v4558_v0 = vld [vmem:[%s6898_s6 + $0x1e0] sm:$0xff]  ;;  %v4604_v45 = vld [vmem:[%s6898_s6 + $0x350] sm:$0xff] }
 0x2b2   :  { %3918 = vmatmul.msk.bf16.gmra.mxu3 %vm1407_vm12, %v5761_v13  ;;  %3944 = vmatmul.msk.bf16.gmra.mxu1 %vm998_vm10, %v5147_v54  ;;  %v4585_v13 = vld [vmem:[%s6898_s6 + $0x2b8] sm:$0xff]  ;;  %v4562_v61 = vld [vmem:[%s6898_s6 + $0x200] sm:$0xff]  ;;  %v1900_v34 = vpack.c.bf16 %v1820_v12, %v1804_v36  ;;  %v1885_v12 = vmul.f32 %v6313_v30, %v5782_v56  ;;  %v7002_v30 = vld [vmem:[#allocation24_spill] sm:$0xff] }
 0x2b3   :  { %3091 = vmatmul.bf16.gmra.mxu0 %v1931_v9  ;;  %3129 = vmatmul.bf16.vlgmr.msrb.gmra.mxu2 %v1901_v24  ;;  %v4582_v23 = vld [vmem:[%s6898_s6 + $0x2a0] sm:$0xff]  ;;  %v4620_v53 = vld [vmem:[%s6898_s6 + $0x3d0] sm:$0xff] }
 0x2b4   :  { %3265 = vmatpush.bf16.msrb.mxu0 %v4585_v13  ;;  %3146 = vmatpush.bf16.msra.mxu3 %v4544_v19  ;;  %v1917_v13 = vpack.c.bf16 %v1853_v50, %v1837_v7  ;;  %v4556_v19 = vld [vmem:[%s6898_s6 + $0x1d0] sm:$0xff]  ;;  %v4578_v56 = vld [vmem:[%s6898_s6 + $0x280] sm:$0xff] }
 0x2b5   :  { %v1570_v54 = vpop.f32.mrf.mxu3  ;;  %3223 = vmatpush.bf16.msra.mxu2 %v4563_v37  ;;  %3196 = vmatpush.bf16.msra.mxu1 %v4558_v0  ;;  %v4579_v37 = vld [vmem:[%s6898_s6 + $0x288] sm:$0xff] }
 0x2b6   :  { %v1647_v43 = vpop.f32.mrf.mxu2  ;;  %v1807_v32 = vmul.f32 %v1570_v54, %v5802_v62  ;;  %v4581_v54 = vld [vmem:[%s6898_s6 + $0x298] sm:$0xff] }
 0x2b7   :  { %v6366_v29 = vpop.f32.mrf.mxu1  ;;  %v6405_v62 = vmul.f32 %v1647_v43, %v5804_v35 }
 0x2b8   :  { %v6371_v41 = vpop.f32.mrf.mxu0  ;;  %3266 = vmatpush.bf16.msrb.mxu0 %v4584_v57  ;;  %3147 = vmatpush.bf16.msra.mxu3 %v4543_v14  ;;  %v4539_v14 = vld [vmem:[%s6898_s6 + $0x148] sm:$0xff] }
 0x2b9   :  { %3224 = vmatpush.bf16.msra.mxu2 %v4562_v61  ;;  %3197 = vmatpush.bf16.msra.mxu1 %v4557_v63  ;;  %v4538_v61 = vld [vmem:[%s6898_s6 + $0x140] sm:$0xff] }
 0x2bc   :  { %3267 = vmatpush.bf16.msrb.mxu0 %v4583_v49  ;;  %3148 = vmatpush.bf16.msra.mxu3 %v4542_v10  ;;  %v1852_v49 = vmul.f32 %v6086_v22, %v5614_v55  ;;  %v4554_v55 = vld [vmem:[%s6898_s6 + $0x1c0] sm:$0xff] }
 0x2bd   :  { %v1572_v25 = vpop.f32.mrf.mxu3  ;;  %3198 = vmatpush.bf16.msra.mxu1 %v4556_v19  ;;  %v7001_v22 = vld [vmem:[#allocation14_spill] sm:$0xff] }
 0x2be   :  { %v1823_v9 = vmul.f32 %v1572_v25, %v5814_v38  ;;  %v1649_v24 = vpop.f32.mrf.mxu2  ;;  %v6998_v25 = vld [vmem:[#allocation7_spill] sm:$0xff] }
 0x2bf   :  { %v6408_v38 = vmul.f32 %v1649_v24, %v5816_v59  ;;  %v6410_v60 = vpop.f32.mrf.mxu1  ;;  %v6997_v59 = vpack.c.bf16 %v6002_v5, %v5999_v2  ;;  %v4540_v5 = vld [vmem:[%s6898_s6 + $0x150] sm:$0xff]  ;;  %v1836_v36 = vmul.f32 %v6058_v8, %v6998_v25  ;;  %v7000_v24 = vld [vmem:[#allocation27_spill] sm:$0xff]  ;;  %v1869_v8 = vmul.f32 %v6297_v21, %v7001_v22  ;;  %v7004_v21 = vld [vmem:[#allocation61_spill] sm:$0xff] }
 0x2c0   :  { %v1903_v26 = vpack.c.bf16 %v1823_v9, %v1807_v32  ;;  %v6415_v11 = vpop.f32.mrf.mxu0  ;;  %3268 = vmatpush.bf16.msrb.mxu0 %v4582_v23  ;;  %3149 = vmatpush.bf16.msra.mxu3 %v4541_v46  ;;  %v6999_v32 = vld [vmem:[#allocation23_spill] sm:$0xff]  ;;  %v7003_v23 = vld [vmem:[#allocation28_spill] sm:$0xff] }
 0x2c1   :  { %v1922_v35 = vpack.c.bf16 %v6408_v38, %v6405_v62  ;;  %3199 = vmatpush.bf16.msra.mxu1 %v4555_v47  ;;  %v1933_v63 = vpack.c.bf16 %v1885_v12, %v1869_v8  ;;  %v7007_v12 = vld [vmem:[#allocation19_spill] sm:$0xff]  ;;  %v7012_v22 = vld [vmem:[#allocation32_spill] sm:$0xff] }
 0x2c2   :  { %3057 = vmatmul.bf16.vlgmr.msrb.gmra.mxu3 %v6997_v59  ;;  %3105 = vmatmul.bf16.vlgmr.msrb.gmra.mxu1 %v1900_v34 }
 0x2c3   :  { %3134 = vmatmul.bf16.gmra.mxu2 %v1917_v13  ;;  %3177 = vmatmul.bf16.vlgmr.msra.gmra.mxu0 %v1903_v26  ;;  %v1916_v13 = vpack.c.bf16 %v1852_v49, %v1836_v36  ;;  %v7008_v36 = vld [vmem:[#allocation8_spill] sm:$0xff] }
 0x2c4   :  { %3269 = vmatpush.bf16.msrb.mxu0 %v4581_v54  ;;  %3150 = vmatpush.bf16.msra.mxu3 %v4540_v5 }
 0x2c5   :  { %v1575_v43 = vpop.f32.mrf.mxu3  ;;  %3200 = vmatpush.bf16.msra.mxu1 %v4554_v55  ;;  %v4598_v55 = vld [vmem:[%s6898_s6 + $0x320] sm:$0xff] }
 0x2c6   :  { %v1652_v2 = vpop.f32.mrf.mxu2  ;;  %v1839_v9 = vmul.f32 %v1575_v43, %v6999_v32  ;;  %v7005_v43 = vpack.c.bf16 %v6054_v58, %v7004_v21  ;;  %v4599_v58 = vld [vmem:[%s6898_s6 + $0x328] sm:$0xff]  ;;  %v1868_v32 = vmul.f32 %v6116_v17, %v7008_v36 }
 0x2c7   :  { %v6440_v1 = vpop.f32.mrf.mxu1  ;;  %v6473_v7 = vmul.f32 %v1652_v2, %v7002_v30  ;;  %v4601_v2 = vld [vmem:[%s6898_s6 + $0x338] sm:$0xff] }
 0x2c8   :  { %v6442_v57 = vpop.f32.mrf.mxu0  ;;  %3270 = vmatpush.bf16.msrb.mxu0 %v4580_v28  ;;  %3151 = vmatpush.bf16.msra.mxu3 %v4539_v14  ;;  %v4600_v28 = vld [vmem:[%s6898_s6 + $0x330] sm:$0xff] }
 0x2c9   :  { %3313 = vmatpush.bf16.msrb.mxu2 %v4601_v2  ;;  %v4577_v2 = vld [vmem:[%s6898_s6 + $0x278] sm:$0xff] }
 0x2cc   :  { %3271 = vmatpush.bf16.msrb.mxu0 %v4579_v37  ;;  %3152 = vmatpush.bf16.msra.mxu3 %v4538_v61  ;;  %v7006_v37 = vld [vmem:[#allocation9_spill] sm:$0xff] }
 0x2cd   :  { %v1577_v50 = vpop.f32.mrf.mxu3  ;;  %3314 = vmatpush.bf16.msrb.mxu2 %v4600_v28  ;;  %v1884_v49 = vmul.f32 %v6139_v18, %v7006_v37  ;;  %v4576_v37 = vld [vmem:[%s6898_s6 + $0x270] sm:$0xff] }
 0x2ce   :  { %v1855_v10 = vmul.f32 %v1577_v50, %v7000_v24  ;;  %v1654_v0 = vpop.f32.mrf.mxu2  ;;  %v1825_v50 = vmul.f32 %v6366_v29, %v7007_v12  ;;  %v7013_v29 = vld [vmem:[#allocation36_spill] sm:$0xff] }
 0x2cf   :  { %v6476_v34 = vmul.f32 %v1654_v0, %v7003_v23  ;;  %v6478_v26 = vpop.f32.mrf.mxu1  ;;  %v1932_v17 = vpack.c.bf16 %v1884_v49, %v1868_v32  ;;  %v4592_v49 = vld [vmem:[%s6898_s6 + $0x2f0] sm:$0xff]  ;;  %v4575_v32 = vld [vmem:[%s6898_s6 + $0x268] sm:$0xff] }
 0x2d0   :  { %v1919_v59 = vpack.c.bf16 %v1855_v10, %v1839_v9  ;;  %v6480_v46 = vpop.f32.mrf.mxu0  ;;  %3272 = vmatpush.bf16.msrb.mxu0 %v4578_v56  ;;  %v7009_v9 = vld [vmem:[#allocation31_spill] sm:$0xff]  ;;  %v7011_v56 = vld [vmem:[#allocation17_spill] sm:$0xff]  ;;  %3241 = vmatpush.bf16.msrb.mxu3 %v4577_v2  ;;  %v4596_v12 = vld [vmem:[%s6898_s6 + $0x310] sm:$0xff] }
 0x2d1   :  { %v1938_v54 = vpack.c.bf16 %v6476_v34, %v6473_v7  ;;  %3315 = vmatpush.bf16.msrb.mxu2 %v4599_v58  ;;  %v7010_v10 = vld [vmem:[#allocation35_spill] sm:$0xff]  ;;  %v1809_v18 = vmul.f32 %v6335_v33, %v7011_v56  ;;  %v4590_v2 = vld [vmem:[%s6898_s6 + $0x2e0] sm:$0xff] }
 0x2d2   :  { %3062 = vmatmul.bf16.gmra.mxu3 %v7005_v43  ;;  %3110 = vmatmul.bf16.gmra.mxu1 %v1916_v13  ;;  %v7014_v43 = vld [vmem:[#allocation64_spill] sm:$0xff]  ;;  %v7059_v34 = vld [vmem:[#allocation38_spill] sm:$0xff] }
 0x2d3   :  { %3139 = vmatmul.bf16.gmra.mxu2 %v1933_v63  ;;  %3182 = vmatmul.bf16.gmra.mxu0 %v1919_v59  ;;  %v1905_v63 = vpack.c.bf16 %v1825_v50, %v1809_v18  ;;  %v7015_v33 = vpack.c.bf16 %v6112_v48, %v7014_v43  ;;  %v4617_v48 = vld [vmem:[%s6898_s6 + $0x3b8] sm:$0xff] }
 0x2d4   :  { %3361 = vmatpush.bf16.msra.mxu0 %v4617_v48  ;;  %3242 = vmatpush.bf16.msrb.mxu3 %v4576_v37 }
 0x2d5   :  { %v1580_v5 = vpop.f32.mrf.mxu3  ;;  %3316 = vmatpush.bf16.msrb.mxu2 %v4598_v55  ;;  %v7017_v55 = vld [vmem:[#allocation25_spill] sm:$0xff] }
 0x2d6   :  { %v1738_v19 = vpop.f32.mrf.mxu2  ;;  %v1871_v24 = vmul.f32 %v1580_v5, %v7009_v9  ;;  %v4593_v5 = vld [vmem:[%s6898_s6 + $0x2f8] sm:$0xff]  ;;  %v4591_v9 = vld [vmem:[%s6898_s6 + $0x2e8] sm:$0xff]  ;;  %v1857_v56 = vmul.f32 %v6440_v1, %v7017_v55  ;;  %v4594_v1 = vld [vmem:[%s6898_s6 + $0x300] sm:$0xff] }
 0x2d7   :  { %v6493_v14 = vpop.f32.mrf.mxu1  ;;  %v6514_v8 = vmul.f32 %v1738_v19, %v7012_v22  ;;  %v4597_v19 = vld [vmem:[%s6898_s6 + $0x318] sm:$0xff]  ;;  %3289 = vmatpush.bf16.msrb.mxu1 %v4593_v5  ;;  %v7018_v22 = vld [vmem:[#allocation10_spill] sm:$0xff] }
 0x2d8   :  { %v6495_v47 = vpop.f32.mrf.mxu0  ;;  %3243 = vmatpush.bf16.msrb.mxu3 %v4575_v32  ;;  %v7021_v5 = vld [vmem:[#allocation21_spill] sm:$0xff] }
 0x2d9   :  { %3317 = vmatpush.bf16.msrb.mxu2 %v4597_v19  ;;  %v7022_v19 = vld [vmem:[#allocation40_spill] sm:$0xff]  ;;  %v4589_v55 = vld [vmem:[%s6898_s6 + $0x2d8] sm:$0xff] }
 0x2db   :  { %3290 = vmatpush.bf16.msrb.mxu1 %v4592_v49 }
 0x2dd   :  { %v1582_v25 = vpop.f32.mrf.mxu3  ;;  %3318 = vmatpush.bf16.msrb.mxu2 %v4596_v12  ;;  %v4614_v12 = vld [vmem:[%s6898_s6 + $0x3a0] sm:$0xff] }
 0x2de   :  { %v1887_v0 = vmul.f32 %v1582_v25, %v7010_v10  ;;  %v1740_v61 = vpop.f32.mrf.mxu2  ;;  %v4616_v25 = vld [vmem:[%s6898_s6 + $0x3b0] sm:$0xff]  ;;  %v4615_v10 = vld [vmem:[%s6898_s6 + $0x3a8] sm:$0xff] }
 0x2df   :  { %v6517_v30 = vmul.f32 %v1740_v61, %v7013_v29  ;;  %v6519_v23 = vpop.f32.mrf.mxu1  ;;  %3362 = vmatpush.bf16.msra.mxu0 %v4616_v25  ;;  %3291 = vmatpush.bf16.msrb.mxu1 %v4591_v9  ;;  %v1808_v29 = vmul.f32 %v6161_v3, %v7018_v22  ;;  %v1841_v3 = vmul.f32 %v6410_v60, %v7021_v5 }
 0x2e0   :  { %v1935_v13 = vpack.c.bf16 %v1887_v0, %v1871_v24  ;;  %v6521_v59 = vpop.f32.mrf.mxu0  ;;  %v4595_v24 = vld [vmem:[%s6898_s6 + $0x308] sm:$0xff] }
 0x2e1   :  { %v1910_v21 = vpack.c.bf16 %v6517_v30, %v6514_v8  ;;  %v7016_v0 = vld [vmem:[#allocation11_spill] sm:$0xff]  ;;  %3319 = vmatpush.bf16.msrb.mxu2 %v4595_v24  ;;  %v1921_v9 = vpack.c.bf16 %v1857_v56, %v1841_v3  ;;  %v4613_v56 = vld [vmem:[%s6898_s6 + $0x398] sm:$0xff]  ;;  %v7062_v30 = vld [vmem:[#allocation46_spill] sm:$0xff] }
 0x2e2   :  { %3067 = vmatmul.bf16.gmra.mxu3 %v7015_v33  ;;  %3115 = vmatmul.bf16.gmra.mxu1 %v1932_v17  ;;  %v1824_v61 = vmul.f32 %v6197_v6, %v7016_v0  ;;  %v7019_v17 = vld [vmem:[#allocation39_spill] sm:$0xff]  ;;  %v4574_v6 = vld [vmem:[%s6898_s6 + $0x260] sm:$0xff]  ;;  %v7028_v3 = vld [vmem:[#allocation33_spill] sm:$0xff] }
 0x2e3   :  { %3187 = vmatmul.bf16.gmra.mxu0 %v1935_v13  ;;  %3225 = vmatmul.bf16.vlgmr.msra.gmra.mxu2 %v1905_v63  ;;  %v7020_v63 = vld [vmem:[#allocation43_spill] sm:$0xff] }
 0x2e4   :  { %3363 = vmatpush.bf16.msra.mxu0 %v4615_v10  ;;  %v1904_v25 = vpack.c.bf16 %v1824_v61, %v1808_v29  ;;  %3244 = vmatpush.bf16.msrb.mxu3 %v4574_v6  ;;  %v7025_v10 = vld [vmem:[#allocation67_spill] sm:$0xff]  ;;  %v4573_v61 = vld [vmem:[%s6898_s6 + $0x258] sm:$0xff]  ;;  %v4572_v29 = vld [vmem:[%s6898_s6 + $0x250] sm:$0xff] }
 0x2e5   :  { %v1666_v28 = vpop.f32.mrf.mxu3  ;;  %3292 = vmatpush.bf16.msrb.mxu1 %v4590_v2  ;;  %3320 = vmatpush.bf16.msrb.mxu2 %v4594_v1  ;;  %v4611_v6 = vld [vmem:[%s6898_s6 + $0x388] sm:$0xff]  ;;  %v7027_v1 = vld [vmem:[#allocation13_spill] sm:$0xff] }
 0x2e6   :  { %v1743_v58 = vpop.f32.mrf.mxu2  ;;  %v1811_v13 = vmul.f32 %v1666_v28, %v7019_v17  ;;  %v7023_v28 = vld [vmem:[#allocation44_spill] sm:$0xff]  ;;  %v1856_v5 = vmul.f32 %v6265_v15, %v7027_v1  ;;  %v4586_v15 = vld [vmem:[%s6898_s6 + $0x2c0] sm:$0xff] }
 0x2e7   :  { %v6549_v50 = vpop.f32.mrf.mxu1  ;;  %v6588_v48 = vmul.f32 %v1743_v58, %v7022_v19  ;;  %v7024_v58 = vld [vmem:[#allocation68_spill] sm:$0xff]  ;;  %v1889_v19 = vmul.f32 %v6493_v14, %v7028_v3  ;;  %v4610_v14 = vld [vmem:[%s6898_s6 + $0x380] sm:$0xff] }
 0x2e8   :  { %v6554_v36 = vpop.f32.mrf.mxu0  ;;  %3364 = vmatpush.bf16.msra.mxu0 %v4614_v12  ;;  %v7026_v0 = vpack.c.bf16 %v7024_v58, %v7025_v10  ;;  %3245 = vmatpush.bf16.msrb.mxu3 %v4573_v61  ;;  %v4588_v17 = vld [vmem:[%s6898_s6 + $0x2d0] sm:$0xff]  ;;  %v7031_v58 = vld [vmem:[#allocation51_spill] sm:$0xff]  ;;  %v4570_v61 = vld [vmem:[%s6898_s6 + $0x240] sm:$0xff] }
 0x2e9   :  { %3293 = vmatpush.bf16.msrb.mxu1 %v4589_v55  ;;  %v7029_v12 = vld [vmem:[#allocation12_spill] sm:$0xff]  ;;  %v7032_v55 = vld [vmem:[#allocation29_spill] sm:$0xff] }
 0x2ec   :  { %3365 = vmatpush.bf16.msra.mxu0 %v4613_v56  ;;  %3246 = vmatpush.bf16.msrb.mxu3 %v4572_v29  ;;  %v7033_v56 = vld [vmem:[#allocation48_spill] sm:$0xff] }
 0x2ed   :  { %v1668_v18 = vpop.f32.mrf.mxu3  ;;  %3294 = vmatpush.bf16.msrb.mxu1 %v4588_v17  ;;  %v7034_v29 = vld [vmem:[#allocation52_spill] sm:$0xff] }
 0x2ee   :  { %v1827_v43 = vmul.f32 %v1668_v18, %v7020_v63  ;;  %v1745_v33 = vpop.f32.mrf.mxu2 }
 0x2ef   :  { %v6591_v37 = vmul.f32 %v1745_v33, %v7023_v28  ;;  %v6593_v49 = vpop.f32.mrf.mxu1  ;;  %v4587_v33 = vld [vmem:[%s6898_s6 + $0x2c8] sm:$0xff] }
 0x2f0   :  { %v1907_v32 = vpack.c.bf16 %v1827_v43, %v1811_v13  ;;  %v6600_v24 = vpop.f32.mrf.mxu0  ;;  %v4612_v13 = vld [vmem:[%s6898_s6 + $0x390] sm:$0xff]  ;;  %v4571_v43 = vld [vmem:[%s6898_s6 + $0x248] sm:$0xff] }
 0x2f1   :  { %v1926_v60 = vpack.c.bf16 %v6591_v37, %v6588_v48  ;;  %3366 = vmatpush.bf16.msra.mxu0 %v4612_v13  ;;  %3247 = vmatpush.bf16.msrb.mxu3 %v4571_v43  ;;  %v7064_v37 = vld [vmem:[#allocation54_spill] sm:$0xff] }
 0x2f2   :  { %3153 = vmatmul.bf16.vlgmr.msra.gmra.mxu3 %v7026_v0  ;;  %3201 = vmatmul.bf16.vlgmr.msra.gmra.mxu1 %v1904_v25  ;;  %v1840_v25 = vmul.f32 %v6237_v16, %v7029_v12  ;;  %v1873_v16 = vmul.f32 %v6478_v26, %v7032_v55  ;;  %v7036_v12 = vld [vmem:[#allocation41_spill] sm:$0xff] }
 0x2f3   :  { %3230 = vmatmul.bf16.gmra.mxu2 %v1921_v9  ;;  %3273 = vmatmul.bf16.vlgmr.msrb.gmra.mxu0 %v1907_v32  ;;  %v7030_v32 = vld [vmem:[#allocation47_spill] sm:$0xff] }
 0x2f4   :  { %3295 = vmatpush.bf16.msrb.mxu1 %v4587_v33  ;;  %v1920_v43 = vpack.c.bf16 %v1856_v5, %v1840_v25  ;;  %v1829_v25 = vmul.f32 %v6549_v50, %v7036_v12  ;;  %v4631_v12 = vld [vmem:[%s6900_s8 + $0x8] sm:$0xff] }
 0x2f5   :  { %v1671_v18 = vpop.f32.mrf.mxu3  ;;  %3367 = vmatpush.bf16.msra.mxu0 %v4611_v6  ;;  %3248 = vmatpush.bf16.msrb.mxu3 %v4570_v61  ;;  %v1937_v6 = vpack.c.bf16 %v1889_v19, %v1873_v16  ;;  %v7040_v61 = vld [vmem:[#allocation37_spill] sm:$0xff] }
 0x2f6   :  { %v1748_v22 = vpop.f32.mrf.mxu2  ;;  %v1843_v9 = vmul.f32 %v1671_v18, %v7030_v32 }
 0x2f7   :  { %v6623_v63 = vpop.f32.mrf.mxu1  ;;  %v6656_v18 = vmul.f32 %v1748_v22, %v7033_v56 }
 0x2f8   :  { %v6634_v2 = vpop.f32.mrf.mxu0  ;;  %3296 = vmatpush.bf16.msrb.mxu1 %v4586_v15  ;;  %v1813_v15 = vmul.f32 %v6519_v23, %v7040_v61  ;;  %v4625_v23 = vld [vmem:[%s6898_s6 + $0x3f8] sm:$0xff]  ;;  %v7045_v61 = vld [vmem:[#allocation60_spill] sm:$0xff] }
 0x2f9   :  { %3368 = vmatpush.bf16.msra.mxu0 %v4610_v14 }
 0x2fa   :  { %v1909_v50 = vpack.c.bf16 %v1829_v25, %v1813_v15  ;;  %v7041_v25 = vld [vmem:[#allocation20_spill] sm:$0xff] }
 0x2fc   :  { %3385 = vmatpush.bf16.msra.mxu1 %v4625_v23 }
 0x2fd   :  { %v1673_v28 = vpop.f32.mrf.mxu3 }
 0x2fe   :  { %v1859_v10 = vmul.f32 %v1673_v28, %v7031_v58  ;;  %v1750_v0 = vpop.f32.mrf.mxu2  ;;  %v7035_v28 = vld [vmem:[#allocation16_spill] sm:$0xff]  ;;  %v7039_v58 = vld [vmem:[#allocation58_spill] sm:$0xff] }
 0x2ff   :  { %v6659_v17 = vmul.f32 %v1750_v0, %v7034_v29  ;;  %v6661_v13 = vpop.f32.mrf.mxu1  ;;  %v1888_v19 = vmul.f32 %v6315_v44, %v7035_v28  ;;  %v4633_v29 = vld [vmem:[%s6900_s8 + $0x18] sm:$0xff]  ;;  %v4623_v28 = vld [vmem:[%s6898_s6 + $0x3e8] sm:$0xff] }
 0x300   :  { %v1923_v33 = vpack.c.bf16 %v1859_v10, %v1843_v9  ;;  %v6668_v26 = vpop.f32.mrf.mxu0  ;;  %v7037_v9 = vld [vmem:[#allocation15_spill] sm:$0xff]  ;;  %3463 = vmatpush.bf16.msra.mxu2 %v4633_v29 }
 0x301   :  { %v1942_v1 = vpack.c.bf16 %v6659_v17, %v6656_v18  ;;  %v1872_v31 = vmul.f32 %v6299_v52, %v7037_v9  ;;  %v4609_v52 = vld [vmem:[%s6898_s6 + $0x378] sm:$0xff] }
 0x302   :  { %3158 = vmatmul.bf16.gmra.mxu3 %v1918_v20  ;;  %3206 = vmatmul.bf16.gmra.mxu1 %v1920_v43  ;;  %v7042_v9 = vld [vmem:[#allocation49_spill] sm:$0xff] }
 0x303   :  { %3235 = vmatmul.bf16.gmra.mxu2 %v1937_v6  ;;  %3278 = vmatmul.bf16.gmra.mxu0 %v1923_v33  ;;  %v1936_v16 = vpack.c.bf16 %v1888_v19, %v1872_v31  ;;  %v4632_v33 = vld [vmem:[%s6900_s8 + $0x10] sm:$0xff]  ;;  %v1861_v31 = vmul.f32 %v6623_v63, %v7042_v9  ;;  %v4630_v63 = vld [vmem:[%s6900_s8] sm:$0xff] }
 0x304   :  { %3337 = vmatpush.bf16.msra.mxu3 %v4609_v52  ;;  %3464 = vmatpush.bf16.msra.mxu2 %v4632_v33 }
 0x305   :  { %v1676_v22 = vpop.f32.mrf.mxu3 }
 0x306   :  { %v3034_v3 = vpop.f32.mrf.mxu2  ;;  %v1875_v20 = vmul.f32 %v1676_v22, %v7038_v39 }
 0x307   :  { %v6670_v5 = vpop.f32.mrf.mxu1 }
 0x308   :  { %v6682_v14 = vpop.f32.mrf.mxu0  ;;  %3338 = vmatpush.bf16.msra.mxu3 %v4608_v40  ;;  %3465 = vmatpush.bf16.msra.mxu2 %v4631_v12  ;;  %v4605_v40 = vld [vmem:[%s6898_s6 + $0x358] sm:$0xff]  ;;  %v7047_v12 = vld [vmem:[#allocation26_spill] sm:$0xff] }
 0x30c   :  { %3466 = vmatpush.bf16.msra.mxu2 %v4630_v63 }
 0x30d   :  { %v1678_v32 = vpop.f32.mrf.mxu3 }
 0x30e   :  { %v1891_v10 = vmul.f32 %v1678_v32, %v7039_v58  ;;  %v3036_v0 = vpop.f32.mrf.mxu2  ;;  %v1828_v32 = vmul.f32 %v6371_v41, %v7041_v25  ;;  %v4622_v41 = vld [vmem:[%s6898_s6 + $0x3e0] sm:$0xff]  ;;  %v1860_v25 = vmul.f32 %v6442_v57, %v7047_v12 }
 0x30f   :  { %v2242_v55 = vpop.f32.mrf.mxu1  ;;  %v4602_v57 = vld [vmem:[%s6898_s6 + $0x340] sm:$0xff] }
 0x310   :  { %v1939_v44 = vpack.c.bf16 %v1891_v10, %v1875_v20  ;;  %v6684_v56 = vadd.f32 %v3034_v3, %v2242_v55  ;;  %v4607_v3 = vld [vmem:[%s6898_s6 + $0x368] sm:$0xff]  ;;  %v6715_v19 = vpop.f32.mrf.mxu0  ;;  %v7043_v20 = vld [vmem:[#allocation18_spill] sm:$0xff] }
 0x311   :  { %3339 = vmatpush.bf16.msra.mxu3 %v4607_v3  ;;  %v1812_v58 = vmul.f32 %v6337_v4, %v7043_v20  ;;  %v7044_v10 = vld [vmem:[#allocation59_spill] sm:$0xff]  ;;  %v7049_v20 = vld [vmem:[#allocation22_spill] sm:$0xff] }
 0x312   :  { %3163 = vmatmul.bf16.gmra.mxu3 %v1934_v27  ;;  %3211 = vmatmul.bf16.gmra.mxu1 %v1936_v16  ;;  %v4624_v27 = vld [vmem:[%s6898_s6 + $0x3f0] sm:$0xff]  ;;  %v4606_v16 = vld [vmem:[%s6898_s6 + $0x360] sm:$0xff]  ;;  %v4603_v3 = vld [vmem:[%s6898_s6 + $0x348] sm:$0xff] }
 0x313   :  { %3283 = vmatmul.bf16.gmra.mxu0 %v1939_v44  ;;  %3321 = vmatmul.bf16.vlgmr.msrb.gmra.mxu2 %v1909_v50  ;;  %v7046_v44 = vld [vmem:[#allocation45_spill] sm:$0xff]  ;;  %v1908_v52 = vpack.c.bf16 %v1828_v32, %v1812_v58  ;;  %v7048_v32 = vld [vmem:[#allocation56_spill] sm:$0xff]  ;;  %v1844_v58 = vmul.f32 %v6415_v11, %v7049_v20 }
 0x314   :  { %3386 = vmatpush.bf16.msra.mxu1 %v4624_v27  ;;  %v1845_v4 = vmul.f32 %v6593_v49, %v7046_v44  ;;  %v4621_v49 = vld [vmem:[%s6898_s6 + $0x3d8] sm:$0xff]  ;;  %v1893_v9 = vmul.f32 %v6670_v5, %v7048_v32  ;;  %v4618_v5 = vld [vmem:[%s6898_s6 + $0x3c0] sm:$0xff] }
 0x315   :  { %v1762_v43 = vpop.f32.mrf.mxu3  ;;  %3340 = vmatpush.bf16.msra.mxu3 %v4606_v16  ;;  %v7052_v16 = vld [vmem:[#allocation53_spill] sm:$0xff]  ;;  %v1924_v44 = vpack.c.bf16 %v1860_v25, %v1844_v58 }
 0x316   :  { %v3039_v51 = vpop.f32.mrf.mxu2 }
 0x317   :  { %v2244_v6 = vpop.f32.mrf.mxu1 }
 0x318   :  { %v6707_v22 = vadd.f32 %v3036_v0, %v2244_v6  ;;  %3387 = vmatpush.bf16.msra.mxu1 %v4623_v28  ;;  %v1815_v0 = vmul.f32 %v1762_v43, %v7044_v10  ;;  %v1925_v43 = vpack.c.bf16 %v1861_v31, %v1845_v4  ;;  %v6750_v27 = vpop.f32.mrf.mxu0  ;;  %v4619_v28 = vld [vmem:[%s6898_s6 + $0x3c8] sm:$0xff]  ;;  %v7050_v10 = vld [vmem:[#allocation62_spill] sm:$0xff] }
 0x319   :  { %3341 = vmatpush.bf16.msra.mxu3 %v4605_v40 }
 0x31c   :  { %3388 = vmatpush.bf16.msra.mxu1 %v4622_v41  ;;  %v1877_v41 = vmul.f32 %v6661_v13, %v7052_v16  ;;  %v7053_v13 = vld [vmem:[#allocation34_spill] sm:$0xff] }
 0x31d   :  { %v1764_v39 = vpop.f32.mrf.mxu3  ;;  %3342 = vmatpush.bf16.msra.mxu3 %v4604_v45 }
 0x31e   :  { %v1831_v15 = vmul.f32 %v1764_v39, %v7045_v61  ;;  %v3041_v55 = vpop.f32.mrf.mxu2  ;;  %v7051_v61 = vld [vmem:[#allocation63_spill] sm:$0xff] }
 0x31f   :  { %v2247_v50 = vpop.f32.mrf.mxu1 }
 0x320   :  { %v1911_v23 = vpack.c.bf16 %v1831_v15, %v1815_v0  ;;  %v6739_v29 = vadd.f32 %v3039_v51, %v2247_v50  ;;  %3389 = vmatpush.bf16.msra.mxu1 %v4621_v49  ;;  %v6770_v31 = vpop.f32.mrf.mxu0  ;;  %v1941_v50 = vpack.c.bf16 %v1893_v9, %v1877_v41  ;;  %v1892_v49 = vmul.f32 %v6495_v47, %v7053_v13  ;;  %v7057_v47 = vld [vmem:[#allocation3_spill] sm:$0xff] }
 0x321   :  { %3343 = vmatpush.bf16.msra.mxu3 %v4603_v3  ;;  %v7056_v3 = vld [vmem:[#allocation66_spill] sm:$0xff] }
 0x322   :  { %3249 = vmatmul.bf16.vlgmr.msrb.gmra.mxu3 %v1906_v42  ;;  %3297 = vmatmul.bf16.vlgmr.msrb.gmra.mxu1 %v1908_v52 }
 0x323   :  { %3326 = vmatmul.bf16.gmra.mxu2 %v1925_v43  ;;  %3369 = vmatmul.bf16.vlgmr.msra.gmra.mxu0 %v1911_v23 }
 0x324   :  { %3390 = vmatpush.bf16.msra.mxu1 %v4620_v53  ;;  %v7055_v53 = vld [vmem:[#allocation65_spill] sm:$0xff] }
 0x325   :  { %v1767_v51 = vpop.f32.mrf.mxu3  ;;  %3344 = vmatpush.bf16.msra.mxu3 %v4602_v57 }
 0x326   :  { %v3044_v33 = vpop.f32.mrf.mxu2  ;;  %v1847_v0 = vmul.f32 %v1767_v51, %v7050_v10 }
 0x327   :  { %v2249_v42 = vpop.f32.mrf.mxu1 }
 0x328   :  { %v6758_v6 = vadd.f32 %v3041_v55, %v2249_v42  ;;  %3391 = vmatpush.bf16.msra.mxu1 %v4619_v28  ;;  %v3089_v43 = vpop.f32.mrf.mxu0 }
 0x32c   :  { %3392 = vmatpush.bf16.msra.mxu1 %v4618_v5 }
 0x32d   :  { %v1769_v39 = vpop.f32.mrf.mxu3 }
 0x32e   :  { %v1863_v15 = vmul.f32 %v1769_v39, %v7051_v61  ;;  %v6776_v55 = vpop.f32.mrf.mxu2 }
 0x32f   :  { %v2252_v63 = vpop.f32.mrf.mxu1 }
 0x330   :  { %v1927_v11 = vpack.c.bf16 %v1863_v15, %v1847_v0  ;;  %v6786_v4 = vadd.f32 %v3044_v33, %v2252_v63  ;;  %v7054_v33 = vld [vmem:[#allocation30_spill] sm:$0xff]  ;;  %v3092_v25 = vpop.f32.mrf.mxu0 }
 0x331   :  { %v1876_v45 = vmul.f32 %v6480_v46, %v7054_v33  ;;  %v7058_v0 = vld [vmem:[#allocation42_spill] sm:$0xff] }
 0x332   :  { %3254 = vmatmul.bf16.gmra.mxu3 %v1922_v35  ;;  %3302 = vmatmul.bf16.gmra.mxu1 %v1924_v44  ;;  %v1832_v61 = vmul.f32 %v6554_v36, %v7058_v0  ;;  %v7060_v63 = vld [vmem:[#allocation2_spill] sm:$0xff] }
 0x333   :  { %3331 = vmatmul.bf16.gmra.mxu2 %v1941_v50  ;;  %3374 = vmatmul.bf16.gmra.mxu0 %v1927_v11  ;;  %v1940_v28 = vpack.c.bf16 %v1892_v49, %v1876_v45 }
 0x335   :  { %v1772_v52 = vpop.f32.mrf.mxu3 }
 0x336   :  { %v3130_v23 = vpop.f32.mrf.mxu2  ;;  %v1879_v42 = vmul.f32 %v1772_v52, %v7055_v53 }
 0x337   :  { %v6791_v40 = vpop.f32.mrf.mxu1 }
 0x338   :  { %v3094_v10 = vpop.f32.mrf.mxu0 }
 0x33d   :  { %v1774_v51 = vpop.f32.mrf.mxu3 }
 0x33e   :  { %v1895_v62 = vmul.f32 %v1774_v51, %v7056_v3  ;;  %v6799_v38 = vpop.f32.mrf.mxu2 }
 0x33f   :  { %v3106_v35 = vpop.f32.mrf.mxu1 }
 0x340   :  { %v1943_v12 = vpack.c.bf16 %v1895_v62, %v1879_v42  ;;  %v3178_v36 = vpop.f32.mrf.mxu0 }
 0x342   :  { %3259 = vmatmul.bf16.gmra.mxu3 %v1938_v54  ;;  %3307 = vmatmul.bf16.gmra.mxu1 %v1940_v28  ;;  %v1816_v54 = vmul.f32 %v6521_v59, %v7059_v34 }
 0x343   :  { %3379 = vmatmul.bf16.gmra.mxu0 %v1943_v12  ;;  %4473 = vmatmul.msk.bf16.vlgmr.msra.gmra.mxu2 %vm998_vm10, %v7057_v47  ;;  %v7063_v12 = vld [vmem:[#allocation57_spill] sm:$0xff] }
 0x344   :  { %v1912_v41 = vpack.c.bf16 %v1832_v61, %v1816_v54  ;;  %v1896_v47 = vmul.f32 %v6682_v14, %v7063_v12 }
 0x345   :  { %v3058_v46 = vpop.f32.mrf.mxu3 }
 0x346   :  { %v3059_v32 = vadd.f32 %v3058_v46, %v6684_v56  ;;  %v3135_v9 = vpop.f32.mrf.mxu2 }
 0x347   :  { %v3108_v39 = vpop.f32.mrf.mxu1 }
 0x348   :  { %v3083_v20 = vadd.f32 %v6715_v19, %v3059_v32  ;;  %v3180_v33 = vpop.f32.mrf.mxu0 }
 0x34a   :  { %v3107_v58 = vadd.f32 %v3106_v35, %v3083_v20 }
 0x34c   :  { %v3131_v15 = vadd.f32 %v3130_v23, %v3107_v58  ;;  %v7061_v23 = vld [vmem:[#allocation50_spill] sm:$0xff] }
 0x34d   :  { %v3060_v7 = vpop.f32.mrf.mxu3 }
 0x34e   :  { %v3061_v57 = vadd.f32 %v3060_v7, %v6707_v22  ;;  %v3137_v5 = vpop.f32.mrf.mxu2 }
 0x34f   :  { %v3111_v16 = vpop.f32.mrf.mxu1 }
 0x350   :  { %v3085_v56 = vadd.f32 %v6750_v27, %v3061_v57  ;;  %v1864_v27 = vmul.f32 %v6634_v2, %v7061_v23  ;;  %v3183_v28 = vpop.f32.mrf.mxu0 }
 0x352   :  { %3345 = vmatmul.bf16.vlgmr.msra.gmra.mxu3 %v1910_v21  ;;  %3393 = vmatmul.bf16.vlgmr.msra.gmra.mxu1 %v1912_v41  ;;  %v3109_v19 = vadd.f32 %v3108_v39, %v3085_v56  ;;  %v1848_v21 = vmul.f32 %v6600_v24, %v7062_v30 }
 0x353   :  { %4474 = vmatmul.msk.bf16.gmra.mxu2 %vm998_vm10, %v7060_v63 }
 0x354   :  { %v1928_v53 = vpack.c.bf16 %v1864_v27, %v1848_v21 }
 0x355   :  { %v3063_v44 = vpop.f32.mrf.mxu3 }
 0x356   :  { %v3064_v59 = vadd.f32 %v3063_v44, %v6739_v29  ;;  %v3140_v11 = vpop.f32.mrf.mxu2 }
 0x357   :  { %v3113_v22 = vpop.f32.mrf.mxu1 }
 0x358   :  { %v3088_v50 = vadd.f32 %v6770_v31, %v3064_v59  ;;  %v3185_v14 = vpop.f32.mrf.mxu0 }
 0x35a   :  { %v3112_v52 = vadd.f32 %v3111_v16, %v3088_v50 }
 0x35c   :  { %v3136_v13 = vadd.f32 %v3135_v9, %v3112_v52 }
 0x35d   :  { %v3065_v8 = vpop.f32.mrf.mxu3 }
 0x35e   :  { %v3066_v49 = vadd.f32 %v3065_v8, %v6758_v6  ;;  %v3142_v51 = vpop.f32.mrf.mxu2 }
 0x35f   :  { %v3116_v45 = vpop.f32.mrf.mxu1 }
 0x360   :  { %v3090_v29 = vadd.f32 %v3089_v43, %v3066_v49  ;;  %v3047_v43 = vadd.f32 %v6776_v55, %v6791_v40  ;;  %v3188_v57 = vpop.f32.mrf.mxu0 }
 0x362   :  { %3350 = vmatmul.bf16.gmra.mxu3 %v1926_v60  ;;  %3398 = vmatmul.bf16.gmra.mxu1 %v1928_v53  ;;  %v3114_v31 = vadd.f32 %v3113_v22, %v3090_v29  ;;  %v1880_v60 = vmul.f32 %v6668_v26, %v7064_v37  ;;  %v3133_v26 = vadd.f32 %v6799_v38, %v3109_v19 }
 0x364   :  { %v3138_v42 = vadd.f32 %v3137_v5, %v3114_v31 }
 0x365   :  { %v3068_v2 = vpop.f32.mrf.mxu3 }
 0x366   :  { %v3069_v3 = vadd.f32 %v3068_v2, %v6786_v4  ;;  %v3226_v62 = vpop.f32.mrf.mxu2  ;;  %v1944_v4 = vpack.c.bf16 %v1896_v47, %v1880_v60 }
 0x367   :  { %v3118_v35 = vpop.f32.mrf.mxu1 }
 0x368   :  { %v3093_v24 = vadd.f32 %v3092_v25, %v3069_v3  ;;  %v3190_v59 = vpop.f32.mrf.mxu0 }
 0x36a   :  { %v3117_v6 = vadd.f32 %v3116_v45, %v3093_v24 }
 0x36c   :  { %v3141_v46 = vadd.f32 %v3140_v11, %v3117_v6 }
 0x36d   :  { %v3070_v48 = vpop.f32.mrf.mxu3 }
 0x36e   :  { %v3071_v32 = vadd.f32 %v3070_v48, %v3047_v43  ;;  %v3228_v9 = vpop.f32.mrf.mxu2 }
 0x36f   :  { %v3202_v39 = vpop.f32.mrf.mxu1 }
 0x370   :  { %v3095_v20 = vadd.f32 %v3094_v10, %v3071_v32  ;;  %v3274_v27 = vpop.f32.mrf.mxu0 }
 0x372   :  { %3355 = vmatmul.bf16.gmra.mxu3 %v1942_v1  ;;  %3403 = vmatmul.bf16.gmra.mxu1 %v1944_v4  ;;  %v3119_v25 = vadd.f32 %v3118_v35, %v3095_v20 }
 0x374   :  { %v3143_v58 = vadd.f32 %v3142_v51, %v3119_v25 }
 0x375   :  { %v3154_v0 = vpop.f32.mrf.mxu3 }
 0x376   :  { %v3155_v55 = vadd.f32 %v3154_v0, %v3131_v15  ;;  %v3231_v40 = vpop.f32.mrf.mxu2 }
 0x377   :  { %v3204_v61 = vpop.f32.mrf.mxu1 }
 0x378   :  { %v3179_v7 = vadd.f32 %v3178_v36, %v3155_v55  ;;  %v3276_v53 = vpop.f32.mrf.mxu0 }
 0x37a   :  { %v3203_v34 = vadd.f32 %v3202_v39, %v3179_v7 }
 0x37c   :  { %v3227_v54 = vadd.f32 %v3226_v62, %v3203_v34 }
 0x37d   :  { %v3156_v5 = vpop.f32.mrf.mxu3 }
 0x37e   :  { %v3157_v10 = vadd.f32 %v3156_v5, %v3133_v26  ;;  %v3233_v16 = vpop.f32.mrf.mxu2 }
 0x37f   :  { %v3207_v41 = vpop.f32.mrf.mxu1 }
 0x380   :  { %v3181_v18 = vadd.f32 %v3180_v33, %v3157_v10 }
 0x382   :  { %v3205_v17 = vadd.f32 %v3204_v61, %v3181_v18 }
 0x384   :  { %v3229_v1 = vadd.f32 %v3228_v9, %v3205_v17 }
 0x385   :  { %v3159_v56 = vpop.f32.mrf.mxu3 }
 0x386   :  { %v3160_v63 = vadd.f32 %v3159_v56, %v3136_v13  ;;  %v3236_v44 = vpop.f32.mrf.mxu2 }
 0x387   :  { %v3209_v15 = vpop.f32.mrf.mxu1 }
 0x388   :  { %v3184_v11 = vadd.f32 %v3183_v28, %v3160_v63  ;;  %v3279_v28 = vpop.f32.mrf.mxu0 }
 0x38a   :  { %v3208_v22 = vadd.f32 %v3207_v41, %v3184_v11 }
 0x38c   :  { %v3232_v36 = vadd.f32 %v3231_v40, %v3208_v22 }
 0x38d   :  { %v3161_v50 = vpop.f32.mrf.mxu3 }
 0x38e   :  { %v3162_v52 = vadd.f32 %v3161_v50, %v3138_v42  ;;  %v3238_v38 = vpop.f32.mrf.mxu2 }
 0x38f   :  { %v3212_v19 = vpop.f32.mrf.mxu1 }
 0x390   :  { %v3186_v23 = vadd.f32 %v3185_v14, %v3162_v52  ;;  %v3281_v39 = vpop.f32.mrf.mxu0 }
 0x392   :  { %v3210_v8 = vadd.f32 %v3209_v15, %v3186_v23 }
 0x394   :  { %v3234_v30 = vadd.f32 %v3233_v16, %v3210_v8 }
 0x395   :  { %v3164_v21 = vpop.f32.mrf.mxu3 }
 0x396   :  { %v3165_v49 = vadd.f32 %v3164_v21, %v3141_v46  ;;  %v3322_v51 = vpop.f32.mrf.mxu2 }
 0x397   :  { %v3214_v33 = vpop.f32.mrf.mxu1 }
 0x398   :  { %v3189_v45 = vadd.f32 %v3188_v57, %v3165_v49  ;;  %v3284_v7 = vpop.f32.mrf.mxu0 }
 0x39a   :  { %v3213_v13 = vadd.f32 %v3212_v19, %v3189_v45 }
 0x39c   :  { %v3237_v29 = vadd.f32 %v3236_v44, %v3213_v13 }
 0x39d   :  { %v3166_v31 = vpop.f32.mrf.mxu3 }
 0x39e   :  { %v3167_v2 = vadd.f32 %v3166_v31, %v3143_v58  ;;  %v3324_v3 = vpop.f32.mrf.mxu2 }
 0x39f   :  { %v3298_v62 = vpop.f32.mrf.mxu1 }
 0x3a0   :  { %v3191_v35 = vadd.f32 %v3190_v59, %v3167_v2  ;;  %v3286_v18 = vpop.f32.mrf.mxu0 }
 0x3a2   :  { %v3215_v42 = vadd.f32 %v3214_v33, %v3191_v35 }
 0x3a4   :  { %v6840_v24 = vadd.f32 %v3238_v38, %v3215_v42 }
 0x3a5   :  { %v3250_v6 = vpop.f32.mrf.mxu3 }
 0x3a6   :  { %v3251_v12 = vadd.f32 %v3250_v6, %v3227_v54  ;;  %v3327_v47 = vpop.f32.mrf.mxu2 }
 0x3a7   :  { %v3300_v43 = vpop.f32.mrf.mxu1 }
 0x3a8   :  { %v3275_v46 = vadd.f32 %v3274_v27, %v3251_v12  ;;  %v3370_v22 = vpop.f32.mrf.mxu0 }
 0x3aa   :  { %v3299_v48 = vadd.f32 %v3298_v62, %v3275_v46 }
 0x3ac   :  { %v3323_v37 = vadd.f32 %v3322_v51, %v3299_v48 }
 0x3ad   :  { %v3252_v60 = vpop.f32.mrf.mxu3 }
 0x3ae   :  { %v3253_v32 = vadd.f32 %v3252_v60, %v3229_v1  ;;  %v3329_v9 = vpop.f32.mrf.mxu2 }
 0x3af   :  { %v3303_v4 = vpop.f32.mrf.mxu1 }
 0x3b0   :  { %v3277_v20 = vadd.f32 %v3276_v53, %v3253_v32  ;;  %v3372_v23 = vpop.f32.mrf.mxu0 }
 0x3b2   :  { %v3301_v25 = vadd.f32 %v3300_v43, %v3277_v20 }
 0x3b4   :  { %v3325_v14 = vadd.f32 %v3324_v3, %v3301_v25 }
 0x3b5   :  { %v3255_v58 = vpop.f32.mrf.mxu3 }
 0x3b6   :  { %v3256_v0 = vadd.f32 %v3255_v58, %v3232_v36  ;;  %v3332_v55 = vpop.f32.mrf.mxu2 }
 0x3b7   :  { %v3305_v40 = vpop.f32.mrf.mxu1 }
 0x3b8   :  { %v3280_v61 = vadd.f32 %v3279_v28, %v3256_v0  ;;  %v3375_v45 = vpop.f32.mrf.mxu0 }
 0x3ba   :  { %v3304_v34 = vadd.f32 %v3303_v4, %v3280_v61 }
 0x3bc   :  { %v3328_v26 = vadd.f32 %v3327_v47, %v3304_v34 }
 0x3bd   :  { %v3257_v54 = vpop.f32.mrf.mxu3 }
 0x3be   :  { %v3258_v57 = vadd.f32 %v3257_v54, %v3234_v30  ;;  %v3334_v5 = vpop.f32.mrf.mxu2  ;;  %v7066_v54 = vld [vmem:[#allocation6_spill] sm:$0xff] }
 0x3bf   :  { %v3308_v10 = vpop.f32.mrf.mxu1 }
 0x3c0   :  { %v3282_v16 = vadd.f32 %v3281_v39, %v3258_v57  ;;  %v3377_v62 = vpop.f32.mrf.mxu0  ;;  %v7067_v57 = vmov 0.0  }
 0x3c2   :  { %v3306_v41 = vadd.f32 %v3305_v40, %v3282_v16 }
 0x3c4   :  { %v3330_v17 = vadd.f32 %v3329_v9, %v3306_v41  ;;  %v7068_v41 = vld [vmem:[#allocation5_spill] sm:$0xff] }
 0x3c5   :  { %v3260_v1 = vpop.f32.mrf.mxu3 }
 0x3c6   :  { %v3261_v56 = vadd.f32 %v3260_v1, %v3237_v29  ;;  %v6842_v63 = vpop.f32.mrf.mxu2  ;;  %v4637_v1 = vld [vmem:[%s6904_s11 + $0x18] sm:$0xff] }
 0x3c7   :  { %v3310_v44 = vpop.f32.mrf.mxu1  ;;  %3563 = vmatpush.bf16.msrb.mxu2 %v4637_v1 }
 0x3c8   :  { %v3285_v59 = vadd.f32 %v3284_v7, %v3261_v56  ;;  %v3380_v60 = vpop.f32.mrf.mxu0  ;;  %v4636_v56 = vld [vmem:[%s6904_s11 + $0x10] sm:$0xff] }
 0x3ca   :  { %v3309_v15 = vadd.f32 %v3308_v10, %v3285_v59  ;;  %v4634_v59 = vld [vmem:[%s6904_s11] sm:$0xff] }
 0x3cb   :  { %3564 = vmatpush.bf16.msrb.mxu2 %v4636_v56 }
 0x3cc   :  { %v3333_v11 = vadd.f32 %v3332_v55, %v3309_v15 }
 0x3cd   :  { %v3262_v36 = vpop.f32.mrf.mxu3 }
 0x3ce   :  { %v6844_v50 = vpop.f32.mrf.mxu2  ;;  %v3263_v12 = vadd.f32 %v3262_v36, %v6840_v24  ;;  %v4649_v24 = vld [vmem:[%s6901_s4] ss:$0 sm:$0xff] }
 0x3cf   :  { %v3394_v52 = vpop.f32.mrf.mxu1  ;;  %vm3412_vm2 = vcmp.eq.s32.totalorder %v7066_v54, %v4649_v24  ;;  %vm3413_vm3 = vcmp.eq.s32.totalorder %v7068_v41, %v4649_v24 }
 0x3d0   :  { %v3287_v48 = vadd.f32 %v3286_v18, %v3263_v12  ;;  %v3382_v0 = vpop.f32.mrf.mxu0  ;;  %v3415_v10 = vsel %vm3412_vm2, 1.0, %v7067_v57  ;;  %v3416_v18 = vsel %vm3413_vm3, 1.0, %v7067_v57  ;;  %v3594_v12 = vpop.permute.xlu2 %3593 }
 0x3d1   :  { %vm3597_vm8 = vcmp.eq.s32.totalorder %v3594_v12, 1 }
 0x3d2   :  { %v3311_v39 = vadd.f32 %v3310_v44, %v3287_v48  ;;  %v4635_v44 = vld [vmem:[%s6904_s11 + $0x8] sm:$0xff] }
 0x3d3   :  { %3565 = vmatpush.bf16.msrb.mxu2 %v4635_v44 }
 0x3d4   :  { %v3335_v20 = vadd.f32 %v3334_v5, %v3311_v39 }
 0x3d5   :  { %v3346_v38 = vpop.f32.mrf.mxu3 }
 0x3d6   :  { %v6846_v19 = vpop.f32.mrf.mxu2  ;;  %v3347_v8 = vadd.f32 %v3346_v38, %v3323_v37 }
 0x3d7   :  { %v3396_v27 = vpop.f32.mrf.mxu1  ;;  %3566 = vmatpush.bf16.msrb.mxu2 %v4634_v59 }
 0x3d8   :  { %v3371_v21 = vadd.f32 %v3370_v22, %v3347_v8  ;;  %v4650_v22 = vld [vmem:[%s6902_s9] ss:$0 sm:$0xff]  ;;  %s4661_s9 = smov 64  }
 0x3da   :  { %v3395_v13 = vadd.f32 %v3394_v52, %v3371_v21  ;;  %v4651_v52 = vld [vmem:[%s6903_s10] ss:$0 sm:$0xff] }
 0x3dd   :  { %v3348_v30 = vpop.f32.mrf.mxu3 }
 0x3de   :  { %v3349_v49 = vadd.f32 %v3348_v30, %v3325_v14  ;;  %v3475_v51 = vpop.f32.mrf.mxu2 }
 0x3df   :  { %v3399_v29 = vpop.f32.mrf.mxu1 }
 0x3e0   :  { %v3373_v33 = vadd.f32 %v3372_v23, %v3349_v49 }
 0x3e2   :  { %v3397_v53 = vadd.f32 %v3396_v27, %v3373_v33 }
 0x3e4   :  { %v3419_v31 = vpack.c.bf16 %v3397_v53, %v3395_v13 }
 0x3e5   :  { %v3351_v2 = vpop.f32.mrf.mxu3 }
 0x3e6   :  { %v3352_v3 = vadd.f32 %v3351_v2, %v3328_v26  ;;  %v7065_v26 = vld [vmem:[#allocation4_spill] sm:$0xff] }
 0x3e7   :  { %v3401_v35 = vpop.f32.mrf.mxu1  ;;  %vm3411_vm12 = vcmp.eq.s32.totalorder %v7065_v26, %v4649_v24 }
 0x3e8   :  { %v3376_v28 = vadd.f32 %v3375_v45, %v3352_v3  ;;  %v3414_v5 = vsel %vm3411_vm12, 1.0, %v7067_v57 }
 0x3e9   :  { %v3417_v16 = vpack.c.bf16 %v3415_v10, %v3414_v5 }
 0x3ea   :  { %v3400_v43 = vadd.f32 %v3399_v29, %v3376_v28 }
 0x3ed   :  { %v3353_v42 = vpop.f32.mrf.mxu3 }
 0x3ee   :  { %v3354_v6 = vadd.f32 %v3353_v42, %v3330_v17  ;;  %v3418_v17 = vpack.c.bf16 %v3416_v18, %v3416_v18 }
 0x3ef   :  { %v3404_v9 = vpop.f32.mrf.mxu1 }
 0x3f0   :  { %v3378_v47 = vadd.f32 %v3377_v62, %v3354_v6 }
 0x3f2   :  { %v3402_v46 = vadd.f32 %v3401_v35, %v3378_v47 }
 0x3f4   :  { %v3420_v37 = vpack.c.bf16 %v3402_v46, %v3400_v43 }
 0x3f5   :  { %v3356_v32 = vpop.f32.mrf.mxu3 }
 0x3f6   :  { %v3357_v4 = vadd.f32 %v3356_v32, %v3333_v11 }
 0x3f7   :  { %v3406_v40 = vpop.f32.mrf.mxu1 }
 0x3f8   :  { %v3381_v14 = vadd.f32 %v3380_v60, %v3357_v4 }
 0x3fa   :  { %v3405_v61 = vadd.f32 %v3404_v9, %v3381_v14 }
 0x3fd   :  { %v3358_v25 = vpop.f32.mrf.mxu3 }
 0x3fe   :  { %v3359_v58 = vadd.f32 %v3358_v25, %v3335_v20 }
 0x400   :  { %v3383_v55 = vadd.f32 %v3382_v0, %v3359_v58 }
 0x402   :  { %v3407_v7 = vadd.f32 %v3406_v40, %v3383_v55 }
 0x404   :  { %v3421_v34 = vpack.c.bf16 %v3407_v7, %v3405_v61 }
 0x406   :  { %3489 = vmatpush.bf16.msrb.mxu3 %v3421_v34 }
 0x40a   :  { %3490 = vmatpush.bf16.msrb.mxu3 %v3420_v37 }
 0x40e   :  { %3491 = vmatpush.bf16.msrb.mxu3 %v3419_v31 }
 0x411   :  { %4475 = vmatmul.msk.bf16.vlgmr.msrb.gmra.mxu3 %vm3477_vm9, %v3417_v16 }
 0x421   :  { %4476 = vmatmul.msk.bf16.gmra.mxu3 %vm3477_vm9, %v3418_v17 }
 0x494   :  { %v3493_v15 = vpop.f32.mrf.mxu3 }
 0x495   :  { %v3494_v11 = vadd.f32 %v3493_v15, %v6842_v63 }
 0x497   :  { %v3506_v36 = vmul.f32 %v4650_v22, %v3494_v11 }
 0x499   :  { %v3513_v27 = vadd.f32 %v4651_v52, %v3506_v36 }
 0x49b   :  { %v3516_v21 = vmax.f32 %v3513_v27, 0.0 }
 0x49c   :  { %v3495_v38 = vpop.f32.mrf.mxu3 }
 0x49d   :  { %v3496_v23 = vadd.f32 %v3495_v38, %v6844_v50  ;;  %v3588_v50 = vpop.permute.xlu0 %3587 }
 0x49e   :  { %vm3595_vm4 = vcmp.eq.s32.totalorder %v3588_v50, 1 }
 0x49f   :  { %v3507_v8 = vmul.f32 %v4650_v22, %v3496_v23 }
 0x4a1   :  { %v3514_v30 = vadd.f32 %v4651_v52, %v3507_v8 }
 0x4a3   :  { %v3517_v49 = vmax.f32 %v3514_v30, 0.0 }
 0x4a4   :  { %v3498_v51 = vpop.f32.mrf.mxu3 }
 0x4a5   :  { %v3519_v33 = vpack.c.bf16 %v3517_v49, %v3516_v21  ;;  %v3499_v63 = vadd.f32 %v3498_v51, %v6846_v19  ;;  %v3591_v19 = vpop.permute.xlu1 %3590 }
 0x4a6   :  { %vm3596_vm7 = vcmp.eq.s32.totalorder %v3591_v19, 1 }
 0x4a7   :  { %4493 = vmatmul.msk.bf16.vlgmr.msrb.gmra.mxu2 %vm998_vm10, %v3519_v33  ;;  %v3508_v45 = vmul.f32 %v4650_v22, %v3499_v63 }
 0x4a9   :  { %v3515_v53 = vadd.f32 %v4651_v52, %v3508_v45 }
 0x4ab   :  { %v3518_v29 = vmax.f32 %v3515_v53, 0.0 }
 0x4ac   :  { %v3500_v13 = vpop.f32.mrf.mxu3 }
 0x4ad   :  { %v3520_v31 = vpack.c.bf16 %v3518_v29, %v3518_v29 }
 0x4b7   :  { %4494 = vmatmul.msk.bf16.gmra.mxu2 %vm998_vm10, %v3520_v31 }
 0x52a   :  { %v3568_v2 = vpop.f32.mrf.mxu2 }
 0x52b   :  { %4652 = vtanh.f32 %v3568_v2 }
 0x531   :  { %v4653_v3 = vpop.eup %4652 }
 0x532   :  { %v3570_v62 = vpop.f32.mrf.mxu2  ;;  %v3598_v35 = vsel %vm3595_vm4, %v4653_v3, -10.0 }
 0x533   :  { %4654 = vtanh.f32 %v3570_v62  ;;  %3604 = vrot.lane.b32.xlu0 %v3598_v35, %s4661_s9 }
 0x539   :  { %v4655_v42 = vpop.eup %4654 }
 0x53a   :  { %v3573_v28 = vpop.f32.mrf.mxu2  ;;  %v3599_v6 = vsel %vm3596_vm7, %v4655_v42, -10.0 }
 0x53b   :  { %4656 = vtanh.f32 %v3573_v28  ;;  %3606 = vrot.lane.b32.xlu1 %v3599_v6, %s4661_s9 }
 0x541   :  { %v4657_v47 = vpop.eup %4656 }
 0x542   :  { %v3575_v43 = vpop.f32.mrf.mxu2  ;;  %v3600_v46 = vsel %vm3597_vm8, %v4657_v47, -10.0 }
 0x543   :  { %3608 = vrot.lane.b32.xlu2 %v3600_v46, %s4661_s9 }
 0x59d   :  { %v3609_v48 = vpop.permute.xlu2 %3608 }
 0x59e   :  { %v3615_v37 = vsel %vm998_vm10, %v3518_v29, %v3609_v48 }
 0x59f   :  { %3618 = vst [vmem:[%s6905_s12 + $0x10] sm:$0xff] %v3615_v37 }
 0x5a5   :  { %v3605_v60 = vpop.permute.xlu0 %3604 }
 0x5a6   :  { %v3613_v32 = vsel %vm998_vm10, %v3516_v21, %v3605_v60 }
 0x5a7   :  { %3616 = vst [vmem:[%s6905_s12] sm:$0xff] %v3613_v32 }
 0x5ad   :  { %v3607_v9 = vpop.permute.xlu1 %3606 }
 0x5ae   :  { %v3614_v39 = vsel %vm998_vm10, %v3517_v49, %v3607_v9 }
 0x5af   :  { %3617 = vst [vmem:[%s6905_s12 + $0x8] sm:$0xff] %v3614_v39 }

// kernel: forward.5
= control target key start
LH: loop header
LB: loop body
LE: loop exit
PB: predicated region body
PF: predicated region fallthrough
CT: control target
= control target key end

     0   :  { %v4673_v0 = vmov 0   ;;  %s4674_s27 = smov 64   ;;  %vm182_vm3 = vcmask 1043456   ;;  %v95_v35 = vlaneseq  ;;  %v6927_v42 = vmov 0.0   ;;  %s6914_s1 = inlined_call_operand.vmem [shape: f32[24,1], index: 1, kind: input, shape index: {}]   ;;  %s6915_s0 = inlined_call_operand.vmem [shape: f32[24,128], index: 0, kind: input, shape index: {}]   ;;  %s6916_s3 = inlined_call_operand.vmem [shape: s32[48,1], index: 3, kind: input, shape index: {}]   ;;  %s6917_s5 = inlined_call_operand.vmem [shape: f32[48,1], index: 5, kind: input, shape index: {}]   ;;  %s6918_s2 = inlined_call_operand.vmem [shape: bf16[48,32], index: 2, kind: input, shape index: {}]   ;;  %s6919_s6 = inlined_call_operand.vmem [shape: bf16[2048,64], index: 6, kind: input, shape index: {}]   ;;  %s6920_s7 = inlined_call_operand.vmem [shape: bf16[64,64], index: 7, kind: input, shape index: {}]   ;;  %s6921_s8 = inlined_call_operand.vmem [shape: bf16[64,64], index: 8, kind: input, shape index: {}]   ;;  %s6922_s4 = inlined_call_operand.vmem [shape: s32[1,48], index: 4, kind: input, shape index: {}]   ;;  %s6923_s9 = inlined_call_operand.vmem [shape: f32[1,64], index: 9, kind: input, shape index: {}]   ;;  %s6924_s10 = inlined_call_operand.vmem [shape: f32[1,64], index: 10, kind: input, shape index: {}]   ;;  %s6925_s11 = inlined_call_operand.vmem [shape: bf16[64,64], index: 11, kind: input, shape index: {}]   ;;  %s6926_s12 = inlined_call_operand.vmem [shape: f32[24,128], index: 12, kind: output, shape index: {}]  }
   0x1   :  { %4662 = vset.pattern.permute.xlu2 %v4673_v0  ;;  %v42_v1 = vld [vmem:[%s6914_s1] sm:$0xff]  ;;  %v47_v2 = vld [vmem:[%s6915_s0 + $0x10] sm:$0xff]  ;;  %4661 = vset.pattern.permute.xlu0 %v4673_v0  ;;  %v43_v4 = vld [vmem:[%s6914_s1 + $0x8] sm:$0xff]  ;;  %vm172_vm6 = vcmask 195584  }
   0x2   :  { %v45_v3 = vld [vmem:[%s6915_s0] sm:$0xff]  ;;  %65 = vperm.xlu2 %4662, %v42_v1   ;;  %55 = vrot.lane.b32.xlu0 %v47_v2, %s4674_s27  ;;  %v44_v5 = vld [vmem:[%s6914_s1 + $0x10] sm:$0xff]  ;;  %v46_v6 = vld [vmem:[%s6915_s0 + $0x8] sm:$0xff]  ;;  %vm3596_vm0 = vcmp.gt.f32.partialorder %v43_v4, 0.0  ;;  %vm3595_vm2 = vcmp.gt.f32.partialorder %v42_v1, 0.0  ;;  %v4804_v39 = vand.u32 127, %v95_v35 }
   0x3   :  { %51 = vrot.lane.b32.xlu1 %v45_v3, %s4674_s27  ;;  %v98_v7 = vld [vmem:[%s6916_s3 + $0x8] sm:$0xff]  ;;  %v89_v8 = vld [vmem:[%s6917_s5] sm:$0xff]  ;;  %v99_v10 = vld [vmem:[%s6916_s3 + $0x10] sm:$0xff]  ;;  %vm3597_vm1 = vcmp.gt.f32.partialorder %v44_v5, 0.0  ;;  %v3599_v19 = vsel %vm3596_vm0, 1, %v4673_v0  ;;  %v3598_v21 = vsel %vm3595_vm2, 1, %v4673_v0 }
   0x4   :  { %4663 = vset.pattern.permute.xlu1 %v4673_v0  ;;  %v97_v9 = vld [vmem:[%s6916_s3] sm:$0xff]  ;;  %v100_v11 = vld [vmem:[%s6916_s3 + $0x18] sm:$0xff]  ;;  %v90_v12 = vld [vmem:[%s6917_s5 + $0x8] sm:$0xff]  ;;  %v3600_v20 = vsel %vm3597_vm1, 1, %v4673_v0  ;;  %v4812_v49 = vshrl.u32 %v95_v35, 7  ;;  %v4823_v58 = vadd.s32 128, %v4804_v39 }
   0x5   :  { %v92_v13 = vld [vmem:[%s6917_s5 + $0x18] sm:$0xff]  ;;  %v101_v14 = vld [vmem:[%s6916_s3 + $0x20] sm:$0xff]  ;;  %v91_v15 = vld [vmem:[%s6917_s5 + $0x10] sm:$0xff]  ;;  %v4840_v0 = vadd.s32 384, %v4804_v39 }
   0x6   :  { %v93_v16 = vld [vmem:[%s6917_s5 + $0x20] sm:$0xff]  ;;  %v94_v17 = vld [vmem:[%s6917_s5 + $0x28] sm:$0xff]  ;;  %6942 = vst [vmem:[#allocation4_spill] sm:$0xff] %v4812_v49  ;;  %v235_v51 = vadd.s32 48, %v4812_v49  ;;  %v236_v52 = vadd.s32 56, %v4812_v49 }
   0x7   :  { %v102_v18 = vld [vmem:[%s6916_s3 + $0x28] sm:$0xff] }
   0x8   :  { %v4816_v54 = vmul.u32 32, %v235_v51  ;;  %v4818_v55 = vmul.u32 32, %v236_v52  ;;  %v379_v56 = vadd.s32 1, %v235_v51  ;;  %v380_v57 = vadd.s32 1, %v236_v52 }
   0xa   :  { %70 = vperm.xlu2 %4662, %v43_v4   ;;  %75 = vperm.xlu0 %4661, %v44_v5   ;;  %vm341_vm9 = vcmp.ge.s32.totalorder %v4804_v39, %v4816_v54  ;;  %v4827_v60 = vmul.u32 32, %v379_v56  ;;  %v4829_v61 = vmul.u32 32, %v380_v57  ;;  %vm357_vm10 = vcmp.ge.s32.totalorder %v4804_v39, %v4818_v55 }
   0xb   :  { %53 = vrot.lane.b32.xlu1 %v46_v6, %s4674_s27  ;;  %vm342_vm14 = vcmp.ge.s32.totalorder %v4823_v58, %v4816_v54  ;;  %vm358_vm1 = vcmp.ge.s32.totalorder %v4823_v58, %v4818_v55  ;;  %v6931_v4 = vmov 1.0|1.0  }
   0xc   :  { %vm485_vm11 = vcmp.lt.s32.totalorder %v4804_v39, %v4827_v60  ;;  %vm501_vm12 = vcmp.lt.s32.totalorder %v4804_v39, %v4829_v61  ;;  %vm486_vm15 = vcmp.lt.s32.totalorder %v4823_v58, %v4827_v60  ;;  %vm502_vm2 = vcmp.lt.s32.totalorder %v4823_v58, %v4829_v61 }
   0xd   :  { %vm613_vm13 = vmand %vm341_vm9, %vm485_vm11  ;;  %vm360_vm9 = vcmp.ge.s32.totalorder %v4840_v0, %v4818_v55 }
   0xe   :  { %vm629_vm0 = vmand %vm357_vm10, %vm501_vm12  ;;  %vm504_vm10 = vcmp.lt.s32.totalorder %v4840_v0, %v4829_v61 }
  0x12   :  { %107 = vperm.xlu2 %4662, %v98_v7   ;;  %135 = vperm.xlu0 %4661, %v89_v8  }
  0x13   :  { %104 = vperm.xlu1 %4663, %v97_v9  }
  0x1a   :  { %110 = vperm.xlu2 %4662, %v99_v10   ;;  %113 = vperm.xlu0 %4661, %v100_v11  }
  0x1b   :  { %140 = vperm.xlu1 %4663, %v90_v12  }
  0x22   :  { %150 = vperm.xlu2 %4662, %v92_v13   ;;  %116 = vperm.xlu0 %4661, %v101_v14  }
  0x23   :  { %145 = vperm.xlu1 %4663, %v91_v15   ;;  %v233_v15 = vadd.s32 32, %v4812_v49 }
  0x2a   :  { %155 = vperm.xlu2 %4662, %v93_v16   ;;  %160 = vperm.xlu0 %4661, %v94_v17   ;;  %v234_v16 = vadd.s32 40, %v4812_v49  ;;  %v377_v17 = vadd.s32 1, %v233_v15 }
  0x2b   :  { %119 = vperm.xlu1 %4663, %v102_v18  }
  0x2c   :  { %v378_v18 = vadd.s32 1, %v234_v16 }
  0x32   :  { %3605 = vperm.xlu2 %4662, %v3599_v19   ;;  %3608 = vperm.xlu0 %4661, %v3600_v20   ;;  %v4870_v19 = vmul.u32 32, %v233_v15  ;;  %v4872_v20 = vmul.u32 32, %v234_v16 }
  0x33   :  { %3602 = vperm.xlu1 %4663, %v3598_v21   ;;  %v4874_v21 = vmul.u32 32, %v377_v17  ;;  %v838_v17 = vand.u32 31, %v4823_v58 }
  0x5c   :  { %v66_v23 = vpop.permute.xlu2 %65 }
  0x64   :  { %v71_v31 = vpop.permute.xlu2 %70 }
  0x6c   :  { %v108_v40 = vpop.permute.xlu2 %107 }
  0x6d   :  { %vm122_vm5 = vcmp.eq.s32.totalorder %v4804_v39, %v108_v40 }
  0x6e   :  { %v128_v44 = vsel %vm122_vm5, 1.0, %v6927_v42  ;;  %vm344_vm5 = vcmp.ge.s32.totalorder %v4840_v0, %v4816_v54 }
  0x74   :  { %v56_v22 = vpop.permute.xlu0 %55  ;;  %v111_v50 = vpop.permute.xlu2 %110 }
  0x75   :  { %v52_v24 = vpop.permute.xlu1 %51  ;;  %v62_v25 = vmul.f32 %v56_v22, %v47_v2  ;;  %vm123_vm7 = vcmp.eq.s32.totalorder %v4804_v39, %v111_v50  ;;  %v4876_v22 = vmul.u32 32, %v378_v18  ;;  %v5048_v50 = vadd.s32 896, %v4804_v39 }
  0x76   :  { %v60_v29 = vmul.f32 %v52_v24, %v45_v3  ;;  %v129_v62 = vsel %vm123_vm7, 1.0, %v6927_v42  ;;  %vm488_vm7 = vcmp.lt.s32.totalorder %v4840_v0, %v4827_v60  ;;  %v4882_v24 = vadd.s32 24, %v4812_v49 }
  0x77   :  { %vm616_vm12 = vmand %vm344_vm5, %vm488_vm7  ;;  %vm310_vm5 = vcmp.ge.s32.totalorder %v4823_v58, %v4870_v19  ;;  %vm454_vm7 = vcmp.lt.s32.totalorder %v4823_v58, %v4874_v21 }
  0x78   :  { %v78_v36 = vmul.f32 %v66_v23, %v60_v29  ;;  %v4879_v23 = vadd.s32 16, %v4812_v49  ;;  %v4917_v29 = vmul.u32 32, %v4882_v24 }
  0x7a   :  { %6943 = vst [vmem:[#allocation5_spill] sm:$0xff] %v4879_v23 }
  0x7c   :  { %v76_v26 = vpop.permute.xlu0 %75  ;;  %v151_v2 = vpop.permute.xlu2 %150 }
  0x7d   :  { %v80_v27 = vmul.f32 %v76_v26, %v62_v25  ;;  %v54_v28 = vpop.permute.xlu1 %53  ;;  %v4901_v25 = vmul.u32 32, %v4879_v23  ;;  %v375_v26 = vadd.s32 1, %v4879_v23 }
  0x7e   :  { %v61_v30 = vmul.f32 %v54_v28, %v46_v6 }
  0x7f   :  { %v4799_v32 = vpack.c.bf16 %v80_v27, %v80_v27  ;;  %v376_v27 = vadd.s32 1, %v4882_v24 }
  0x80   :  { %v79_v33 = vmul.f32 %v71_v31, %v61_v30  ;;  %v4921_v30 = vmul.u32 32, %v375_v26 }
  0x81   :  { %6940 = vst [vmem:[#allocation2_spill] sm:$0xff] %v4799_v32  ;;  %v184_v34 = vsel %vm182_vm3, %v4799_v32, 0  ;;  %vm3641_vm3 = vmpackc.low %vm629_vm0, %vm613_vm13  ;;  %v4923_v31 = vmul.u32 32, %v376_v27  ;;  %v5598_v27 = vadd.s32 1792, %v4804_v39 }
  0x82   :  { %192 = vmatpush.bf16.msra.mxu0 %v184_v34  ;;  %v4802_v37 = vpack.c.bf16 %v79_v33, %v78_v36  ;;  %3642 = vmatpush.bf16.msk.msra.mxu1 %vm3641_vm3, %v6931_v4  ;;  %vm632_vm13 = vmand %vm360_vm9, %vm504_vm10  ;;  %vm469_vm3 = vcmp.lt.s32.totalorder %v4804_v39, %v4876_v22  ;;  %vm326_vm9 = vcmp.ge.s32.totalorder %v4823_v58, %v4872_v20  ;;  %v4926_v33 = vadd.s32 8, %v4812_v49 }
  0x83   :  { %vm470_vm10 = vcmp.lt.s32.totalorder %v4823_v58, %v4876_v22  ;;  %v373_v34 = vadd.s32 1, %v4812_v49  ;;  %v4952_v36 = vmul.u32 32, %v4812_v49 }
  0x84   :  { %6941 = vst [vmem:[#allocation3_spill] sm:$0xff] %v4802_v37  ;;  %v136_v41 = vpop.permute.xlu0 %135  ;;  %v156_v12 = vpop.permute.xlu2 %155  ;;  %v374_v35 = vadd.s32 1, %v4926_v33  ;;  %v4962_v40 = vmul.u32 32, %v4926_v33 }
  0x85   :  { %v105_v38 = vpop.permute.xlu1 %104  ;;  %6946 = vst [vmem:[#allocation6_spill] sm:$0xff] %v4926_v33 }
  0x86   :  { %193 = vmatpush.bf16.msra.mxu0 %v4802_v37  ;;  %vm121_vm4 = vcmp.eq.s32.totalorder %v4804_v39, %v105_v38  ;;  %v4954_v38 = vmul.u32 32, %v373_v34  ;;  %v5698_v34 = vld [vmem:[%s6918_s2] sm:$0xff] }
  0x87   :  { %v127_v43 = vsel %vm121_vm4, 1.0, %v6927_v42  ;;  %vm614_vm4 = vmand %vm342_vm14, %vm486_vm15 }
  0x88   :  { %v163_v46 = vmul.f32 %v136_v41, %v127_v43  ;;  %vm3674_vm14 = vmpackc.low %vm632_vm13, %vm616_vm12  ;;  %vm312_vm13 = vcmp.ge.s32.totalorder %v4840_v0, %v4870_v19  ;;  %v4964_v41 = vmul.u32 32, %v374_v35  ;;  %v5001_v43 = vadd.s32 640, %v4804_v39 }
  0x89   :  { %vm4906_vm12 = vmand %vm310_vm5, %vm454_vm7  ;;  %vm293_vm7 = vcmp.ge.s32.totalorder %v4804_v39, %v4917_v29 }
  0x8a   :  { %3675 = vmatpush.bf16.msk.msrb.mxu0 %vm3674_vm14, %v6931_v4  ;;  %vm328_vm14 = vcmp.ge.s32.totalorder %v4840_v0, %v4872_v20 }
  0x8c   :  { %v114_v53 = vpop.permute.xlu0 %113 }
  0x8d   :  { %v141_v45 = vpop.permute.xlu1 %140  ;;  %vm124_vm8 = vcmp.eq.s32.totalorder %v4804_v39, %v114_v53 }
  0x8e   :  { %v164_v47 = vmul.f32 %v141_v45, %v128_v44  ;;  %v130_v63 = vsel %vm124_vm8, 1.0, %v6927_v42  ;;  %vm630_vm8 = vmand %vm358_vm1, %vm502_vm2  ;;  %vm325_vm1 = vcmp.ge.s32.totalorder %v4804_v39, %v4872_v20  ;;  %vm453_vm2 = vcmp.lt.s32.totalorder %v4804_v39, %v4874_v21 }
  0x8f   :  { %v166_v3 = vmul.f32 %v151_v2, %v130_v63  ;;  %vm3652_vm11 = vmpackc.low %vm630_vm8, %vm614_vm4  ;;  %v5228_v2 = vadd.s32 1024, %v4804_v39 }
  0x90   :  { %v169_v48 = vpack.c.bf16 %v164_v47, %v163_v46  ;;  %3653 = vmatpush.bf16.msk.msra.mxu2 %vm3652_vm11, %v6931_v4  ;;  %4653 = vmatpush.bf16.msk.msra.mxu3 %vm3652_vm11, %v6931_v4  ;;  %vm597_vm8 = vmand %vm325_vm1, %vm469_vm3  ;;  %vm277_vm3 = vcmp.ge.s32.totalorder %v4804_v39, %v4901_v25  ;;  %v5040_v46 = vadd.s32 256, %v4804_v39  ;;  %v5043_v47 = vadd.s32 512, %v4804_v39 }
  0x92   :  { %3638 = vmatmul.msk.bf16.vlgmr.msra.gmra.mxu0 %vm172_vm6, %v169_v48 }
  0x94   :  { %v117_v6 = vpop.permute.xlu0 %116 }
  0x95   :  { %v146_v59 = vpop.permute.xlu1 %145  ;;  %vm125_vm0 = vcmp.eq.s32.totalorder %v4804_v39, %v117_v6  ;;  %v5362_v6 = vadd.s32 1664, %v4804_v39 }
  0x96   :  { %v165_v1 = vmul.f32 %v146_v59, %v129_v62  ;;  %v131_v9 = vsel %vm125_vm0, 1.0, %v6927_v42  ;;  %vm598_vm0 = vmand %vm326_vm9, %vm470_vm10  ;;  %v5163_v59 = vadd.s32 1152, %v4804_v39 }
  0x97   :  { %v167_v13 = vmul.f32 %v156_v12, %v131_v9  ;;  %vm3654_vm1 = vmpackc.low %vm598_vm0, %vm4906_vm12  ;;  %vm422_vm12 = vcmp.lt.s32.totalorder %v4823_v58, %v4921_v30  ;;  %v5425_v9 = vadd.s32 1536, %v4804_v39 }
  0x98   :  { %v170_v5 = vpack.c.bf16 %v166_v3, %v165_v1  ;;  %3655 = vmatpush.bf16.msk.msra.mxu2 %vm3654_vm1, %v6931_v4  ;;  %4654 = vmatpush.bf16.msk.msra.mxu3 %vm3654_vm1, %v6931_v4  ;;  %vm280_vm1 = vcmp.ge.s32.totalorder %v4840_v0, %v4901_v25  ;;  %v5225_v1 = vadd.s32 768, %v4804_v39 }
  0x9c   :  { %v161_v10 = vpop.permute.xlu0 %160 }
  0x9d   :  { %v120_v7 = vpop.permute.xlu1 %119 }
  0x9e   :  { %vm126_vm15 = vcmp.eq.s32.totalorder %v4804_v39, %v120_v7 }
  0x9f   :  { %v132_v8 = vsel %vm126_vm15, 1.0, %v6927_v42  ;;  %vm456_vm15 = vcmp.lt.s32.totalorder %v4840_v0, %v4874_v21 }
  0xa0   :  { %v168_v11 = vmul.f32 %v161_v10, %v132_v8  ;;  %v5422_v8 = vadd.s32 1280, %v4804_v39  ;;  %v839_v10 = vand.u32 31, %v5040_v46 }
  0xa2   :  { %3639 = vmatmul.msk.bf16.gmra.mxu0 %vm172_vm6, %v170_v5  ;;  %v171_v14 = vpack.c.bf16 %v168_v11, %v167_v13  ;;  %v5235_v5 = vadd.s32 1408, %v4804_v39  ;;  %v5432_v11 = vadd.s32 1920, %v4804_v39 }
  0xb2   :  { %3640 = vmatmul.msk.bf16.gmra.mxu0 %vm172_vm6, %v171_v14  ;;  %vm309_vm6 = vcmp.ge.s32.totalorder %v4804_v39, %v4870_v19 }
  0xb3   :  { %vm581_vm4 = vmand %vm309_vm6, %vm453_vm2  ;;  %vm472_vm6 = vcmp.lt.s32.totalorder %v4840_v0, %v4876_v22 }
  0xb4   :  { %vm3643_vm11 = vmpackc.low %vm597_vm8, %vm581_vm4  ;;  %vm421_vm4 = vcmp.lt.s32.totalorder %v4804_v39, %v4921_v30  ;;  %vm437_vm8 = vcmp.lt.s32.totalorder %v4804_v39, %v4923_v31 }
  0xb5   :  { %3644 = vmatpush.bf16.msk.msra.mxu1 %vm3643_vm11, %v6931_v4  ;;  %vm584_vm2 = vmand %vm312_vm13, %vm456_vm15  ;;  %vm278_vm11 = vcmp.ge.s32.totalorder %v4823_v58, %v4901_v25  ;;  %vm438_vm15 = vcmp.lt.s32.totalorder %v4823_v58, %v4923_v31 }
  0xb6   :  { %vm600_vm5 = vmand %vm328_vm14, %vm472_vm6  ;;  %vm294_vm14 = vcmp.ge.s32.totalorder %v4823_v58, %v4917_v29 }
  0xb7   :  { %vm3676_vm9 = vmpackc.low %vm600_vm5, %vm584_vm2  ;;  %vm424_vm2 = vcmp.lt.s32.totalorder %v4840_v0, %v4921_v30  ;;  %vm440_vm5 = vcmp.lt.s32.totalorder %v4840_v0, %v4923_v31 }
  0xb8   :  { %3677 = vmatpush.bf16.msk.msrb.mxu0 %vm3676_vm9, %v6931_v4  ;;  %vm549_vm10 = vmand %vm277_vm3, %vm421_vm4  ;;  %vm296_vm4 = vcmp.ge.s32.totalorder %v4840_v0, %v4917_v29  ;;  %vm245_vm9 = vcmp.ge.s32.totalorder %v4804_v39, %v4952_v36 }
  0xb9   :  { %vm565_vm13 = vmand %vm293_vm7, %vm437_vm8 }
  0xba   :  { %vm3645_vm0 = vmpackc.low %vm565_vm13, %vm549_vm10  ;;  %vm389_vm10 = vcmp.lt.s32.totalorder %v4804_v39, %v4954_v38  ;;  %vm405_vm13 = vcmp.lt.s32.totalorder %v4804_v39, %v4964_v41 }
  0xbb   :  { %3646 = vmatpush.bf16.msk.msra.mxu1 %vm3645_vm0, %v6931_v4  ;;  %vm550_vm6 = vmand %vm278_vm11, %vm422_vm12  ;;  %vm261_vm12 = vcmp.ge.s32.totalorder %v4804_v39, %v4962_v40  ;;  %vm246_vm0 = vcmp.ge.s32.totalorder %v4823_v58, %v4952_v36 }
  0xbc   :  { %vm566_vm3 = vmand %vm294_vm14, %vm438_vm15 }
  0xbd   :  { %vm3656_vm7 = vmpackc.low %vm566_vm3, %vm550_vm6  ;;  %vm390_vm6 = vcmp.lt.s32.totalorder %v4823_v58, %v4954_v38  ;;  %vm406_vm3 = vcmp.lt.s32.totalorder %v4823_v58, %v4964_v41 }
  0xbe   :  { %3657 = vmatpush.bf16.msk.msra.mxu2 %vm3656_vm7, %v6931_v4  ;;  %vm552_vm8 = vmand %vm280_vm1, %vm424_vm2  ;;  %4655 = vmatpush.bf16.msk.msra.mxu3 %vm3656_vm7, %v6931_v4  ;;  %vm262_vm2 = vcmp.ge.s32.totalorder %v4823_v58, %v4962_v40  ;;  %vm248_vm7 = vcmp.ge.s32.totalorder %v4840_v0, %v4952_v36 }
  0xbf   :  { %vm568_vm11 = vmand %vm296_vm4, %vm440_vm5 }
  0xc0   :  { %vm3678_vm14 = vmpackc.low %vm568_vm11, %vm552_vm8  ;;  %vm392_vm8 = vcmp.lt.s32.totalorder %v4840_v0, %v4954_v38  ;;  %vm408_vm11 = vcmp.lt.s32.totalorder %v4840_v0, %v4964_v41 }
  0xc1   :  { %3679 = vmatpush.bf16.msk.msrb.mxu0 %vm3678_vm14, %v6931_v4  ;;  %vm517_vm15 = vmand %vm245_vm9, %vm389_vm10  ;;  %vm264_vm10 = vcmp.ge.s32.totalorder %v4840_v0, %v4962_v40 }
  0xc2   :  { %vm533_vm1 = vmand %vm261_vm12, %vm405_vm13 }
  0xc3   :  { %vm3647_vm4 = vmpackc.low %vm533_vm1, %vm517_vm15  ;;  %vm490_vm1 = vcmp.lt.s32.totalorder %v5001_v43, %v4827_v60 }
  0xc4   :  { %3648 = vmatpush.bf16.msk.msra.mxu1 %vm3647_vm4, %v6931_v4  ;;  %vm518_vm5 = vmand %vm246_vm0, %vm390_vm6  ;;  %vm346_vm0 = vcmp.ge.s32.totalorder %v5001_v43, %v4816_v54  ;;  %vm362_vm6 = vcmp.ge.s32.totalorder %v5001_v43, %v4818_v55 }
  0xc5   :  { %vm534_vm9 = vmand %vm262_vm2, %vm406_vm3  ;;  %vm506_vm2 = vcmp.lt.s32.totalorder %v5001_v43, %v4829_v61 }
  0xc6   :  { %vm3658_vm12 = vmpackc.low %vm534_vm9, %vm518_vm5  ;;  %vm458_vm9 = vcmp.lt.s32.totalorder %v5001_v43, %v4874_v21 }
  0xc7   :  { %3659 = vmatpush.bf16.msk.msra.mxu2 %vm3658_vm12, %v6931_v4  ;;  %vm520_vm13 = vmand %vm248_vm7, %vm392_vm8  ;;  %4656 = vmatpush.bf16.msk.msra.mxu3 %vm3658_vm12, %v6931_v4  ;;  %vm314_vm7 = vcmp.ge.s32.totalorder %v5001_v43, %v4870_v19  ;;  %vm330_vm8 = vcmp.ge.s32.totalorder %v5001_v43, %v4872_v20 }
  0xc8   :  { %vm536_vm14 = vmand %vm264_vm10, %vm408_vm11  ;;  %vm474_vm10 = vcmp.lt.s32.totalorder %v5001_v43, %v4876_v22 }
  0xc9   :  { %vm3680_vm15 = vmpackc.low %vm536_vm14, %vm520_vm13  ;;  %vm282_vm13 = vcmp.ge.s32.totalorder %v5001_v43, %v4901_v25  ;;  %vm298_vm14 = vcmp.ge.s32.totalorder %v5001_v43, %v4917_v29 }
  0xca   :  { %3681 = vmatpush.bf16.msk.msrb.mxu0 %vm3680_vm15, %v6931_v4  ;;  %vm618_vm3 = vmand %vm346_vm0, %vm490_vm1  ;;  %vm426_vm15 = vcmp.lt.s32.totalorder %v5001_v43, %v4921_v30  ;;  %vm442_vm0 = vcmp.lt.s32.totalorder %v5001_v43, %v4923_v31 }
  0xcb   :  { %vm634_vm4 = vmand %vm362_vm6, %vm506_vm2 }
  0xcc   :  { %vm3696_vm5 = vmpackc.low %vm634_vm4, %vm618_vm3  ;;  %vm250_vm4 = vcmp.ge.s32.totalorder %v5001_v43, %v4952_v36 }
  0xcd   :  { %3697 = vmatpush.bf16.msk.msrb.mxu2 %vm3696_vm5, %v6931_v4  ;;  %vm586_vm11 = vmand %vm314_vm7, %vm458_vm9  ;;  %vm266_vm5 = vcmp.ge.s32.totalorder %v5001_v43, %v4962_v40  ;;  %vm394_vm7 = vcmp.lt.s32.totalorder %v5001_v43, %v4954_v38 }
  0xce   :  { %vm602_vm12 = vmand %vm330_vm8, %vm474_vm10  ;;  %vm410_vm8 = vcmp.lt.s32.totalorder %v5001_v43, %v4964_v41  ;;  %vm1013_vm10 = vcmask 523264  }
  0xcf   :  { %vm3698_vm6 = vmpackc.low %vm602_vm12, %vm586_vm11 }
  0xd0   :  { %vm554_vm1 = vmand %vm282_vm13, %vm426_vm15  ;;  %vm343_vm13 = vcmp.ge.s32.totalorder %v5040_v46, %v4816_v54  ;;  %vm487_vm15 = vcmp.lt.s32.totalorder %v5040_v46, %v4827_v60 }
  0xd1   :  { %3699 = vmatpush.bf16.msk.msrb.mxu2 %vm3698_vm6, %v6931_v4  ;;  %vm570_vm2 = vmand %vm298_vm14, %vm442_vm0  ;;  %vm359_vm14 = vcmp.ge.s32.totalorder %v5040_v46, %v4818_v55  ;;  %vm503_vm0 = vcmp.lt.s32.totalorder %v5040_v46, %v4829_v61 }
  0xd2   :  { %vm3700_vm3 = vmpackc.low %vm570_vm2, %vm554_vm1  ;;  %vm345_vm1 = vcmp.ge.s32.totalorder %v5043_v47, %v4816_v54  ;;  %vm489_vm2 = vcmp.lt.s32.totalorder %v5043_v47, %v4827_v60 }
  0xd3   :  { %vm522_vm9 = vmand %vm250_vm4, %vm394_vm7  ;;  %vm361_vm4 = vcmp.ge.s32.totalorder %v5043_v47, %v4818_v55 }
  0xd4   :  { %vm538_vm11 = vmand %vm266_vm5, %vm410_vm8  ;;  %vm505_vm5 = vcmp.lt.s32.totalorder %v5043_v47, %v4829_v61 }
  0xd5   :  { %3701 = vmatpush.bf16.msk.msrb.mxu2 %vm3700_vm3, %v6931_v4  ;;  %vm3702_vm12 = vmpackc.low %vm538_vm11, %vm522_vm9  ;;  %vm348_vm9 = vcmp.ge.s32.totalorder %v5048_v50, %v4816_v54  ;;  %vm492_vm11 = vcmp.lt.s32.totalorder %v5048_v50, %v4827_v60 }
  0xd6   :  { %vm615_vm6 = vmand %vm343_vm13, %vm487_vm15  ;;  %vm364_vm13 = vcmp.ge.s32.totalorder %v5048_v50, %v4818_v55 }
  0xd7   :  { %vm631_vm3 = vmand %vm359_vm14, %vm503_vm0  ;;  %vm508_vm14 = vcmp.lt.s32.totalorder %v5048_v50, %v4829_v61 }
  0xd8   :  { %vm3663_vm7 = vmpackc.low %vm631_vm3, %vm615_vm6  ;;  %vm311_vm6 = vcmp.ge.s32.totalorder %v5040_v46, %v4870_v19  ;;  %vm327_vm3 = vcmp.ge.s32.totalorder %v5040_v46, %v4872_v20 }
  0xd9   :  { %3703 = vmatpush.bf16.msk.msrb.mxu2 %vm3702_vm12, %v6931_v4  ;;  %3664 = vmatpush.bf16.msk.msrb.mxu3 %vm3663_vm7, %v6931_v4  ;;  %vm617_vm8 = vmand %vm345_vm1, %vm489_vm2  ;;  %vm455_vm1 = vcmp.lt.s32.totalorder %v5040_v46, %v4874_v21 }
  0xda   :  { %vm633_vm12 = vmand %vm361_vm4, %vm505_vm5  ;;  %vm471_vm4 = vcmp.lt.s32.totalorder %v5040_v46, %v4876_v22 }
  0xdb   :  { %vm3685_vm15 = vmpackc.low %vm633_vm12, %vm617_vm8  ;;  %vm313_vm8 = vcmp.ge.s32.totalorder %v5043_v47, %v4870_v19  ;;  %vm329_vm12 = vcmp.ge.s32.totalorder %v5043_v47, %v4872_v20 }
  0xdc   :  { %3686 = vmatpush.bf16.msk.msrb.mxu1 %vm3685_vm15, %v6931_v4  ;;  %vm620_vm0 = vmand %vm348_vm9, %vm492_vm11  ;;  %vm457_vm9 = vcmp.lt.s32.totalorder %v5043_v47, %v4874_v21 }
  0xdd   :  { %vm636_vm2 = vmand %vm364_vm13, %vm508_vm14  ;;  %vm473_vm13 = vcmp.lt.s32.totalorder %v5043_v47, %v4876_v22 }
  0xde   :  { %vm3718_vm5 = vmpackc.low %vm636_vm2, %vm620_vm0  ;;  %vm316_vm0 = vcmp.ge.s32.totalorder %v5048_v50, %v4870_v19  ;;  %vm332_vm2 = vcmp.ge.s32.totalorder %v5048_v50, %v4872_v20 }
  0xdf   :  { %3719 = vmatpush.bf16.msk.msra.mxu0 %vm3718_vm5, %v6931_v4  ;;  %vm583_vm7 = vmand %vm311_vm6, %vm455_vm1  ;;  %vm460_vm6 = vcmp.lt.s32.totalorder %v5048_v50, %v4874_v21 }
  0xe0   :  { %vm599_vm11 = vmand %vm327_vm3, %vm471_vm4  ;;  %vm476_vm3 = vcmp.lt.s32.totalorder %v5048_v50, %v4876_v22 }
  0xe1   :  { %vm3665_vm14 = vmpackc.low %vm599_vm11, %vm583_vm7  ;;  %vm279_vm7 = vcmp.ge.s32.totalorder %v5040_v46, %v4901_v25  ;;  %vm295_vm11 = vcmp.ge.s32.totalorder %v5040_v46, %v4917_v29 }
  0xe2   :  { %3666 = vmatpush.bf16.msk.msrb.mxu3 %vm3665_vm14, %v6931_v4  ;;  %vm585_vm15 = vmand %vm313_vm8, %vm457_vm9  ;;  %vm423_vm8 = vcmp.lt.s32.totalorder %v5040_v46, %v4921_v30 }
  0xe3   :  { %vm601_vm1 = vmand %vm329_vm12, %vm473_vm13  ;;  %vm439_vm12 = vcmp.lt.s32.totalorder %v5040_v46, %v4923_v31 }
  0xe4   :  { %vm3687_vm4 = vmpackc.low %vm601_vm1, %vm585_vm15  ;;  %vm281_vm15 = vcmp.ge.s32.totalorder %v5043_v47, %v4901_v25  ;;  %vm297_vm1 = vcmp.ge.s32.totalorder %v5043_v47, %v4917_v29 }
  0xe5   :  { %3688 = vmatpush.bf16.msk.msrb.mxu1 %vm3687_vm4, %v6931_v4  ;;  %vm588_vm5 = vmand %vm316_vm0, %vm460_vm6  ;;  %vm425_vm0 = vcmp.lt.s32.totalorder %v5043_v47, %v4921_v30 }
  0xe6   :  { %vm604_vm9 = vmand %vm332_vm2, %vm476_vm3  ;;  %vm441_vm2 = vcmp.lt.s32.totalorder %v5043_v47, %v4923_v31 }
  0xe7   :  { %vm3720_vm13 = vmpackc.low %vm604_vm9, %vm588_vm5  ;;  %vm284_vm5 = vcmp.ge.s32.totalorder %v5048_v50, %v4901_v25  ;;  %vm300_vm9 = vcmp.ge.s32.totalorder %v5048_v50, %v4917_v29 }
  0xe8   :  { %3721 = vmatpush.bf16.msk.msra.mxu0 %vm3720_vm13, %v6931_v4  ;;  %vm551_vm14 = vmand %vm279_vm7, %vm423_vm8  ;;  %vm428_vm7 = vcmp.lt.s32.totalorder %v5048_v50, %v4921_v30 }
  0xe9   :  { %vm567_vm6 = vmand %vm295_vm11, %vm439_vm12  ;;  %vm444_vm11 = vcmp.lt.s32.totalorder %v5048_v50, %v4923_v31 }
  0xea   :  { %vm3667_vm3 = vmpackc.low %vm567_vm6, %vm551_vm14  ;;  %vm247_vm14 = vcmp.ge.s32.totalorder %v5040_v46, %v4952_v36  ;;  %vm263_vm6 = vcmp.ge.s32.totalorder %v5040_v46, %v4962_v40 }
  0xeb   :  { %3668 = vmatpush.bf16.msk.msrb.mxu3 %vm3667_vm3, %v6931_v4  ;;  %vm553_vm4 = vmand %vm281_vm15, %vm425_vm0  ;;  %vm391_vm15 = vcmp.lt.s32.totalorder %v5040_v46, %v4954_v38 }
  0xec   :  { %vm569_vm8 = vmand %vm297_vm1, %vm441_vm2  ;;  %vm407_vm1 = vcmp.lt.s32.totalorder %v5040_v46, %v4964_v41 }
  0xed   :  { %vm3689_vm12 = vmpackc.low %vm569_vm8, %vm553_vm4  ;;  %vm249_vm4 = vcmp.ge.s32.totalorder %v5043_v47, %v4952_v36  ;;  %vm265_vm8 = vcmp.ge.s32.totalorder %v5043_v47, %v4962_v40 }
  0xee   :  { %3690 = vmatpush.bf16.msk.msrb.mxu1 %vm3689_vm12, %v6931_v4  ;;  %vm556_vm13 = vmand %vm284_vm5, %vm428_vm7  ;;  %vm393_vm5 = vcmp.lt.s32.totalorder %v5043_v47, %v4954_v38 }
  0xef   :  { %vm572_vm0 = vmand %vm300_vm9, %vm444_vm11  ;;  %vm409_vm9 = vcmp.lt.s32.totalorder %v5043_v47, %v4964_v41 }
  0xf0   :  { %vm3722_vm2 = vmpackc.low %vm572_vm0, %vm556_vm13  ;;  %vm252_vm13 = vcmp.ge.s32.totalorder %v5048_v50, %v4952_v36  ;;  %vm268_vm0 = vcmp.ge.s32.totalorder %v5048_v50, %v4962_v40 }
  0xf1   :  { %3723 = vmatpush.bf16.msk.msra.mxu0 %vm3722_vm2, %v6931_v4  ;;  %vm519_vm3 = vmand %vm247_vm14, %vm391_vm15  ;;  %vm396_vm14 = vcmp.lt.s32.totalorder %v5048_v50, %v4954_v38 }
  0xf2   :  { %vm535_vm7 = vmand %vm263_vm6, %vm407_vm1  ;;  %vm412_vm6 = vcmp.lt.s32.totalorder %v5048_v50, %v4964_v41 }
  0xf3   :  { %vm3669_vm11 = vmpackc.low %vm535_vm7, %vm519_vm3  ;;  %vm350_vm3 = vcmp.ge.s32.totalorder %v5163_v59, %v4816_v54  ;;  %vm366_vm7 = vcmp.ge.s32.totalorder %v5163_v59, %v4818_v55 }
  0xf4   :  { %3670 = vmatpush.bf16.msk.msrb.mxu3 %vm3669_vm11, %v6931_v4  ;;  %vm521_vm12 = vmand %vm249_vm4, %vm393_vm5  ;;  %vm494_vm4 = vcmp.lt.s32.totalorder %v5163_v59, %v4827_v60 }
  0xf5   :  { %vm537_vm15 = vmand %vm265_vm8, %vm409_vm9  ;;  %vm510_vm8 = vcmp.lt.s32.totalorder %v5163_v59, %v4829_v61 }
  0xf6   :  { %vm3691_vm1 = vmpackc.low %vm537_vm15, %vm521_vm12  ;;  %vm318_vm12 = vcmp.ge.s32.totalorder %v5163_v59, %v4870_v19  ;;  %vm334_vm15 = vcmp.ge.s32.totalorder %v5163_v59, %v4872_v20 }
  0xf7   :  { %vm524_vm2 = vmand %vm252_vm13, %vm396_vm14  ;;  %3692 = vmatpush.bf16.msk.msrb.mxu1 %vm3691_vm1, %v6931_v4  ;;  %vm462_vm13 = vcmp.lt.s32.totalorder %v5163_v59, %v4874_v21 }
  0xf8   :  { %vm540_vm5 = vmand %vm268_vm0, %vm412_vm6  ;;  %vm478_vm0 = vcmp.lt.s32.totalorder %v5163_v59, %v4876_v22 }
  0xf9   :  { %vm3724_vm9 = vmpackc.low %vm540_vm5, %vm524_vm2  ;;  %vm286_vm2 = vcmp.ge.s32.totalorder %v5163_v59, %v4901_v25  ;;  %vm302_vm5 = vcmp.ge.s32.totalorder %v5163_v59, %v4917_v29 }
  0xfa   :  { %3725 = vmatpush.bf16.msk.msra.mxu0 %vm3724_vm9, %v6931_v4  ;;  %vm622_vm11 = vmand %vm350_vm3, %vm494_vm4  ;;  %vm430_vm3 = vcmp.lt.s32.totalorder %v5163_v59, %v4921_v30 }
  0xfb   :  { %vm638_vm14 = vmand %vm366_vm7, %vm510_vm8  ;;  %vm446_vm7 = vcmp.lt.s32.totalorder %v5163_v59, %v4923_v31 }
  0xfc   :  { %vm3740_vm6 = vmpackc.low %vm638_vm14, %vm622_vm11  ;;  %vm254_vm11 = vcmp.ge.s32.totalorder %v5163_v59, %v4952_v36  ;;  %vm270_vm14 = vcmp.ge.s32.totalorder %v5163_v59, %v4962_v40 }
  0xfd   :  { %vm590_vm1 = vmand %vm318_vm12, %vm462_vm13  ;;  %vm398_vm12 = vcmp.lt.s32.totalorder %v5163_v59, %v4954_v38 }
  0xfe   :  { %vm606_vm4 = vmand %vm334_vm15, %vm478_vm0  ;;  %vm414_vm15 = vcmp.lt.s32.totalorder %v5163_v59, %v4964_v41 }
  0xff   :  { %vm3742_vm8 = vmpackc.low %vm606_vm4, %vm590_vm1  ;;  %vm363_vm4 = vcmp.ge.s32.totalorder %v5225_v1, %v4818_v55 }
 0x100   :  { %vm558_vm9 = vmand %vm286_vm2, %vm430_vm3  ;;  %vm347_vm3 = vcmp.ge.s32.totalorder %v5225_v1, %v4816_v54 }
 0x101   :  { %vm574_vm13 = vmand %vm302_vm5, %vm446_vm7  ;;  %vm491_vm5 = vcmp.lt.s32.totalorder %v5225_v1, %v4827_v60  ;;  %vm507_vm7 = vcmp.lt.s32.totalorder %v5225_v1, %v4829_v61 }
 0x102   :  { %vm3744_vm0 = vmpackc.low %vm574_vm13, %vm558_vm9  ;;  %vm349_vm9 = vcmp.ge.s32.totalorder %v5228_v2, %v4816_v54  ;;  %vm365_vm13 = vcmp.ge.s32.totalorder %v5228_v2, %v4818_v55 }
 0x103   :  { %vm5230_vm1 = vmand %vm270_vm14, %vm414_vm15  ;;  %vm509_vm14 = vcmp.lt.s32.totalorder %v5228_v2, %v4829_v61 }
 0x10f   :  { %v195_v44 = vpop.f32.mrf.mxu0 }
 0x117   :  { %v197_v45 = vpop.f32.mrf.mxu0 }
 0x118   :  { %v5045_v48 = vpack.c.bf16 %v197_v45, %v195_v44  ;;  %v842_v44 = vand.u32 31, %v5001_v43  ;;  %v5733_v43 = vld [vmem:[%s6918_s2 + $0x8] sm:$0xff] }
 0x11a   :  { %3649 = vmatmul.msk.bf16.vlgmr.msra.gmra.mxu1 %vm1013_vm10, %v5045_v48  ;;  %3660 = vmatmul.msk.bf16.vlgmr.msra.gmra.mxu2 %vm1013_vm10, %v5045_v48 }
 0x11b   :  { %3682 = vmatmul.msk.bf16.vlgmr.msrb.gmra.mxu0 %vm1013_vm10, %v5045_v48  ;;  %3741 = vmatpush.bf16.msk.msra.mxu2 %vm3740_vm6, %v6931_v4  ;;  %vm5220_vm6 = vmand %vm254_vm11, %vm398_vm12  ;;  %vm493_vm11 = vcmp.lt.s32.totalorder %v5228_v2, %v4827_v60 }
 0x11c   :  { %vm3746_vm2 = vmpackc.low %vm5230_vm1, %vm5220_vm6  ;;  %vm315_vm1 = vcmp.ge.s32.totalorder %v5225_v1, %v4870_v19 }
 0x11d   :  { %vm635_vm12 = vmand %vm363_vm4, %vm507_vm7  ;;  %vm496_vm4 = vcmp.lt.s32.totalorder %v5235_v5, %v4827_v60  ;;  %vm368_vm7 = vcmp.ge.s32.totalorder %v5235_v5, %v4818_v55 }
 0x11f   :  { %v200_v51 = vpop.f32.mrf.mxu0  ;;  %3743 = vmatpush.bf16.msk.msra.mxu2 %vm3742_vm8, %v6931_v4  ;;  %vm619_vm8 = vmand %vm347_vm3, %vm491_vm5  ;;  %vm352_vm3 = vcmp.ge.s32.totalorder %v5235_v5, %v4816_v54 }
 0x120   :  { %vm3707_vm15 = vmpackc.low %vm635_vm12, %vm619_vm8  ;;  %vm512_vm8 = vcmp.lt.s32.totalorder %v5235_v5, %v4829_v61 }
 0x121   :  { %vm637_vm5 = vmand %vm365_vm13, %vm509_vm14  ;;  %vm475_vm13 = vcmp.lt.s32.totalorder %v5225_v1, %v4876_v22 }
 0x122   :  { %vm624_vm6 = vmand %vm352_vm3, %vm496_vm4  ;;  %vm461_vm3 = vcmp.lt.s32.totalorder %v5228_v2, %v4874_v21 }
 0x123   :  { %3745 = vmatpush.bf16.msk.msra.mxu2 %vm3744_vm0, %v6931_v4  ;;  %vm621_vm0 = vmand %vm349_vm9, %vm493_vm11  ;;  %vm331_vm11 = vcmp.ge.s32.totalorder %v5225_v1, %v4872_v20 }
 0x124   :  { %vm3729_vm12 = vmpackc.low %vm637_vm5, %vm621_vm0  ;;  %vm317_vm0 = vcmp.ge.s32.totalorder %v5228_v2, %v4870_v19  ;;  %vm333_vm5 = vcmp.ge.s32.totalorder %v5228_v2, %v4872_v20 }
 0x125   :  { %3730 = vmatpush.bf16.msk.msra.mxu1 %vm3729_vm12, %v6931_v4  ;;  %vm640_vm9 = vmand %vm368_vm7, %vm512_vm8  ;;  %vm477_vm7 = vcmp.lt.s32.totalorder %v5228_v2, %v4876_v22 }
 0x126   :  { %vm3762_vm14 = vmpackc.low %vm640_vm9, %vm624_vm6  ;;  %vm320_vm6 = vcmp.ge.s32.totalorder %v5235_v5, %v4870_v19  ;;  %vm336_vm9 = vcmp.ge.s32.totalorder %v5235_v5, %v4872_v20 }
 0x127   :  { %v202_v52 = vpop.f32.mrf.mxu0  ;;  %3747 = vmatpush.bf16.msk.msra.mxu2 %vm3746_vm2, %v6931_v4  ;;  %vm459_vm2 = vcmp.lt.s32.totalorder %v5225_v1, %v4874_v21  ;;  %3763 = vmatpush.bf16.msk.msrb.mxu0 %vm3762_vm14, %v6931_v4  ;;  %vm603_vm4 = vmand %vm331_vm11, %vm475_vm13  ;;  %vm480_vm11 = vcmp.lt.s32.totalorder %v5235_v5, %v4876_v22 }
 0x128   :  { %v5109_v53 = vpack.c.bf16 %v202_v52, %v200_v51  ;;  %vm589_vm12 = vmand %vm317_vm0, %vm461_vm3  ;;  %vm427_vm0 = vcmp.lt.s32.totalorder %v5225_v1, %v4921_v30 }
 0x129   :  { %vm608_vm3 = vmand %vm336_vm9, %vm480_vm11  ;;  %vm445_vm9 = vcmp.lt.s32.totalorder %v5228_v2, %v4923_v31 }
 0x12a   :  { %3650 = vmatmul.msk.bf16.gmra.mxu1 %vm1013_vm10, %v5109_v53  ;;  %3661 = vmatmul.msk.bf16.gmra.mxu2 %vm1013_vm10, %v5109_v53 }
 0x12b   :  { %3683 = vmatmul.msk.bf16.gmra.mxu0 %vm1013_vm10, %v5109_v53 }
 0x12f   :  { %v205_v56 = vpop.f32.mrf.mxu0 }
 0x137   :  { %v207_v57 = vpop.f32.mrf.mxu0 }
 0x138   :  { %v5165_v62 = vpack.c.bf16 %v207_v57, %v205_v56 }
 0x13a   :  { %3651 = vmatmul.msk.bf16.gmra.mxu1 %vm1013_vm10, %v5165_v62  ;;  %3662 = vmatmul.msk.bf16.vlgmr.msra.gmra.mxu3 %vm1013_vm10, %v5165_v62 }
 0x13b   :  { %3684 = vmatmul.msk.bf16.gmra.mxu0 %vm1013_vm10, %v5165_v62  ;;  %3704 = vmatmul.msk.bf16.vlgmr.msrb.gmra.mxu2 %vm1013_vm10, %v5045_v48 }
 0x13c   :  { %3708 = vmatpush.bf16.msk.msra.mxu3 %vm3707_vm15, %v6931_v4  ;;  %vm587_vm15 = vmand %vm315_vm1, %vm459_vm2  ;;  %vm464_vm1 = vcmp.lt.s32.totalorder %v5235_v5, %v4874_v21 }
 0x13d   :  { %vm3709_vm8 = vmpackc.low %vm603_vm4, %vm587_vm15  ;;  %vm283_vm15 = vcmp.ge.s32.totalorder %v5225_v1, %v4901_v25  ;;  %vm299_vm4 = vcmp.ge.s32.totalorder %v5225_v1, %v4917_v29 }
 0x13e   :  { %vm605_vm2 = vmand %vm333_vm5, %vm477_vm7  ;;  %vm443_vm5 = vcmp.lt.s32.totalorder %v5225_v1, %v4923_v31 }
 0x13f   :  { %vm3731_vm13 = vmpackc.low %vm605_vm2, %vm589_vm12  ;;  %vm285_vm12 = vcmp.ge.s32.totalorder %v5228_v2, %v4901_v25  ;;  %vm301_vm2 = vcmp.ge.s32.totalorder %v5228_v2, %v4917_v29 }
 0x140   :  { %3710 = vmatpush.bf16.msk.msra.mxu3 %vm3709_vm8, %v6931_v4  ;;  %3732 = vmatpush.bf16.msk.msra.mxu1 %vm3731_vm13, %v6931_v4  ;;  %vm592_vm14 = vmand %vm320_vm6, %vm464_vm1  ;;  %vm429_vm6 = vcmp.lt.s32.totalorder %v5228_v2, %v4921_v30 }
 0x141   :  { %vm3764_vm7 = vmpackc.low %vm608_vm3, %vm592_vm14  ;;  %vm288_vm14 = vcmp.ge.s32.totalorder %v5235_v5, %v4901_v25  ;;  %vm304_vm3 = vcmp.ge.s32.totalorder %v5235_v5, %v4917_v29 }
 0x142   :  { %3765 = vmatpush.bf16.msk.msrb.mxu0 %vm3764_vm7, %v6931_v4  ;;  %vm555_vm8 = vmand %vm283_vm15, %vm427_vm0  ;;  %vm432_vm15 = vcmp.lt.s32.totalorder %v5235_v5, %v4921_v30 }
 0x143   :  { %vm571_vm1 = vmand %vm299_vm4, %vm443_vm5  ;;  %vm448_vm4 = vcmp.lt.s32.totalorder %v5235_v5, %v4923_v31 }
 0x144   :  { %vm3711_vm11 = vmpackc.low %vm571_vm1, %vm555_vm8  ;;  %vm251_vm8 = vcmp.ge.s32.totalorder %v5225_v1, %v4952_v36  ;;  %vm267_vm1 = vcmp.ge.s32.totalorder %v5225_v1, %v4962_v40 }
 0x145   :  { %3712 = vmatpush.bf16.msk.msra.mxu3 %vm3711_vm11, %v6931_v4  ;;  %vm557_vm13 = vmand %vm285_vm12, %vm429_vm6  ;;  %vm395_vm12 = vcmp.lt.s32.totalorder %v5225_v1, %v4954_v38 }
 0x146   :  { %vm573_vm0 = vmand %vm301_vm2, %vm445_vm9  ;;  %vm411_vm2 = vcmp.lt.s32.totalorder %v5225_v1, %v4964_v41 }
 0x147   :  { %vm3733_vm5 = vmpackc.low %vm573_vm0, %vm557_vm13  ;;  %vm253_vm13 = vcmp.ge.s32.totalorder %v5228_v2, %v4952_v36  ;;  %vm269_vm0 = vcmp.ge.s32.totalorder %v5228_v2, %v4962_v40 }
 0x148   :  { %3734 = vmatpush.bf16.msk.msra.mxu1 %vm3733_vm5, %v6931_v4  ;;  %vm560_vm7 = vmand %vm288_vm14, %vm432_vm15  ;;  %vm397_vm14 = vcmp.lt.s32.totalorder %v5228_v2, %v4954_v38 }
 0x149   :  { %vm576_vm6 = vmand %vm304_vm3, %vm448_vm4  ;;  %vm413_vm3 = vcmp.lt.s32.totalorder %v5228_v2, %v4964_v41 }
 0x14a   :  { %3671 = vmatmul.msk.bf16.vlgmr.msrb.gmra.mxu3 %vm1013_vm10, %v5045_v48  ;;  %3693 = vmatmul.msk.bf16.vlgmr.msrb.gmra.mxu1 %vm1013_vm10, %v5045_v48  ;;  %vm3766_vm9 = vmpackc.low %vm576_vm6, %vm560_vm7  ;;  %vm256_vm7 = vcmp.ge.s32.totalorder %v5235_v5, %v4952_v36  ;;  %vm272_vm6 = vcmp.ge.s32.totalorder %v5235_v5, %v4962_v40 }
 0x14b   :  { %3705 = vmatmul.msk.bf16.gmra.mxu2 %vm1013_vm10, %v5109_v53  ;;  %3726 = vmatmul.msk.bf16.vlgmr.msra.gmra.mxu0 %vm1013_vm10, %v5045_v48  ;;  %vm523_vm11 = vmand %vm251_vm8, %vm395_vm12  ;;  %vm400_vm8 = vcmp.lt.s32.totalorder %v5235_v5, %v4954_v38 }
 0x14c   :  { %3767 = vmatpush.bf16.msk.msrb.mxu0 %vm3766_vm9, %v6931_v4  ;;  %vm539_vm15 = vmand %vm267_vm1, %vm411_vm2  ;;  %vm416_vm1 = vcmp.lt.s32.totalorder %v5235_v5, %v4964_v41 }
 0x14d   :  { %vm3713_vm4 = vmpackc.low %vm539_vm15, %vm523_vm11  ;;  %vm354_vm11 = vcmp.ge.s32.totalorder %v5362_v6, %v4816_v54  ;;  %vm370_vm15 = vcmp.ge.s32.totalorder %v5362_v6, %v4818_v55 }
 0x14e   :  { %3714 = vmatpush.bf16.msk.msra.mxu3 %vm3713_vm4, %v6931_v4  ;;  %vm525_vm5 = vmand %vm253_vm13, %vm397_vm14  ;;  %vm498_vm13 = vcmp.lt.s32.totalorder %v5362_v6, %v4827_v60 }
 0x14f   :  { %vm541_vm12 = vmand %vm269_vm0, %vm413_vm3  ;;  %vm514_vm0 = vcmp.lt.s32.totalorder %v5362_v6, %v4829_v61 }
 0x150   :  { %vm3735_vm2 = vmpackc.low %vm541_vm12, %vm525_vm5  ;;  %vm322_vm5 = vcmp.ge.s32.totalorder %v5362_v6, %v4870_v19  ;;  %vm338_vm12 = vcmp.ge.s32.totalorder %v5362_v6, %v4872_v20 }
 0x151   :  { %vm528_vm9 = vmand %vm256_vm7, %vm400_vm8  ;;  %3736 = vmatpush.bf16.msk.msra.mxu1 %vm3735_vm2, %v6931_v4  ;;  %vm466_vm7 = vcmp.lt.s32.totalorder %v5362_v6, %v4874_v21 }
 0x152   :  { %vm544_vm14 = vmand %vm272_vm6, %vm416_vm1  ;;  %vm482_vm6 = vcmp.lt.s32.totalorder %v5362_v6, %v4876_v22 }
 0x153   :  { %vm3768_vm3 = vmpackc.low %vm544_vm14, %vm528_vm9  ;;  %vm290_vm9 = vcmp.ge.s32.totalorder %v5362_v6, %v4901_v25  ;;  %vm306_vm14 = vcmp.ge.s32.totalorder %v5362_v6, %v4917_v29 }
 0x154   :  { %3769 = vmatpush.bf16.msk.msrb.mxu0 %vm3768_vm3, %v6931_v4  ;;  %vm626_vm4 = vmand %vm354_vm11, %vm498_vm13  ;;  %vm434_vm11 = vcmp.lt.s32.totalorder %v5362_v6, %v4921_v30 }
 0x155   :  { %vm642_vm8 = vmand %vm370_vm15, %vm514_vm0  ;;  %vm450_vm15 = vcmp.lt.s32.totalorder %v5362_v6, %v4923_v31 }
 0x156   :  { %vm3784_vm1 = vmpackc.low %vm642_vm8, %vm626_vm4  ;;  %vm402_vm8 = vcmp.lt.s32.totalorder %v5362_v6, %v4954_v38 }
 0x157   :  { %3785 = vmatpush.bf16.msk.msrb.mxu2 %vm3784_vm1, %v6931_v4  ;;  %vm594_vm2 = vmand %vm322_vm5, %vm466_vm7  ;;  %vm258_vm5 = vcmp.ge.s32.totalorder %v5362_v6, %v4952_v36  ;;  %vm274_vm7 = vcmp.ge.s32.totalorder %v5362_v6, %v4962_v40 }
 0x158   :  { %vm610_vm13 = vmand %vm338_vm12, %vm482_vm6  ;;  %vm418_vm12 = vcmp.lt.s32.totalorder %v5362_v6, %v4964_v41 }
 0x159   :  { %vm3786_vm0 = vmpackc.low %vm610_vm13, %vm594_vm2  ;;  %vm367_vm13 = vcmp.ge.s32.totalorder %v5422_v8, %v4818_v55 }
 0x15a   :  { %3672 = vmatmul.msk.bf16.gmra.mxu3 %vm1013_vm10, %v5109_v53  ;;  %3694 = vmatmul.msk.bf16.gmra.mxu1 %vm1013_vm10, %v5109_v53  ;;  %vm562_vm3 = vmand %vm290_vm9, %vm434_vm11  ;;  %vm351_vm11 = vcmp.ge.s32.totalorder %v5422_v8, %v4816_v54 }
 0x15b   :  { %3706 = vmatmul.msk.bf16.gmra.mxu2 %vm1013_vm10, %v5165_v62  ;;  %3727 = vmatmul.msk.bf16.gmra.mxu0 %vm1013_vm10, %v5109_v53  ;;  %vm578_vm4 = vmand %vm306_vm14, %vm450_vm15  ;;  %vm495_vm14 = vcmp.lt.s32.totalorder %v5422_v8, %v4827_v60  ;;  %vm511_vm15 = vcmp.lt.s32.totalorder %v5422_v8, %v4829_v61 }
 0x15c   :  { %3787 = vmatpush.bf16.msk.msrb.mxu2 %vm3786_vm0, %v6931_v4  ;;  %vm3788_vm6 = vmpackc.low %vm578_vm4, %vm562_vm3  ;;  %vm353_vm3 = vcmp.ge.s32.totalorder %v5425_v9, %v4816_v54  ;;  %vm497_vm4 = vcmp.lt.s32.totalorder %v5425_v9, %v4827_v60 }
 0x15d   :  { %vm5417_vm1 = vmand %vm258_vm5, %vm402_vm8  ;;  %vm513_vm8 = vcmp.lt.s32.totalorder %v5425_v9, %v4829_v61 }
 0x15e   :  { %vm5427_vm2 = vmand %vm274_vm7, %vm418_vm12  ;;  %vm369_vm7 = vcmp.ge.s32.totalorder %v5425_v9, %v4818_v55 }
 0x15f   :  { %vm3790_vm9 = vmpackc.low %vm5427_vm2, %vm5417_vm1  ;;  %vm319_vm2 = vcmp.ge.s32.totalorder %v5422_v8, %v4870_v19 }
 0x160   :  { %3789 = vmatpush.bf16.msk.msrb.mxu2 %vm3788_vm6, %v6931_v4  ;;  %vm623_vm0 = vmand %vm351_vm11, %vm495_vm14  ;;  %vm356_vm11 = vcmp.ge.s32.totalorder %v5432_v11, %v4816_v54 }
 0x161   :  { %vm639_vm5 = vmand %vm367_vm13, %vm511_vm15  ;;  %vm500_vm13 = vcmp.lt.s32.totalorder %v5432_v11, %v4827_v60  ;;  %vm372_vm15 = vcmp.ge.s32.totalorder %v5432_v11, %v4818_v55 }
 0x162   :  { %vm3751_vm12 = vmpackc.low %vm639_vm5, %vm623_vm0  ;;  %vm516_vm0 = vcmp.lt.s32.totalorder %v5432_v11, %v4829_v61 }
 0x163   :  { %3752 = vmatpush.bf16.msk.msrb.mxu3 %vm3751_vm12, %v6931_v4  ;;  %vm625_vm6 = vmand %vm353_vm3, %vm497_vm4  ;;  %vm335_vm4 = vcmp.ge.s32.totalorder %v5422_v8, %v4872_v20 }
 0x164   :  { %3791 = vmatpush.bf16.msk.msrb.mxu2 %vm3790_vm9, %v6931_v4  ;;  %vm641_vm14 = vmand %vm369_vm7, %vm513_vm8  ;;  %vm463_vm9 = vcmp.lt.s32.totalorder %v5422_v8, %v4874_v21  ;;  %vm479_vm7 = vcmp.lt.s32.totalorder %v5422_v8, %v4876_v22 }
 0x165   :  { %vm3773_vm5 = vmpackc.low %vm641_vm14, %vm625_vm6  ;;  %vm321_vm6 = vcmp.ge.s32.totalorder %v5425_v9, %v4870_v19  ;;  %vm337_vm14 = vcmp.ge.s32.totalorder %v5425_v9, %v4872_v20 }
 0x166   :  { %3774 = vmatpush.bf16.msk.msrb.mxu1 %vm3773_vm5, %v6931_v4  ;;  %vm628_vm1 = vmand %vm356_vm11, %vm500_vm13  ;;  %vm465_vm11 = vcmp.lt.s32.totalorder %v5425_v9, %v4874_v21 }
 0x167   :  { %vm644_vm3 = vmand %vm372_vm15, %vm516_vm0  ;;  %vm481_vm15 = vcmp.lt.s32.totalorder %v5425_v9, %v4876_v22 }
 0x168   :  { %vm3806_vm8 = vmpackc.low %vm644_vm3, %vm628_vm1  ;;  %vm324_vm1 = vcmp.ge.s32.totalorder %v5432_v11, %v4870_v19  ;;  %vm340_vm3 = vcmp.ge.s32.totalorder %v5432_v11, %v4872_v20 }
 0x169   :  { %3807 = vmatpush.bf16.msk.msra.mxu0 %vm3806_vm8, %v6931_v4  ;;  %vm591_vm12 = vmand %vm319_vm2, %vm463_vm9  ;;  %vm468_vm2 = vcmp.lt.s32.totalorder %v5432_v11, %v4874_v21 }
 0x16a   :  { %3673 = vmatmul.msk.bf16.gmra.mxu3 %vm1013_vm10, %v5165_v62  ;;  %3695 = vmatmul.msk.bf16.gmra.mxu1 %vm1013_vm10, %v5165_v62  ;;  %vm607_vm13 = vmand %vm335_vm4, %vm479_vm7  ;;  %vm484_vm4 = vcmp.lt.s32.totalorder %v5432_v11, %v4876_v22 }
 0x16b   :  { %3728 = vmatmul.msk.bf16.gmra.mxu0 %vm1013_vm10, %v5165_v62  ;;  %3748 = vmatmul.msk.bf16.vlgmr.msra.gmra.mxu2 %vm1013_vm10, %v5045_v48  ;;  %vm3753_vm0 = vmpackc.low %vm607_vm13, %vm591_vm12  ;;  %vm287_vm12 = vcmp.ge.s32.totalorder %v5422_v8, %v4901_v25  ;;  %vm303_vm13 = vcmp.ge.s32.totalorder %v5422_v8, %v4917_v29 }
 0x16c   :  { %3754 = vmatpush.bf16.msk.msrb.mxu3 %vm3753_vm0, %v6931_v4  ;;  %vm593_vm5 = vmand %vm321_vm6, %vm465_vm11  ;;  %vm431_vm6 = vcmp.lt.s32.totalorder %v5422_v8, %v4921_v30 }
 0x16d   :  { %vm609_vm9 = vmand %vm337_vm14, %vm481_vm15  ;;  %vm447_vm14 = vcmp.lt.s32.totalorder %v5422_v8, %v4923_v31 }
 0x16e   :  { %vm3775_vm7 = vmpackc.low %vm609_vm9, %vm593_vm5  ;;  %vm289_vm5 = vcmp.ge.s32.totalorder %v5425_v9, %v4901_v25  ;;  %vm305_vm9 = vcmp.ge.s32.totalorder %v5425_v9, %v4917_v29 }
 0x16f   :  { %3776 = vmatpush.bf16.msk.msrb.mxu1 %vm3775_vm7, %v6931_v4  ;;  %vm596_vm8 = vmand %vm324_vm1, %vm468_vm2  ;;  %vm433_vm1 = vcmp.lt.s32.totalorder %v5425_v9, %v4921_v30 }
 0x170   :  { %vm612_vm11 = vmand %vm340_vm3, %vm484_vm4  ;;  %vm449_vm3 = vcmp.lt.s32.totalorder %v5425_v9, %v4923_v31 }
 0x171   :  { %vm3808_vm15 = vmpackc.low %vm612_vm11, %vm596_vm8  ;;  %vm292_vm8 = vcmp.ge.s32.totalorder %v5432_v11, %v4901_v25  ;;  %vm308_vm11 = vcmp.ge.s32.totalorder %v5432_v11, %v4917_v29 }
 0x172   :  { %3809 = vmatpush.bf16.msk.msra.mxu0 %vm3808_vm15, %v6931_v4  ;;  %vm559_vm0 = vmand %vm287_vm12, %vm431_vm6  ;;  %vm436_vm12 = vcmp.lt.s32.totalorder %v5432_v11, %v4921_v30 }
 0x173   :  { %vm575_vm2 = vmand %vm303_vm13, %vm447_vm14  ;;  %vm452_vm13 = vcmp.lt.s32.totalorder %v5432_v11, %v4923_v31 }
 0x174   :  { %vm3755_vm4 = vmpackc.low %vm575_vm2, %vm559_vm0  ;;  %vm255_vm0 = vcmp.ge.s32.totalorder %v5422_v8, %v4952_v36  ;;  %vm271_vm2 = vcmp.ge.s32.totalorder %v5422_v8, %v4962_v40 }
 0x175   :  { %3756 = vmatpush.bf16.msk.msrb.mxu3 %vm3755_vm4, %v6931_v4  ;;  %vm561_vm7 = vmand %vm289_vm5, %vm433_vm1  ;;  %vm399_vm5 = vcmp.lt.s32.totalorder %v5422_v8, %v4954_v38 }
 0x176   :  { %vm577_vm6 = vmand %vm305_vm9, %vm449_vm3  ;;  %vm415_vm9 = vcmp.lt.s32.totalorder %v5422_v8, %v4964_v41 }
 0x177   :  { %vm3777_vm14 = vmpackc.low %vm577_vm6, %vm561_vm7  ;;  %vm257_vm7 = vcmp.ge.s32.totalorder %v5425_v9, %v4952_v36  ;;  %vm273_vm6 = vcmp.ge.s32.totalorder %v5425_v9, %v4962_v40 }
 0x178   :  { %3778 = vmatpush.bf16.msk.msrb.mxu1 %vm3777_vm14, %v6931_v4  ;;  %vm564_vm15 = vmand %vm292_vm8, %vm436_vm12  ;;  %vm401_vm8 = vcmp.lt.s32.totalorder %v5425_v9, %v4954_v38 }
 0x179   :  { %vm580_vm1 = vmand %vm308_vm11, %vm452_vm13  ;;  %vm417_vm11 = vcmp.lt.s32.totalorder %v5425_v9, %v4964_v41 }
 0x17a   :  { %3715 = vmatmul.msk.bf16.vlgmr.msra.gmra.mxu3 %vm1013_vm10, %v5045_v48  ;;  %3737 = vmatmul.msk.bf16.vlgmr.msra.gmra.mxu1 %vm1013_vm10, %v5045_v48  ;;  %vm3810_vm3 = vmpackc.low %vm580_vm1, %vm564_vm15  ;;  %vm260_vm15 = vcmp.ge.s32.totalorder %v5432_v11, %v4952_v36  ;;  %vm276_vm1 = vcmp.ge.s32.totalorder %v5432_v11, %v4962_v40 }
 0x17b   :  { %3749 = vmatmul.msk.bf16.gmra.mxu2 %vm1013_vm10, %v5109_v53  ;;  %3770 = vmatmul.msk.bf16.vlgmr.msrb.gmra.mxu0 %vm1013_vm10, %v5045_v48  ;;  %vm527_vm4 = vmand %vm255_vm0, %vm399_vm5  ;;  %vm404_vm0 = vcmp.lt.s32.totalorder %v5432_v11, %v4954_v38 }
 0x17c   :  { %3811 = vmatpush.bf16.msk.msra.mxu0 %vm3810_vm3, %v6931_v4  ;;  %vm543_vm12 = vmand %vm271_vm2, %vm415_vm9  ;;  %vm420_vm2 = vcmp.lt.s32.totalorder %v5432_v11, %v4964_v41 }
 0x17d   :  { %vm3757_vm13 = vmpackc.low %vm543_vm12, %vm527_vm4  ;;  %vm902_vm12 = vcmp.eq.s32.totalorder %v838_v17, %v4882_v24 }
 0x17e   :  { %3758 = vmatpush.bf16.msk.msrb.mxu3 %vm3757_vm13, %v6931_v4  ;;  %vm529_vm14 = vmand %vm257_vm7, %vm401_vm8  ;;  %vm886_vm8 = vcmp.eq.s32.totalorder %v838_v17, %v4879_v23  ;;  %vm870_vm13 = vcmp.eq.s32.totalorder %v838_v17, %v4926_v33 }
 0x17f   :  { %vm545_vm5 = vmand %vm273_vm6, %vm417_vm11  ;;  %vm854_vm11 = vcmp.eq.s32.totalorder %v838_v17, %v4812_v49  ;;  %v841_v17 = vand.u32 31, %v5043_v47 }
 0x180   :  { %vm3779_vm9 = vmpackc.low %vm545_vm5, %vm529_vm14  ;;  %vm499_vm5 = vcmp.lt.s32.totalorder %v5598_v27, %v4827_v60 }
 0x181   :  { %vm532_vm3 = vmand %vm260_vm15, %vm404_vm0  ;;  %3780 = vmatpush.bf16.msk.msrb.mxu1 %vm3779_vm9, %v6931_v4  ;;  %vm355_vm15 = vcmp.ge.s32.totalorder %v5598_v27, %v4816_v54  ;;  %vm371_vm0 = vcmp.ge.s32.totalorder %v5598_v27, %v4818_v55 }
 0x182   :  { %vm548_vm4 = vmand %vm276_vm1, %vm420_vm2  ;;  %vm515_vm1 = vcmp.lt.s32.totalorder %v5598_v27, %v4829_v61  ;;  %v837_v61 = vand.u32 31, %v4804_v39 }
 0x183   :  { %vm3812_vm7 = vmpackc.low %vm548_vm4, %vm532_vm3  ;;  %vm323_vm4 = vcmp.ge.s32.totalorder %v5598_v27, %v4870_v19  ;;  %v840_v19 = vand.u32 31, %v4840_v0 }
 0x184   :  { %3813 = vmatpush.bf16.msk.msra.mxu0 %vm3812_vm7, %v6931_v4  ;;  %vm3836_vm6 = vmpackc.low %vm902_vm12, %vm886_vm8  ;;  %vm339_vm7 = vcmp.ge.s32.totalorder %v5598_v27, %v4872_v20  ;;  %vm467_vm8 = vcmp.lt.s32.totalorder %v5598_v27, %v4874_v21  ;;  %vm483_vm12 = vcmp.lt.s32.totalorder %v5598_v27, %v4876_v22 }
 0x185   :  { %3837 = vmatpush.bf16.msk.msra.mxu2 %vm3836_vm6, %v6931_v4  ;;  %vm3838_vm14 = vmpackc.low %vm870_vm13, %vm854_vm11 }
 0x186   :  { %vm627_vm2 = vmand %vm355_vm15, %vm499_vm5  ;;  %vm307_vm15 = vcmp.ge.s32.totalorder %v5598_v27, %v4917_v29  ;;  %vm451_vm5 = vcmp.lt.s32.totalorder %v5598_v27, %v4923_v31 }
 0x187   :  { %vm643_vm9 = vmand %vm371_vm0, %vm515_vm1  ;;  %vm435_vm0 = vcmp.lt.s32.totalorder %v5598_v27, %v4921_v30 }
 0x188   :  { %vm3795_vm3 = vmpackc.low %vm643_vm9, %vm627_vm2 }
 0x189   :  { %3839 = vmatpush.bf16.msk.msra.mxu2 %vm3838_vm14, %v6931_v4  ;;  %3796 = vmatpush.bf16.msk.msra.mxu3 %vm3795_vm3, %v6931_v4  ;;  %vm595_vm6 = vmand %vm323_vm4, %vm467_vm8  ;;  %vm291_vm14 = vcmp.ge.s32.totalorder %v5598_v27, %v4901_v25  ;;  %vm885_vm3 = vcmp.eq.s32.totalorder %v837_v61, %v4879_v23  ;;  %vm901_vm4 = vcmp.eq.s32.totalorder %v837_v61, %v4882_v24 }
 0x18a   :  { %3716 = vmatmul.msk.bf16.gmra.mxu3 %vm1013_vm10, %v5109_v53  ;;  %3738 = vmatmul.msk.bf16.gmra.mxu1 %vm1013_vm10, %v5109_v53  ;;  %vm611_vm11 = vmand %vm339_vm7, %vm483_vm12  ;;  %vm888_vm7 = vcmp.eq.s32.totalorder %v840_v19, %v4879_v23  ;;  %vm904_vm8 = vcmp.eq.s32.totalorder %v840_v19, %v4882_v24 }
 0x18b   :  { %3750 = vmatmul.msk.bf16.gmra.mxu2 %vm1013_vm10, %v5165_v62  ;;  %3771 = vmatmul.msk.bf16.gmra.mxu0 %vm1013_vm10, %v5109_v53  ;;  %vm3797_vm13 = vmpackc.low %vm611_vm11, %vm595_vm6  ;;  %vm259_vm11 = vcmp.ge.s32.totalorder %v5598_v27, %v4952_v36 }
 0x18c   :  { %vm563_vm1 = vmand %vm291_vm14, %vm435_vm0  ;;  %vm403_vm14 = vcmp.lt.s32.totalorder %v5598_v27, %v4954_v38 }
 0x18d   :  { %3798 = vmatpush.bf16.msk.msra.mxu3 %vm3797_vm13, %v6931_v4  ;;  %vm579_vm2 = vmand %vm307_vm15, %vm451_vm5  ;;  %vm275_vm13 = vcmp.ge.s32.totalorder %v5598_v27, %v4962_v40  ;;  %vm419_vm15 = vcmp.lt.s32.totalorder %v5598_v27, %v4964_v41  ;;  %vm853_vm5 = vcmp.eq.s32.totalorder %v837_v61, %v4812_v49 }
 0x18e   :  { %vm3799_vm9 = vmpackc.low %vm579_vm2, %vm563_vm1  ;;  %vm869_vm1 = vcmp.eq.s32.totalorder %v837_v61, %v4926_v33  ;;  %v844_v61 = vand.u32 31, %v5048_v50 }
 0x18f   :  { %vm3829_vm12 = vmpackc.low %vm901_vm4, %vm885_vm3  ;;  %vm872_vm3 = vcmp.eq.s32.totalorder %v840_v19, %v4926_v33 }
 0x190   :  { %3830 = vmatpush.bf16.msk.msra.mxu1 %vm3829_vm12, %v6931_v4  ;;  %vm3850_vm6 = vmpackc.low %vm904_vm8, %vm888_vm7  ;;  %vm1422_vm12 = vcmask 261120  }
 0x191   :  { %3800 = vmatpush.bf16.msk.msra.mxu3 %vm3799_vm9, %v6931_v4  ;;  %3851 = vmatpush.bf16.msk.msrb.mxu0 %vm3850_vm6, %v6931_v4  ;;  %vm531_vm0 = vmand %vm259_vm11, %vm403_vm14  ;;  %vm856_vm9 = vcmp.eq.s32.totalorder %v840_v19, %v4812_v49  ;;  %vm890_vm6 = vcmp.eq.s32.totalorder %v842_v44, %v4879_v23  ;;  %vm906_vm11 = vcmp.eq.s32.totalorder %v842_v44, %v4882_v24  ;;  %v5779_v19 = vld [vmem:[%s6918_s2 + $0x10] sm:$0xff] }
 0x192   :  { %vm547_vm2 = vmand %vm275_vm13, %vm419_vm15  ;;  %vm858_vm14 = vcmp.eq.s32.totalorder %v842_v44, %v4812_v49  ;;  %vm874_vm15 = vcmp.eq.s32.totalorder %v842_v44, %v4926_v33 }
 0x193   :  { %vm3801_vm4 = vmpackc.low %vm547_vm2, %vm531_vm0  ;;  %vm889_vm2 = vcmp.eq.s32.totalorder %v841_v17, %v4879_v23 }
 0x194   :  { %vm3831_vm7 = vmpackc.low %vm869_vm1, %vm853_vm5  ;;  %vm887_vm5 = vcmp.eq.s32.totalorder %v839_v10, %v4879_v23  ;;  %vm903_vm1 = vcmp.eq.s32.totalorder %v839_v10, %v4882_v24 }
 0x195   :  { %3802 = vmatpush.bf16.msk.msra.mxu3 %vm3801_vm4, %v6931_v4  ;;  %vm3852_vm8 = vmpackc.low %vm872_vm3, %vm856_vm9  ;;  %3832 = vmatpush.bf16.msk.msra.mxu1 %vm3831_vm7, %v6931_v4  ;;  %vm905_vm9 = vcmp.eq.s32.totalorder %v841_v17, %v4882_v24  ;;  %vm892_vm4 = vcmp.eq.s32.totalorder %v844_v61, %v4879_v23  ;;  %vm908_vm7 = vcmp.eq.s32.totalorder %v844_v61, %v4882_v24 }
 0x196   :  { %3853 = vmatpush.bf16.msk.msrb.mxu0 %vm3852_vm8, %v6931_v4  ;;  %vm3864_vm13 = vmpackc.low %vm906_vm11, %vm890_vm6  ;;  %vm855_vm11 = vcmp.eq.s32.totalorder %v839_v10, %v4812_v49 }
 0x197   :  { %v5558_v12 = vpop.f32.mrf.mxu1  ;;  %vm3866_vm0 = vmpackc.low %vm874_vm15, %vm858_vm14  ;;  %vm857_vm14 = vcmp.eq.s32.totalorder %v841_v17, %v4812_v49  ;;  %vm873_vm15 = vcmp.eq.s32.totalorder %v841_v17, %v4926_v33 }
 0x198   :  { %v5560_v13 = vpop.f32.mrf.mxu0  ;;  %vm3843_vm3 = vmpackc.low %vm903_vm1, %vm887_vm5  ;;  %vm860_vm5 = vcmp.eq.s32.totalorder %v844_v61, %v4812_v49  ;;  %vm876_vm1 = vcmp.eq.s32.totalorder %v844_v61, %v4926_v33 }
 0x199   :  { %vm3857_vm8 = vmpackc.low %vm905_vm9, %vm889_vm2 }
 0x19a   :  { %3717 = vmatmul.msk.bf16.gmra.mxu3 %vm1013_vm10, %v5165_v62  ;;  %3739 = vmatmul.msk.bf16.gmra.mxu1 %vm1013_vm10, %v5165_v62  ;;  %vm3878_vm6 = vmpackc.low %vm908_vm7, %vm892_vm4 }
 0x19b   :  { %3772 = vmatmul.msk.bf16.gmra.mxu0 %vm1013_vm10, %v5165_v62  ;;  %3792 = vmatmul.msk.bf16.vlgmr.msrb.gmra.mxu2 %vm1013_vm10, %v5045_v48  ;;  %vm3859_vm2 = vmpackc.low %vm873_vm15, %vm857_vm14 }
 0x19c   :  { %3865 = vmatpush.bf16.msk.msrb.mxu2 %vm3864_vm13, %v6931_v4  ;;  %vm871_vm13 = vcmp.eq.s32.totalorder %v839_v10, %v4926_v33  ;;  %vm3880_vm9 = vmpackc.low %vm876_vm1, %vm860_vm5 }
 0x19d   :  { %v5580_v14 = vpop.f32.mrf.mxu2 }
 0x19f   :  { %v5583_v15 = vpop.f32.mrf.mxu1 }
 0x1a0   :  { %v5585_v16 = vpop.f32.mrf.mxu0  ;;  %3867 = vmatpush.bf16.msk.msrb.mxu2 %vm3866_vm0, %v6931_v4  ;;  %vm3845_vm0 = vmpackc.low %vm871_vm13, %vm855_vm11 }
 0x1a5   :  { %v5591_v18 = vpop.f32.mrf.mxu2 }
 0x1a7   :  { %v5595_v26 = vpop.f32.mrf.mxu1 }
 0x1a8   :  { %v5600_v58 = vpop.f32.mrf.mxu0 }
 0x1a9   :  { %6955 = vst [vmem:[#allocation7_spill] sm:$0xff] %v5600_v58  ;;  %v848_v58 = vand.u32 31, %v5235_v5 }
 0x1aa   :  { %3759 = vmatmul.msk.bf16.vlgmr.msrb.gmra.mxu3 %vm1013_vm10, %v5045_v48  ;;  %3781 = vmatmul.msk.bf16.vlgmr.msrb.gmra.mxu1 %vm1013_vm10, %v5045_v48 }
 0x1ab   :  { %3793 = vmatmul.msk.bf16.gmra.mxu2 %vm1013_vm10, %v5109_v53  ;;  %3814 = vmatmul.msk.bf16.vlgmr.msra.gmra.mxu0 %vm1013_vm10, %v5045_v48  ;;  %vm896_vm1 = vcmp.eq.s32.totalorder %v848_v58, %v4879_v23 }
 0x1ac   :  { %3844 = vmatpush.bf16.msk.msrb.mxu3 %vm3843_vm3, %v6931_v4  ;;  %3858 = vmatpush.bf16.msk.msrb.mxu1 %vm3857_vm8, %v6931_v4 }
 0x1ad   :  { %v5619_v54 = vpop.f32.mrf.mxu2  ;;  %3879 = vmatpush.bf16.msk.msra.mxu0 %vm3878_vm6, %v6931_v4 }
 0x1af   :  { %v5630_v55 = vpop.f32.mrf.mxu1 }
 0x1b0   :  { %v5632_v60 = vpop.f32.mrf.mxu0  ;;  %3846 = vmatpush.bf16.msk.msrb.mxu3 %vm3845_vm0, %v6931_v4  ;;  %3860 = vmatpush.bf16.msk.msrb.mxu1 %vm3859_vm2, %v6931_v4  ;;  %vm912_vm2 = vcmp.eq.s32.totalorder %v848_v58, %v4882_v24 }
 0x1b1   :  { %3881 = vmatpush.bf16.msk.msra.mxu0 %vm3880_vm9, %v6931_v4 }
 0x1b5   :  { %v5649_v20 = vpop.f32.mrf.mxu2 }
 0x1b7   :  { %v5664_v39 = vpop.f32.mrf.mxu1 }
 0x1b8   :  { %v5668_v0 = vpop.f32.mrf.mxu0 }
 0x1b9   :  { %6956 = vst [vmem:[#allocation8_spill] sm:$0xff] %v5668_v0 }
 0x1ba   :  { %3760 = vmatmul.msk.bf16.gmra.mxu3 %vm1013_vm10, %v5109_v53  ;;  %3782 = vmatmul.msk.bf16.gmra.mxu1 %vm1013_vm10, %v5109_v53 }
 0x1bb   :  { %3794 = vmatmul.msk.bf16.gmra.mxu2 %vm1013_vm10, %v5165_v62  ;;  %3815 = vmatmul.msk.bf16.gmra.mxu0 %vm1013_vm10, %v5109_v53 }
 0x1bd   :  { %v5681_v21 = vpop.f32.mrf.mxu3 }
 0x1be   :  { %v5683_v22 = vpop.f32.mrf.mxu2 }
 0x1bf   :  { %v5685_v25 = vpop.f32.mrf.mxu1 }
 0x1c0   :  { %v5687_v28 = vpop.f32.mrf.mxu0 }
 0x1c1   :  { %6957 = vst [vmem:[#allocation9_spill] sm:$0xff] %v5687_v28  ;;  %v843_v28 = vand.u32 31, %v5225_v1 }
 0x1c3   :  { %vm891_vm13 = vcmp.eq.s32.totalorder %v843_v28, %v4879_v23  ;;  %vm907_vm14 = vcmp.eq.s32.totalorder %v843_v28, %v4882_v24 }
 0x1c4   :  { %vm3871_vm5 = vmpackc.low %vm907_vm14, %vm891_vm13  ;;  %vm864_vm13 = vcmp.eq.s32.totalorder %v848_v58, %v4812_v49  ;;  %vm880_vm14 = vcmp.eq.s32.totalorder %v848_v58, %v4926_v33 }
 0x1c5   :  { %v5689_v29 = vpop.f32.mrf.mxu3 }
 0x1c6   :  { %v5691_v30 = vpop.f32.mrf.mxu2 }
 0x1c7   :  { %v5693_v31 = vpop.f32.mrf.mxu1 }
 0x1c8   :  { %v5700_v35 = vpop.f32.mrf.mxu0 }
 0x1c9   :  { %6958 = vst [vmem:[#allocation10_spill] sm:$0xff] %v5700_v35 }
 0x1ca   :  { %3761 = vmatmul.msk.bf16.gmra.mxu3 %vm1013_vm10, %v5165_v62  ;;  %3783 = vmatmul.msk.bf16.gmra.mxu1 %vm1013_vm10, %v5165_v62 }
 0x1cb   :  { %3816 = vmatmul.msk.bf16.gmra.mxu0 %vm1013_vm10, %v5165_v62  ;;  %3840 = vmatmul.msk.bf16.vlgmr.msra.gmra.mxu2 %vm1422_vm12, %v5698_v34 }
 0x1cd   :  { %v5710_v36 = vpop.f32.mrf.mxu3 }
 0x1ce   :  { %v5712_v38 = vpop.f32.mrf.mxu2 }
 0x1cf   :  { %v5714_v40 = vpop.f32.mrf.mxu1 }
 0x1d0   :  { %v5716_v41 = vpop.f32.mrf.mxu0 }
 0x1d1   :  { %6959 = vst [vmem:[#allocation11_spill] sm:$0xff] %v5716_v41  ;;  %v6969_v41 = vmov 1.0|1.0  }
 0x1d5   :  { %v5722_v45 = vpop.f32.mrf.mxu3 }
 0x1d6   :  { %v5724_v51 = vpop.f32.mrf.mxu2 }
 0x1d7   :  { %v5728_v52 = vpop.f32.mrf.mxu1 }
 0x1d8   :  { %v5735_v56 = vpop.f32.mrf.mxu0 }
 0x1d9   :  { %6960 = vst [vmem:[#allocation12_spill] sm:$0xff] %v5735_v56 }
 0x1da   :  { %3803 = vmatmul.msk.bf16.vlgmr.msra.gmra.mxu3 %vm1013_vm10, %v5045_v48  ;;  %3833 = vmatmul.msk.bf16.vlgmr.msra.gmra.mxu1 %vm1422_vm12, %v5698_v34 }
 0x1db   :  { %3841 = vmatmul.msk.bf16.gmra.mxu2 %vm1422_vm12, %v5733_v43  ;;  %3854 = vmatmul.msk.bf16.vlgmr.msrb.gmra.mxu0 %vm1422_vm12, %v5698_v34 }
 0x1dc   :  { %3872 = vmatpush.bf16.msk.msra.mxu3 %vm3871_vm5, %v6969_v41 }
 0x1dd   :  { %v5746_v57 = vpop.f32.mrf.mxu3 }
 0x1de   :  { %v5748_v63 = vpop.f32.mrf.mxu2 }
 0x1df   :  { %v5750_v3 = vpop.f32.mrf.mxu1 }
 0x1e0   :  { %v5752_v7 = vpop.f32.mrf.mxu0 }
 0x1e1   :  { %6961 = vst [vmem:[#allocation13_spill] sm:$0xff] %v5752_v7 }
 0x1e5   :  { %v5764_v46 = vpop.f32.mrf.mxu3 }
 0x1e6   :  { %v5767_v47 = vpop.f32.mrf.mxu2 }
 0x1e7   :  { %v5774_v50 = vpop.f32.mrf.mxu1 }
 0x1e8   :  { %6962 = vst [vmem:[#allocation14_spill] sm:$0xff] %v5774_v50  ;;  %v5783_v44 = vpop.f32.mrf.mxu0  ;;  %v845_v50 = vand.u32 31, %v5228_v2 }
 0x1e9   :  { %6963 = vst [vmem:[#allocation15_spill] sm:$0xff] %v5783_v44 }
 0x1ea   :  { %3804 = vmatmul.msk.bf16.gmra.mxu3 %vm1013_vm10, %v5109_v53  ;;  %3834 = vmatmul.msk.bf16.gmra.mxu1 %vm1422_vm12, %v5733_v43  ;;  %vm893_vm15 = vcmp.eq.s32.totalorder %v845_v50, %v4879_v23  ;;  %vm909_vm0 = vcmp.eq.s32.totalorder %v845_v50, %v4882_v24 }
 0x1eb   :  { %3842 = vmatmul.msk.bf16.gmra.mxu2 %vm1422_vm12, %v5779_v19  ;;  %3855 = vmatmul.msk.bf16.gmra.mxu0 %vm1422_vm12, %v5733_v43  ;;  %vm3885_vm9 = vmpackc.low %vm909_vm0, %vm893_vm15 }
 0x1ec   :  { %3886 = vmatpush.bf16.msk.msra.mxu1 %vm3885_vm9, %v6969_v41  ;;  %vm3908_vm0 = vmpackc.low %vm880_vm14, %vm864_vm13 }
 0x1ed   :  { %v5796_v10 = vpop.f32.mrf.mxu3 }
 0x1ee   :  { %v5798_v17 = vpop.f32.mrf.mxu2 }
 0x1ef   :  { %v5800_v61 = vpop.f32.mrf.mxu1 }
 0x1f0   :  { %v5802_v42 = vpop.f32.mrf.mxu0 }
 0x1f1   :  { %6964 = vst [vmem:[#allocation16_spill] sm:$0xff] %v5802_v42 }
 0x1f5   :  { %v5804_v32 = vpop.f32.mrf.mxu3 }
 0x1f6   :  { %v5806_v37 = vpop.f32.mrf.mxu2 }
 0x1f7   :  { %v5808_v44 = vpop.f32.mrf.mxu1 }
 0x1f8   :  { %6965 = vst [vmem:[#allocation17_spill] sm:$0xff] %v5808_v44  ;;  %v5810_v56 = vpop.f32.mrf.mxu0 }
 0x1f9   :  { %6966 = vst [vmem:[#allocation18_spill] sm:$0xff] %v5810_v56  ;;  %v846_v56 = vand.u32 31, %v5163_v59 }
 0x1fa   :  { %3805 = vmatmul.msk.bf16.gmra.mxu3 %vm1013_vm10, %v5165_v62  ;;  %3835 = vmatmul.msk.bf16.gmra.mxu1 %vm1422_vm12, %v5779_v19 }
 0x1fb   :  { %3856 = vmatmul.msk.bf16.gmra.mxu0 %vm1422_vm12, %v5779_v19  ;;  %3868 = vmatmul.msk.bf16.vlgmr.msrb.gmra.mxu2 %vm1422_vm12, %v5698_v34  ;;  %vm894_vm3 = vcmp.eq.s32.totalorder %v846_v56, %v4879_v23  ;;  %vm910_vm4 = vcmp.eq.s32.totalorder %v846_v56, %v4882_v24  ;;  %vm862_vm8 = vcmp.eq.s32.totalorder %v846_v56, %v4812_v49 }
 0x1fc   :  { %vm3892_vm7 = vmpackc.low %vm910_vm4, %vm894_vm3  ;;  %vm878_vm6 = vcmp.eq.s32.totalorder %v846_v56, %v4926_v33  ;;  %vm859_vm4 = vcmp.eq.s32.totalorder %v843_v28, %v4812_v49 }
 0x1fd   :  { %v5820_v4 = vpop.f32.mrf.mxu3  ;;  %3893 = vmatpush.bf16.msk.msra.mxu2 %vm3892_vm7, %v6969_v41  ;;  %vm3894_vm11 = vmpackc.low %vm878_vm6, %vm862_vm8  ;;  %vm875_vm7 = vcmp.eq.s32.totalorder %v843_v28, %v4926_v33  ;;  %vm861_vm8 = vcmp.eq.s32.totalorder %v845_v50, %v4812_v49  ;;  %vm877_vm6 = vcmp.eq.s32.totalorder %v845_v50, %v4926_v33 }
 0x1fe   :  { %v5822_v42 = vpop.f32.mrf.mxu2  ;;  %vm3906_vm3 = vmpackc.low %vm912_vm2, %vm896_vm1 }
 0x1ff   :  { %v5824_v7 = vpop.f32.mrf.mxu1  ;;  %3907 = vmatpush.bf16.msk.msrb.mxu0 %vm3906_vm3, %v6969_v41  ;;  %vm3887_vm15 = vmpackc.low %vm877_vm6, %vm861_vm8 }
 0x200   :  { %6967 = vst [vmem:[#allocation19_spill] sm:$0xff] %v5824_v7  ;;  %v5826_v35 = vpop.f32.mrf.mxu0  ;;  %3888 = vmatpush.bf16.msk.msra.mxu1 %vm3887_vm15, %v6969_v41 }
 0x201   :  { %6968 = vst [vmem:[#allocation20_spill] sm:$0xff] %v5826_v35  ;;  %3895 = vmatpush.bf16.msk.msra.mxu2 %vm3894_vm11, %v6969_v41  ;;  %vm3873_vm11 = vmpackc.low %vm875_vm7, %vm859_vm4 }
 0x202   :  { %3874 = vmatpush.bf16.msk.msra.mxu3 %vm3873_vm11, %v6969_v41 }
 0x203   :  { %3909 = vmatpush.bf16.msk.msrb.mxu0 %vm3908_vm0, %v6969_v41 }
 0x205   :  { %v5832_v44 = vpop.f32.mrf.mxu3 }
 0x206   :  { %v5834_v0 = vpop.f32.mrf.mxu2 }
 0x207   :  { %v5838_v7 = vpop.f32.mrf.mxu1 }
 0x208   :  { %6970 = vst [vmem:[#allocation21_spill] sm:$0xff] %v5838_v7  ;;  %v5840_v35 = vpop.f32.mrf.mxu0 }
 0x209   :  { %6971 = vst [vmem:[#allocation22_spill] sm:$0xff] %v5840_v35 }
 0x20a   :  { %3847 = vmatmul.msk.bf16.vlgmr.msrb.gmra.mxu3 %vm1422_vm12, %v5698_v34  ;;  %3861 = vmatmul.msk.bf16.vlgmr.msrb.gmra.mxu1 %vm1422_vm12, %v5698_v34 }
 0x20b   :  { %3869 = vmatmul.msk.bf16.gmra.mxu2 %vm1422_vm12, %v5733_v43  ;;  %3882 = vmatmul.msk.bf16.vlgmr.msra.gmra.mxu0 %vm1422_vm12, %v5698_v34 }
 0x20d   :  { %v5851_v59 = vpop.f32.mrf.mxu3 }
 0x20e   :  { %6972 = vst [vmem:[#allocation23_spill] sm:$0xff] %v5851_v59  ;;  %v5853_v56 = vpop.f32.mrf.mxu2 }
 0x20f   :  { %6973 = vst [vmem:[#allocation24_spill] sm:$0xff] %v5853_v56  ;;  %v5855_v7 = vpop.f32.mrf.mxu1 }
 0x210   :  { %6974 = vst [vmem:[#allocation25_spill] sm:$0xff] %v5855_v7  ;;  %v5857_v35 = vpop.f32.mrf.mxu0 }
 0x211   :  { %6975 = vst [vmem:[#allocation26_spill] sm:$0xff] %v5857_v35 }
 0x215   :  { %v5869_v1 = vpop.f32.mrf.mxu3 }
 0x216   :  { %6976 = vst [vmem:[#allocation27_spill] sm:$0xff] %v5869_v1  ;;  %v5872_v2 = vpop.f32.mrf.mxu2 }
 0x217   :  { %6977 = vst [vmem:[#allocation28_spill] sm:$0xff] %v5872_v2  ;;  %v5879_v5 = vpop.f32.mrf.mxu1 }
 0x218   :  { %6978 = vst [vmem:[#allocation29_spill] sm:$0xff] %v5879_v5  ;;  %v5883_v35 = vpop.f32.mrf.mxu0 }
 0x219   :  { %6979 = vst [vmem:[#allocation30_spill] sm:$0xff] %v5883_v35 }
 0x21a   :  { %3848 = vmatmul.msk.bf16.gmra.mxu3 %vm1422_vm12, %v5733_v43  ;;  %3862 = vmatmul.msk.bf16.gmra.mxu1 %vm1422_vm12, %v5733_v43 }
 0x21b   :  { %3870 = vmatmul.msk.bf16.gmra.mxu2 %vm1422_vm12, %v5779_v19  ;;  %3883 = vmatmul.msk.bf16.gmra.mxu0 %vm1422_vm12, %v5733_v43 }
 0x21d   :  { %v5896_v58 = vpop.f32.mrf.mxu3 }
 0x21e   :  { %6980 = vst [vmem:[#allocation31_spill] sm:$0xff] %v5896_v58  ;;  %v5898_v28 = vpop.f32.mrf.mxu2  ;;  %v4513_v58 = vld [vmem:[%s6919_s6] sm:$0xff] }
 0x21f   :  { %6981 = vst [vmem:[#allocation32_spill] sm:$0xff] %v5898_v28  ;;  %v5900_v50 = vpop.f32.mrf.mxu1 }
 0x220   :  { %6982 = vst [vmem:[#allocation33_spill] sm:$0xff] %v5900_v50  ;;  %v5902_v35 = vpop.f32.mrf.mxu0 }
 0x221   :  { %6983 = vst [vmem:[#allocation34_spill] sm:$0xff] %v5902_v35 }
 0x225   :  { %v5904_v5 = vpop.f32.mrf.mxu3 }
 0x226   :  { %6984 = vst [vmem:[#allocation35_spill] sm:$0xff] %v5904_v5  ;;  %v5906_v7 = vpop.f32.mrf.mxu2 }
 0x227   :  { %6985 = vst [vmem:[#allocation36_spill] sm:$0xff] %v5906_v7  ;;  %v5908_v2 = vpop.f32.mrf.mxu1 }
 0x228   :  { %6986 = vst [vmem:[#allocation37_spill] sm:$0xff] %v5908_v2  ;;  %v5910_v56 = vpop.f32.mrf.mxu0 }
 0x229   :  { %6987 = vst [vmem:[#allocation38_spill] sm:$0xff] %v5910_v56  ;;  %v850_v56 = vand.u32 31, %v5362_v6 }
 0x22a   :  { %3849 = vmatmul.msk.bf16.gmra.mxu3 %vm1422_vm12, %v5779_v19  ;;  %3863 = vmatmul.msk.bf16.gmra.mxu1 %vm1422_vm12, %v5779_v19 }
 0x22b   :  { %3884 = vmatmul.msk.bf16.gmra.mxu0 %vm1422_vm12, %v5779_v19  ;;  %3896 = vmatmul.msk.bf16.vlgmr.msra.gmra.mxu2 %vm1422_vm12, %v5698_v34  ;;  %vm898_vm5 = vcmp.eq.s32.totalorder %v850_v56, %v4879_v23  ;;  %vm914_vm1 = vcmp.eq.s32.totalorder %v850_v56, %v4882_v24  ;;  %vm866_vm9 = vcmp.eq.s32.totalorder %v850_v56, %v4812_v49 }
 0x22c   :  { %vm3920_vm2 = vmpackc.low %vm914_vm1, %vm898_vm5  ;;  %vm882_vm3 = vcmp.eq.s32.totalorder %v850_v56, %v4926_v33 }
 0x22d   :  { %v5920_v35 = vpop.f32.mrf.mxu3  ;;  %3921 = vmatpush.bf16.msk.msrb.mxu2 %vm3920_vm2, %v6969_v41  ;;  %vm3922_vm4 = vmpackc.low %vm882_vm3, %vm866_vm9 }
 0x22e   :  { %6988 = vst [vmem:[#allocation39_spill] sm:$0xff] %v5920_v35  ;;  %v5922_v50 = vpop.f32.mrf.mxu2 }
 0x22f   :  { %6989 = vst [vmem:[#allocation40_spill] sm:$0xff] %v5922_v50  ;;  %v5924_v7 = vpop.f32.mrf.mxu1  ;;  %v849_v50 = vand.u32 31, %v5425_v9 }
 0x230   :  { %6990 = vst [vmem:[#allocation41_spill] sm:$0xff] %v5924_v7  ;;  %v5926_v2 = vpop.f32.mrf.mxu0 }
 0x231   :  { %6991 = vst [vmem:[#allocation42_spill] sm:$0xff] %v5926_v2  ;;  %3923 = vmatpush.bf16.msk.msrb.mxu2 %vm3922_vm4, %v6969_v41  ;;  %vm897_vm6 = vcmp.eq.s32.totalorder %v849_v50, %v4879_v23  ;;  %vm913_vm11 = vcmp.eq.s32.totalorder %v849_v50, %v4882_v24  ;;  %vm865_vm9 = vcmp.eq.s32.totalorder %v849_v50, %v4812_v49 }
 0x232   :  { %vm3913_vm0 = vmpackc.low %vm913_vm11, %vm897_vm6  ;;  %vm881_vm3 = vcmp.eq.s32.totalorder %v849_v50, %v4926_v33 }
 0x233   :  { %3914 = vmatpush.bf16.msk.msrb.mxu1 %vm3913_vm0, %v6969_v41  ;;  %vm3915_vm6 = vmpackc.low %vm881_vm3, %vm865_vm9  ;;  %vm3492_vm9 = vcmask 392192  }
 0x235   :  { %v5932_v28 = vpop.f32.mrf.mxu3 }
 0x236   :  { %6992 = vst [vmem:[#allocation43_spill] sm:$0xff] %v5932_v28  ;;  %v5934_v5 = vpop.f32.mrf.mxu2  ;;  %v852_v28 = vand.u32 31, %v5432_v11 }
 0x237   :  { %6993 = vst [vmem:[#allocation44_spill] sm:$0xff] %v5934_v5  ;;  %v5938_v7 = vpop.f32.mrf.mxu1  ;;  %v847_v5 = vand.u32 31, %v5422_v8  ;;  %3916 = vmatpush.bf16.msk.msrb.mxu1 %vm3915_vm6, %v6969_v41 }
 0x238   :  { %6994 = vst [vmem:[#allocation45_spill] sm:$0xff] %v5938_v7  ;;  %v5940_v2 = vpop.f32.mrf.mxu0  ;;  %vm900_vm14 = vcmp.eq.s32.totalorder %v852_v28, %v4879_v23  ;;  %vm916_vm15 = vcmp.eq.s32.totalorder %v852_v28, %v4882_v24 }
 0x239   :  { %6995 = vst [vmem:[#allocation46_spill] sm:$0xff] %v5940_v2  ;;  %vm895_vm7 = vcmp.eq.s32.totalorder %v847_v5, %v4879_v23  ;;  %vm911_vm8 = vcmp.eq.s32.totalorder %v847_v5, %v4882_v24  ;;  %vm3934_vm5 = vmpackc.low %vm916_vm15, %vm900_vm14  ;;  %vm863_vm1 = vcmp.eq.s32.totalorder %v847_v5, %v4812_v49  ;;  %vm879_vm2 = vcmp.eq.s32.totalorder %v847_v5, %v4926_v33  ;;  %v4520_v5 = vld [vmem:[%s6919_s6 + $0x38] sm:$0xff] }
 0x23a   :  { %3875 = vmatmul.msk.bf16.vlgmr.msra.gmra.mxu3 %vm1422_vm12, %v5698_v34  ;;  %3889 = vmatmul.msk.bf16.vlgmr.msra.gmra.mxu1 %vm1422_vm12, %v5698_v34  ;;  %vm3899_vm13 = vmpackc.low %vm911_vm8, %vm895_vm7  ;;  %vm868_vm7 = vcmp.eq.s32.totalorder %v852_v28, %v4812_v49  ;;  %vm884_vm8 = vcmp.eq.s32.totalorder %v852_v28, %v4926_v33 }
 0x23b   :  { %3897 = vmatmul.msk.bf16.gmra.mxu2 %vm1422_vm12, %v5733_v43  ;;  %3910 = vmatmul.msk.bf16.vlgmr.msrb.gmra.mxu0 %vm1422_vm12, %v5698_v34  ;;  %vm3901_vm4 = vmpackc.low %vm879_vm2, %vm863_vm1 }
 0x23c   :  { %3900 = vmatpush.bf16.msk.msrb.mxu3 %vm3899_vm13, %v6969_v41  ;;  %3935 = vmatpush.bf16.msk.msra.mxu0 %vm3934_vm5, %v6969_v41  ;;  %vm3936_vm11 = vmpackc.low %vm884_vm8, %vm868_vm7 }
 0x23d   :  { %v5951_v6 = vpop.f32.mrf.mxu3  ;;  %3040 = vmatpush.bf16.msra.mxu2 %v4520_v5 }
 0x23e   :  { %6996 = vst [vmem:[#allocation47_spill] sm:$0xff] %v5951_v6  ;;  %v5953_v56 = vpop.f32.mrf.mxu2 }
 0x23f   :  { %6997 = vst [vmem:[#allocation48_spill] sm:$0xff] %v5953_v56  ;;  %v5955_v7 = vpop.f32.mrf.mxu1 }
 0x240   :  { %6998 = vst [vmem:[#allocation49_spill] sm:$0xff] %v5955_v7  ;;  %v5957_v2 = vpop.f32.mrf.mxu0  ;;  %3902 = vmatpush.bf16.msk.msrb.mxu3 %vm3901_vm4, %v6969_v41  ;;  %3937 = vmatpush.bf16.msk.msra.mxu0 %vm3936_vm11, %v6969_v41 }
 0x241   :  { %6999 = vst [vmem:[#allocation50_spill] sm:$0xff] %v5957_v2 }
 0x245   :  { %v5969_v8 = vpop.f32.mrf.mxu3 }
 0x246   :  { %7000 = vst [vmem:[#allocation51_spill] sm:$0xff] %v5969_v8  ;;  %v5972_v9 = vpop.f32.mrf.mxu2 }
 0x247   :  { %7001 = vst [vmem:[#allocation52_spill] sm:$0xff] %v5972_v9  ;;  %v5979_v11 = vpop.f32.mrf.mxu1  ;;  %v4518_v9 = vld [vmem:[%s6919_s6 + $0x28] sm:$0xff] }
 0x248   :  { %7002 = vst [vmem:[#allocation53_spill] sm:$0xff] %v5979_v11  ;;  %v5983_v2 = vpop.f32.mrf.mxu0 }
 0x249   :  { %7003 = vst [vmem:[#allocation54_spill] sm:$0xff] %v5983_v2  ;;  %v4519_v2 = vld [vmem:[%s6919_s6 + $0x30] sm:$0xff] }
 0x24a   :  { %3876 = vmatmul.msk.bf16.gmra.mxu3 %vm1422_vm12, %v5733_v43  ;;  %3890 = vmatmul.msk.bf16.gmra.mxu1 %vm1422_vm12, %v5733_v43 }
 0x24b   :  { %3898 = vmatmul.msk.bf16.gmra.mxu2 %vm1422_vm12, %v5779_v19  ;;  %3911 = vmatmul.msk.bf16.gmra.mxu0 %vm1422_vm12, %v5733_v43 }
 0x24c   :  { %3041 = vmatpush.bf16.msra.mxu2 %v4519_v2 }
 0x24d   :  { %v5999_v28 = vpop.f32.mrf.mxu3 }
 0x24e   :  { %7004 = vst [vmem:[#allocation55_spill] sm:$0xff] %v5999_v28  ;;  %v1465_v50 = vpop.f32.mrf.mxu2  ;;  %v4517_v28 = vld [vmem:[%s6919_s6 + $0x20] sm:$0xff] }
 0x24f   :  { %v6004_v11 = vpop.f32.mrf.mxu1  ;;  %v6017_v8 = vmul.f32 %v1465_v50, %v5580_v14  ;;  %v4516_v14 = vld [vmem:[%s6919_s6 + $0x18] sm:$0xff] }
 0x250   :  { %7005 = vst [vmem:[#allocation56_spill] sm:$0xff] %v6004_v11  ;;  %v6006_v7 = vpop.f32.mrf.mxu0  ;;  %3042 = vmatpush.bf16.msra.mxu2 %v4518_v9  ;;  %v4535_v9 = vld [vmem:[%s6919_s6 + $0xb0] sm:$0xff] }
 0x251   :  { %7006 = vst [vmem:[#allocation57_spill] sm:$0xff] %v6006_v7 }
 0x254   :  { %3043 = vmatpush.bf16.msra.mxu2 %v4517_v28 }
 0x255   :  { %v6011_v56 = vpop.f32.mrf.mxu3 }
 0x256   :  { %7007 = vst [vmem:[#allocation58_spill] sm:$0xff] %v6011_v56  ;;  %v1467_v5 = vpop.f32.mrf.mxu2 }
 0x257   :  { %v6020_v11 = vmul.f32 %v1467_v5, %v5591_v18  ;;  %v6022_v7 = vpop.f32.mrf.mxu1  ;;  %v4536_v18 = vld [vmem:[%s6919_s6 + $0xb8] sm:$0xff]  ;;  %v4515_v5 = vld [vmem:[%s6919_s6 + $0x10] sm:$0xff] }
 0x258   :  { %v6024_v2 = vpop.f32.mrf.mxu0  ;;  %3044 = vmatpush.bf16.msra.mxu2 %v4516_v14  ;;  %3088 = vmatpush.bf16.msrb.mxu0 %v4536_v18  ;;  %v4514_v14 = vld [vmem:[%s6919_s6 + $0x8] sm:$0xff] }
 0x259   :  { %v4534_v18 = vld [vmem:[%s6919_s6 + $0xa8] sm:$0xff] }
 0x25a   :  { %3877 = vmatmul.msk.bf16.gmra.mxu3 %vm1422_vm12, %v5779_v19  ;;  %3891 = vmatmul.msk.bf16.gmra.mxu1 %vm1422_vm12, %v5779_v19 }
 0x25b   :  { %3912 = vmatmul.msk.bf16.gmra.mxu0 %vm1422_vm12, %v5779_v19  ;;  %3924 = vmatmul.msk.bf16.vlgmr.msrb.gmra.mxu2 %vm1422_vm12, %v5698_v34 }
 0x25c   :  { %3045 = vmatpush.bf16.msra.mxu2 %v4515_v5  ;;  %3089 = vmatpush.bf16.msrb.mxu0 %v4535_v9  ;;  %v4533_v9 = vld [vmem:[%s6919_s6 + $0xa0] sm:$0xff] }
 0x25d   :  { %v6042_v28 = vpop.f32.mrf.mxu3 }
 0x25e   :  { %7008 = vst [vmem:[#allocation59_spill] sm:$0xff] %v6042_v28  ;;  %v1470_v50 = vpop.f32.mrf.mxu2 }
 0x25f   :  { %v6050_v56 = vpop.f32.mrf.mxu1  ;;  %v6069_v5 = vmul.f32 %v1470_v50, %v5619_v54  ;;  %v4644_v54 = vld [vmem:[%s6920_s7 + $0x18] sm:$0xff]  ;;  %v4643_v50 = vld [vmem:[%s6920_s7 + $0x10] sm:$0xff] }
 0x260   :  { %v6052_v6 = vpop.f32.mrf.mxu0  ;;  %3046 = vmatpush.bf16.msra.mxu2 %v4514_v14  ;;  %3090 = vmatpush.bf16.msrb.mxu0 %v4534_v18 }
 0x261   :  { %7010 = vst [vmem:[#allocation61_spill] sm:$0xff] %v6069_v5  ;;  %2252 = vmatpush.bf16.msra.mxu1 %v4644_v54  ;;  %v851_v5 = vand.u32 31, %v5598_v27  ;;  %v4642_v54 = vld [vmem:[%s6920_s7 + $0x8] sm:$0xff] }
 0x263   :  { %vm899_vm13 = vcmp.eq.s32.totalorder %v851_v5, %v4879_v23  ;;  %vm915_vm14 = vcmp.eq.s32.totalorder %v851_v5, %v4882_v24  ;;  %vm867_vm0 = vcmp.eq.s32.totalorder %v851_v5, %v4812_v49  ;;  %vm883_vm5 = vcmp.eq.s32.totalorder %v851_v5, %v4926_v33  ;;  %v4641_v24 = vld [vmem:[%s6920_s7] sm:$0xff] }
 0x264   :  { %3047 = vmatpush.bf16.msra.mxu2 %v4513_v58  ;;  %3091 = vmatpush.bf16.msrb.mxu0 %v4533_v9  ;;  %v4531_v9 = vld [vmem:[%s6919_s6 + $0x90] sm:$0xff]  ;;  %vm3927_vm15 = vmpackc.low %vm915_vm14, %vm899_vm13  ;;  %v4549_v49 = vld [vmem:[%s6919_s6 + $0x120] sm:$0xff] }
 0x265   :  { %v6060_v28 = vpop.f32.mrf.mxu3  ;;  %2253 = vmatpush.bf16.msra.mxu1 %v4643_v50  ;;  %3928 = vmatpush.bf16.msk.msra.mxu3 %vm3927_vm15, %v6969_v41  ;;  %v4529_v50 = vld [vmem:[%s6919_s6 + $0x80] sm:$0xff]  ;;  %vm3929_vm1 = vmpackc.low %vm883_vm5, %vm867_vm0 }
 0x266   :  { %7009 = vst [vmem:[#allocation60_spill] sm:$0xff] %v6060_v28  ;;  %v1472_v35 = vpop.f32.mrf.mxu2 }
 0x267   :  { %v6072_v1 = vmul.f32 %v1472_v35, %v5649_v20  ;;  %v6074_v59 = vpop.f32.mrf.mxu1  ;;  %v4532_v20 = vld [vmem:[%s6919_s6 + $0x98] sm:$0xff] }
 0x268   :  { %v6076_v14 = vpop.f32.mrf.mxu0  ;;  %3092 = vmatpush.bf16.msrb.mxu0 %v4532_v20  ;;  %v4530_v20 = vld [vmem:[%s6919_s6 + $0x88] sm:$0xff] }
 0x269   :  { %2254 = vmatpush.bf16.msra.mxu1 %v4642_v54  ;;  %3930 = vmatpush.bf16.msk.msra.mxu3 %vm3929_vm1, %v6969_v41 }
 0x26a   :  { %3903 = vmatmul.msk.bf16.vlgmr.msrb.gmra.mxu3 %vm1422_vm12, %v5698_v34  ;;  %3917 = vmatmul.msk.bf16.vlgmr.msrb.gmra.mxu1 %vm1422_vm12, %v5698_v34 }
 0x26b   :  { %3925 = vmatmul.msk.bf16.gmra.mxu2 %vm1422_vm12, %v5733_v43  ;;  %3938 = vmatmul.msk.bf16.vlgmr.msra.gmra.mxu0 %vm1422_vm12, %v5698_v34 }
 0x26c   :  { %3093 = vmatpush.bf16.msrb.mxu0 %v4531_v9 }
 0x26d   :  { %v6094_v35 = vpop.f32.mrf.mxu3  ;;  %2255 = vmatpush.bf16.msra.mxu1 %v4641_v24 }
 0x26e   :  { %7011 = vst [vmem:[#allocation62_spill] sm:$0xff] %v6094_v35  ;;  %v1475_v58 = vpop.f32.mrf.mxu2 }
 0x26f   :  { %v6102_v18 = vpop.f32.mrf.mxu1  ;;  %v6127_v9 = vmul.f32 %v1475_v58, %v5681_v21  ;;  %v4552_v21 = vld [vmem:[%s6919_s6 + $0x138] sm:$0xff]  ;;  %v4551_v58 = vld [vmem:[%s6919_s6 + $0x130] sm:$0xff] }
 0x270   :  { %v6104_v28 = vpop.f32.mrf.mxu0  ;;  %3094 = vmatpush.bf16.msrb.mxu0 %v4530_v20  ;;  %3136 = vmatpush.bf16.msrb.mxu2 %v4552_v21  ;;  %v1832_v21 = vmul.f32 %v6050_v56, %v5583_v15  ;;  %v4546_v56 = vld [vmem:[%s6919_s6 + $0x108] sm:$0xff] }
 0x271   :  { %7013 = vst [vmem:[#allocation64_spill] sm:$0xff] %v6127_v9 }
 0x274   :  { %3095 = vmatpush.bf16.msrb.mxu0 %v4529_v50  ;;  %3137 = vmatpush.bf16.msrb.mxu2 %v4551_v58  ;;  %v4550_v50 = vld [vmem:[%s6919_s6 + $0x128] sm:$0xff] }
 0x275   :  { %v6116_v35 = vpop.f32.mrf.mxu3 }
 0x276   :  { %7012 = vst [vmem:[#allocation63_spill] sm:$0xff] %v6116_v35  ;;  %v1477_v27 = vpop.f32.mrf.mxu2 }
 0x277   :  { %v6130_v54 = vmul.f32 %v1477_v27, %v5689_v29  ;;  %v6132_v20 = vpop.f32.mrf.mxu1 }
 0x278   :  { %v6134_v23 = vpop.f32.mrf.mxu0  ;;  %3138 = vmatpush.bf16.msrb.mxu2 %v4550_v50 }
 0x27a   :  { %3904 = vmatmul.msk.bf16.gmra.mxu3 %vm1422_vm12, %v5733_v43  ;;  %3918 = vmatmul.msk.bf16.gmra.mxu1 %vm1422_vm12, %v5733_v43 }
 0x27b   :  { %3926 = vmatmul.msk.bf16.gmra.mxu2 %vm1422_vm12, %v5779_v19  ;;  %3939 = vmatmul.msk.bf16.gmra.mxu0 %vm1422_vm12, %v5733_v43 }
 0x27c   :  { %3139 = vmatpush.bf16.msrb.mxu2 %v4549_v49  ;;  %v4548_v49 = vld [vmem:[%s6919_s6 + $0x118] sm:$0xff] }
 0x27d   :  { %v6150_v29 = vpop.f32.mrf.mxu3 }
 0x27e   :  { %7014 = vst [vmem:[#allocation65_spill] sm:$0xff] %v6150_v29  ;;  %v1561_v41 = vpop.f32.mrf.mxu2  ;;  %v1816_v29 = vmul.f32 %v6022_v7, %v5558_v12  ;;  %v4544_v12 = vld [vmem:[%s6919_s6 + $0xf8] sm:$0xff] }
 0x27f   :  { %v6155_v27 = vpop.f32.mrf.mxu1  ;;  %v6172_v58 = vmul.f32 %v1561_v41, %v5683_v22  ;;  %v4568_v22 = vld [vmem:[%s6919_s6 + $0x1b8] sm:$0xff]  ;;  %3112 = vmatpush.bf16.msrb.mxu1 %v4544_v12  ;;  %v4543_v41 = vld [vmem:[%s6919_s6 + $0xf0] sm:$0xff] }
 0x280   :  { %v6157_v24 = vpop.f32.mrf.mxu0  ;;  %v1912_v15 = vpack.c.bf16 %v1832_v21, %v1816_v29  ;;  %3140 = vmatpush.bf16.msrb.mxu2 %v4548_v49  ;;  %3184 = vmatpush.bf16.msra.mxu0 %v4568_v22  ;;  %v4527_v29 = vld [vmem:[%s6919_s6 + $0x70] sm:$0xff]  ;;  %v4526_v49 = vld [vmem:[%s6919_s6 + $0x68] sm:$0xff] }
 0x281   :  { %7016 = vst [vmem:[#allocation67_spill] sm:$0xff] %v6172_v58  ;;  %v4547_v21 = vld [vmem:[%s6919_s6 + $0x110] sm:$0xff]  ;;  %v4542_v22 = vld [vmem:[%s6919_s6 + $0xe8] sm:$0xff] }
 0x283   :  { %3113 = vmatpush.bf16.msrb.mxu1 %v4543_v41 }
 0x284   :  { %3141 = vmatpush.bf16.msrb.mxu2 %v4547_v21 }
 0x285   :  { %v6164_v5 = vpop.f32.mrf.mxu3 }
 0x286   :  { %7015 = vst [vmem:[#allocation66_spill] sm:$0xff] %v6164_v5  ;;  %v1563_v33 = vpop.f32.mrf.mxu2  ;;  %v4566_v5 = vld [vmem:[%s6919_s6 + $0x1a8] sm:$0xff] }
 0x287   :  { %v6175_v35 = vmul.f32 %v1563_v33, %v5691_v30  ;;  %v6177_v50 = vpop.f32.mrf.mxu1  ;;  %v4528_v33 = vld [vmem:[%s6919_s6 + $0x78] sm:$0xff]  ;;  %3114 = vmatpush.bf16.msrb.mxu1 %v4542_v22 }
 0x288   :  { %v6179_v9 = vpop.f32.mrf.mxu0  ;;  %3064 = vmatpush.bf16.msrb.mxu3 %v4528_v33  ;;  %v4567_v33 = vld [vmem:[%s6919_s6 + $0x1b0] sm:$0xff]  ;;  %3142 = vmatpush.bf16.msrb.mxu2 %v4546_v56  ;;  %v4565_v56 = vld [vmem:[%s6919_s6 + $0x1a0] sm:$0xff] }
 0x289   :  { %7017 = vst [vmem:[#allocation68_spill] sm:$0xff] %v6175_v35  ;;  %3185 = vmatpush.bf16.msra.mxu0 %v4567_v33  ;;  %v4525_v35 = vld [vmem:[%s6919_s6 + $0x60] sm:$0xff] }
 0x28a   :  { %3905 = vmatmul.msk.bf16.gmra.mxu3 %vm1422_vm12, %v5779_v19  ;;  %3919 = vmatmul.msk.bf16.gmra.mxu1 %vm1422_vm12, %v5779_v19 }
 0x28b   :  { %3940 = vmatmul.msk.bf16.gmra.mxu0 %vm1422_vm12, %v5779_v19  ;;  %3048 = vmatmul.bf16.vlgmr.msra.gmra.mxu2 %v1912_v15 }
 0x28c   :  { %3065 = vmatpush.bf16.msrb.mxu3 %v4527_v29  ;;  %v1864_v29 = vmul.f32 %v6102_v18, %v5630_v55  ;;  %v4545_v55 = vld [vmem:[%s6919_s6 + $0x100] sm:$0xff]  ;;  %v1848_v18 = vmul.f32 %v6074_v59, %v5595_v26  ;;  %v4564_v59 = vld [vmem:[%s6919_s6 + $0x198] sm:$0xff] }
 0x28d   :  { %v1489_v30 = vpop.f32.mrf.mxu3  ;;  %3186 = vmatpush.bf16.msra.mxu0 %v4566_v5  ;;  %3143 = vmatpush.bf16.msrb.mxu2 %v4545_v55  ;;  %v4562_v55 = vld [vmem:[%s6919_s6 + $0x188] sm:$0xff] }
 0x28e   :  { %v1566_v7 = vpop.f32.mrf.mxu2  ;;  %v1818_v21 = vmul.f32 %v1489_v30, %v5710_v36 }
 0x28f   :  { %v6210_v15 = vpop.f32.mrf.mxu1  ;;  %v6245_v36 = vmul.f32 %v1566_v7, %v5712_v38  ;;  %v4524_v38 = vld [vmem:[%s6919_s6 + $0x58] sm:$0xff]  ;;  %v4563_v7 = vld [vmem:[%s6919_s6 + $0x190] sm:$0xff] }
 0x290   :  { %v6215_v12 = vpop.f32.mrf.mxu0  ;;  %3066 = vmatpush.bf16.msrb.mxu3 %v4526_v49  ;;  %v4541_v49 = vld [vmem:[%s6919_s6 + $0xe0] sm:$0xff] }
 0x291   :  { %3115 = vmatpush.bf16.msrb.mxu1 %v4541_v49  ;;  %3187 = vmatpush.bf16.msra.mxu0 %v4565_v56  ;;  %v4538_v49 = vld [vmem:[%s6919_s6 + $0xc8] sm:$0xff] }
 0x294   :  { %3067 = vmatpush.bf16.msrb.mxu3 %v4525_v35 }
 0x295   :  { %v1491_v41 = vpop.f32.mrf.mxu3  ;;  %3188 = vmatpush.bf16.msra.mxu0 %v4564_v59  ;;  %v4537_v59 = vld [vmem:[%s6919_s6 + $0xc0] sm:$0xff] }
 0x296   :  { %v1834_v33 = vmul.f32 %v1491_v41, %v5722_v45  ;;  %v1568_v58 = vpop.f32.mrf.mxu2  ;;  %v1928_v41 = vpack.c.bf16 %v1864_v29, %v1848_v18  ;;  %v1896_v18 = vmul.f32 %v6155_v27, %v5685_v25  ;;  %v1880_v25 = vmul.f32 %v6132_v20, %v5664_v39  ;;  %v4584_v39 = vld [vmem:[%s6919_s6 + $0x238] sm:$0xff]  ;;  %v4583_v20 = vld [vmem:[%s6919_s6 + $0x230] sm:$0xff] }
 0x297   :  { %v6248_v45 = vmul.f32 %v1568_v58, %v5724_v51  ;;  %v6250_v5 = vpop.f32.mrf.mxu1  ;;  %v4540_v51 = vld [vmem:[%s6919_s6 + $0xd8] sm:$0xff]  ;;  %v4539_v58 = vld [vmem:[%s6919_s6 + $0xd0] sm:$0xff]  ;;  %3232 = vmatpush.bf16.msra.mxu2 %v4584_v39 }
 0x298   :  { %v1914_v30 = vpack.c.bf16 %v1834_v33, %v1818_v21  ;;  %v6255_v22 = vpop.f32.mrf.mxu0  ;;  %3068 = vmatpush.bf16.msrb.mxu3 %v4524_v38  ;;  %3116 = vmatpush.bf16.msrb.mxu1 %v4540_v51  ;;  %v4522_v33 = vld [vmem:[%s6919_s6 + $0x48] sm:$0xff]  ;;  %v4521_v51 = vld [vmem:[%s6919_s6 + $0x40] sm:$0xff] }
 0x299   :  { %v1933_v26 = vpack.c.bf16 %v6248_v45, %v6245_v36  ;;  %3189 = vmatpush.bf16.msra.mxu0 %v4563_v7  ;;  %v1944_v7 = vpack.c.bf16 %v1896_v18, %v1880_v25  ;;  %v4559_v25 = vld [vmem:[%s6919_s6 + $0x170] sm:$0xff]  ;;  %v7059_v45 = vld [vmem:[#allocation55_spill] sm:$0xff] }
 0x29a   :  { %3931 = vmatmul.msk.bf16.vlgmr.msra.gmra.mxu3 %vm1422_vm12, %v5698_v34  ;;  %3957 = vmatmul.msk.bf16.vlgmr.msra.gmra.mxu1 %vm1013_vm10, %v5045_v48  ;;  %v4523_v48 = vld [vmem:[%s6919_s6 + $0x50] sm:$0xff] }
 0x29b   :  { %3053 = vmatmul.bf16.gmra.mxu2 %v1928_v41  ;;  %3096 = vmatmul.bf16.vlgmr.msrb.gmra.mxu0 %v1914_v30 }
 0x29c   :  { %3069 = vmatpush.bf16.msrb.mxu3 %v4523_v48  ;;  %3117 = vmatpush.bf16.msrb.mxu1 %v4539_v58  ;;  %v4561_v48 = vld [vmem:[%s6919_s6 + $0x180] sm:$0xff] }
 0x29d   :  { %v1494_v34 = vpop.f32.mrf.mxu3  ;;  %3190 = vmatpush.bf16.msra.mxu0 %v4562_v55  ;;  %3233 = vmatpush.bf16.msra.mxu2 %v4583_v20  ;;  %v4558_v20 = vld [vmem:[%s6919_s6 + $0x168] sm:$0xff] }
 0x29e   :  { %v1571_v35 = vpop.f32.mrf.mxu2  ;;  %v1850_v30 = vmul.f32 %v1494_v34, %v5746_v57 }
 0x29f   :  { %v6281_v29 = vpop.f32.mrf.mxu1  ;;  %v6310_v57 = vmul.f32 %v1571_v35, %v5748_v63 }
 0x2a0   :  { %v6283_v21 = vpop.f32.mrf.mxu0  ;;  %3070 = vmatpush.bf16.msrb.mxu3 %v4522_v33  ;;  %3118 = vmatpush.bf16.msrb.mxu1 %v4538_v49 }
 0x2a1   :  { %3191 = vmatpush.bf16.msra.mxu0 %v4561_v48 }
 0x2a4   :  { %3071 = vmatpush.bf16.msrb.mxu3 %v4521_v51  ;;  %3119 = vmatpush.bf16.msrb.mxu1 %v4537_v59 }
 0x2a5   :  { %v1496_v56 = vpop.f32.mrf.mxu3 }
 0x2a6   :  { %v1866_v41 = vmul.f32 %v1496_v56, %v5764_v46  ;;  %v1573_v38 = vpop.f32.mrf.mxu2 }
 0x2a7   :  { %v6313_v46 = vmul.f32 %v1573_v38, %v5767_v47  ;;  %v6315_v27 = vpop.f32.mrf.mxu1  ;;  %v1820_v38 = vmul.f32 %v6177_v50, %v5693_v31  ;;  %v4576_v31 = vld [vmem:[%s6919_s6 + $0x1f8] sm:$0xff] }
 0x2a8   :  { %v1930_v34 = vpack.c.bf16 %v1866_v41, %v1850_v30  ;;  %v6317_v58 = vpop.f32.mrf.mxu0  ;;  %v4581_v41 = vld [vmem:[%s6919_s6 + $0x220] sm:$0xff]  ;;  %3208 = vmatpush.bf16.msra.mxu1 %v4576_v31 }
 0x2a9   :  { %v1949_v33 = vpack.c.bf16 %v6313_v46, %v6310_v57  ;;  %v4623_v46 = vld [vmem:[%s6919_s6 + $0x370] sm:$0xff] }
 0x2aa   :  { %3932 = vmatmul.msk.bf16.gmra.mxu3 %vm1422_vm12, %v5733_v43  ;;  %3958 = vmatmul.msk.bf16.gmra.mxu1 %vm1013_vm10, %v5109_v53  ;;  %v4582_v53 = vld [vmem:[%s6919_s6 + $0x228] sm:$0xff]  ;;  %v1836_v43 = vmul.f32 %v6210_v15, %v5714_v40 }
 0x2ab   :  { %3058 = vmatmul.bf16.gmra.mxu2 %v1944_v7  ;;  %3101 = vmatmul.bf16.gmra.mxu0 %v1930_v34  ;;  %v4575_v34 = vld [vmem:[%s6919_s6 + $0x1f0] sm:$0xff] }
 0x2ac   :  { %3234 = vmatpush.bf16.msra.mxu2 %v4582_v53  ;;  %v4579_v7 = vld [vmem:[%s6919_s6 + $0x210] sm:$0xff]  ;;  %3209 = vmatpush.bf16.msra.mxu1 %v4575_v34  ;;  %v4574_v53 = vld [vmem:[%s6919_s6 + $0x1e8] sm:$0xff] }
 0x2ad   :  { %v1499_v63 = vpop.f32.mrf.mxu3  ;;  %v4595_v34 = vld [vmem:[%s6919_s6 + $0x290] sm:$0xff] }
 0x2ae   :  { %v1657_v47 = vpop.f32.mrf.mxu2  ;;  %v1882_v18 = vmul.f32 %v1499_v63, %v5796_v10  ;;  %v4599_v63 = vld [vmem:[%s6919_s6 + $0x2b0] sm:$0xff] }
 0x2af   :  { %v6331_v35 = vpop.f32.mrf.mxu1  ;;  %v6348_v51 = vmul.f32 %v1657_v47, %v5798_v17  ;;  %v4580_v17 = vld [vmem:[%s6919_s6 + $0x218] sm:$0xff] }
 0x2b0   :  { %v6333_v49 = vpop.f32.mrf.mxu0  ;;  %3235 = vmatpush.bf16.msra.mxu2 %v4581_v41  ;;  %3210 = vmatpush.bf16.msra.mxu1 %v4574_v53  ;;  %v1819_v41 = vmul.f32 %v6024_v2, %v5560_v13  ;;  %v1852_v13 = vmul.f32 %v6250_v5, %v5728_v52  ;;  %v4556_v52 = vld [vmem:[%s6919_s6 + $0x158] sm:$0xff]  ;;  %v4570_v53 = vld [vmem:[%s6919_s6 + $0x1c8] sm:$0xff] }
 0x2b1   :  { %v4572_v5 = vld [vmem:[%s6919_s6 + $0x1d8] sm:$0xff] }
 0x2b4   :  { %3236 = vmatpush.bf16.msra.mxu2 %v4580_v17 }
 0x2b5   :  { %v1501_v55 = vpop.f32.mrf.mxu3 }
 0x2b6   :  { %v1898_v56 = vmul.f32 %v1501_v55, %v5804_v32  ;;  %v1659_v30 = vpop.f32.mrf.mxu2  ;;  %v1916_v32 = vpack.c.bf16 %v1836_v43, %v1820_v38  ;;  %v4578_v43 = vld [vmem:[%s6919_s6 + $0x208] sm:$0xff] }
 0x2b7   :  { %v6351_v59 = vmul.f32 %v1659_v30, %v5806_v37  ;;  %v6353_v40 = vpop.f32.mrf.mxu1  ;;  %v4560_v37 = vld [vmem:[%s6919_s6 + $0x178] sm:$0xff]  ;;  %v4598_v55 = vld [vmem:[%s6919_s6 + $0x2a8] sm:$0xff] }
 0x2b8   :  { %v1946_v15 = vpack.c.bf16 %v1898_v56, %v1882_v18  ;;  %v6355_v10 = vpop.f32.mrf.mxu0  ;;  %3160 = vmatpush.bf16.msra.mxu3 %v4560_v37  ;;  %3237 = vmatpush.bf16.msra.mxu2 %v4579_v7  ;;  %v1835_v18 = vmul.f32 %v6052_v6, %v5585_v16  ;;  %v1868_v56 = vmul.f32 %v6281_v29, %v5750_v3  ;;  %v4557_v16 = vld [vmem:[%s6919_s6 + $0x160] sm:$0xff] }
 0x2b9   :  { %v1921_v48 = vpack.c.bf16 %v6351_v59, %v6348_v51  ;;  %v4573_v6 = vld [vmem:[%s6919_s6 + $0x1e0] sm:$0xff]  ;;  %v4619_v51 = vld [vmem:[%s6919_s6 + $0x350] sm:$0xff] }
 0x2ba   :  { %3933 = vmatmul.msk.bf16.gmra.mxu3 %vm1422_vm12, %v5779_v19  ;;  %3959 = vmatmul.msk.bf16.gmra.mxu1 %vm1013_vm10, %v5165_v62  ;;  %v4600_v19 = vld [vmem:[%s6919_s6 + $0x2b8] sm:$0xff]  ;;  %v4577_v3 = vld [vmem:[%s6919_s6 + $0x200] sm:$0xff]  ;;  %v1915_v37 = vpack.c.bf16 %v1835_v18, %v1819_v41  ;;  %v1900_v18 = vmul.f32 %v6331_v35, %v5800_v61  ;;  %v7023_v35 = vld [vmem:[#allocation24_spill] sm:$0xff] }
 0x2bb   :  { %3106 = vmatmul.bf16.gmra.mxu0 %v1946_v15  ;;  %3144 = vmatmul.bf16.vlgmr.msrb.gmra.mxu2 %v1916_v32  ;;  %v4597_v29 = vld [vmem:[%s6919_s6 + $0x2a0] sm:$0xff]  ;;  %v4635_v59 = vld [vmem:[%s6919_s6 + $0x3d0] sm:$0xff] }
 0x2bc   :  { %3280 = vmatpush.bf16.msrb.mxu0 %v4600_v19  ;;  %3161 = vmatpush.bf16.msra.mxu3 %v4559_v25  ;;  %v1932_v19 = vpack.c.bf16 %v1868_v56, %v1852_v13  ;;  %v4571_v25 = vld [vmem:[%s6919_s6 + $0x1d0] sm:$0xff]  ;;  %v4593_v61 = vld [vmem:[%s6919_s6 + $0x280] sm:$0xff] }
 0x2bd   :  { %v1585_v62 = vpop.f32.mrf.mxu3  ;;  %3238 = vmatpush.bf16.msra.mxu2 %v4578_v43  ;;  %3211 = vmatpush.bf16.msra.mxu1 %v4573_v6  ;;  %v4594_v43 = vld [vmem:[%s6919_s6 + $0x288] sm:$0xff] }
 0x2be   :  { %v1662_v50 = vpop.f32.mrf.mxu2  ;;  %v1822_v38 = vmul.f32 %v1585_v62, %v5820_v4  ;;  %v4596_v62 = vld [vmem:[%s6919_s6 + $0x298] sm:$0xff] }
 0x2bf   :  { %v6384_v39 = vpop.f32.mrf.mxu1  ;;  %v6423_v4 = vmul.f32 %v1662_v50, %v5822_v42 }
 0x2c0   :  { %v6389_v47 = vpop.f32.mrf.mxu0  ;;  %3281 = vmatpush.bf16.msrb.mxu0 %v4599_v63  ;;  %3162 = vmatpush.bf16.msra.mxu3 %v4558_v20  ;;  %v4554_v20 = vld [vmem:[%s6919_s6 + $0x148] sm:$0xff] }
 0x2c1   :  { %3239 = vmatpush.bf16.msra.mxu2 %v4577_v3  ;;  %3212 = vmatpush.bf16.msra.mxu1 %v4572_v5  ;;  %v4553_v3 = vld [vmem:[%s6919_s6 + $0x140] sm:$0xff] }
 0x2c4   :  { %3282 = vmatpush.bf16.msrb.mxu0 %v4598_v55  ;;  %3163 = vmatpush.bf16.msra.mxu3 %v4557_v16  ;;  %v1867_v55 = vmul.f32 %v6104_v28, %v5632_v60  ;;  %v4569_v60 = vld [vmem:[%s6919_s6 + $0x1c0] sm:$0xff] }
 0x2c5   :  { %v1587_v30 = vpop.f32.mrf.mxu3  ;;  %3213 = vmatpush.bf16.msra.mxu1 %v4571_v25  ;;  %v7022_v28 = vld [vmem:[#allocation14_spill] sm:$0xff] }
 0x2c6   :  { %v1838_v15 = vmul.f32 %v1587_v30, %v5832_v44  ;;  %v1664_v32 = vpop.f32.mrf.mxu2  ;;  %v7019_v30 = vld [vmem:[#allocation7_spill] sm:$0xff] }
 0x2c7   :  { %v6426_v44 = vmul.f32 %v1664_v32, %v5834_v0  ;;  %v6428_v2 = vpop.f32.mrf.mxu1  ;;  %v7018_v0 = vpack.c.bf16 %v6020_v11, %v6017_v8  ;;  %v4555_v11 = vld [vmem:[%s6919_s6 + $0x150] sm:$0xff]  ;;  %v1851_v41 = vmul.f32 %v6076_v14, %v7019_v30  ;;  %v7021_v32 = vld [vmem:[#allocation27_spill] sm:$0xff]  ;;  %v1884_v14 = vmul.f32 %v6315_v27, %v7022_v28  ;;  %v7025_v27 = vld [vmem:[#allocation61_spill] sm:$0xff] }
 0x2c8   :  { %v1918_v31 = vpack.c.bf16 %v1838_v15, %v1822_v38  ;;  %v6433_v17 = vpop.f32.mrf.mxu0  ;;  %3283 = vmatpush.bf16.msrb.mxu0 %v4597_v29  ;;  %3164 = vmatpush.bf16.msra.mxu3 %v4556_v52  ;;  %v7020_v38 = vld [vmem:[#allocation23_spill] sm:$0xff]  ;;  %v7024_v29 = vld [vmem:[#allocation28_spill] sm:$0xff] }
 0x2c9   :  { %v1937_v42 = vpack.c.bf16 %v6426_v44, %v6423_v4  ;;  %3214 = vmatpush.bf16.msra.mxu1 %v4570_v53  ;;  %v1948_v5 = vpack.c.bf16 %v1900_v18, %v1884_v14  ;;  %v7028_v18 = vld [vmem:[#allocation19_spill] sm:$0xff]  ;;  %v7033_v28 = vld [vmem:[#allocation32_spill] sm:$0xff] }
 0x2ca   :  { %3072 = vmatmul.bf16.vlgmr.msrb.gmra.mxu3 %v7018_v0  ;;  %3120 = vmatmul.bf16.vlgmr.msrb.gmra.mxu1 %v1915_v37 }
 0x2cb   :  { %3149 = vmatmul.bf16.gmra.mxu2 %v1932_v19  ;;  %3192 = vmatmul.bf16.vlgmr.msra.gmra.mxu0 %v1918_v31  ;;  %v1931_v19 = vpack.c.bf16 %v1867_v55, %v1851_v41  ;;  %v7029_v41 = vld [vmem:[#allocation8_spill] sm:$0xff] }
 0x2cc   :  { %3284 = vmatpush.bf16.msrb.mxu0 %v4596_v62  ;;  %3165 = vmatpush.bf16.msra.mxu3 %v4555_v11 }
 0x2cd   :  { %v1590_v50 = vpop.f32.mrf.mxu3  ;;  %3215 = vmatpush.bf16.msra.mxu1 %v4569_v60  ;;  %v4613_v60 = vld [vmem:[%s6919_s6 + $0x320] sm:$0xff] }
 0x2ce   :  { %v1667_v8 = vpop.f32.mrf.mxu2  ;;  %v1854_v15 = vmul.f32 %v1590_v50, %v7020_v38  ;;  %v7026_v50 = vpack.c.bf16 %v6072_v1, %v7025_v27  ;;  %v4614_v1 = vld [vmem:[%s6919_s6 + $0x328] sm:$0xff]  ;;  %v1883_v38 = vmul.f32 %v6134_v23, %v7029_v41 }
 0x2cf   :  { %v6458_v7 = vpop.f32.mrf.mxu1  ;;  %v6491_v13 = vmul.f32 %v1667_v8, %v7023_v35  ;;  %v4616_v8 = vld [vmem:[%s6919_s6 + $0x338] sm:$0xff] }
 0x2d0   :  { %v6460_v63 = vpop.f32.mrf.mxu0  ;;  %3285 = vmatpush.bf16.msrb.mxu0 %v4595_v34  ;;  %3166 = vmatpush.bf16.msra.mxu3 %v4554_v20  ;;  %v4615_v34 = vld [vmem:[%s6919_s6 + $0x330] sm:$0xff] }
 0x2d1   :  { %3328 = vmatpush.bf16.msrb.mxu2 %v4616_v8  ;;  %v4592_v8 = vld [vmem:[%s6919_s6 + $0x278] sm:$0xff] }
 0x2d4   :  { %3286 = vmatpush.bf16.msrb.mxu0 %v4594_v43  ;;  %3167 = vmatpush.bf16.msra.mxu3 %v4553_v3  ;;  %v7027_v43 = vld [vmem:[#allocation9_spill] sm:$0xff] }
 0x2d5   :  { %v1592_v56 = vpop.f32.mrf.mxu3  ;;  %3329 = vmatpush.bf16.msrb.mxu2 %v4615_v34  ;;  %v1899_v55 = vmul.f32 %v6157_v24, %v7027_v43  ;;  %v4591_v43 = vld [vmem:[%s6919_s6 + $0x270] sm:$0xff] }
 0x2d6   :  { %v1870_v16 = vmul.f32 %v1592_v56, %v7021_v32  ;;  %v1669_v6 = vpop.f32.mrf.mxu2  ;;  %v1840_v56 = vmul.f32 %v6384_v39, %v7028_v18  ;;  %v7034_v39 = vld [vmem:[#allocation36_spill] sm:$0xff] }
 0x2d7   :  { %v6494_v37 = vmul.f32 %v1669_v6, %v7024_v29  ;;  %v6496_v31 = vpop.f32.mrf.mxu1  ;;  %v1947_v23 = vpack.c.bf16 %v1899_v55, %v1883_v38  ;;  %v4607_v55 = vld [vmem:[%s6919_s6 + $0x2f0] sm:$0xff]  ;;  %v4590_v38 = vld [vmem:[%s6919_s6 + $0x268] sm:$0xff] }
 0x2d8   :  { %v1934_v0 = vpack.c.bf16 %v1870_v16, %v1854_v15  ;;  %v6498_v52 = vpop.f32.mrf.mxu0  ;;  %3287 = vmatpush.bf16.msrb.mxu0 %v4593_v61  ;;  %v7030_v15 = vld [vmem:[#allocation31_spill] sm:$0xff]  ;;  %v7032_v61 = vld [vmem:[#allocation17_spill] sm:$0xff]  ;;  %3256 = vmatpush.bf16.msrb.mxu3 %v4592_v8  ;;  %v4611_v18 = vld [vmem:[%s6919_s6 + $0x310] sm:$0xff] }
 0x2d9   :  { %v1953_v62 = vpack.c.bf16 %v6494_v37, %v6491_v13  ;;  %3330 = vmatpush.bf16.msrb.mxu2 %v4614_v1  ;;  %v7031_v16 = vld [vmem:[#allocation35_spill] sm:$0xff]  ;;  %v1824_v24 = vmul.f32 %v6353_v40, %v7032_v61  ;;  %v4605_v8 = vld [vmem:[%s6919_s6 + $0x2e0] sm:$0xff] }
 0x2da   :  { %3077 = vmatmul.bf16.gmra.mxu3 %v7026_v50  ;;  %3125 = vmatmul.bf16.gmra.mxu1 %v1931_v19  ;;  %v7035_v50 = vld [vmem:[#allocation64_spill] sm:$0xff]  ;;  %v7080_v37 = vld [vmem:[#allocation38_spill] sm:$0xff] }
 0x2db   :  { %3154 = vmatmul.bf16.gmra.mxu2 %v1948_v5  ;;  %3197 = vmatmul.bf16.gmra.mxu0 %v1934_v0  ;;  %v1920_v5 = vpack.c.bf16 %v1840_v56, %v1824_v24  ;;  %v7036_v40 = vpack.c.bf16 %v6130_v54, %v7035_v50  ;;  %v4632_v54 = vld [vmem:[%s6919_s6 + $0x3b8] sm:$0xff] }
 0x2dc   :  { %3376 = vmatpush.bf16.msra.mxu0 %v4632_v54  ;;  %3257 = vmatpush.bf16.msrb.mxu3 %v4591_v43 }
 0x2dd   :  { %v1595_v11 = vpop.f32.mrf.mxu3  ;;  %3331 = vmatpush.bf16.msrb.mxu2 %v4613_v60  ;;  %v7038_v60 = vld [vmem:[#allocation25_spill] sm:$0xff] }
 0x2de   :  { %v1753_v25 = vpop.f32.mrf.mxu2  ;;  %v1886_v32 = vmul.f32 %v1595_v11, %v7030_v15  ;;  %v4608_v11 = vld [vmem:[%s6919_s6 + $0x2f8] sm:$0xff]  ;;  %v4606_v15 = vld [vmem:[%s6919_s6 + $0x2e8] sm:$0xff]  ;;  %v1872_v61 = vmul.f32 %v6458_v7, %v7038_v60  ;;  %v4609_v7 = vld [vmem:[%s6919_s6 + $0x300] sm:$0xff] }
 0x2df   :  { %v6511_v20 = vpop.f32.mrf.mxu1  ;;  %v6532_v14 = vmul.f32 %v1753_v25, %v7033_v28  ;;  %v4612_v25 = vld [vmem:[%s6919_s6 + $0x318] sm:$0xff]  ;;  %3304 = vmatpush.bf16.msrb.mxu1 %v4608_v11  ;;  %v7039_v28 = vld [vmem:[#allocation10_spill] sm:$0xff] }
 0x2e0   :  { %v6513_v53 = vpop.f32.mrf.mxu0  ;;  %3258 = vmatpush.bf16.msrb.mxu3 %v4590_v38  ;;  %v7042_v11 = vld [vmem:[#allocation21_spill] sm:$0xff] }
 0x2e1   :  { %3332 = vmatpush.bf16.msrb.mxu2 %v4612_v25  ;;  %v7043_v25 = vld [vmem:[#allocation40_spill] sm:$0xff]  ;;  %v4604_v60 = vld [vmem:[%s6919_s6 + $0x2d8] sm:$0xff] }
 0x2e3   :  { %3305 = vmatpush.bf16.msrb.mxu1 %v4607_v55 }
 0x2e5   :  { %v1597_v30 = vpop.f32.mrf.mxu3  ;;  %3333 = vmatpush.bf16.msrb.mxu2 %v4611_v18  ;;  %v4629_v18 = vld [vmem:[%s6919_s6 + $0x3a0] sm:$0xff] }
 0x2e6   :  { %v1902_v6 = vmul.f32 %v1597_v30, %v7031_v16  ;;  %v1755_v3 = vpop.f32.mrf.mxu2  ;;  %v4631_v30 = vld [vmem:[%s6919_s6 + $0x3b0] sm:$0xff]  ;;  %v4630_v16 = vld [vmem:[%s6919_s6 + $0x3a8] sm:$0xff] }
 0x2e7   :  { %v6535_v35 = vmul.f32 %v1755_v3, %v7034_v39  ;;  %v6537_v29 = vpop.f32.mrf.mxu1  ;;  %3377 = vmatpush.bf16.msra.mxu0 %v4631_v30  ;;  %3306 = vmatpush.bf16.msrb.mxu1 %v4606_v15  ;;  %v1823_v39 = vmul.f32 %v6179_v9, %v7039_v28  ;;  %v1856_v9 = vmul.f32 %v6428_v2, %v7042_v11 }
 0x2e8   :  { %v1950_v19 = vpack.c.bf16 %v1902_v6, %v1886_v32  ;;  %v6539_v0 = vpop.f32.mrf.mxu0  ;;  %v4610_v32 = vld [vmem:[%s6919_s6 + $0x308] sm:$0xff] }
 0x2e9   :  { %v1925_v27 = vpack.c.bf16 %v6535_v35, %v6532_v14  ;;  %v7037_v6 = vld [vmem:[#allocation11_spill] sm:$0xff]  ;;  %3334 = vmatpush.bf16.msrb.mxu2 %v4610_v32  ;;  %v1936_v15 = vpack.c.bf16 %v1872_v61, %v1856_v9  ;;  %v4628_v61 = vld [vmem:[%s6919_s6 + $0x398] sm:$0xff]  ;;  %v7083_v35 = vld [vmem:[#allocation46_spill] sm:$0xff] }
 0x2ea   :  { %3082 = vmatmul.bf16.gmra.mxu3 %v7036_v40  ;;  %3130 = vmatmul.bf16.gmra.mxu1 %v1947_v23  ;;  %v1839_v3 = vmul.f32 %v6215_v12, %v7037_v6  ;;  %v7040_v23 = vld [vmem:[#allocation39_spill] sm:$0xff]  ;;  %v4589_v12 = vld [vmem:[%s6919_s6 + $0x260] sm:$0xff]  ;;  %v7049_v9 = vld [vmem:[#allocation33_spill] sm:$0xff] }
 0x2eb   :  { %3202 = vmatmul.bf16.gmra.mxu0 %v1950_v19  ;;  %3240 = vmatmul.bf16.vlgmr.msra.gmra.mxu2 %v1920_v5  ;;  %v7041_v5 = vld [vmem:[#allocation43_spill] sm:$0xff] }
 0x2ec   :  { %3378 = vmatpush.bf16.msra.mxu0 %v4630_v16  ;;  %v1919_v30 = vpack.c.bf16 %v1839_v3, %v1823_v39  ;;  %3259 = vmatpush.bf16.msrb.mxu3 %v4589_v12  ;;  %v7046_v16 = vld [vmem:[#allocation67_spill] sm:$0xff]  ;;  %v4588_v3 = vld [vmem:[%s6919_s6 + $0x258] sm:$0xff]  ;;  %v4587_v39 = vld [vmem:[%s6919_s6 + $0x250] sm:$0xff] }
 0x2ed   :  { %v1681_v34 = vpop.f32.mrf.mxu3  ;;  %3307 = vmatpush.bf16.msrb.mxu1 %v4605_v8  ;;  %3335 = vmatpush.bf16.msrb.mxu2 %v4609_v7  ;;  %v4626_v12 = vld [vmem:[%s6919_s6 + $0x388] sm:$0xff]  ;;  %v7048_v7 = vld [vmem:[#allocation13_spill] sm:$0xff] }
 0x2ee   :  { %v1758_v1 = vpop.f32.mrf.mxu2  ;;  %v1826_v19 = vmul.f32 %v1681_v34, %v7040_v23  ;;  %v7044_v34 = vld [vmem:[#allocation44_spill] sm:$0xff]  ;;  %v1871_v11 = vmul.f32 %v6283_v21, %v7048_v7  ;;  %v4601_v21 = vld [vmem:[%s6919_s6 + $0x2c0] sm:$0xff] }
 0x2ef   :  { %v6567_v56 = vpop.f32.mrf.mxu1  ;;  %v6606_v54 = vmul.f32 %v1758_v1, %v7043_v25  ;;  %v7045_v1 = vld [vmem:[#allocation68_spill] sm:$0xff]  ;;  %v1904_v25 = vmul.f32 %v6511_v20, %v7049_v9  ;;  %v4625_v20 = vld [vmem:[%s6919_s6 + $0x380] sm:$0xff] }
 0x2f0   :  { %v6572_v41 = vpop.f32.mrf.mxu0  ;;  %3379 = vmatpush.bf16.msra.mxu0 %v4629_v18  ;;  %v7047_v6 = vpack.c.bf16 %v7045_v1, %v7046_v16  ;;  %3260 = vmatpush.bf16.msrb.mxu3 %v4588_v3  ;;  %v4603_v23 = vld [vmem:[%s6919_s6 + $0x2d0] sm:$0xff]  ;;  %v7052_v1 = vld [vmem:[#allocation51_spill] sm:$0xff]  ;;  %v4585_v3 = vld [vmem:[%s6919_s6 + $0x240] sm:$0xff] }
 0x2f1   :  { %3308 = vmatpush.bf16.msrb.mxu1 %v4604_v60  ;;  %v7050_v18 = vld [vmem:[#allocation12_spill] sm:$0xff]  ;;  %v7053_v60 = vld [vmem:[#allocation29_spill] sm:$0xff] }
 0x2f4   :  { %3380 = vmatpush.bf16.msra.mxu0 %v4628_v61  ;;  %3261 = vmatpush.bf16.msrb.mxu3 %v4587_v39  ;;  %v7054_v61 = vld [vmem:[#allocation48_spill] sm:$0xff] }
 0x2f5   :  { %v1683_v24 = vpop.f32.mrf.mxu3  ;;  %3309 = vmatpush.bf16.msrb.mxu1 %v4603_v23  ;;  %v7055_v39 = vld [vmem:[#allocation52_spill] sm:$0xff] }
 0x2f6   :  { %v1842_v50 = vmul.f32 %v1683_v24, %v7041_v5  ;;  %v1760_v40 = vpop.f32.mrf.mxu2 }
 0x2f7   :  { %v6609_v43 = vmul.f32 %v1760_v40, %v7044_v34  ;;  %v6611_v55 = vpop.f32.mrf.mxu1  ;;  %v4602_v40 = vld [vmem:[%s6919_s6 + $0x2c8] sm:$0xff] }
 0x2f8   :  { %v1922_v38 = vpack.c.bf16 %v1842_v50, %v1826_v19  ;;  %v6618_v32 = vpop.f32.mrf.mxu0  ;;  %v4627_v19 = vld [vmem:[%s6919_s6 + $0x390] sm:$0xff]  ;;  %v4586_v50 = vld [vmem:[%s6919_s6 + $0x248] sm:$0xff] }
 0x2f9   :  { %v1941_v2 = vpack.c.bf16 %v6609_v43, %v6606_v54  ;;  %3381 = vmatpush.bf16.msra.mxu0 %v4627_v19  ;;  %3262 = vmatpush.bf16.msrb.mxu3 %v4586_v50  ;;  %v7085_v43 = vld [vmem:[#allocation54_spill] sm:$0xff] }
 0x2fa   :  { %3168 = vmatmul.bf16.vlgmr.msra.gmra.mxu3 %v7047_v6  ;;  %3216 = vmatmul.bf16.vlgmr.msra.gmra.mxu1 %v1919_v30  ;;  %v1855_v30 = vmul.f32 %v6255_v22, %v7050_v18  ;;  %v1888_v22 = vmul.f32 %v6496_v31, %v7053_v60  ;;  %v7057_v18 = vld [vmem:[#allocation41_spill] sm:$0xff] }
 0x2fb   :  { %3245 = vmatmul.bf16.gmra.mxu2 %v1936_v15  ;;  %3288 = vmatmul.bf16.vlgmr.msrb.gmra.mxu0 %v1922_v38  ;;  %v7051_v38 = vld [vmem:[#allocation47_spill] sm:$0xff] }
 0x2fc   :  { %3310 = vmatpush.bf16.msrb.mxu1 %v4602_v40  ;;  %v1935_v50 = vpack.c.bf16 %v1871_v11, %v1855_v30  ;;  %v1844_v30 = vmul.f32 %v6567_v56, %v7057_v18  ;;  %v4646_v18 = vld [vmem:[%s6921_s8 + $0x8] sm:$0xff] }
 0x2fd   :  { %v1686_v24 = vpop.f32.mrf.mxu3  ;;  %3382 = vmatpush.bf16.msra.mxu0 %v4626_v12  ;;  %3263 = vmatpush.bf16.msrb.mxu3 %v4585_v3  ;;  %v1952_v12 = vpack.c.bf16 %v1904_v25, %v1888_v22  ;;  %v7061_v3 = vld [vmem:[#allocation37_spill] sm:$0xff] }
 0x2fe   :  { %v1763_v28 = vpop.f32.mrf.mxu2  ;;  %v1858_v15 = vmul.f32 %v1686_v24, %v7051_v38 }
 0x2ff   :  { %v6641_v5 = vpop.f32.mrf.mxu1  ;;  %v6674_v24 = vmul.f32 %v1763_v28, %v7054_v61 }
 0x300   :  { %v6652_v8 = vpop.f32.mrf.mxu0  ;;  %3311 = vmatpush.bf16.msrb.mxu1 %v4601_v21  ;;  %v1828_v21 = vmul.f32 %v6537_v29, %v7061_v3  ;;  %v4640_v29 = vld [vmem:[%s6919_s6 + $0x3f8] sm:$0xff]  ;;  %v7066_v3 = vld [vmem:[#allocation60_spill] sm:$0xff] }
 0x301   :  { %3383 = vmatpush.bf16.msra.mxu0 %v4625_v20 }
 0x302   :  { %v1924_v56 = vpack.c.bf16 %v1844_v30, %v1828_v21  ;;  %v7062_v30 = vld [vmem:[#allocation20_spill] sm:$0xff] }
 0x304   :  { %3400 = vmatpush.bf16.msra.mxu1 %v4640_v29 }
 0x305   :  { %v1688_v34 = vpop.f32.mrf.mxu3 }
 0x306   :  { %v1874_v16 = vmul.f32 %v1688_v34, %v7052_v1  ;;  %v1765_v6 = vpop.f32.mrf.mxu2  ;;  %v7056_v34 = vld [vmem:[#allocation16_spill] sm:$0xff]  ;;  %v7060_v1 = vld [vmem:[#allocation58_spill] sm:$0xff] }
 0x307   :  { %v6677_v23 = vmul.f32 %v1765_v6, %v7055_v39  ;;  %v6679_v19 = vpop.f32.mrf.mxu1  ;;  %v1903_v25 = vmul.f32 %v6333_v49, %v7056_v34  ;;  %v4648_v39 = vld [vmem:[%s6921_s8 + $0x18] sm:$0xff]  ;;  %v4638_v34 = vld [vmem:[%s6919_s6 + $0x3e8] sm:$0xff] }
 0x308   :  { %v1938_v40 = vpack.c.bf16 %v1874_v16, %v1858_v15  ;;  %v6686_v31 = vpop.f32.mrf.mxu0  ;;  %v7058_v15 = vld [vmem:[#allocation15_spill] sm:$0xff]  ;;  %3478 = vmatpush.bf16.msra.mxu2 %v4648_v39 }
 0x309   :  { %v1957_v7 = vpack.c.bf16 %v6677_v23, %v6674_v24  ;;  %v1887_v36 = vmul.f32 %v6317_v58, %v7058_v15  ;;  %v4624_v58 = vld [vmem:[%s6919_s6 + $0x378] sm:$0xff] }
 0x30a   :  { %3173 = vmatmul.bf16.gmra.mxu3 %v1933_v26  ;;  %3221 = vmatmul.bf16.gmra.mxu1 %v1935_v50  ;;  %v7063_v15 = vld [vmem:[#allocation49_spill] sm:$0xff] }
 0x30b   :  { %3250 = vmatmul.bf16.gmra.mxu2 %v1952_v12  ;;  %3293 = vmatmul.bf16.gmra.mxu0 %v1938_v40  ;;  %v1951_v22 = vpack.c.bf16 %v1903_v25, %v1887_v36  ;;  %v4647_v40 = vld [vmem:[%s6921_s8 + $0x10] sm:$0xff]  ;;  %v1876_v36 = vmul.f32 %v6641_v5, %v7063_v15  ;;  %v4645_v5 = vld [vmem:[%s6921_s8] sm:$0xff] }
 0x30c   :  { %3352 = vmatpush.bf16.msra.mxu3 %v4624_v58  ;;  %3479 = vmatpush.bf16.msra.mxu2 %v4647_v40 }
 0x30d   :  { %v1691_v28 = vpop.f32.mrf.mxu3 }
 0x30e   :  { %v3049_v9 = vpop.f32.mrf.mxu2  ;;  %v1890_v26 = vmul.f32 %v1691_v28, %v7059_v45 }
 0x30f   :  { %v6688_v11 = vpop.f32.mrf.mxu1 }
 0x310   :  { %v6700_v20 = vpop.f32.mrf.mxu0  ;;  %3353 = vmatpush.bf16.msra.mxu3 %v4623_v46  ;;  %3480 = vmatpush.bf16.msra.mxu2 %v4646_v18  ;;  %v4620_v46 = vld [vmem:[%s6919_s6 + $0x358] sm:$0xff]  ;;  %v7068_v18 = vld [vmem:[#allocation26_spill] sm:$0xff] }
 0x314   :  { %3481 = vmatpush.bf16.msra.mxu2 %v4645_v5 }
 0x315   :  { %v1693_v38 = vpop.f32.mrf.mxu3 }
 0x316   :  { %v1906_v16 = vmul.f32 %v1693_v38, %v7060_v1  ;;  %v3051_v6 = vpop.f32.mrf.mxu2  ;;  %v1843_v38 = vmul.f32 %v6389_v47, %v7062_v30  ;;  %v4637_v47 = vld [vmem:[%s6919_s6 + $0x3e0] sm:$0xff]  ;;  %v1875_v30 = vmul.f32 %v6460_v63, %v7068_v18 }
 0x317   :  { %v2257_v60 = vpop.f32.mrf.mxu1  ;;  %v4617_v63 = vld [vmem:[%s6919_s6 + $0x340] sm:$0xff] }
 0x318   :  { %v1954_v49 = vpack.c.bf16 %v1906_v16, %v1890_v26  ;;  %v6702_v61 = vadd.f32 %v3049_v9, %v2257_v60  ;;  %v4622_v9 = vld [vmem:[%s6919_s6 + $0x368] sm:$0xff]  ;;  %v6733_v25 = vpop.f32.mrf.mxu0  ;;  %v7064_v26 = vld [vmem:[#allocation18_spill] sm:$0xff] }
 0x319   :  { %3354 = vmatpush.bf16.msra.mxu3 %v4622_v9  ;;  %v1827_v1 = vmul.f32 %v6355_v10, %v7064_v26  ;;  %v7065_v16 = vld [vmem:[#allocation59_spill] sm:$0xff]  ;;  %v7070_v26 = vld [vmem:[#allocation22_spill] sm:$0xff] }
 0x31a   :  { %3178 = vmatmul.bf16.gmra.mxu3 %v1949_v33  ;;  %3226 = vmatmul.bf16.gmra.mxu1 %v1951_v22  ;;  %v4639_v33 = vld [vmem:[%s6919_s6 + $0x3f0] sm:$0xff]  ;;  %v4621_v22 = vld [vmem:[%s6919_s6 + $0x360] sm:$0xff]  ;;  %v4618_v9 = vld [vmem:[%s6919_s6 + $0x348] sm:$0xff] }
 0x31b   :  { %3298 = vmatmul.bf16.gmra.mxu0 %v1954_v49  ;;  %3336 = vmatmul.bf16.vlgmr.msrb.gmra.mxu2 %v1924_v56  ;;  %v7067_v49 = vld [vmem:[#allocation45_spill] sm:$0xff]  ;;  %v1923_v58 = vpack.c.bf16 %v1843_v38, %v1827_v1  ;;  %v7069_v38 = vld [vmem:[#allocation56_spill] sm:$0xff]  ;;  %v1859_v1 = vmul.f32 %v6433_v17, %v7070_v26 }
 0x31c   :  { %3401 = vmatpush.bf16.msra.mxu1 %v4639_v33  ;;  %v1860_v10 = vmul.f32 %v6611_v55, %v7067_v49  ;;  %v4636_v55 = vld [vmem:[%s6919_s6 + $0x3d8] sm:$0xff]  ;;  %v1908_v15 = vmul.f32 %v6688_v11, %v7069_v38  ;;  %v4633_v11 = vld [vmem:[%s6919_s6 + $0x3c0] sm:$0xff] }
 0x31d   :  { %v1777_v50 = vpop.f32.mrf.mxu3  ;;  %3355 = vmatpush.bf16.msra.mxu3 %v4621_v22  ;;  %v7073_v22 = vld [vmem:[#allocation53_spill] sm:$0xff]  ;;  %v1939_v49 = vpack.c.bf16 %v1875_v30, %v1859_v1 }
 0x31e   :  { %v3054_v57 = vpop.f32.mrf.mxu2 }
 0x31f   :  { %v2259_v12 = vpop.f32.mrf.mxu1 }
 0x320   :  { %v6725_v28 = vadd.f32 %v3051_v6, %v2259_v12  ;;  %3402 = vmatpush.bf16.msra.mxu1 %v4638_v34  ;;  %v1830_v6 = vmul.f32 %v1777_v50, %v7065_v16  ;;  %v1940_v50 = vpack.c.bf16 %v1876_v36, %v1860_v10  ;;  %v6768_v33 = vpop.f32.mrf.mxu0  ;;  %v4634_v34 = vld [vmem:[%s6919_s6 + $0x3c8] sm:$0xff]  ;;  %v7071_v16 = vld [vmem:[#allocation62_spill] sm:$0xff] }
 0x321   :  { %3356 = vmatpush.bf16.msra.mxu3 %v4620_v46 }
 0x324   :  { %3403 = vmatpush.bf16.msra.mxu1 %v4637_v47  ;;  %v1892_v47 = vmul.f32 %v6679_v19, %v7073_v22  ;;  %v7074_v19 = vld [vmem:[#allocation34_spill] sm:$0xff] }
 0x325   :  { %v1779_v45 = vpop.f32.mrf.mxu3  ;;  %3357 = vmatpush.bf16.msra.mxu3 %v4619_v51 }
 0x326   :  { %v1846_v21 = vmul.f32 %v1779_v45, %v7066_v3  ;;  %v3056_v60 = vpop.f32.mrf.mxu2  ;;  %v7072_v3 = vld [vmem:[#allocation63_spill] sm:$0xff] }
 0x327   :  { %v2262_v56 = vpop.f32.mrf.mxu1 }
 0x328   :  { %v1926_v29 = vpack.c.bf16 %v1846_v21, %v1830_v6  ;;  %v6757_v39 = vadd.f32 %v3054_v57, %v2262_v56  ;;  %3404 = vmatpush.bf16.msra.mxu1 %v4636_v55  ;;  %v6788_v36 = vpop.f32.mrf.mxu0  ;;  %v1956_v56 = vpack.c.bf16 %v1908_v15, %v1892_v47  ;;  %v1907_v55 = vmul.f32 %v6513_v53, %v7074_v19  ;;  %v7078_v53 = vld [vmem:[#allocation3_spill] sm:$0xff] }
 0x329   :  { %3358 = vmatpush.bf16.msra.mxu3 %v4618_v9  ;;  %v7077_v9 = vld [vmem:[#allocation66_spill] sm:$0xff] }
 0x32a   :  { %3264 = vmatmul.bf16.vlgmr.msrb.gmra.mxu3 %v1921_v48  ;;  %3312 = vmatmul.bf16.vlgmr.msrb.gmra.mxu1 %v1923_v58 }
 0x32b   :  { %3341 = vmatmul.bf16.gmra.mxu2 %v1940_v50  ;;  %3384 = vmatmul.bf16.vlgmr.msra.gmra.mxu0 %v1926_v29 }
 0x32c   :  { %3405 = vmatpush.bf16.msra.mxu1 %v4635_v59  ;;  %v7076_v59 = vld [vmem:[#allocation65_spill] sm:$0xff] }
 0x32d   :  { %v1782_v57 = vpop.f32.mrf.mxu3  ;;  %3359 = vmatpush.bf16.msra.mxu3 %v4617_v63 }
 0x32e   :  { %v3059_v40 = vpop.f32.mrf.mxu2  ;;  %v1862_v6 = vmul.f32 %v1782_v57, %v7071_v16 }
 0x32f   :  { %v2264_v48 = vpop.f32.mrf.mxu1 }
 0x330   :  { %v6776_v12 = vadd.f32 %v3056_v60, %v2264_v48  ;;  %3406 = vmatpush.bf16.msra.mxu1 %v4634_v34  ;;  %v3104_v50 = vpop.f32.mrf.mxu0 }
 0x334   :  { %3407 = vmatpush.bf16.msra.mxu1 %v4633_v11 }
 0x335   :  { %v1784_v45 = vpop.f32.mrf.mxu3 }
 0x336   :  { %v1878_v21 = vmul.f32 %v1784_v45, %v7072_v3  ;;  %v6794_v60 = vpop.f32.mrf.mxu2 }
 0x337   :  { %v2267_v5 = vpop.f32.mrf.mxu1 }
 0x338   :  { %v1942_v17 = vpack.c.bf16 %v1878_v21, %v1862_v6  ;;  %v6804_v10 = vadd.f32 %v3059_v40, %v2267_v5  ;;  %v7075_v40 = vld [vmem:[#allocation30_spill] sm:$0xff]  ;;  %v3107_v30 = vpop.f32.mrf.mxu0 }
 0x339   :  { %v1891_v51 = vmul.f32 %v6498_v52, %v7075_v40  ;;  %v7079_v6 = vld [vmem:[#allocation42_spill] sm:$0xff] }
 0x33a   :  { %3269 = vmatmul.bf16.gmra.mxu3 %v1937_v42  ;;  %3317 = vmatmul.bf16.gmra.mxu1 %v1939_v49  ;;  %v1847_v3 = vmul.f32 %v6572_v41, %v7079_v6  ;;  %v7081_v5 = vld [vmem:[#allocation2_spill] sm:$0xff] }
 0x33b   :  { %3346 = vmatmul.bf16.gmra.mxu2 %v1956_v56  ;;  %3389 = vmatmul.bf16.gmra.mxu0 %v1942_v17  ;;  %v1955_v34 = vpack.c.bf16 %v1907_v55, %v1891_v51 }
 0x33d   :  { %v1787_v58 = vpop.f32.mrf.mxu3 }
 0x33e   :  { %v3145_v29 = vpop.f32.mrf.mxu2  ;;  %v1894_v48 = vmul.f32 %v1787_v58, %v7076_v59 }
 0x33f   :  { %v6809_v46 = vpop.f32.mrf.mxu1 }
 0x340   :  { %v3109_v16 = vpop.f32.mrf.mxu0 }
 0x345   :  { %v1789_v57 = vpop.f32.mrf.mxu3 }
 0x346   :  { %v1910_v4 = vmul.f32 %v1789_v57, %v7077_v9  ;;  %v6817_v44 = vpop.f32.mrf.mxu2 }
 0x347   :  { %v3121_v42 = vpop.f32.mrf.mxu1 }
 0x348   :  { %v1958_v18 = vpack.c.bf16 %v1910_v4, %v1894_v48  ;;  %v3193_v41 = vpop.f32.mrf.mxu0 }
 0x34a   :  { %3274 = vmatmul.bf16.gmra.mxu3 %v1953_v62  ;;  %3322 = vmatmul.bf16.gmra.mxu1 %v1955_v34  ;;  %v1831_v62 = vmul.f32 %v6539_v0, %v7080_v37 }
 0x34b   :  { %3394 = vmatmul.bf16.gmra.mxu0 %v1958_v18  ;;  %4488 = vmatmul.msk.bf16.vlgmr.msra.gmra.mxu2 %vm1013_vm10, %v7078_v53  ;;  %v7084_v18 = vld [vmem:[#allocation57_spill] sm:$0xff] }
 0x34c   :  { %v1927_v47 = vpack.c.bf16 %v1847_v3, %v1831_v62  ;;  %v1911_v53 = vmul.f32 %v6700_v20, %v7084_v18 }
 0x34d   :  { %v3073_v52 = vpop.f32.mrf.mxu3 }
 0x34e   :  { %v3074_v38 = vadd.f32 %v3073_v52, %v6702_v61  ;;  %v3150_v15 = vpop.f32.mrf.mxu2 }
 0x34f   :  { %v3123_v45 = vpop.f32.mrf.mxu1 }
 0x350   :  { %v3098_v26 = vadd.f32 %v6733_v25, %v3074_v38  ;;  %v3195_v40 = vpop.f32.mrf.mxu0 }
 0x352   :  { %v3122_v1 = vadd.f32 %v3121_v42, %v3098_v26 }
 0x354   :  { %v3146_v21 = vadd.f32 %v3145_v29, %v3122_v1  ;;  %v7082_v29 = vld [vmem:[#allocation50_spill] sm:$0xff] }
 0x355   :  { %v3075_v13 = vpop.f32.mrf.mxu3 }
 0x356   :  { %v3076_v63 = vadd.f32 %v3075_v13, %v6725_v28  ;;  %v3152_v11 = vpop.f32.mrf.mxu2 }
 0x357   :  { %v3126_v22 = vpop.f32.mrf.mxu1 }
 0x358   :  { %v3100_v61 = vadd.f32 %v6768_v33, %v3076_v63  ;;  %v1879_v33 = vmul.f32 %v6652_v8, %v7082_v29  ;;  %v3198_v34 = vpop.f32.mrf.mxu0 }
 0x35a   :  { %3360 = vmatmul.bf16.vlgmr.msra.gmra.mxu3 %v1925_v27  ;;  %3408 = vmatmul.bf16.vlgmr.msra.gmra.mxu1 %v1927_v47  ;;  %v3124_v25 = vadd.f32 %v3123_v45, %v3100_v61  ;;  %v1863_v27 = vmul.f32 %v6618_v32, %v7083_v35 }
 0x35b   :  { %4489 = vmatmul.msk.bf16.gmra.mxu2 %vm1013_vm10, %v7081_v5 }
 0x35c   :  { %v1943_v59 = vpack.c.bf16 %v1879_v33, %v1863_v27 }
 0x35d   :  { %v3078_v49 = vpop.f32.mrf.mxu3 }
 0x35e   :  { %v3079_v0 = vadd.f32 %v3078_v49, %v6757_v39  ;;  %v3155_v17 = vpop.f32.mrf.mxu2 }
 0x35f   :  { %v3128_v28 = vpop.f32.mrf.mxu1 }
 0x360   :  { %v3103_v56 = vadd.f32 %v6788_v36, %v3079_v0  ;;  %v3200_v20 = vpop.f32.mrf.mxu0 }
 0x362   :  { %v3127_v58 = vadd.f32 %v3126_v22, %v3103_v56 }
 0x364   :  { %v3151_v19 = vadd.f32 %v3150_v15, %v3127_v58 }
 0x365   :  { %v3080_v14 = vpop.f32.mrf.mxu3 }
 0x366   :  { %v3081_v55 = vadd.f32 %v3080_v14, %v6776_v12  ;;  %v3157_v57 = vpop.f32.mrf.mxu2 }
 0x367   :  { %v3131_v51 = vpop.f32.mrf.mxu1 }
 0x368   :  { %v3105_v39 = vadd.f32 %v3104_v50, %v3081_v55  ;;  %v3062_v50 = vadd.f32 %v6794_v60, %v6809_v46  ;;  %v3203_v63 = vpop.f32.mrf.mxu0 }
 0x36a   :  { %3365 = vmatmul.bf16.gmra.mxu3 %v1941_v2  ;;  %3413 = vmatmul.bf16.gmra.mxu1 %v1943_v59  ;;  %v3129_v36 = vadd.f32 %v3128_v28, %v3105_v39  ;;  %v1895_v2 = vmul.f32 %v6686_v31, %v7085_v43  ;;  %v3148_v31 = vadd.f32 %v6817_v44, %v3124_v25 }
 0x36c   :  { %v3153_v48 = vadd.f32 %v3152_v11, %v3129_v36 }
 0x36d   :  { %v3083_v8 = vpop.f32.mrf.mxu3 }
 0x36e   :  { %v3084_v9 = vadd.f32 %v3083_v8, %v6804_v10  ;;  %v3241_v4 = vpop.f32.mrf.mxu2  ;;  %v1959_v10 = vpack.c.bf16 %v1911_v53, %v1895_v2 }
 0x36f   :  { %v3133_v42 = vpop.f32.mrf.mxu1 }
 0x370   :  { %v3108_v32 = vadd.f32 %v3107_v30, %v3084_v9  ;;  %v3205_v0 = vpop.f32.mrf.mxu0 }
 0x372   :  { %v3132_v12 = vadd.f32 %v3131_v51, %v3108_v32 }
 0x374   :  { %v3156_v52 = vadd.f32 %v3155_v17, %v3132_v12 }
 0x375   :  { %v3085_v54 = vpop.f32.mrf.mxu3 }
 0x376   :  { %v3086_v38 = vadd.f32 %v3085_v54, %v3062_v50  ;;  %v3243_v15 = vpop.f32.mrf.mxu2 }
 0x377   :  { %v3217_v45 = vpop.f32.mrf.mxu1 }
 0x378   :  { %v3110_v26 = vadd.f32 %v3109_v16, %v3086_v38  ;;  %v3289_v33 = vpop.f32.mrf.mxu0 }
 0x37a   :  { %3370 = vmatmul.bf16.gmra.mxu3 %v1957_v7  ;;  %3418 = vmatmul.bf16.gmra.mxu1 %v1959_v10  ;;  %v3134_v30 = vadd.f32 %v3133_v42, %v3110_v26 }
 0x37c   :  { %v3158_v1 = vadd.f32 %v3157_v57, %v3134_v30 }
 0x37d   :  { %v3169_v6 = vpop.f32.mrf.mxu3 }
 0x37e   :  { %v3170_v60 = vadd.f32 %v3169_v6, %v3146_v21  ;;  %v3246_v46 = vpop.f32.mrf.mxu2 }
 0x37f   :  { %v3219_v3 = vpop.f32.mrf.mxu1 }
 0x380   :  { %v3194_v13 = vadd.f32 %v3193_v41, %v3170_v60  ;;  %v3291_v59 = vpop.f32.mrf.mxu0 }
 0x382   :  { %v3218_v37 = vadd.f32 %v3217_v45, %v3194_v13 }
 0x384   :  { %v3242_v62 = vadd.f32 %v3241_v4, %v3218_v37 }
 0x385   :  { %v3171_v11 = vpop.f32.mrf.mxu3 }
 0x386   :  { %v3172_v16 = vadd.f32 %v3171_v11, %v3148_v31  ;;  %v3248_v22 = vpop.f32.mrf.mxu2 }
 0x387   :  { %v3222_v47 = vpop.f32.mrf.mxu1 }
 0x388   :  { %v3196_v24 = vadd.f32 %v3195_v40, %v3172_v16 }
 0x38a   :  { %v3220_v23 = vadd.f32 %v3219_v3, %v3196_v24 }
 0x38c   :  { %v3244_v7 = vadd.f32 %v3243_v15, %v3220_v23 }
 0x38d   :  { %v3174_v61 = vpop.f32.mrf.mxu3 }
 0x38e   :  { %v3175_v5 = vadd.f32 %v3174_v61, %v3151_v19  ;;  %v3251_v49 = vpop.f32.mrf.mxu2 }
 0x38f   :  { %v3224_v21 = vpop.f32.mrf.mxu1 }
 0x390   :  { %v3199_v17 = vadd.f32 %v3198_v34, %v3175_v5  ;;  %v3294_v34 = vpop.f32.mrf.mxu0 }
 0x392   :  { %v3223_v28 = vadd.f32 %v3222_v47, %v3199_v17 }
 0x394   :  { %v3247_v41 = vadd.f32 %v3246_v46, %v3223_v28 }
 0x395   :  { %v3176_v56 = vpop.f32.mrf.mxu3 }
 0x396   :  { %v3177_v58 = vadd.f32 %v3176_v56, %v3153_v48  ;;  %v3253_v44 = vpop.f32.mrf.mxu2 }
 0x397   :  { %v3227_v25 = vpop.f32.mrf.mxu1 }
 0x398   :  { %v3201_v29 = vadd.f32 %v3200_v20, %v3177_v58  ;;  %v3296_v45 = vpop.f32.mrf.mxu0 }
 0x39a   :  { %v3225_v14 = vadd.f32 %v3224_v21, %v3201_v29 }
 0x39c   :  { %v3249_v35 = vadd.f32 %v3248_v22, %v3225_v14 }
 0x39d   :  { %v3179_v27 = vpop.f32.mrf.mxu3 }
 0x39e   :  { %v3180_v55 = vadd.f32 %v3179_v27, %v3156_v52  ;;  %v3337_v57 = vpop.f32.mrf.mxu2 }
 0x39f   :  { %v3229_v40 = vpop.f32.mrf.mxu1 }
 0x3a0   :  { %v3204_v51 = vadd.f32 %v3203_v63, %v3180_v55  ;;  %v3299_v13 = vpop.f32.mrf.mxu0 }
 0x3a2   :  { %v3228_v19 = vadd.f32 %v3227_v25, %v3204_v51 }
 0x3a4   :  { %v3252_v39 = vadd.f32 %v3251_v49, %v3228_v19 }
 0x3a5   :  { %v3181_v36 = vpop.f32.mrf.mxu3 }
 0x3a6   :  { %v3182_v8 = vadd.f32 %v3181_v36, %v3158_v1  ;;  %v3339_v9 = vpop.f32.mrf.mxu2 }
 0x3a7   :  { %v3313_v4 = vpop.f32.mrf.mxu1 }
 0x3a8   :  { %v3206_v42 = vadd.f32 %v3205_v0, %v3182_v8  ;;  %v3301_v24 = vpop.f32.mrf.mxu0 }
 0x3aa   :  { %v3230_v48 = vadd.f32 %v3229_v40, %v3206_v42 }
 0x3ac   :  { %v6858_v32 = vadd.f32 %v3253_v44, %v3230_v48 }
 0x3ad   :  { %v3265_v12 = vpop.f32.mrf.mxu3 }
 0x3ae   :  { %v3266_v18 = vadd.f32 %v3265_v12, %v3242_v62  ;;  %v3342_v53 = vpop.f32.mrf.mxu2 }
 0x3af   :  { %v3315_v50 = vpop.f32.mrf.mxu1 }
 0x3b0   :  { %v3290_v52 = vadd.f32 %v3289_v33, %v3266_v18  ;;  %v3385_v28 = vpop.f32.mrf.mxu0 }
 0x3b2   :  { %v3314_v54 = vadd.f32 %v3313_v4, %v3290_v52 }
 0x3b4   :  { %v3338_v43 = vadd.f32 %v3337_v57, %v3314_v54 }
 0x3b5   :  { %v3267_v2 = vpop.f32.mrf.mxu3 }
 0x3b6   :  { %v3268_v38 = vadd.f32 %v3267_v2, %v3244_v7  ;;  %v3344_v15 = vpop.f32.mrf.mxu2 }
 0x3b7   :  { %v3318_v10 = vpop.f32.mrf.mxu1 }
 0x3b8   :  { %v3292_v26 = vadd.f32 %v3291_v59, %v3268_v38  ;;  %v3387_v29 = vpop.f32.mrf.mxu0 }
 0x3ba   :  { %v3316_v30 = vadd.f32 %v3315_v50, %v3292_v26 }
 0x3bc   :  { %v3340_v20 = vadd.f32 %v3339_v9, %v3316_v30 }
 0x3bd   :  { %v3270_v1 = vpop.f32.mrf.mxu3 }
 0x3be   :  { %v3271_v6 = vadd.f32 %v3270_v1, %v3247_v41  ;;  %v3347_v60 = vpop.f32.mrf.mxu2 }
 0x3bf   :  { %v3320_v46 = vpop.f32.mrf.mxu1 }
 0x3c0   :  { %v3295_v3 = vadd.f32 %v3294_v34, %v3271_v6  ;;  %v3390_v51 = vpop.f32.mrf.mxu0 }
 0x3c2   :  { %v3319_v37 = vadd.f32 %v3318_v10, %v3295_v3 }
 0x3c4   :  { %v3343_v31 = vadd.f32 %v3342_v53, %v3319_v37 }
 0x3c5   :  { %v3272_v62 = vpop.f32.mrf.mxu3 }
 0x3c6   :  { %v3273_v63 = vadd.f32 %v3272_v62, %v3249_v35  ;;  %v3349_v11 = vpop.f32.mrf.mxu2  ;;  %v7087_v62 = vld [vmem:[#allocation6_spill] sm:$0xff] }
 0x3c7   :  { %v3323_v16 = vpop.f32.mrf.mxu1 }
 0x3c8   :  { %v3297_v22 = vadd.f32 %v3296_v45, %v3273_v63  ;;  %v3392_v4 = vpop.f32.mrf.mxu0  ;;  %v7088_v63 = vmov 0.0  }
 0x3ca   :  { %v3321_v47 = vadd.f32 %v3320_v46, %v3297_v22 }
 0x3cc   :  { %v3345_v23 = vadd.f32 %v3344_v15, %v3321_v47  ;;  %v7089_v47 = vld [vmem:[#allocation5_spill] sm:$0xff] }
 0x3cd   :  { %v3275_v7 = vpop.f32.mrf.mxu3 }
 0x3ce   :  { %v3276_v61 = vadd.f32 %v3275_v7, %v3252_v39  ;;  %v6860_v5 = vpop.f32.mrf.mxu2  ;;  %v4652_v7 = vld [vmem:[%s6925_s11 + $0x18] sm:$0xff] }
 0x3cf   :  { %v3325_v49 = vpop.f32.mrf.mxu1  ;;  %3578 = vmatpush.bf16.msrb.mxu2 %v4652_v7 }
 0x3d0   :  { %v3300_v0 = vadd.f32 %v3299_v13, %v3276_v61  ;;  %v3395_v2 = vpop.f32.mrf.mxu0  ;;  %v4651_v61 = vld [vmem:[%s6925_s11 + $0x10] sm:$0xff] }
 0x3d2   :  { %v3324_v21 = vadd.f32 %v3323_v16, %v3300_v0  ;;  %v4649_v0 = vld [vmem:[%s6925_s11] sm:$0xff] }
 0x3d3   :  { %3579 = vmatpush.bf16.msrb.mxu2 %v4651_v61 }
 0x3d4   :  { %v3348_v17 = vadd.f32 %v3347_v60, %v3324_v21 }
 0x3d5   :  { %v3277_v41 = vpop.f32.mrf.mxu3 }
 0x3d6   :  { %v6862_v56 = vpop.f32.mrf.mxu2  ;;  %v3278_v18 = vadd.f32 %v3277_v41, %v6858_v32  ;;  %v4664_v32 = vld [vmem:[%s6922_s4] ss:$0 sm:$0xff] }
 0x3d7   :  { %v3409_v58 = vpop.f32.mrf.mxu1  ;;  %vm3427_vm2 = vcmp.eq.s32.totalorder %v7087_v62, %v4664_v32  ;;  %vm3428_vm3 = vcmp.eq.s32.totalorder %v7089_v47, %v4664_v32 }
 0x3d8   :  { %v3302_v54 = vadd.f32 %v3301_v24, %v3278_v18  ;;  %v3397_v6 = vpop.f32.mrf.mxu0  ;;  %v3430_v16 = vsel %vm3427_vm2, 1.0, %v7088_v63  ;;  %v3431_v24 = vsel %vm3428_vm3, 1.0, %v7088_v63  ;;  %v3609_v18 = vpop.permute.xlu0 %3608 }
 0x3d9   :  { %vm3612_vm8 = vcmp.eq.s32.totalorder %v3609_v18, 1 }
 0x3da   :  { %v3326_v45 = vadd.f32 %v3325_v49, %v3302_v54  ;;  %v4650_v49 = vld [vmem:[%s6925_s11 + $0x8] sm:$0xff] }
 0x3db   :  { %3580 = vmatpush.bf16.msrb.mxu2 %v4650_v49 }
 0x3dc   :  { %v3350_v26 = vadd.f32 %v3349_v11, %v3326_v45 }
 0x3dd   :  { %v3361_v44 = vpop.f32.mrf.mxu3 }
 0x3de   :  { %v6864_v25 = vpop.f32.mrf.mxu2  ;;  %v3362_v14 = vadd.f32 %v3361_v44, %v3338_v43 }
 0x3df   :  { %v3411_v33 = vpop.f32.mrf.mxu1  ;;  %3581 = vmatpush.bf16.msrb.mxu2 %v4649_v0 }
 0x3e0   :  { %v3386_v27 = vadd.f32 %v3385_v28, %v3362_v14  ;;  %v4665_v28 = vld [vmem:[%s6923_s9] ss:$0 sm:$0xff] }
 0x3e2   :  { %v3410_v19 = vadd.f32 %v3409_v58, %v3386_v27  ;;  %v4666_v58 = vld [vmem:[%s6924_s10] ss:$0 sm:$0xff] }
 0x3e5   :  { %v3363_v35 = vpop.f32.mrf.mxu3 }
 0x3e6   :  { %v3364_v55 = vadd.f32 %v3363_v35, %v3340_v20  ;;  %v3490_v57 = vpop.f32.mrf.mxu2 }
 0x3e7   :  { %v3414_v39 = vpop.f32.mrf.mxu1 }
 0x3e8   :  { %v3388_v40 = vadd.f32 %v3387_v29, %v3364_v55 }
 0x3ea   :  { %v3412_v59 = vadd.f32 %v3411_v33, %v3388_v40 }
 0x3ec   :  { %v3434_v36 = vpack.c.bf16 %v3412_v59, %v3410_v19 }
 0x3ed   :  { %v3366_v8 = vpop.f32.mrf.mxu3 }
 0x3ee   :  { %v3367_v9 = vadd.f32 %v3366_v8, %v3343_v31  ;;  %v7086_v31 = vld [vmem:[#allocation4_spill] sm:$0xff] }
 0x3ef   :  { %v3416_v42 = vpop.f32.mrf.mxu1  ;;  %vm3426_vm12 = vcmp.eq.s32.totalorder %v7086_v31, %v4664_v32 }
 0x3f0   :  { %v3391_v34 = vadd.f32 %v3390_v51, %v3367_v9  ;;  %v3429_v11 = vsel %vm3426_vm12, 1.0, %v7088_v63 }
 0x3f1   :  { %v3432_v22 = vpack.c.bf16 %v3430_v16, %v3429_v11 }
 0x3f2   :  { %v3415_v50 = vadd.f32 %v3414_v39, %v3391_v34 }
 0x3f5   :  { %v3368_v48 = vpop.f32.mrf.mxu3 }
 0x3f6   :  { %v3369_v12 = vadd.f32 %v3368_v48, %v3345_v23  ;;  %v3433_v23 = vpack.c.bf16 %v3431_v24, %v3431_v24 }
 0x3f7   :  { %v3419_v15 = vpop.f32.mrf.mxu1 }
 0x3f8   :  { %v3393_v53 = vadd.f32 %v3392_v4, %v3369_v12 }
 0x3fa   :  { %v3417_v52 = vadd.f32 %v3416_v42, %v3393_v53 }
 0x3fc   :  { %v3435_v43 = vpack.c.bf16 %v3417_v52, %v3415_v50 }
 0x3fd   :  { %v3371_v38 = vpop.f32.mrf.mxu3 }
 0x3fe   :  { %v3372_v10 = vadd.f32 %v3371_v38, %v3348_v17 }
 0x3ff   :  { %v3421_v46 = vpop.f32.mrf.mxu1 }
 0x400   :  { %v3396_v20 = vadd.f32 %v3395_v2, %v3372_v10 }
 0x402   :  { %v3420_v3 = vadd.f32 %v3419_v15, %v3396_v20 }
 0x405   :  { %v3373_v30 = vpop.f32.mrf.mxu3 }
 0x406   :  { %v3374_v1 = vadd.f32 %v3373_v30, %v3350_v26 }
 0x408   :  { %v3398_v60 = vadd.f32 %v3397_v6, %v3374_v1 }
 0x40a   :  { %v3422_v13 = vadd.f32 %v3421_v46, %v3398_v60 }
 0x40c   :  { %v3436_v37 = vpack.c.bf16 %v3422_v13, %v3420_v3 }
 0x40e   :  { %3504 = vmatpush.bf16.msrb.mxu3 %v3436_v37 }
 0x412   :  { %3505 = vmatpush.bf16.msrb.mxu3 %v3435_v43 }
 0x416   :  { %3506 = vmatpush.bf16.msrb.mxu3 %v3434_v36 }
 0x419   :  { %4490 = vmatmul.msk.bf16.vlgmr.msrb.gmra.mxu3 %vm3492_vm9, %v3432_v22 }
 0x429   :  { %4491 = vmatmul.msk.bf16.gmra.mxu3 %vm3492_vm9, %v3433_v23 }
 0x49c   :  { %v3508_v21 = vpop.f32.mrf.mxu3 }
 0x49d   :  { %v3509_v17 = vadd.f32 %v3508_v21, %v6860_v5 }
 0x49f   :  { %v3521_v41 = vmul.f32 %v4665_v28, %v3509_v17 }
 0x4a1   :  { %v3528_v33 = vadd.f32 %v4666_v58, %v3521_v41 }
 0x4a3   :  { %v3531_v27 = vmax.f32 %v3528_v33, 0.0 }
 0x4a4   :  { %v3510_v44 = vpop.f32.mrf.mxu3 }
 0x4a5   :  { %v3511_v29 = vadd.f32 %v3510_v44, %v6862_v56  ;;  %v3603_v56 = vpop.permute.xlu1 %3602 }
 0x4a6   :  { %vm3610_vm4 = vcmp.eq.s32.totalorder %v3603_v56, 1 }
 0x4a7   :  { %v3522_v14 = vmul.f32 %v4665_v28, %v3511_v29 }
 0x4a9   :  { %v3529_v35 = vadd.f32 %v4666_v58, %v3522_v14 }
 0x4ab   :  { %v3532_v55 = vmax.f32 %v3529_v35, 0.0 }
 0x4ac   :  { %v3513_v57 = vpop.f32.mrf.mxu3 }
 0x4ad   :  { %v3534_v40 = vpack.c.bf16 %v3532_v55, %v3531_v27  ;;  %v3514_v5 = vadd.f32 %v3513_v57, %v6864_v25  ;;  %v3606_v25 = vpop.permute.xlu2 %3605 }
 0x4ae   :  { %vm3611_vm7 = vcmp.eq.s32.totalorder %v3606_v25, 1 }
 0x4af   :  { %4508 = vmatmul.msk.bf16.vlgmr.msrb.gmra.mxu2 %vm1013_vm10, %v3534_v40  ;;  %v3523_v51 = vmul.f32 %v4665_v28, %v3514_v5 }
 0x4b1   :  { %v3530_v59 = vadd.f32 %v4666_v58, %v3523_v51 }
 0x4b3   :  { %v3533_v39 = vmax.f32 %v3530_v59, 0.0 }
 0x4b4   :  { %v3515_v19 = vpop.f32.mrf.mxu3 }
 0x4b5   :  { %v3535_v36 = vpack.c.bf16 %v3533_v39, %v3533_v39 }
 0x4bf   :  { %4509 = vmatmul.msk.bf16.gmra.mxu2 %vm1013_vm10, %v3535_v36 }
 0x532   :  { %v3583_v8 = vpop.f32.mrf.mxu2 }
 0x533   :  { %4667 = vtanh.f32 %v3583_v8 }
 0x539   :  { %v4668_v9 = vpop.eup %4667 }
 0x53a   :  { %v3585_v4 = vpop.f32.mrf.mxu2  ;;  %v3613_v42 = vsel %vm3610_vm4, %v4668_v9, -10.0 }
 0x53b   :  { %4669 = vtanh.f32 %v3585_v4  ;;  %3619 = vrot.lane.b32.xlu1 %v3613_v42, %s4674_s27 }
 0x541   :  { %v4670_v48 = vpop.eup %4669 }
 0x542   :  { %v3588_v34 = vpop.f32.mrf.mxu2  ;;  %v3614_v12 = vsel %vm3611_vm7, %v4670_v48, -10.0 }
 0x543   :  { %4671 = vtanh.f32 %v3588_v34  ;;  %3621 = vrot.lane.b32.xlu2 %v3614_v12, %s4674_s27 }
 0x549   :  { %v4672_v53 = vpop.eup %4671 }
 0x54a   :  { %v3590_v50 = vpop.f32.mrf.mxu2  ;;  %v3615_v52 = vsel %vm3612_vm8, %v4672_v53, -10.0 }
 0x54b   :  { %3623 = vrot.lane.b32.xlu0 %v3615_v52, %s4674_s27 }
 0x59d   :  { %v3622_v54 = vpop.permute.xlu2 %3621 }
 0x59e   :  { %v3629_v43 = vsel %vm1013_vm10, %v3532_v55, %v3622_v54 }
 0x59f   :  { %3632 = vst [vmem:[%s6926_s12 + $0x8] sm:$0xff] %v3629_v43 }
 0x5ad   :  { %v3620_v2 = vpop.permute.xlu1 %3619 }
 0x5ae   :  { %v3628_v38 = vsel %vm1013_vm10, %v3531_v27, %v3620_v2 }
 0x5af   :  { %3631 = vst [vmem:[%s6926_s12] sm:$0xff] %v3628_v38 }
 0x5bd   :  { %v3624_v15 = vpop.permute.xlu0 %3623 }
 0x5be   :  { %v3630_v45 = vsel %vm1013_vm10, %v3533_v39, %v3624_v15 }
 0x5bf   :  { %3633 = vst [vmem:[%s6926_s12 + $0x10] sm:$0xff] %v3630_v45 }

</bundles_post_ra>
